<compile_context>
chip_gen: v5e
topology: v5e:2x2
jax: 0.10.0
libtpu: 0.0.40
codegen_flags: <defaults>
</compile_context>

<pallas_src>
import functools

import jax
import jax.numpy as jnp
from jax.experimental import pallas as pl
from jax.experimental.pallas import tpu as pltpu


# ----------------------------- in-kernel helpers -----------------------------

def _layernorm(x, g, b, eps):
    mu = jnp.mean(x, axis=-1, keepdims=True)
    xc = x - mu
    var = jnp.mean(xc * xc, axis=-1, keepdims=True)
    return xc * jax.lax.rsqrt(var + eps) * g + b


def _mha(q_src, kv_src, wq_ref, wk_ref, wv_ref, bq_ref, bk_ref, bv_ref, wo_ref,
         num_heads, prefix=()):
    """Per-head-stacked multi-head attention.

    q_src: (Lq, D), kv_src: (Lk, D).  Weight refs are stacked per head:
      wq/wk/wv: (..., H, D, dh), b*: (..., H, 1, dh), wo: (..., H, dh, Dout)
    `prefix` selects leading (e.g. layer) indices.  Heads are independent tiny matmuls;
    the out-projection is accumulated per head, so there is no lane slicing / concat.
    """
    dh = wq_ref.shape[-1]
    scale = 1.0 / (dh ** 0.5)
    out = None
    for h in range(num_heads):
        i = prefix + (h,)
        qh = jnp.dot(q_src, wq_ref[i], preferred_element_type=jnp.float32) + bq_ref[i]
        kh = jnp.dot(kv_src, wk_ref[i], preferred_element_type=jnp.float32) + bk_ref[i]
        vh = jnp.dot(kv_src, wv_ref[i], preferred_element_type=jnp.float32) + bv_ref[i]
        s = jax.lax.dot_general(qh, kh, (((1,), (1,)), ((), ())),
                                preferred_element_type=jnp.float32) * scale
        m = jnp.max(s, axis=-1, keepdims=True)
        p = jnp.exp(s - m)
        p = p * pl.reciprocal(jnp.sum(p, axis=-1, keepdims=True), approx=True)
        ctx = jnp.dot(p, vh, preferred_element_type=jnp.float32)
        contrib = jnp.dot(ctx, wo_ref[i], preferred_element_type=jnp.float32)
        out = contrib if out is None else out + contrib
    return out


# ----------------------------- Pallas kernels -----------------------------

def _conv_gelu_kernel(x_ref, w_ref, b_ref, o_ref):
    y = jnp.dot(x_ref[0], w_ref[...], preferred_element_type=jnp.float32) + b_ref[...]
    # NOTE: PyTorch nn.GELU defaults to erf; tanh approximation used for TPU-friendly lowering.
    o_ref[0] = jax.nn.gelu(y, approximate=True).astype(o_ref.dtype)


def _finder_fused_kernel(cols_ref, pe_w2_ref, pe_b2_ref, pos_ref,
                         ewq, ewk, ewv, ebq, ebk, ebv, ewo, ebo,
                         eln1g, eln1b, ew1, eb1, ew2, eb2, eln2g, eln2b,
                         sew1t, seb1, sew2t, seb2,
                         fpw, fpb, cq_ref,
                         cwq, cwk, cwv, cbq, cbk, cbv, cwo, cbo,
                         cln1g, cln1b, cw1, cb1, cw2, cb2, cln2g, cln2b,
                         headw, headb, o_ref, *, depth, num_heads, eps):
    # ---- patch-embed conv2 (+GELU) with fused pos_embed add ----
    x = jnp.dot(cols_ref[0], pe_w2_ref[...], preferred_element_type=jnp.float32) + pe_b2_ref[...]
    x = jax.nn.gelu(x, approximate=True) + pos_ref[0]                    # (N, E)

    # ---- encoder: static in-kernel loop over all depth blocks (post-norm MHA + MLP) ----
    for l in range(depth):
        attn = _mha(x, x, ewq, ewk, ewv, ebq, ebk, ebv, ewo,
                    num_heads, prefix=(l,)) + ebo[l]
        x = _layernorm(x + attn, eln1g[l], eln1b[l], eps)
        h = jax.nn.gelu(jnp.dot(x, ew1[l], preferred_element_type=jnp.float32) + eb1[l],
                        approximate=True)
        x = _layernorm(x + jnp.dot(h, ew2[l], preferred_element_type=jnp.float32) + eb2[l],
                       eln2g[l], eln2b[l], eps)

    # ---- squeeze-excitation over the patch axis (weights pre-transposed, MXU-natural) ----
    s = jnp.mean(x, axis=-1, keepdims=True)                              # (N, 1)
    z1 = jnp.maximum(jnp.dot(sew1t[...], s, preferred_element_type=jnp.float32)
                     + seb1[...], 0.0)                                   # (Nr, 1)
    z2 = jnp.dot(sew2t[...], z1, preferred_element_type=jnp.float32) + seb2[...]   # (N, 1)
    x = x * jax.nn.sigmoid(z2)

    # ---- feat_proj ----
    feats = jnp.dot(x, fpw[...], preferred_element_type=jnp.float32) + fpb[...]    # (N, Dd)

    # ---- character finder: cross-attention block (post-norm) ----
    q_in = cq_ref[0]                                                     # (Lq, Dd)
    attn = _mha(q_in, feats, cwq, cwk, cwv, cbq, cbk, cbv, cwo, num_heads) + cbo[...]
    y = _layernorm(q_in + attn, cln1g[...], cln1b[...], eps)
    h = jax.nn.gelu(jnp.dot(y, cw1[...], preferred_element_type=jnp.float32) + cb1[...],
                    approximate=True)
    y = _layernorm(y + jnp.dot(h, cw2[...], preferred_element_type=jnp.float32) + cb2[...],
                   cln2g[...], cln2b[...], eps)

    # ---- char_head (lane-dense padded class width) ----
    logits = jnp.dot(y, headw[...], preferred_element_type=jnp.float32) + headb[...]
    o_ref[0] = logits.astype(o_ref.dtype)


# ----------------------------- wrappers -----------------------------

def _const_index_map(ndim):
    def im(b):
        return (0,) * ndim
    return im


def _const_spec(a):
    """Whole-array block, shared across the batch grid (block index 0 every step)."""
    return pl.BlockSpec(a.shape, _const_index_map(a.ndim))


def pallas_conv_gelu(cols, w, b):
    """cols: (B, P, K) im2col patches -> gelu(cols @ w + b); single step per batch item."""
    B, P, K = cols.shape
    C = w.shape[1]
    return pl.pallas_call(
        _conv_gelu_kernel,
        out_shape=jax.ShapeDtypeStruct((B, P, C), jnp.float32),
        grid=(B,),
        in_specs=[pl.BlockSpec((1, P, K), lambda i: (i, 0, 0)),
                  pl.BlockSpec((K, C), lambda i: (0, 0)),
                  pl.BlockSpec((1, C), lambda i: (0, 0))],
        out_specs=pl.BlockSpec((1, P, C), lambda i: (i, 0, 0)),
        compiler_params=pltpu.CompilerParams(dimension_semantics=("parallel",)),
    )(cols, w, b)


def finder_fused(cols2, params, *, depth, num_heads):
    """conv2+pos -> encoder stack -> SE -> feat_proj -> char cross-attn -> head, one call."""
    B, N, K2 = cols2.shape
    Lq = params["char_tokens"].shape[1]          # padded char length (multiple of 8)
    Cp = params["head_w"].shape[1]               # padded (lane-dense) num_class
    e, c = params["enc"], params["cf"]
    inputs = (
        cols2, params["pe_w2"], params["pe_b2"], params["pos_embed"],
        e["wq"], e["wk"], e["wv"], e["bq"], e["bk"], e["bv"], e["wo"], e["bo"],
        e["ln1_g"], e["ln1_b"], e["w1"], e["b1"], e["w2"], e["b2"], e["ln2_g"], e["ln2_b"],
        params["se_w1t"], params["se_b1"], params["se_w2t"], params["se_b2"],
        params["fp_w"], params["fp_b"], params["char_tokens"],
        c["wq"], c["wk"], c["wv"], c["bq"], c["bk"], c["bv"], c["wo"], c["bo"],
        c["ln1_g"], c["ln1_b"], c["w1"], c["b1"], c["w2"], c["b2"], c["ln2_g"], c["ln2_b"],
        params["head_w"], params["head_b"],
    )
    in_specs = ([pl.BlockSpec((1, N, K2), lambda b: (b, 0, 0))]
                + [_const_spec(a) for a in inputs[1:]])
    return pl.pallas_call(
        functools.partial(_finder_fused_kernel, depth=depth, num_heads=num_heads, eps=1e-5),
        out_shape=jax.ShapeDtypeStruct((B, Lq, Cp), jnp.float32),
        grid=(B,),
        in_specs=in_specs,
        out_specs=pl.BlockSpec((1, Lq, Cp), lambda b: (b, 0, 0)),
        compiler_params=pltpu.CompilerParams(dimension_semantics=("parallel",)),
    )(*inputs)


# ----------------------------- XLA glue -----------------------------

def im2col_3x3_s2(x):
    """x: (B, H, W, C) NHWC; 3x3 conv, stride 2, pad 1 -> (B, Ho*Wo, 9*C)."""
    B, H, W, C = x.shape
    Ho, Wo = H // 2, W // 2
    xp = jnp.pad(x, ((0, 0), (1, 1), (1, 1), (0, 0)))
    cols = []
    for di in range(3):
        for dj in range(3):
            cols.append(xp[:, di:di + 2 * Ho:2, dj:dj + 2 * Wo:2, :])
    patches = jnp.concatenate(cols, axis=-1)                 # (B, Ho, Wo, 9*C)
    return patches.reshape(B, Ho * Wo, 9 * C), (Ho, Wo)


# ----------------------------- parameters -----------------------------

def _round_up(n, m):
    return ((n + m - 1) // m) * m


def _normal(key, shape, scale=0.02):
    return scale * jax.random.normal(key, shape, dtype=jnp.float32)


def init_params(key, cfg):
    E, Dd = cfg["embed_dim"], cfg["decoder_dim"]
    Hh, depth = cfg["num_heads"], cfg["depth"]
    H, W = cfg["img_size"]
    ph, pw = cfg["patch_size"]
    N = (H // ph) * (W // pw)
    Nr = max(1, N // 4)                        # SE reduction ratio 4 (class def not provided)
    Lq_pad = _round_up(cfg["batch_max_length"], 8)           # 27 -> 32
    Cp = _round_up(cfg["num_class"], 128)                    # 38 -> 128 (lane-dense head)
    dh, dhd = E // Hh, Dd // Hh
    hidE, hidD = E * cfg["mlp_ratio"], Dd * cfg["mlp_ratio"]
    ks = iter(jax.random.split(key, 24))

    # module inits pos_embed/char_tokens to zeros; small random values used to exercise kernels
    char = _normal(next(ks), (1, cfg["batch_max_length"], Dd))
    char = jnp.pad(char, ((0, 0), (0, Lq_pad - cfg["batch_max_length"]), (0, 0)))
    head_w = jnp.pad(_normal(next(ks), (Dd, cfg["num_class"])),
                     ((0, 0), (0, Cp - cfg["num_class"])))

    enc = dict(      # all encoder layers stacked on a leading depth axis; attention per-head
        wq=_normal(next(ks), (depth, Hh, E, dh)),
        wk=_normal(next(ks), (depth, Hh, E, dh)),
        wv=_normal(next(ks), (depth, Hh, E, dh)),
        bq=jnp.zeros((depth, Hh, 1, dh), jnp.float32),
        bk=jnp.zeros((depth, Hh, 1, dh), jnp.float32),
        bv=jnp.zeros((depth, Hh, 1, dh), jnp.float32),
        wo=_normal(next(ks), (depth, Hh, dh, E)),
        bo=jnp.zeros((depth, 1, E), jnp.float32),
        ln1_g=jnp.ones((depth, 1, E), jnp.float32),
        ln1_b=jnp.zeros((depth, 1, E), jnp.float32),
        w1=_normal(next(ks), (depth, E, hidE)),
        b1=jnp.zeros((depth, 1, hidE), jnp.float32),
        w2=_normal(next(ks), (depth, hidE, E)),
        b2=jnp.zeros((depth, 1, E), jnp.float32),
        ln2_g=jnp.ones((depth, 1, E), jnp.float32),
        ln2_b=jnp.zeros((depth, 1, E), jnp.float32),
    )
    cf = dict(       # character_finder cross-attention block, per-head weight layout
        wq=_normal(next(ks), (Hh, Dd, dhd)),
        wk=_normal(next(ks), (Hh, Dd, dhd)),
        wv=_normal(next(ks), (Hh, Dd, dhd)),
        bq=jnp.zeros((Hh, 1, dhd), jnp.float32),
        bk=jnp.zeros((Hh, 1, dhd), jnp.float32),
        bv=jnp.zeros((Hh, 1, dhd), jnp.float32),
        wo=_normal(next(ks), (Hh, dhd, Dd)),
        bo=jnp.zeros((1, Dd), jnp.float32),
        ln1_g=jnp.ones((1, Dd), jnp.float32),
        ln1_b=jnp.zeros((1, Dd), jnp.float32),
        w1=_normal(next(ks), (Dd, hidD)),
        b1=jnp.zeros((1, hidD), jnp.float32),
        w2=_normal(next(ks), (hidD, Dd)),
        b2=jnp.zeros((1, Dd), jnp.float32),
        ln2_g=jnp.ones((1, Dd), jnp.float32),
        ln2_b=jnp.zeros((1, Dd), jnp.float32),
    )
    return dict(
        pe_w1=_normal(next(ks), (9 * 3, E // 2)), pe_b1=jnp.zeros((1, E // 2), jnp.float32),
        pe_w2=_normal(next(ks), (9 * (E // 2), E)), pe_b2=jnp.zeros((1, E), jnp.float32),
        pos_embed=_normal(next(ks), (1, N, E)),
        char_tokens=char,
        enc=enc,
        # SE weights stored pre-transposed for natural MXU contraction orientation
        se_w1t=_normal(next(ks), (Nr, N)), se_b1=jnp.zeros((Nr, 1), jnp.float32),
        se_w2t=_normal(next(ks), (N, Nr)), se_b2=jnp.zeros((N, 1), jnp.float32),
        fp_w=_normal(next(ks), (E, Dd)), fp_b=jnp.zeros((1, Dd), jnp.float32),
        cf=cf,
        head_w=head_w, head_b=jnp.zeros((1, Cp), jnp.float32),
    )


# ----------------------------- forward -----------------------------

def finder_forward(x_nchw, params, *, cfg):
    B = x_nchw.shape[0]
    x = jnp.transpose(x_nchw, (0, 2, 3, 1))                   # NCHW -> NHWC

    # patch_embed conv1 (3x3/s2 + GELU): small standalone kernel
    cols1, (H1, W1) = im2col_3x3_s2(x)
    h = pallas_conv_gelu(cols1, params["pe_w1"], params["pe_b1"])
    h = h.reshape(B, H1, W1, params["pe_w1"].shape[1])

    # conv2(+pos) + encoder stack + SE + feat_proj + char finder + head: ONE fused kernel
    cols2, _ = im2col_3x3_s2(h)
    logits = finder_fused(cols2, params, depth=cfg["depth"], num_heads=cfg["num_heads"])

    # drop query-row / class-lane padding once, at the very end
    return logits[:, :cfg["batch_max_length"], :cfg["num_class"]]


# ----------------------------- main -----------------------------

if __name__ == "__main__":
    cfg = dict(embed_dim=32, num_heads=4, depth=2, decoder_dim=32,
               num_class=38, batch_max_length=27, mlp_ratio=4,
               patch_size=(4, 4), img_size=(16, 32))
    B = 2
    key = jax.random.PRNGKey(0)
    kx, kp = jax.random.split(key)
    x = jax.random.normal(kx, (B, 3, cfg["img_size"][0], cfg["img_size"][1]), dtype=jnp.float32)
    params = init_params(kp, cfg)

    fwd = jax.jit(functools.partial(finder_forward, cfg=cfg))
    out = fwd(x, params)
    out = jax.block_until_ready(out)

    assert out.shape == (B, cfg["batch_max_length"], cfg["num_class"]), out.shape
    assert bool(jnp.all(jnp.isfinite(out)))
    print("KERNEL_OK")
</pallas_src>

<mosaic_0001>
module attributes {stable_mosaic.version = 11 : i64} {
  func.func @_conv_gelu_kernel(%arg0: i32, %arg1: memref<1x128x27xf32, #tpu.memory_space<vmem>>, %arg2: memref<27x16xf32, #tpu.memory_space<vmem>>, %arg3: memref<1x16xf32, #tpu.memory_space<vmem>>, %arg4: memref<1x128x16xf32, #tpu.memory_space<vmem>>) attributes {dimension_semantics = [#tpu.dimension_semantics<parallel>], iteration_bounds = array<i64: 2>, scalar_prefetch = 0 : i64, scratch_operands = 0 : i64, tpu.core_type = #tpu.core_type<tc>, window_params = [{transform_indices = @transform_0, window_bounds = array<i64: 1, 128, 27>}, {pipeline_mode = #tpu.pipeline_mode<synchronous>, transform_indices = @transform_1, window_bounds = array<i64: 27, 16>}, {pipeline_mode = #tpu.pipeline_mode<synchronous>, transform_indices = @transform_2, window_bounds = array<i64: 1, 16>}, {transform_indices = @transform_3, window_bounds = array<i64: 1, 128, 16>}]} {
    %c0 = arith.constant 0 : index
    %c0_0 = arith.constant 0 : index
    %c0_1 = arith.constant 0 : index
    %0 = vector.load %arg1[%c0, %c0_0, %c0_1] : memref<1x128x27xf32, #tpu.memory_space<vmem>>, vector<1x128x27xf32>
    %1 = vector.shape_cast %0 : vector<1x128x27xf32> to vector<128x27xf32>
    %c0_2 = arith.constant 0 : index
    %c0_3 = arith.constant 0 : index
    %2 = vector.load %arg2[%c0_2, %c0_3] : memref<27x16xf32, #tpu.memory_space<vmem>>, vector<27x16xf32>
    %cst = arith.constant dense<0.000000e+00> : vector<128x16xf32>
    %3 = tpu.matmul %1, %2, %cst {dimension_numbers = #tpu.dot_dimension_numbers<[1], [0], [0], [1], [0, 0, 1, 1], [], []>} : vector<128x27xf32>, vector<27x16xf32>, vector<128x16xf32> -> vector<128x16xf32>
    %c0_4 = arith.constant 0 : index
    %c0_5 = arith.constant 0 : index
    %4 = vector.load %arg3[%c0_4, %c0_5] : memref<1x16xf32, #tpu.memory_space<vmem>>, vector<1x16xf32>
    %5 = vector.broadcast %4 : vector<1x16xf32> to vector<128x16xf32>
    %6 = arith.addf %3, %5 : vector<128x16xf32>
    %7 = arith.mulf %6, %6 : vector<128x16xf32>
    %8 = arith.mulf %6, %7 : vector<128x16xf32>
    %cst_6 = arith.constant 4.471500e-02 : f32
    %9 = vector.broadcast %cst_6 : f32 to vector<128x16xf32>
    %10 = arith.mulf %9, %8 : vector<128x16xf32>
    %11 = arith.addf %6, %10 : vector<128x16xf32>
    %cst_7 = arith.constant 0.797884583 : f32
    %12 = vector.broadcast %cst_7 : f32 to vector<128x16xf32>
    %13 = arith.mulf %12, %11 : vector<128x16xf32>
    %14 = math.tanh %13 : vector<128x16xf32>
    %cst_8 = arith.constant 1.000000e+00 : f32
    %15 = vector.broadcast %cst_8 : f32 to vector<128x16xf32>
    %16 = arith.addf %15, %14 : vector<128x16xf32>
    %cst_9 = arith.constant 5.000000e-01 : f32
    %17 = vector.broadcast %cst_9 : f32 to vector<128x16xf32>
    %18 = arith.mulf %17, %16 : vector<128x16xf32>
    %19 = arith.mulf %6, %18 : vector<128x16xf32>
    %c0_10 = arith.constant 0 : index
    %c0_11 = arith.constant 0 : index
    %c0_12 = arith.constant 0 : index
    %20 = vector.load %arg4[%c0_10, %c0_11, %c0_12] : memref<1x128x16xf32, #tpu.memory_space<vmem>>, vector<1x128x16xf32>
    %21 = vector.shape_cast %20 : vector<1x128x16xf32> to vector<128x16xf32>
    %22 = vector.shape_cast %19 : vector<128x16xf32> to vector<1x128x16xf32>
    tpu.vector_store %arg4[%c0_10, %c0_11, %c0_12], %22 {strides = array<i32>} : memref<1x128x16xf32, #tpu.memory_space<vmem>>, vector<1x128x16xf32>,
    return
  }
  func.func @transform_0(%arg0: i32) -> (i32, i32, i32) {
    %c0_i32 = arith.constant 0 : i32
    %c0_i32_0 = arith.constant 0 : i32
    %c0_i32_1 = arith.constant 0 : i32
    return %arg0, %c0_i32, %c0_i32_0 : i32, i32, i32
  }
  func.func @transform_1(%arg0: i32) -> (i32, i32) {
    %c0_i32 = arith.constant 0 : i32
    %c0_i32_0 = arith.constant 0 : i32
    %c0_i32_1 = arith.constant 0 : i32
    return %c0_i32, %c0_i32_0 : i32, i32
  }
  func.func @transform_2(%arg0: i32) -> (i32, i32) {
    %c0_i32 = arith.constant 0 : i32
    %c0_i32_0 = arith.constant 0 : i32
    %c0_i32_1 = arith.constant 0 : i32
    return %c0_i32, %c0_i32_0 : i32, i32
  }
  func.func @transform_3(%arg0: i32) -> (i32, i32, i32) {
    %c0_i32 = arith.constant 0 : i32
    %c0_i32_0 = arith.constant 0 : i32
    %c0_i32_1 = arith.constant 0 : i32
    return %arg0, %c0_i32, %c0_i32_0 : i32, i32, i32
  }
}

module attributes {stable_mosaic.version = 11 : i64} {
  func.func @_finder_fused_kernel(%arg0: i32, %arg1: memref<1x32x144xf32, #tpu.memory_space<vmem>>, %arg2: memref<144x32xf32, #tpu.memory_space<vmem>>, %arg3: memref<1x32xf32, #tpu.memory_space<vmem>>, %arg4: memref<1x32x32xf32, #tpu.memory_space<vmem>>, %arg5: memref<2x4x32x8xf32, #tpu.memory_space<vmem>>, %arg6: memref<2x4x32x8xf32, #tpu.memory_space<vmem>>, %arg7: memref<2x4x32x8xf32, #tpu.memory_space<vmem>>, %arg8: memref<2x4x1x8xf32, #tpu.memory_space<vmem>>, %arg9: memref<2x4x1x8xf32, #tpu.memory_space<vmem>>, %arg10: memref<2x4x1x8xf32, #tpu.memory_space<vmem>>, %arg11: memref<2x4x8x32xf32, #tpu.memory_space<vmem>>, %arg12: memref<2x1x32xf32, #tpu.memory_space<vmem>>, %arg13: memref<2x1x32xf32, #tpu.memory_space<vmem>>, %arg14: memref<2x1x32xf32, #tpu.memory_space<vmem>>, %arg15: memref<2x32x128xf32, #tpu.memory_space<vmem>>, %arg16: memref<2x1x128xf32, #tpu.memory_space<vmem>>, %arg17: memref<2x128x32xf32, #tpu.memory_space<vmem>>, %arg18: memref<2x1x32xf32, #tpu.memory_space<vmem>>, %arg19: memref<2x1x32xf32, #tpu.memory_space<vmem>>, %arg20: memref<2x1x32xf32, #tpu.memory_space<vmem>>, %arg21: memref<8x32xf32, #tpu.memory_space<vmem>>, %arg22: memref<8x1xf32, #tpu.memory_space<vmem>>, %arg23: memref<32x8xf32, #tpu.memory_space<vmem>>, %arg24: memref<32x1xf32, #tpu.memory_space<vmem>>, %arg25: memref<32x32xf32, #tpu.memory_space<vmem>>, %arg26: memref<1x32xf32, #tpu.memory_space<vmem>>, %arg27: memref<1x32x32xf32, #tpu.memory_space<vmem>>, %arg28: memref<4x32x8xf32, #tpu.memory_space<vmem>>, %arg29: memref<4x32x8xf32, #tpu.memory_space<vmem>>, %arg30: memref<4x32x8xf32, #tpu.memory_space<vmem>>, %arg31: memref<4x1x8xf32, #tpu.memory_space<vmem>>, %arg32: memref<4x1x8xf32, #tpu.memory_space<vmem>>, %arg33: memref<4x1x8xf32, #tpu.memory_space<vmem>>, %arg34: memref<4x8x32xf32, #tpu.memory_space<vmem>>, %arg35: memref<1x32xf32, #tpu.memory_space<vmem>>, %arg36: memref<1x32xf32, #tpu.memory_space<vmem>>, %arg37: memref<1x32xf32, #tpu.memory_space<vmem>>, %arg38: memref<32x128xf32, #tpu.memory_space<vmem>>, %arg39: memref<1x128xf32, #tpu.memory_space<vmem>>, %arg40: memref<128x32xf32, #tpu.memory_space<vmem>>, %arg41: memref<1x32xf32, #tpu.memory_space<vmem>>, %arg42: memref<1x32xf32, #tpu.memory_space<vmem>>, %arg43: memref<1x32xf32, #tpu.memory_space<vmem>>, %arg44: memref<32x128xf32, #tpu.memory_space<vmem>>, %arg45: memref<1x128xf32, #tpu.memory_space<vmem>>, %arg46: memref<1x32x128xf32, #tpu.memory_space<vmem>>) attributes {dimension_semantics = [#tpu.dimension_semantics<parallel>], iteration_bounds = array<i64: 2>, scalar_prefetch = 0 : i64, scratch_operands = 0 : i64, tpu.core_type = #tpu.core_type<tc>, window_params = [{transform_indices = @transform_0, window_bounds = array<i64: 1, 32, 144>}, {pipeline_mode = #tpu.pipeline_mode<synchronous>, transform_indices = @transform_1, window_bounds = array<i64: 144, 32>}, {pipeline_mode = #tpu.pipeline_mode<synchronous>, transform_indices = @transform_2, window_bounds = array<i64: 1, 32>}, {pipeline_mode = #tpu.pipeline_mode<synchronous>, transform_indices = @transform_3, window_bounds = array<i64: 1, 32, 32>}, {pipeline_mode = #tpu.pipeline_mode<synchronous>, transform_indices = @transform_4, window_bounds = array<i64: 2, 4, 32, 8>}, {pipeline_mode = #tpu.pipeline_mode<synchronous>, transform_indices = @transform_5, window_bounds = array<i64: 2, 4, 32, 8>}, {pipeline_mode = #tpu.pipeline_mode<synchronous>, transform_indices = @transform_6, window_bounds = array<i64: 2, 4, 32, 8>}, {pipeline_mode = #tpu.pipeline_mode<synchronous>, transform_indices = @transform_7, window_bounds = array<i64: 2, 4, 1, 8>}, {pipeline_mode = #tpu.pipeline_mode<synchronous>, transform_indices = @transform_8, window_bounds = array<i64: 2, 4, 1, 8>}, {pipeline_mode = #tpu.pipeline_mode<synchronous>, transform_indices = @transform_9, window_bounds = array<i64: 2, 4, 1, 8>}, {pipeline_mode = #tpu.pipeline_mode<synchronous>, transform_indices = @transform_10, window_bounds = array<i64: 2, 4, 8, 32>}, {pipeline_mode = #tpu.pipeline_mode<synchronous>, transform_indices = @transform_11, window_bounds = array<i64: 2, 1, 32>}, {pipeline_mode = #tpu.pipeline_mode<synchronous>, transform_indices = @transform_12, window_bounds = array<i64: 2, 1, 32>}, {pipeline_mode = #tpu.pipeline_mode<synchronous>, transform_indices = @transform_13, window_bounds = array<i64: 2, 1, 32>}, {pipeline_mode = #tpu.pipeline_mode<synchronous>, transform_indices = @transform_14, window_bounds = array<i64: 2, 32, 128>}, {pipeline_mode = #tpu.pipeline_mode<synchronous>, transform_indices = @transform_15, window_bounds = array<i64: 2, 1, 128>}, {pipeline_mode = #tpu.pipeline_mode<synchronous>, transform_indices = @transform_16, window_bounds = array<i64: 2, 128, 32>}, {pipeline_mode = #tpu.pipeline_mode<synchronous>, transform_indices = @transform_17, window_bounds = array<i64: 2, 1, 32>}, {pipeline_mode = #tpu.pipeline_mode<synchronous>, transform_indices = @transform_18, window_bounds = array<i64: 2, 1, 32>}, {pipeline_mode = #tpu.pipeline_mode<synchronous>, transform_indices = @transform_19, window_bounds = array<i64: 2, 1, 32>}, {pipeline_mode = #tpu.pipeline_mode<synchronous>, transform_indices = @transform_20, window_bounds = array<i64: 8, 32>}, {pipeline_mode = #tpu.pipeline_mode<synchronous>, transform_indices = @transform_21, window_bounds = array<i64: 8, 1>}, {pipeline_mode = #tpu.pipeline_mode<synchronous>, transform_indices = @transform_22, window_bounds = array<i64: 32, 8>}, {pipeline_mode = #tpu.pipeline_mode<synchronous>, transform_indices = @transform_23, window_bounds = array<i64: 32, 1>}, {pipeline_mode = #tpu.pipeline_mode<synchronous>, transform_indices = @transform_24, window_bounds = array<i64: 32, 32>}, {pipeline_mode = #tpu.pipeline_mode<synchronous>, transform_indices = @transform_25, window_bounds = array<i64: 1, 32>}, {pipeline_mode = #tpu.pipeline_mode<synchronous>, transform_indices = @transform_26, window_bounds = array<i64: 1, 32, 32>}, {pipeline_mode = #tpu.pipeline_mode<synchronous>, transform_indices = @transform_27, window_bounds = array<i64: 4, 32, 8>}, {pipeline_mode = #tpu.pipeline_mode<synchronous>, transform_indices = @transform_28, window_bounds = array<i64: 4, 32, 8>}, {pipeline_mode = #tpu.pipeline_mode<synchronous>, transform_indices = @transform_29, window_bounds = array<i64: 4, 32, 8>}, {pipeline_mode = #tpu.pipeline_mode<synchronous>, transform_indices = @transform_30, window_bounds = array<i64: 4, 1, 8>}, {pipeline_mode = #tpu.pipeline_mode<synchronous>, transform_indices = @transform_31, window_bounds = array<i64: 4, 1, 8>}, {pipeline_mode = #tpu.pipeline_mode<synchronous>, transform_indices = @transform_32, window_bounds = array<i64: 4, 1, 8>}, {pipeline_mode = #tpu.pipeline_mode<synchronous>, transform_indices = @transform_33, window_bounds = array<i64: 4, 8, 32>}, {pipeline_mode = #tpu.pipeline_mode<synchronous>, transform_indices = @transform_34, window_bounds = array<i64: 1, 32>}, {pipeline_mode = #tpu.pipeline_mode<synchronous>, transform_indices = @transform_35, window_bounds = array<i64: 1, 32>}, {pipeline_mode = #tpu.pipeline_mode<synchronous>, transform_indices = @transform_36, window_bounds = array<i64: 1, 32>}, {pipeline_mode = #tpu.pipeline_mode<synchronous>, transform_indices = @transform_37, window_bounds = array<i64: 32, 128>}, {pipeline_mode = #tpu.pipeline_mode<synchronous>, transform_indices = @transform_38, window_bounds = array<i64: 1, 128>}, {pipeline_mode = #tpu.pipeline_mode<synchronous>, transform_indices = @transform_39, window_bounds = array<i64: 128, 32>}, {pipeline_mode = #tpu.pipeline_mode<synchronous>, transform_indices = @transform_40, window_bounds = array<i64: 1, 32>}, {pipeline_mode = #tpu.pipeline_mode<synchronous>, transform_indices = @transform_41, window_bounds = array<i64: 1, 32>}, {pipeline_mode = #tpu.pipeline_mode<synchronous>, transform_indices = @transform_42, window_bounds = array<i64: 1, 32>}, {pipeline_mode = #tpu.pipeline_mode<synchronous>, transform_indices = @transform_43, window_bounds = array<i64: 32, 128>}, {pipeline_mode = #tpu.pipeline_mode<synchronous>, transform_indices = @transform_44, window_bounds = array<i64: 1, 128>}, {transform_indices = @transform_45, window_bounds = array<i64: 1, 32, 128>}]} {
    %c0 = arith.constant 0 : index
    %c0_0 = arith.constant 0 : index
    %c0_1 = arith.constant 0 : index
    %0 = vector.load %arg1[%c0, %c0_0, %c0_1] : memref<1x32x144xf32, #tpu.memory_space<vmem>>, vector<1x32x144xf32>
    %1 = vector.shape_cast %0 : vector<1x32x144xf32> to vector<32x144xf32>
    %c0_2 = arith.constant 0 : index
    %c0_3 = arith.constant 0 : index
    %2 = vector.load %arg2[%c0_2, %c0_3] : memref<144x32xf32, #tpu.memory_space<vmem>>, vector<144x32xf32>
    %cst = arith.constant dense<0.000000e+00> : vector<32x32xf32>
    %3 = tpu.matmul %1, %2, %cst {dimension_numbers = #tpu.dot_dimension_numbers<[1], [0], [0], [1], [0, 0, 1, 1], [], []>} : vector<32x144xf32>, vector<144x32xf32>, vector<32x32xf32> -> vector<32x32xf32>
    %c0_4 = arith.constant 0 : index
    %c0_5 = arith.constant 0 : index
    %4 = vector.load %arg3[%c0_4, %c0_5] : memref<1x32xf32, #tpu.memory_space<vmem>>, vector<1x32xf32>
    %5 = vector.broadcast %4 : vector<1x32xf32> to vector<32x32xf32>
    %6 = arith.addf %3, %5 : vector<32x32xf32>
    %7 = arith.mulf %6, %6 : vector<32x32xf32>
    %8 = arith.mulf %6, %7 : vector<32x32xf32>
    %cst_6 = arith.constant 4.471500e-02 : f32
    %9 = vector.broadcast %cst_6 : f32 to vector<32x32xf32>
    %10 = arith.mulf %9, %8 : vector<32x32xf32>
    %11 = arith.addf %6, %10 : vector<32x32xf32>
    %cst_7 = arith.constant 0.797884583 : f32
    %12 = vector.broadcast %cst_7 : f32 to vector<32x32xf32>
    %13 = arith.mulf %12, %11 : vector<32x32xf32>
    %14 = math.tanh %13 : vector<32x32xf32>
    %cst_8 = arith.constant 1.000000e+00 : f32
    %15 = vector.broadcast %cst_8 : f32 to vector<32x32xf32>
    %16 = arith.addf %15, %14 : vector<32x32xf32>
    %cst_9 = arith.constant 5.000000e-01 : f32
    %17 = vector.broadcast %cst_9 : f32 to vector<32x32xf32>
    %18 = arith.mulf %17, %16 : vector<32x32xf32>
    %19 = arith.mulf %6, %18 : vector<32x32xf32>
    %c0_10 = arith.constant 0 : index
    %c0_11 = arith.constant 0 : index
    %c0_12 = arith.constant 0 : index
    %20 = vector.load %arg4[%c0_10, %c0_11, %c0_12] : memref<1x32x32xf32, #tpu.memory_space<vmem>>, vector<1x32x32xf32>
    %21 = vector.shape_cast %20 : vector<1x32x32xf32> to vector<32x32xf32>
    %22 = arith.addf %19, %21 : vector<32x32xf32>
    %c0_13 = arith.constant 0 : index
    %c0_14 = arith.constant 0 : index
    %c0_15 = arith.constant 0 : index
    %c0_16 = arith.constant 0 : index
    %23 = vector.load %arg5[%c0_13, %c0_14, %c0_15, %c0_16] : memref<2x4x32x8xf32, #tpu.memory_space<vmem>>, vector<1x1x32x8xf32>
    %24 = vector.shape_cast %23 : vector<1x1x32x8xf32> to vector<32x8xf32>
    %cst_17 = arith.constant dense<0.000000e+00> : vector<32x8xf32>
    %25 = tpu.matmul %22, %24, %cst_17 {dimension_numbers = #tpu.dot_dimension_numbers<[1], [0], [0], [1], [0, 0, 1, 1], [], []>} : vector<32x32xf32>, vector<32x8xf32>, vector<32x8xf32> -> vector<32x8xf32>
    %c0_18 = arith.constant 0 : index
    %c0_19 = arith.constant 0 : index
    %c0_20 = arith.constant 0 : index
    %c0_21 = arith.constant 0 : index
    %26 = vector.load %arg8[%c0_18, %c0_19, %c0_20, %c0_21] : memref<2x4x1x8xf32, #tpu.memory_space<vmem>>, vector<1x1x1x8xf32>
    %27 = vector.shape_cast %26 : vector<1x1x1x8xf32> to vector<1x8xf32>
    %28 = vector.broadcast %27 : vector<1x8xf32> to vector<32x8xf32>
    %29 = arith.addf %25, %28 : vector<32x8xf32>
    %c0_22 = arith.constant 0 : index
    %c0_23 = arith.constant 0 : index
    %c0_24 = arith.constant 0 : index
    %c0_25 = arith.constant 0 : index
    %30 = vector.load %arg6[%c0_22, %c0_23, %c0_24, %c0_25] : memref<2x4x32x8xf32, #tpu.memory_space<vmem>>, vector<1x1x32x8xf32>
    %31 = vector.shape_cast %30 : vector<1x1x32x8xf32> to vector<32x8xf32>
    %cst_26 = arith.constant dense<0.000000e+00> : vector<32x8xf32>
    %32 = tpu.matmul %22, %31, %cst_26 {dimension_numbers = #tpu.dot_dimension_numbers<[1], [0], [0], [1], [0, 0, 1, 1], [], []>} : vector<32x32xf32>, vector<32x8xf32>, vector<32x8xf32> -> vector<32x8xf32>
    %c0_27 = arith.constant 0 : index
    %c0_28 = arith.constant 0 : index
    %c0_29 = arith.constant 0 : index
    %c0_30 = arith.constant 0 : index
    %33 = vector.load %arg9[%c0_27, %c0_28, %c0_29, %c0_30] : memref<2x4x1x8xf32, #tpu.memory_space<vmem>>, vector<1x1x1x8xf32>
    %34 = vector.shape_cast %33 : vector<1x1x1x8xf32> to vector<1x8xf32>
    %35 = vector.broadcast %34 : vector<1x8xf32> to vector<32x8xf32>
    %36 = arith.addf %32, %35 : vector<32x8xf32>
    %c0_31 = arith.constant 0 : index
    %c0_32 = arith.constant 0 : index
    %c0_33 = arith.constant 0 : index
    %c0_34 = arith.constant 0 : index
    %37 = vector.load %arg7[%c0_31, %c0_32, %c0_33, %c0_34] : memref<2x4x32x8xf32, #tpu.memory_space<vmem>>, vector<1x1x32x8xf32>
    %38 = vector.shape_cast %37 : vector<1x1x32x8xf32> to vector<32x8xf32>
    %cst_35 = arith.constant dense<0.000000e+00> : vector<32x8xf32>
    %39 = tpu.matmul %22, %38, %cst_35 {dimension_numbers = #tpu.dot_dimension_numbers<[1], [0], [0], [1], [0, 0, 1, 1], [], []>} : vector<32x32xf32>, vector<32x8xf32>, vector<32x8xf32> -> vector<32x8xf32>
    %c0_36 = arith.constant 0 : index
    %c0_37 = arith.constant 0 : index
    %c0_38 = arith.constant 0 : index
    %c0_39 = arith.constant 0 : index
    %40 = vector.load %arg10[%c0_36, %c0_37, %c0_38, %c0_39] : memref<2x4x1x8xf32, #tpu.memory_space<vmem>>, vector<1x1x1x8xf32>
    %41 = vector.shape_cast %40 : vector<1x1x1x8xf32> to vector<1x8xf32>
    %42 = vector.broadcast %41 : vector<1x8xf32> to vector<32x8xf32>
    %43 = arith.addf %39, %42 : vector<32x8xf32>
    %cst_40 = arith.constant dense<0.000000e+00> : vector<32x32xf32>
    %44 = tpu.matmul %29, %36, %cst_40 {dimension_numbers = #tpu.dot_dimension_numbers<[1], [1], [0], [0], [0, 0, 1, 0], [], []>} : vector<32x8xf32>, vector<32x8xf32>, vector<32x32xf32> -> vector<32x32xf32>
    %cst_41 = arith.constant 0.353553385 : f32
    %45 = vector.broadcast %cst_41 : f32 to vector<32x32xf32>
    %46 = arith.mulf %44, %45 : vector<32x32xf32>
    %cst_42 = arith.constant dense<0xFF800000> : vector<32xf32>
    %47 = vector.multi_reduction <maximumf>, %46, %cst_42 [1] : vector<32x32xf32> to vector<32xf32>
    %48 = vector.shape_cast %47 : vector<32xf32> to vector<32x1xf32>
    %49 = vector.broadcast %48 : vector<32x1xf32> to vector<32x32xf32>
    %50 = arith.subf %46, %49 : vector<32x32xf32>
    %51 = math.exp %50 : vector<32x32xf32>
    %cst_43 = arith.constant dense<0.000000e+00> : vector<32xf32>
    %52 = vector.multi_reduction <add>, %51, %cst_43 [1] : vector<32x32xf32> to vector<32xf32>
    %53 = vector.shape_cast %52 : vector<32xf32> to vector<32x1xf32>
    %54 = tpu.reciprocal %53 {approx = true} : vector<32x1xf32> -> vector<32x1xf32>
    %55 = vector.broadcast %54 : vector<32x1xf32> to vector<32x32xf32>
    %56 = arith.mulf %51, %55 : vector<32x32xf32>
    %cst_44 = arith.constant dense<0.000000e+00> : vector<32x8xf32>
    %57 = tpu.matmul %56, %43, %cst_44 {dimension_numbers = #tpu.dot_dimension_numbers<[1], [0], [0], [1], [0, 0, 1, 1], [], []>} : vector<32x32xf32>, vector<32x8xf32>, vector<32x8xf32> -> vector<32x8xf32>
    %c0_45 = arith.constant 0 : index
    %c0_46 = arith.constant 0 : index
    %c0_47 = arith.constant 0 : index
    %c0_48 = arith.constant 0 : index
    %58 = vector.load %arg11[%c0_45, %c0_46, %c0_47, %c0_48] : memref<2x4x8x32xf32, #tpu.memory_space<vmem>>, vector<1x1x8x32xf32>
    %59 = vector.shape_cast %58 : vector<1x1x8x32xf32> to vector<8x32xf32>
    %cst_49 = arith.constant dense<0.000000e+00> : vector<32x32xf32>
    %60 = tpu.matmul %57, %59, %cst_49 {dimension_numbers = #tpu.dot_dimension_numbers<[1], [0], [0], [1], [0, 0, 1, 1], [], []>} : vector<32x8xf32>, vector<8x32xf32>, vector<32x32xf32> -> vector<32x32xf32>
    %c0_50 = arith.constant 0 : index
    %c1 = arith.constant 1 : index
    %c0_51 = arith.constant 0 : index
    %c0_52 = arith.constant 0 : index
    %61 = vector.load %arg5[%c0_50, %c1, %c0_51, %c0_52] : memref<2x4x32x8xf32, #tpu.memory_space<vmem>>, vector<1x1x32x8xf32>
    %62 = vector.shape_cast %61 : vector<1x1x32x8xf32> to vector<32x8xf32>
    %cst_53 = arith.constant dense<0.000000e+00> : vector<32x8xf32>
    %63 = tpu.matmul %22, %62, %cst_53 {dimension_numbers = #tpu.dot_dimension_numbers<[1], [0], [0], [1], [0, 0, 1, 1], [], []>} : vector<32x32xf32>, vector<32x8xf32>, vector<32x8xf32> -> vector<32x8xf32>
    %c0_54 = arith.constant 0 : index
    %c1_55 = arith.constant 1 : index
    %c0_56 = arith.constant 0 : index
    %c0_57 = arith.constant 0 : index
    %64 = vector.load %arg8[%c0_54, %c1_55, %c0_56, %c0_57] : memref<2x4x1x8xf32, #tpu.memory_space<vmem>>, vector<1x1x1x8xf32>
    %65 = vector.shape_cast %64 : vector<1x1x1x8xf32> to vector<1x8xf32>
    %66 = vector.broadcast %65 : vector<1x8xf32> to vector<32x8xf32>
    %67 = arith.addf %63, %66 : vector<32x8xf32>
    %c0_58 = arith.constant 0 : index
    %c1_59 = arith.constant 1 : index
    %c0_60 = arith.constant 0 : index
    %c0_61 = arith.constant 0 : index
    %68 = vector.load %arg6[%c0_58, %c1_59, %c0_60, %c0_61] : memref<2x4x32x8xf32, #tpu.memory_space<vmem>>, vector<1x1x32x8xf32>
    %69 = vector.shape_cast %68 : vector<1x1x32x8xf32> to vector<32x8xf32>
    %cst_62 = arith.constant dense<0.000000e+00> : vector<32x8xf32>
    %70 = tpu.matmul %22, %69, %cst_62 {dimension_numbers = #tpu.dot_dimension_numbers<[1], [0], [0], [1], [0, 0, 1, 1], [], []>} : vector<32x32xf32>, vector<32x8xf32>, vector<32x8xf32> -> vector<32x8xf32>
    %c0_63 = arith.constant 0 : index
    %c1_64 = arith.constant 1 : index
    %c0_65 = arith.constant 0 : index
    %c0_66 = arith.constant 0 : index
    %71 = vector.load %arg9[%c0_63, %c1_64, %c0_65, %c0_66] : memref<2x4x1x8xf32, #tpu.memory_space<vmem>>, vector<1x1x1x8xf32>
    %72 = vector.shape_cast %71 : vector<1x1x1x8xf32> to vector<1x8xf32>
    %73 = vector.broadcast %72 : vector<1x8xf32> to vector<32x8xf32>
    %74 = arith.addf %70, %73 : vector<32x8xf32>
    %c0_67 = arith.constant 0 : index
    %c1_68 = arith.constant 1 : index
    %c0_69 = arith.constant 0 : index
    %c0_70 = arith.constant 0 : index
    %75 = vector.load %arg7[%c0_67, %c1_68, %c0_69, %c0_70] : memref<2x4x32x8xf32, #tpu.memory_space<vmem>>, vector<1x1x32x8xf32>
    %76 = vector.shape_cast %75 : vector<1x1x32x8xf32> to vector<32x8xf32>
    %cst_71 = arith.constant dense<0.000000e+00> : vector<32x8xf32>
    %77 = tpu.matmul %22, %76, %cst_71 {dimension_numbers = #tpu.dot_dimension_numbers<[1], [0], [0], [1], [0, 0, 1, 1], [], []>} : vector<32x32xf32>, vector<32x8xf32>, vector<32x8xf32> -> vector<32x8xf32>
    %c0_72 = arith.constant 0 : index
    %c1_73 = arith.constant 1 : index
    %c0_74 = arith.constant 0 : index
    %c0_75 = arith.constant 0 : index
    %78 = vector.load %arg10[%c0_72, %c1_73, %c0_74, %c0_75] : memref<2x4x1x8xf32, #tpu.memory_space<vmem>>, vector<1x1x1x8xf32>
    %79 = vector.shape_cast %78 : vector<1x1x1x8xf32> to vector<1x8xf32>
    %80 = vector.broadcast %79 : vector<1x8xf32> to vector<32x8xf32>
    %81 = arith.addf %77, %80 : vector<32x8xf32>
    %cst_76 = arith.constant dense<0.000000e+00> : vector<32x32xf32>
    %82 = tpu.matmul %67, %74, %cst_76 {dimension_numbers = #tpu.dot_dimension_numbers<[1], [1], [0], [0], [0, 0, 1, 0], [], []>} : vector<32x8xf32>, vector<32x8xf32>, vector<32x32xf32> -> vector<32x32xf32>
    %cst_77 = arith.constant 0.353553385 : f32
    %83 = vector.broadcast %cst_77 : f32 to vector<32x32xf32>
    %84 = arith.mulf %82, %83 : vector<32x32xf32>
    %cst_78 = arith.constant dense<0xFF800000> : vector<32xf32>
    %85 = vector.multi_reduction <maximumf>, %84, %cst_78 [1] : vector<32x32xf32> to vector<32xf32>
    %86 = vector.shape_cast %85 : vector<32xf32> to vector<32x1xf32>
    %87 = vector.broadcast %86 : vector<32x1xf32> to vector<32x32xf32>
    %88 = arith.subf %84, %87 : vector<32x32xf32>
    %89 = math.exp %88 : vector<32x32xf32>
    %cst_79 = arith.constant dense<0.000000e+00> : vector<32xf32>
    %90 = vector.multi_reduction <add>, %89, %cst_79 [1] : vector<32x32xf32> to vector<32xf32>
    %91 = vector.shape_cast %90 : vector<32xf32> to vector<32x1xf32>
    %92 = tpu.reciprocal %91 {approx = true} : vector<32x1xf32> -> vector<32x1xf32>
    %93 = vector.broadcast %92 : vector<32x1xf32> to vector<32x32xf32>
    %94 = arith.mulf %89, %93 : vector<32x32xf32>
    %cst_80 = arith.constant dense<0.000000e+00> : vector<32x8xf32>
    %95 = tpu.matmul %94, %81, %cst_80 {dimension_numbers = #tpu.dot_dimension_numbers<[1], [0], [0], [1], [0, 0, 1, 1], [], []>} : vector<32x32xf32>, vector<32x8xf32>, vector<32x8xf32> -> vector<32x8xf32>
    %c0_81 = arith.constant 0 : index
    %c1_82 = arith.constant 1 : index
    %c0_83 = arith.constant 0 : index
    %c0_84 = arith.constant 0 : index
    %96 = vector.load %arg11[%c0_81, %c1_82, %c0_83, %c0_84] : memref<2x4x8x32xf32, #tpu.memory_space<vmem>>, vector<1x1x8x32xf32>
    %97 = vector.shape_cast %96 : vector<1x1x8x32xf32> to vector<8x32xf32>
    %cst_85 = arith.constant dense<0.000000e+00> : vector<32x32xf32>
    %98 = tpu.matmul %95, %97, %cst_85 {dimension_numbers = #tpu.dot_dimension_numbers<[1], [0], [0], [1], [0, 0, 1, 1], [], []>} : vector<32x8xf32>, vector<8x32xf32>, vector<32x32xf32> -> vector<32x32xf32>
    %99 = arith.addf %60, %98 : vector<32x32xf32>
    %c0_86 = arith.constant 0 : index
    %c2 = arith.constant 2 : index
    %c0_87 = arith.constant 0 : index
    %c0_88 = arith.constant 0 : index
    %100 = vector.load %arg5[%c0_86, %c2, %c0_87, %c0_88] : memref<2x4x32x8xf32, #tpu.memory_space<vmem>>, vector<1x1x32x8xf32>
    %101 = vector.shape_cast %100 : vector<1x1x32x8xf32> to vector<32x8xf32>
    %cst_89 = arith.constant dense<0.000000e+00> : vector<32x8xf32>
    %102 = tpu.matmul %22, %101, %cst_89 {dimension_numbers = #tpu.dot_dimension_numbers<[1], [0], [0], [1], [0, 0, 1, 1], [], []>} : vector<32x32xf32>, vector<32x8xf32>, vector<32x8xf32> -> vector<32x8xf32>
    %c0_90 = arith.constant 0 : index
    %c2_91 = arith.constant 2 : index
    %c0_92 = arith.constant 0 : index
    %c0_93 = arith.constant 0 : index
    %103 = vector.load %arg8[%c0_90, %c2_91, %c0_92, %c0_93] : memref<2x4x1x8xf32, #tpu.memory_space<vmem>>, vector<1x1x1x8xf32>
    %104 = vector.shape_cast %103 : vector<1x1x1x8xf32> to vector<1x8xf32>
    %105 = vector.broadcast %104 : vector<1x8xf32> to vector<32x8xf32>
    %106 = arith.addf %102, %105 : vector<32x8xf32>
    %c0_94 = arith.constant 0 : index
    %c2_95 = arith.constant 2 : index
    %c0_96 = arith.constant 0 : index
    %c0_97 = arith.constant 0 : index
    %107 = vector.load %arg6[%c0_94, %c2_95, %c0_96, %c0_97] : memref<2x4x32x8xf32, #tpu.memory_space<vmem>>, vector<1x1x32x8xf32>
    %108 = vector.shape_cast %107 : vector<1x1x32x8xf32> to vector<32x8xf32>
    %cst_98 = arith.constant dense<0.000000e+00> : vector<32x8xf32>
    %109 = tpu.matmul %22, %108, %cst_98 {dimension_numbers = #tpu.dot_dimension_numbers<[1], [0], [0], [1], [0, 0, 1, 1], [], []>} : vector<32x32xf32>, vector<32x8xf32>, vector<32x8xf32> -> vector<32x8xf32>
    %c0_99 = arith.constant 0 : index
    %c2_100 = arith.constant 2 : index
    %c0_101 = arith.constant 0 : index
    %c0_102 = arith.constant 0 : index
    %110 = vector.load %arg9[%c0_99, %c2_100, %c0_101, %c0_102] : memref<2x4x1x8xf32, #tpu.memory_space<vmem>>, vector<1x1x1x8xf32>
    %111 = vector.shape_cast %110 : vector<1x1x1x8xf32> to vector<1x8xf32>
    %112 = vector.broadcast %111 : vector<1x8xf32> to vector<32x8xf32>
    %113 = arith.addf %109, %112 : vector<32x8xf32>
    %c0_103 = arith.constant 0 : index
    %c2_104 = arith.constant 2 : index
    %c0_105 = arith.constant 0 : index
    %c0_106 = arith.constant 0 : index
    %114 = vector.load %arg7[%c0_103, %c2_104, %c0_105, %c0_106] : memref<2x4x32x8xf32, #tpu.memory_space<vmem>>, vector<1x1x32x8xf32>
    %115 = vector.shape_cast %114 : vector<1x1x32x8xf32> to vector<32x8xf32>
    %cst_107 = arith.constant dense<0.000000e+00> : vector<32x8xf32>
    %116 = tpu.matmul %22, %115, %cst_107 {dimension_numbers = #tpu.dot_dimension_numbers<[1], [0], [0], [1], [0, 0, 1, 1], [], []>} : vector<32x32xf32>, vector<32x8xf32>, vector<32x8xf32> -> vector<32x8xf32>
    %c0_108 = arith.constant 0 : index
    %c2_109 = arith.constant 2 : index
    %c0_110 = arith.constant 0 : index
    %c0_111 = arith.constant 0 : index
    %117 = vector.load %arg10[%c0_108, %c2_109, %c0_110, %c0_111] : memref<2x4x1x8xf32, #tpu.memory_space<vmem>>, vector<1x1x1x8xf32>
    %118 = vector.shape_cast %117 : vector<1x1x1x8xf32> to vector<1x8xf32>
    %119 = vector.broadcast %118 : vector<1x8xf32> to vector<32x8xf32>
    %120 = arith.addf %116, %119 : vector<32x8xf32>
    %cst_112 = arith.constant dense<0.000000e+00> : vector<32x32xf32>
    %121 = tpu.matmul %106, %113, %cst_112 {dimension_numbers = #tpu.dot_dimension_numbers<[1], [1], [0], [0], [0, 0, 1, 0], [], []>} : vector<32x8xf32>, vector<32x8xf32>, vector<32x32xf32> -> vector<32x32xf32>
    %cst_113 = arith.constant 0.353553385 : f32
    %122 = vector.broadcast %cst_113 : f32 to vector<32x32xf32>
    %123 = arith.mulf %121, %122 : vector<32x32xf32>
    %cst_114 = arith.constant dense<0xFF800000> : vector<32xf32>
    %124 = vector.multi_reduction <maximumf>, %123, %cst_114 [1] : vector<32x32xf32> to vector<32xf32>
    %125 = vector.shape_cast %124 : vector<32xf32> to vector<32x1xf32>
    %126 = vector.broadcast %125 : vector<32x1xf32> to vector<32x32xf32>
    %127 = arith.subf %123, %126 : vector<32x32xf32>
    %128 = math.exp %127 : vector<32x32xf32>
    %cst_115 = arith.constant dense<0.000000e+00> : vector<32xf32>
    %129 = vector.multi_reduction <add>, %128, %cst_115 [1] : vector<32x32xf32> to vector<32xf32>
    %130 = vector.shape_cast %129 : vector<32xf32> to vector<32x1xf32>
    %131 = tpu.reciprocal %130 {approx = true} : vector<32x1xf32> -> vector<32x1xf32>
    %132 = vector.broadcast %131 : vector<32x1xf32> to vector<32x32xf32>
    %133 = arith.mulf %128, %132 : vector<32x32xf32>
    %cst_116 = arith.constant dense<0.000000e+00> : vector<32x8xf32>
    %134 = tpu.matmul %133, %120, %cst_116 {dimension_numbers = #tpu.dot_dimension_numbers<[1], [0], [0], [1], [0, 0, 1, 1], [], []>} : vector<32x32xf32>, vector<32x8xf32>, vector<32x8xf32> -> vector<32x8xf32>
    %c0_117 = arith.constant 0 : index
    %c2_118 = arith.constant 2 : index
    %c0_119 = arith.constant 0 : index
    %c0_120 = arith.constant 0 : index
    %135 = vector.load %arg11[%c0_117, %c2_118, %c0_119, %c0_120] : memref<2x4x8x32xf32, #tpu.memory_space<vmem>>, vector<1x1x8x32xf32>
    %136 = vector.shape_cast %135 : vector<1x1x8x32xf32> to vector<8x32xf32>
    %cst_121 = arith.constant dense<0.000000e+00> : vector<32x32xf32>
    %137 = tpu.matmul %134, %136, %cst_121 {dimension_numbers = #tpu.dot_dimension_numbers<[1], [0], [0], [1], [0, 0, 1, 1], [], []>} : vector<32x8xf32>, vector<8x32xf32>, vector<32x32xf32> -> vector<32x32xf32>
    %138 = arith.addf %99, %137 : vector<32x32xf32>
    %c0_122 = arith.constant 0 : index
    %c3 = arith.constant 3 : index
    %c0_123 = arith.constant 0 : index
    %c0_124 = arith.constant 0 : index
    %139 = vector.load %arg5[%c0_122, %c3, %c0_123, %c0_124] : memref<2x4x32x8xf32, #tpu.memory_space<vmem>>, vector<1x1x32x8xf32>
    %140 = vector.shape_cast %139 : vector<1x1x32x8xf32> to vector<32x8xf32>
    %cst_125 = arith.constant dense<0.000000e+00> : vector<32x8xf32>
    %141 = tpu.matmul %22, %140, %cst_125 {dimension_numbers = #tpu.dot_dimension_numbers<[1], [0], [0], [1], [0, 0, 1, 1], [], []>} : vector<32x32xf32>, vector<32x8xf32>, vector<32x8xf32> -> vector<32x8xf32>
    %c0_126 = arith.constant 0 : index
    %c3_127 = arith.constant 3 : index
    %c0_128 = arith.constant 0 : index
    %c0_129 = arith.constant 0 : index
    %142 = vector.load %arg8[%c0_126, %c3_127, %c0_128, %c0_129] : memref<2x4x1x8xf32, #tpu.memory_space<vmem>>, vector<1x1x1x8xf32>
    %143 = vector.shape_cast %142 : vector<1x1x1x8xf32> to vector<1x8xf32>
    %144 = vector.broadcast %143 : vector<1x8xf32> to vector<32x8xf32>
    %145 = arith.addf %141, %144 : vector<32x8xf32>
    %c0_130 = arith.constant 0 : index
    %c3_131 = arith.constant 3 : index
    %c0_132 = arith.constant 0 : index
    %c0_133 = arith.constant 0 : index
    %146 = vector.load %arg6[%c0_130, %c3_131, %c0_132, %c0_133] : memref<2x4x32x8xf32, #tpu.memory_space<vmem>>, vector<1x1x32x8xf32>
    %147 = vector.shape_cast %146 : vector<1x1x32x8xf32> to vector<32x8xf32>
    %cst_134 = arith.constant dense<0.000000e+00> : vector<32x8xf32>
    %148 = tpu.matmul %22, %147, %cst_134 {dimension_numbers = #tpu.dot_dimension_numbers<[1], [0], [0], [1], [0, 0, 1, 1], [], []>} : vector<32x32xf32>, vector<32x8xf32>, vector<32x8xf32> -> vector<32x8xf32>
    %c0_135 = arith.constant 0 : index
    %c3_136 = arith.constant 3 : index
    %c0_137 = arith.constant 0 : index
    %c0_138 = arith.constant 0 : index
    %149 = vector.load %arg9[%c0_135, %c3_136, %c0_137, %c0_138] : memref<2x4x1x8xf32, #tpu.memory_space<vmem>>, vector<1x1x1x8xf32>
    %150 = vector.shape_cast %149 : vector<1x1x1x8xf32> to vector<1x8xf32>
    %151 = vector.broadcast %150 : vector<1x8xf32> to vector<32x8xf32>
    %152 = arith.addf %148, %151 : vector<32x8xf32>
    %c0_139 = arith.constant 0 : index
    %c3_140 = arith.constant 3 : index
    %c0_141 = arith.constant 0 : index
    %c0_142 = arith.constant 0 : index
    %153 = vector.load %arg7[%c0_139, %c3_140, %c0_141, %c0_142] : memref<2x4x32x8xf32, #tpu.memory_space<vmem>>, vector<1x1x32x8xf32>
    %154 = vector.shape_cast %153 : vector<1x1x32x8xf32> to vector<32x8xf32>
    %cst_143 = arith.constant dense<0.000000e+00> : vector<32x8xf32>
    %155 = tpu.matmul %22, %154, %cst_143 {dimension_numbers = #tpu.dot_dimension_numbers<[1], [0], [0], [1], [0, 0, 1, 1], [], []>} : vector<32x32xf32>, vector<32x8xf32>, vector<32x8xf32> -> vector<32x8xf32>
    %c0_144 = arith.constant 0 : index
    %c3_145 = arith.constant 3 : index
    %c0_146 = arith.constant 0 : index
    %c0_147 = arith.constant 0 : index
    %156 = vector.load %arg10[%c0_144, %c3_145, %c0_146, %c0_147] : memref<2x4x1x8xf32, #tpu.memory_space<vmem>>, vector<1x1x1x8xf32>
    %157 = vector.shape_cast %156 : vector<1x1x1x8xf32> to vector<1x8xf32>
    %158 = vector.broadcast %157 : vector<1x8xf32> to vector<32x8xf32>
    %159 = arith.addf %155, %158 : vector<32x8xf32>
    %cst_148 = arith.constant dense<0.000000e+00> : vector<32x32xf32>
    %160 = tpu.matmul %145, %152, %cst_148 {dimension_numbers = #tpu.dot_dimension_numbers<[1], [1], [0], [0], [0, 0, 1, 0], [], []>} : vector<32x8xf32>, vector<32x8xf32>, vector<32x32xf32> -> vector<32x32xf32>
    %cst_149 = arith.constant 0.353553385 : f32
    %161 = vector.broadcast %cst_149 : f32 to vector<32x32xf32>
    %162 = arith.mulf %160, %161 : vector<32x32xf32>
    %cst_150 = arith.constant dense<0xFF800000> : vector<32xf32>
    %163 = vector.multi_reduction <maximumf>, %162, %cst_150 [1] : vector<32x32xf32> to vector<32xf32>
    %164 = vector.shape_cast %163 : vector<32xf32> to vector<32x1xf32>
    %165 = vector.broadcast %164 : vector<32x1xf32> to vector<32x32xf32>
    %166 = arith.subf %162, %165 : vector<32x32xf32>
    %167 = math.exp %166 : vector<32x32xf32>
    %cst_151 = arith.constant dense<0.000000e+00> : vector<32xf32>
    %168 = vector.multi_reduction <add>, %167, %cst_151 [1] : vector<32x32xf32> to vector<32xf32>
    %169 = vector.shape_cast %168 : vector<32xf32> to vector<32x1xf32>
    %170 = tpu.reciprocal %169 {approx = true} : vector<32x1xf32> -> vector<32x1xf32>
    %171 = vector.broadcast %170 : vector<32x1xf32> to vector<32x32xf32>
    %172 = arith.mulf %167, %171 : vector<32x32xf32>
    %cst_152 = arith.constant dense<0.000000e+00> : vector<32x8xf32>
    %173 = tpu.matmul %172, %159, %cst_152 {dimension_numbers = #tpu.dot_dimension_numbers<[1], [0], [0], [1], [0, 0, 1, 1], [], []>} : vector<32x32xf32>, vector<32x8xf32>, vector<32x8xf32> -> vector<32x8xf32>
    %c0_153 = arith.constant 0 : index
    %c3_154 = arith.constant 3 : index
    %c0_155 = arith.constant 0 : index
    %c0_156 = arith.constant 0 : index
    %174 = vector.load %arg11[%c0_153, %c3_154, %c0_155, %c0_156] : memref<2x4x8x32xf32, #tpu.memory_space<vmem>>, vector<1x1x8x32xf32>
    %175 = vector.shape_cast %174 : vector<1x1x8x32xf32> to vector<8x32xf32>
    %cst_157 = arith.constant dense<0.000000e+00> : vector<32x32xf32>
    %176 = tpu.matmul %173, %175, %cst_157 {dimension_numbers = #tpu.dot_dimension_numbers<[1], [0], [0], [1], [0, 0, 1, 1], [], []>} : vector<32x8xf32>, vector<8x32xf32>, vector<32x32xf32> -> vector<32x32xf32>
    %177 = arith.addf %138, %176 : vector<32x32xf32>
    %c0_158 = arith.constant 0 : index
    %c0_159 = arith.constant 0 : index
    %c0_160 = arith.constant 0 : index
    %178 = vector.load %arg12[%c0_158, %c0_159, %c0_160] : memref<2x1x32xf32, #tpu.memory_space<vmem>>, vector<1x1x32xf32>
    %179 = vector.shape_cast %178 : vector<1x1x32xf32> to vector<1x32xf32>
    %180 = vector.broadcast %179 : vector<1x32xf32> to vector<32x32xf32>
    %181 = arith.addf %177, %180 : vector<32x32xf32>
    %182 = arith.addf %22, %181 : vector<32x32xf32>
    %c0_161 = arith.constant 0 : index
    %c0_162 = arith.constant 0 : index
    %c0_163 = arith.constant 0 : index
    %183 = vector.load %arg13[%c0_161, %c0_162, %c0_163] : memref<2x1x32xf32, #tpu.memory_space<vmem>>, vector<1x1x32xf32>
    %184 = vector.shape_cast %183 : vector<1x1x32xf32> to vector<1x32xf32>
    %c0_164 = arith.constant 0 : index
    %c0_165 = arith.constant 0 : index
    %c0_166 = arith.constant 0 : index
    %185 = vector.load %arg14[%c0_164, %c0_165, %c0_166] : memref<2x1x32xf32, #tpu.memory_space<vmem>>, vector<1x1x32xf32>
    %186 = vector.shape_cast %185 : vector<1x1x32xf32> to vector<1x32xf32>
    %cst_167 = arith.constant dense<0.000000e+00> : vector<32xf32>
    %187 = vector.multi_reduction <add>, %182, %cst_167 [1] : vector<32x32xf32> to vector<32xf32>
    %188 = vector.shape_cast %187 : vector<32xf32> to vector<32x1xf32>
    %cst_168 = arith.constant 3.200000e+01 : f32
    %189 = vector.broadcast %cst_168 : f32 to vector<32x1xf32>
    %190 = arith.divf %188, %189 : vector<32x1xf32>
    %191 = vector.broadcast %190 : vector<32x1xf32> to vector<32x32xf32>
    %192 = arith.subf %182, %191 : vector<32x32xf32>
    %193 = arith.mulf %192, %192 : vector<32x32xf32>
    %cst_169 = arith.constant dense<0.000000e+00> : vector<32xf32>
    %194 = vector.multi_reduction <add>, %193, %cst_169 [1] : vector<32x32xf32> to vector<32xf32>
    %195 = vector.shape_cast %194 : vector<32xf32> to vector<32x1xf32>
    %cst_170 = arith.constant 3.200000e+01 : f32
    %196 = vector.broadcast %cst_170 : f32 to vector<32x1xf32>
    %197 = arith.divf %195, %196 : vector<32x1xf32>
    %cst_171 = arith.constant 9.99999974E-6 : f32
    %198 = vector.broadcast %cst_171 : f32 to vector<32x1xf32>
    %199 = arith.addf %197, %198 : vector<32x1xf32>
    %200 = math.rsqrt %199 : vector<32x1xf32>
    %201 = vector.broadcast %200 : vector<32x1xf32> to vector<32x32xf32>
    %202 = arith.mulf %192, %201 : vector<32x32xf32>
    %203 = vector.broadcast %184 : vector<1x32xf32> to vector<32x32xf32>
    %204 = arith.mulf %202, %203 : vector<32x32xf32>
    %205 = vector.broadcast %186 : vector<1x32xf32> to vector<32x32xf32>
    %206 = arith.addf %204, %205 : vector<32x32xf32>
    %c0_172 = arith.constant 0 : index
    %c0_173 = arith.constant 0 : index
    %c0_174 = arith.constant 0 : index
    %207 = vector.load %arg15[%c0_172, %c0_173, %c0_174] : memref<2x32x128xf32, #tpu.memory_space<vmem>>, vector<1x32x128xf32>
    %208 = vector.shape_cast %207 : vector<1x32x128xf32> to vector<32x128xf32>
    %cst_175 = arith.constant dense<0.000000e+00> : vector<32x128xf32>
    %209 = tpu.matmul %206, %208, %cst_175 {dimension_numbers = #tpu.dot_dimension_numbers<[1], [0], [0], [1], [0, 0, 1, 1], [], []>} : vector<32x32xf32>, vector<32x128xf32>, vector<32x128xf32> -> vector<32x128xf32>
    %c0_176 = arith.constant 0 : index
    %c0_177 = arith.constant 0 : index
    %c0_178 = arith.constant 0 : index
    %210 = vector.load %arg16[%c0_176, %c0_177, %c0_178] : memref<2x1x128xf32, #tpu.memory_space<vmem>>, vector<1x1x128xf32>
    %211 = vector.shape_cast %210 : vector<1x1x128xf32> to vector<1x128xf32>
    %212 = vector.broadcast %211 : vector<1x128xf32> to vector<32x128xf32>
    %213 = arith.addf %209, %212 : vector<32x128xf32>
    %214 = arith.mulf %213, %213 : vector<32x128xf32>
    %215 = arith.mulf %213, %214 : vector<32x128xf32>
    %cst_179 = arith.constant 4.471500e-02 : f32
    %216 = vector.broadcast %cst_179 : f32 to vector<32x128xf32>
    %217 = arith.mulf %216, %215 : vector<32x128xf32>
    %218 = arith.addf %213, %217 : vector<32x128xf32>
    %cst_180 = arith.constant 0.797884583 : f32
    %219 = vector.broadcast %cst_180 : f32 to vector<32x128xf32>
    %220 = arith.mulf %219, %218 : vector<32x128xf32>
    %221 = math.tanh %220 : vector<32x128xf32>
    %cst_181 = arith.constant 1.000000e+00 : f32
    %222 = vector.broadcast %cst_181 : f32 to vector<32x128xf32>
    %223 = arith.addf %222, %221 : vector<32x128xf32>
    %cst_182 = arith.constant 5.000000e-01 : f32
    %224 = vector.broadcast %cst_182 : f32 to vector<32x128xf32>
    %225 = arith.mulf %224, %223 : vector<32x128xf32>
    %226 = arith.mulf %213, %225 : vector<32x128xf32>
    %c0_183 = arith.constant 0 : index
    %c0_184 = arith.constant 0 : index
    %c0_185 = arith.constant 0 : index
    %227 = vector.load %arg17[%c0_183, %c0_184, %c0_185] : memref<2x128x32xf32, #tpu.memory_space<vmem>>, vector<1x128x32xf32>
    %228 = vector.shape_cast %227 : vector<1x128x32xf32> to vector<128x32xf32>
    %cst_186 = arith.constant dense<0.000000e+00> : vector<32x32xf32>
    %229 = tpu.matmul %226, %228, %cst_186 {dimension_numbers = #tpu.dot_dimension_numbers<[1], [0], [0], [1], [0, 0, 1, 1], [], []>} : vector<32x128xf32>, vector<128x32xf32>, vector<32x32xf32> -> vector<32x32xf32>
    %230 = arith.addf %206, %229 : vector<32x32xf32>
    %c0_187 = arith.constant 0 : index
    %c0_188 = arith.constant 0 : index
    %c0_189 = arith.constant 0 : index
    %231 = vector.load %arg18[%c0_187, %c0_188, %c0_189] : memref<2x1x32xf32, #tpu.memory_space<vmem>>, vector<1x1x32xf32>
    %232 = vector.shape_cast %231 : vector<1x1x32xf32> to vector<1x32xf32>
    %233 = vector.broadcast %232 : vector<1x32xf32> to vector<32x32xf32>
    %234 = arith.addf %230, %233 : vector<32x32xf32>
    %c0_190 = arith.constant 0 : index
    %c0_191 = arith.constant 0 : index
    %c0_192 = arith.constant 0 : index
    %235 = vector.load %arg19[%c0_190, %c0_191, %c0_192] : memref<2x1x32xf32, #tpu.memory_space<vmem>>, vector<1x1x32xf32>
    %236 = vector.shape_cast %235 : vector<1x1x32xf32> to vector<1x32xf32>
    %c0_193 = arith.constant 0 : index
    %c0_194 = arith.constant 0 : index
    %c0_195 = arith.constant 0 : index
    %237 = vector.load %arg20[%c0_193, %c0_194, %c0_195] : memref<2x1x32xf32, #tpu.memory_space<vmem>>, vector<1x1x32xf32>
    %238 = vector.shape_cast %237 : vector<1x1x32xf32> to vector<1x32xf32>
    %cst_196 = arith.constant dense<0.000000e+00> : vector<32xf32>
    %239 = vector.multi_reduction <add>, %234, %cst_196 [1] : vector<32x32xf32> to vector<32xf32>
    %240 = vector.shape_cast %239 : vector<32xf32> to vector<32x1xf32>
    %cst_197 = arith.constant 3.200000e+01 : f32
    %241 = vector.broadcast %cst_197 : f32 to vector<32x1xf32>
    %242 = arith.divf %240, %241 : vector<32x1xf32>
    %243 = vector.broadcast %242 : vector<32x1xf32> to vector<32x32xf32>
    %244 = arith.subf %234, %243 : vector<32x32xf32>
    %245 = arith.mulf %244, %244 : vector<32x32xf32>
    %cst_198 = arith.constant dense<0.000000e+00> : vector<32xf32>
    %246 = vector.multi_reduction <add>, %245, %cst_198 [1] : vector<32x32xf32> to vector<32xf32>
    %247 = vector.shape_cast %246 : vector<32xf32> to vector<32x1xf32>
    %cst_199 = arith.constant 3.200000e+01 : f32
    %248 = vector.broadcast %cst_199 : f32 to vector<32x1xf32>
    %249 = arith.divf %247, %248 : vector<32x1xf32>
    %cst_200 = arith.constant 9.99999974E-6 : f32
    %250 = vector.broadcast %cst_200 : f32 to vector<32x1xf32>
    %251 = arith.addf %249, %250 : vector<32x1xf32>
    %252 = math.rsqrt %251 : vector<32x1xf32>
    %253 = vector.broadcast %252 : vector<32x1xf32> to vector<32x32xf32>
    %254 = arith.mulf %244, %253 : vector<32x32xf32>
    %255 = vector.broadcast %236 : vector<1x32xf32> to vector<32x32xf32>
    %256 = arith.mulf %254, %255 : vector<32x32xf32>
    %257 = vector.broadcast %238 : vector<1x32xf32> to vector<32x32xf32>
    %258 = arith.addf %256, %257 : vector<32x32xf32>
    %c1_201 = arith.constant 1 : index
    %c0_202 = arith.constant 0 : index
    %c0_203 = arith.constant 0 : index
    %c0_204 = arith.constant 0 : index
    %259 = vector.load %arg5[%c1_201, %c0_202, %c0_203, %c0_204] : memref<2x4x32x8xf32, #tpu.memory_space<vmem>>, vector<1x1x32x8xf32>
    %260 = vector.shape_cast %259 : vector<1x1x32x8xf32> to vector<32x8xf32>
    %cst_205 = arith.constant dense<0.000000e+00> : vector<32x8xf32>
    %261 = tpu.matmul %258, %260, %cst_205 {dimension_numbers = #tpu.dot_dimension_numbers<[1], [0], [0], [1], [0, 0, 1, 1], [], []>} : vector<32x32xf32>, vector<32x8xf32>, vector<32x8xf32> -> vector<32x8xf32>
    %c1_206 = arith.constant 1 : index
    %c0_207 = arith.constant 0 : index
    %c0_208 = arith.constant 0 : index
    %c0_209 = arith.constant 0 : index
    %262 = vector.load %arg8[%c1_206, %c0_207, %c0_208, %c0_209] : memref<2x4x1x8xf32, #tpu.memory_space<vmem>>, vector<1x1x1x8xf32>
    %263 = vector.shape_cast %262 : vector<1x1x1x8xf32> to vector<1x8xf32>
    %264 = vector.broadcast %263 : vector<1x8xf32> to vector<32x8xf32>
    %265 = arith.addf %261, %264 : vector<32x8xf32>
    %c1_210 = arith.constant 1 : index
    %c0_211 = arith.constant 0 : index
    %c0_212 = arith.constant 0 : index
    %c0_213 = arith.constant 0 : index
    %266 = vector.load %arg6[%c1_210, %c0_211, %c0_212, %c0_213] : memref<2x4x32x8xf32, #tpu.memory_space<vmem>>, vector<1x1x32x8xf32>
    %267 = vector.shape_cast %266 : vector<1x1x32x8xf32> to vector<32x8xf32>
    %cst_214 = arith.constant dense<0.000000e+00> : vector<32x8xf32>
    %268 = tpu.matmul %258, %267, %cst_214 {dimension_numbers = #tpu.dot_dimension_numbers<[1], [0], [0], [1], [0, 0, 1, 1], [], []>} : vector<32x32xf32>, vector<32x8xf32>, vector<32x8xf32> -> vector<32x8xf32>
    %c1_215 = arith.constant 1 : index
    %c0_216 = arith.constant 0 : index
    %c0_217 = arith.constant 0 : index
    %c0_218 = arith.constant 0 : index
    %269 = vector.load %arg9[%c1_215, %c0_216, %c0_217, %c0_218] : memref<2x4x1x8xf32, #tpu.memory_space<vmem>>, vector<1x1x1x8xf32>
    %270 = vector.shape_cast %269 : vector<1x1x1x8xf32> to vector<1x8xf32>
    %271 = vector.broadcast %270 : vector<1x8xf32> to vector<32x8xf32>
    %272 = arith.addf %268, %271 : vector<32x8xf32>
    %c1_219 = arith.constant 1 : index
    %c0_220 = arith.constant 0 : index
    %c0_221 = arith.constant 0 : index
    %c0_222 = arith.constant 0 : index
    %273 = vector.load %arg7[%c1_219, %c0_220, %c0_221, %c0_222] : memref<2x4x32x8xf32, #tpu.memory_space<vmem>>, vector<1x1x32x8xf32>
    %274 = vector.shape_cast %273 : vector<1x1x32x8xf32> to vector<32x8xf32>
    %cst_223 = arith.constant dense<0.000000e+00> : vector<32x8xf32>
    %275 = tpu.matmul %258, %274, %cst_223 {dimension_numbers = #tpu.dot_dimension_numbers<[1], [0], [0], [1], [0, 0, 1, 1], [], []>} : vector<32x32xf32>, vector<32x8xf32>, vector<32x8xf32> -> vector<32x8xf32>
    %c1_224 = arith.constant 1 : index
    %c0_225 = arith.constant 0 : index
    %c0_226 = arith.constant 0 : index
    %c0_227 = arith.constant 0 : index
    %276 = vector.load %arg10[%c1_224, %c0_225, %c0_226, %c0_227] : memref<2x4x1x8xf32, #tpu.memory_space<vmem>>, vector<1x1x1x8xf32>
    %277 = vector.shape_cast %276 : vector<1x1x1x8xf32> to vector<1x8xf32>
    %278 = vector.broadcast %277 : vector<1x8xf32> to vector<32x8xf32>
    %279 = arith.addf %275, %278 : vector<32x8xf32>
    %cst_228 = arith.constant dense<0.000000e+00> : vector<32x32xf32>
    %280 = tpu.matmul %265, %272, %cst_228 {dimension_numbers = #tpu.dot_dimension_numbers<[1], [1], [0], [0], [0, 0, 1, 0], [], []>} : vector<32x8xf32>, vector<32x8xf32>, vector<32x32xf32> -> vector<32x32xf32>
    %cst_229 = arith.constant 0.353553385 : f32
    %281 = vector.broadcast %cst_229 : f32 to vector<32x32xf32>
    %282 = arith.mulf %280, %281 : vector<32x32xf32>
    %cst_230 = arith.constant dense<0xFF800000> : vector<32xf32>
    %283 = vector.multi_reduction <maximumf>, %282, %cst_230 [1] : vector<32x32xf32> to vector<32xf32>
    %284 = vector.shape_cast %283 : vector<32xf32> to vector<32x1xf32>
    %285 = vector.broadcast %284 : vector<32x1xf32> to vector<32x32xf32>
    %286 = arith.subf %282, %285 : vector<32x32xf32>
    %287 = math.exp %286 : vector<32x32xf32>
    %cst_231 = arith.constant dense<0.000000e+00> : vector<32xf32>
    %288 = vector.multi_reduction <add>, %287, %cst_231 [1] : vector<32x32xf32> to vector<32xf32>
    %289 = vector.shape_cast %288 : vector<32xf32> to vector<32x1xf32>
    %290 = tpu.reciprocal %289 {approx = true} : vector<32x1xf32> -> vector<32x1xf32>
    %291 = vector.broadcast %290 : vector<32x1xf32> to vector<32x32xf32>
    %292 = arith.mulf %287, %291 : vector<32x32xf32>
    %cst_232 = arith.constant dense<0.000000e+00> : vector<32x8xf32>
    %293 = tpu.matmul %292, %279, %cst_232 {dimension_numbers = #tpu.dot_dimension_numbers<[1], [0], [0], [1], [0, 0, 1, 1], [], []>} : vector<32x32xf32>, vector<32x8xf32>, vector<32x8xf32> -> vector<32x8xf32>
    %c1_233 = arith.constant 1 : index
    %c0_234 = arith.constant 0 : index
    %c0_235 = arith.constant 0 : index
    %c0_236 = arith.constant 0 : index
    %294 = vector.load %arg11[%c1_233, %c0_234, %c0_235, %c0_236] : memref<2x4x8x32xf32, #tpu.memory_space<vmem>>, vector<1x1x8x32xf32>
    %295 = vector.shape_cast %294 : vector<1x1x8x32xf32> to vector<8x32xf32>
    %cst_237 = arith.constant dense<0.000000e+00> : vector<32x32xf32>
    %296 = tpu.matmul %293, %295, %cst_237 {dimension_numbers = #tpu.dot_dimension_numbers<[1], [0], [0], [1], [0, 0, 1, 1], [], []>} : vector<32x8xf32>, vector<8x32xf32>, vector<32x32xf32> -> vector<32x32xf32>
    %c1_238 = arith.constant 1 : index
    %c1_239 = arith.constant 1 : index
    %c0_240 = arith.constant 0 : index
    %c0_241 = arith.constant 0 : index
    %297 = vector.load %arg5[%c1_238, %c1_239, %c0_240, %c0_241] : memref<2x4x32x8xf32, #tpu.memory_space<vmem>>, vector<1x1x32x8xf32>
    %298 = vector.shape_cast %297 : vector<1x1x32x8xf32> to vector<32x8xf32>
    %cst_242 = arith.constant dense<0.000000e+00> : vector<32x8xf32>
    %299 = tpu.matmul %258, %298, %cst_242 {dimension_numbers = #tpu.dot_dimension_numbers<[1], [0], [0], [1], [0, 0, 1, 1], [], []>} : vector<32x32xf32>, vector<32x8xf32>, vector<32x8xf32> -> vector<32x8xf32>
    %c1_243 = arith.constant 1 : index
    %c1_244 = arith.constant 1 : index
    %c0_245 = arith.constant 0 : index
    %c0_246 = arith.constant 0 : index
    %300 = vector.load %arg8[%c1_243, %c1_244, %c0_245, %c0_246] : memref<2x4x1x8xf32, #tpu.memory_space<vmem>>, vector<1x1x1x8xf32>
    %301 = vector.shape_cast %300 : vector<1x1x1x8xf32> to vector<1x8xf32>
    %302 = vector.broadcast %301 : vector<1x8xf32> to vector<32x8xf32>
    %303 = arith.addf %299, %302 : vector<32x8xf32>
    %c1_247 = arith.constant 1 : index
    %c1_248 = arith.constant 1 : index
    %c0_249 = arith.constant 0 : index
    %c0_250 = arith.constant 0 : index
    %304 = vector.load %arg6[%c1_247, %c1_248, %c0_249, %c0_250] : memref<2x4x32x8xf32, #tpu.memory_space<vmem>>, vector<1x1x32x8xf32>
    %305 = vector.shape_cast %304 : vector<1x1x32x8xf32> to vector<32x8xf32>
    %cst_251 = arith.constant dense<0.000000e+00> : vector<32x8xf32>
    %306 = tpu.matmul %258, %305, %cst_251 {dimension_numbers = #tpu.dot_dimension_numbers<[1], [0], [0], [1], [0, 0, 1, 1], [], []>} : vector<32x32xf32>, vector<32x8xf32>, vector<32x8xf32> -> vector<32x8xf32>
    %c1_252 = arith.constant 1 : index
    %c1_253 = arith.constant 1 : index
    %c0_254 = arith.constant 0 : index
    %c0_255 = arith.constant 0 : index
    %307 = vector.load %arg9[%c1_252, %c1_253, %c0_254, %c0_255] : memref<2x4x1x8xf32, #tpu.memory_space<vmem>>, vector<1x1x1x8xf32>
    %308 = vector.shape_cast %307 : vector<1x1x1x8xf32> to vector<1x8xf32>
    %309 = vector.broadcast %308 : vector<1x8xf32> to vector<32x8xf32>
    %310 = arith.addf %306, %309 : vector<32x8xf32>
    %c1_256 = arith.constant 1 : index
    %c1_257 = arith.constant 1 : index
    %c0_258 = arith.constant 0 : index
    %c0_259 = arith.constant 0 : index
    %311 = vector.load %arg7[%c1_256, %c1_257, %c0_258, %c0_259] : memref<2x4x32x8xf32, #tpu.memory_space<vmem>>, vector<1x1x32x8xf32>
    %312 = vector.shape_cast %311 : vector<1x1x32x8xf32> to vector<32x8xf32>
    %cst_260 = arith.constant dense<0.000000e+00> : vector<32x8xf32>
    %313 = tpu.matmul %258, %312, %cst_260 {dimension_numbers = #tpu.dot_dimension_numbers<[1], [0], [0], [1], [0, 0, 1, 1], [], []>} : vector<32x32xf32>, vector<32x8xf32>, vector<32x8xf32> -> vector<32x8xf32>
    %c1_261 = arith.constant 1 : index
    %c1_262 = arith.constant 1 : index
    %c0_263 = arith.constant 0 : index
    %c0_264 = arith.constant 0 : index
    %314 = vector.load %arg10[%c1_261, %c1_262, %c0_263, %c0_264] : memref<2x4x1x8xf32, #tpu.memory_space<vmem>>, vector<1x1x1x8xf32>
    %315 = vector.shape_cast %314 : vector<1x1x1x8xf32> to vector<1x8xf32>
    %316 = vector.broadcast %315 : vector<1x8xf32> to vector<32x8xf32>
    %317 = arith.addf %313, %316 : vector<32x8xf32>
    %cst_265 = arith.constant dense<0.000000e+00> : vector<32x32xf32>
    %318 = tpu.matmul %303, %310, %cst_265 {dimension_numbers = #tpu.dot_dimension_numbers<[1], [1], [0], [0], [0, 0, 1, 0], [], []>} : vector<32x8xf32>, vector<32x8xf32>, vector<32x32xf32> -> vector<32x32xf32>
    %cst_266 = arith.constant 0.353553385 : f32
    %319 = vector.broadcast %cst_266 : f32 to vector<32x32xf32>
    %320 = arith.mulf %318, %319 : vector<32x32xf32>
    %cst_267 = arith.constant dense<0xFF800000> : vector<32xf32>
    %321 = vector.multi_reduction <maximumf>, %320, %cst_267 [1] : vector<32x32xf32> to vector<32xf32>
    %322 = vector.shape_cast %321 : vector<32xf32> to vector<32x1xf32>
    %323 = vector.broadcast %322 : vector<32x1xf32> to vector<32x32xf32>
    %324 = arith.subf %320, %323 : vector<32x32xf32>
    %325 = math.exp %324 : vector<32x32xf32>
    %cst_268 = arith.constant dense<0.000000e+00> : vector<32xf32>
    %326 = vector.multi_reduction <add>, %325, %cst_268 [1] : vector<32x32xf32> to vector<32xf32>
    %327 = vector.shape_cast %326 : vector<32xf32> to vector<32x1xf32>
    %328 = tpu.reciprocal %327 {approx = true} : vector<32x1xf32> -> vector<32x1xf32>
    %329 = vector.broadcast %328 : vector<32x1xf32> to vector<32x32xf32>
    %330 = arith.mulf %325, %329 : vector<32x32xf32>
    %cst_269 = arith.constant dense<0.000000e+00> : vector<32x8xf32>
    %331 = tpu.matmul %330, %317, %cst_269 {dimension_numbers = #tpu.dot_dimension_numbers<[1], [0], [0], [1], [0, 0, 1, 1], [], []>} : vector<32x32xf32>, vector<32x8xf32>, vector<32x8xf32> -> vector<32x8xf32>
    %c1_270 = arith.constant 1 : index
    %c1_271 = arith.constant 1 : index
    %c0_272 = arith.constant 0 : index
    %c0_273 = arith.constant 0 : index
    %332 = vector.load %arg11[%c1_270, %c1_271, %c0_272, %c0_273] : memref<2x4x8x32xf32, #tpu.memory_space<vmem>>, vector<1x1x8x32xf32>
    %333 = vector.shape_cast %332 : vector<1x1x8x32xf32> to vector<8x32xf32>
    %cst_274 = arith.constant dense<0.000000e+00> : vector<32x32xf32>
    %334 = tpu.matmul %331, %333, %cst_274 {dimension_numbers = #tpu.dot_dimension_numbers<[1], [0], [0], [1], [0, 0, 1, 1], [], []>} : vector<32x8xf32>, vector<8x32xf32>, vector<32x32xf32> -> vector<32x32xf32>
    %335 = arith.addf %296, %334 : vector<32x32xf32>
    %c1_275 = arith.constant 1 : index
    %c2_276 = arith.constant 2 : index
    %c0_277 = arith.constant 0 : index
    %c0_278 = arith.constant 0 : index
    %336 = vector.load %arg5[%c1_275, %c2_276, %c0_277, %c0_278] : memref<2x4x32x8xf32, #tpu.memory_space<vmem>>, vector<1x1x32x8xf32>
    %337 = vector.shape_cast %336 : vector<1x1x32x8xf32> to vector<32x8xf32>
    %cst_279 = arith.constant dense<0.000000e+00> : vector<32x8xf32>
    %338 = tpu.matmul %258, %337, %cst_279 {dimension_numbers = #tpu.dot_dimension_numbers<[1], [0], [0], [1], [0, 0, 1, 1], [], []>} : vector<32x32xf32>, vector<32x8xf32>, vector<32x8xf32> -> vector<32x8xf32>
    %c1_280 = arith.constant 1 : index
    %c2_281 = arith.constant 2 : index
    %c0_282 = arith.constant 0 : index
    %c0_283 = arith.constant 0 : index
    %339 = vector.load %arg8[%c1_280, %c2_281, %c0_282, %c0_283] : memref<2x4x1x8xf32, #tpu.memory_space<vmem>>, vector<1x1x1x8xf32>
    %340 = vector.shape_cast %339 : vector<1x1x1x8xf32> to vector<1x8xf32>
    %341 = vector.broadcast %340 : vector<1x8xf32> to vector<32x8xf32>
    %342 = arith.addf %338, %341 : vector<32x8xf32>
    %c1_284 = arith.constant 1 : index
    %c2_285 = arith.constant 2 : index
    %c0_286 = arith.constant 0 : index
    %c0_287 = arith.constant 0 : index
    %343 = vector.load %arg6[%c1_284, %c2_285, %c0_286, %c0_287] : memref<2x4x32x8xf32, #tpu.memory_space<vmem>>, vector<1x1x32x8xf32>
    %344 = vector.shape_cast %343 : vector<1x1x32x8xf32> to vector<32x8xf32>
    %cst_288 = arith.constant dense<0.000000e+00> : vector<32x8xf32>
    %345 = tpu.matmul %258, %344, %cst_288 {dimension_numbers = #tpu.dot_dimension_numbers<[1], [0], [0], [1], [0, 0, 1, 1], [], []>} : vector<32x32xf32>, vector<32x8xf32>, vector<32x8xf32> -> vector<32x8xf32>
    %c1_289 = arith.constant 1 : index
    %c2_290 = arith.constant 2 : index
    %c0_291 = arith.constant 0 : index
    %c0_292 = arith.constant 0 : index
    %346 = vector.load %arg9[%c1_289, %c2_290, %c0_291, %c0_292] : memref<2x4x1x8xf32, #tpu.memory_space<vmem>>, vector<1x1x1x8xf32>
    %347 = vector.shape_cast %346 : vector<1x1x1x8xf32> to vector<1x8xf32>
    %348 = vector.broadcast %347 : vector<1x8xf32> to vector<32x8xf32>
    %349 = arith.addf %345, %348 : vector<32x8xf32>
    %c1_293 = arith.constant 1 : index
    %c2_294 = arith.constant 2 : index
    %c0_295 = arith.constant 0 : index
    %c0_296 = arith.constant 0 : index
    %350 = vector.load %arg7[%c1_293, %c2_294, %c0_295, %c0_296] : memref<2x4x32x8xf32, #tpu.memory_space<vmem>>, vector<1x1x32x8xf32>
    %351 = vector.shape_cast %350 : vector<1x1x32x8xf32> to vector<32x8xf32>
    %cst_297 = arith.constant dense<0.000000e+00> : vector<32x8xf32>
    %352 = tpu.matmul %258, %351, %cst_297 {dimension_numbers = #tpu.dot_dimension_numbers<[1], [0], [0], [1], [0, 0, 1, 1], [], []>} : vector<32x32xf32>, vector<32x8xf32>, vector<32x8xf32> -> vector<32x8xf32>
    %c1_298 = arith.constant 1 : index
    %c2_299 = arith.constant 2 : index
    %c0_300 = arith.constant 0 : index
    %c0_301 = arith.constant 0 : index
    %353 = vector.load %arg10[%c1_298, %c2_299, %c0_300, %c0_301] : memref<2x4x1x8xf32, #tpu.memory_space<vmem>>, vector<1x1x1x8xf32>
    %354 = vector.shape_cast %353 : vector<1x1x1x8xf32> to vector<1x8xf32>
    %355 = vector.broadcast %354 : vector<1x8xf32> to vector<32x8xf32>
    %356 = arith.addf %352, %355 : vector<32x8xf32>
    %cst_302 = arith.constant dense<0.000000e+00> : vector<32x32xf32>
    %357 = tpu.matmul %342, %349, %cst_302 {dimension_numbers = #tpu.dot_dimension_numbers<[1], [1], [0], [0], [0, 0, 1, 0], [], []>} : vector<32x8xf32>, vector<32x8xf32>, vector<32x32xf32> -> vector<32x32xf32>
    %cst_303 = arith.constant 0.353553385 : f32
    %358 = vector.broadcast %cst_303 : f32 to vector<32x32xf32>
    %359 = arith.mulf %357, %358 : vector<32x32xf32>
    %cst_304 = arith.constant dense<0xFF800000> : vector<32xf32>
    %360 = vector.multi_reduction <maximumf>, %359, %cst_304 [1] : vector<32x32xf32> to vector<32xf32>
    %361 = vector.shape_cast %360 : vector<32xf32> to vector<32x1xf32>
    %362 = vector.broadcast %361 : vector<32x1xf32> to vector<32x32xf32>
    %363 = arith.subf %359, %362 : vector<32x32xf32>
    %364 = math.exp %363 : vector<32x32xf32>
    %cst_305 = arith.constant dense<0.000000e+00> : vector<32xf32>
    %365 = vector.multi_reduction <add>, %364, %cst_305 [1] : vector<32x32xf32> to vector<32xf32>
    %366 = vector.shape_cast %365 : vector<32xf32> to vector<32x1xf32>
    %367 = tpu.reciprocal %366 {approx = true} : vector<32x1xf32> -> vector<32x1xf32>
    %368 = vector.broadcast %367 : vector<32x1xf32> to vector<32x32xf32>
    %369 = arith.mulf %364, %368 : vector<32x32xf32>
    %cst_306 = arith.constant dense<0.000000e+00> : vector<32x8xf32>
    %370 = tpu.matmul %369, %356, %cst_306 {dimension_numbers = #tpu.dot_dimension_numbers<[1], [0], [0], [1], [0, 0, 1, 1], [], []>} : vector<32x32xf32>, vector<32x8xf32>, vector<32x8xf32> -> vector<32x8xf32>
    %c1_307 = arith.constant 1 : index
    %c2_308 = arith.constant 2 : index
    %c0_309 = arith.constant 0 : index
    %c0_310 = arith.constant 0 : index
    %371 = vector.load %arg11[%c1_307, %c2_308, %c0_309, %c0_310] : memref<2x4x8x32xf32, #tpu.memory_space<vmem>>, vector<1x1x8x32xf32>
    %372 = vector.shape_cast %371 : vector<1x1x8x32xf32> to vector<8x32xf32>
    %cst_311 = arith.constant dense<0.000000e+00> : vector<32x32xf32>
    %373 = tpu.matmul %370, %372, %cst_311 {dimension_numbers = #tpu.dot_dimension_numbers<[1], [0], [0], [1], [0, 0, 1, 1], [], []>} : vector<32x8xf32>, vector<8x32xf32>, vector<32x32xf32> -> vector<32x32xf32>
    %374 = arith.addf %335, %373 : vector<32x32xf32>
    %c1_312 = arith.constant 1 : index
    %c3_313 = arith.constant 3 : index
    %c0_314 = arith.constant 0 : index
    %c0_315 = arith.constant 0 : index
    %375 = vector.load %arg5[%c1_312, %c3_313, %c0_314, %c0_315] : memref<2x4x32x8xf32, #tpu.memory_space<vmem>>, vector<1x1x32x8xf32>
    %376 = vector.shape_cast %375 : vector<1x1x32x8xf32> to vector<32x8xf32>
    %cst_316 = arith.constant dense<0.000000e+00> : vector<32x8xf32>
    %377 = tpu.matmul %258, %376, %cst_316 {dimension_numbers = #tpu.dot_dimension_numbers<[1], [0], [0], [1], [0, 0, 1, 1], [], []>} : vector<32x32xf32>, vector<32x8xf32>, vector<32x8xf32> -> vector<32x8xf32>
    %c1_317 = arith.constant 1 : index
    %c3_318 = arith.constant 3 : index
    %c0_319 = arith.constant 0 : index
    %c0_320 = arith.constant 0 : index
    %378 = vector.load %arg8[%c1_317, %c3_318, %c0_319, %c0_320] : memref<2x4x1x8xf32, #tpu.memory_space<vmem>>, vector<1x1x1x8xf32>
    %379 = vector.shape_cast %378 : vector<1x1x1x8xf32> to vector<1x8xf32>
    %380 = vector.broadcast %379 : vector<1x8xf32> to vector<32x8xf32>
    %381 = arith.addf %377, %380 : vector<32x8xf32>
    %c1_321 = arith.constant 1 : index
    %c3_322 = arith.constant 3 : index
    %c0_323 = arith.constant 0 : index
    %c0_324 = arith.constant 0 : index
    %382 = vector.load %arg6[%c1_321, %c3_322, %c0_323, %c0_324] : memref<2x4x32x8xf32, #tpu.memory_space<vmem>>, vector<1x1x32x8xf32>
    %383 = vector.shape_cast %382 : vector<1x1x32x8xf32> to vector<32x8xf32>
    %cst_325 = arith.constant dense<0.000000e+00> : vector<32x8xf32>
    %384 = tpu.matmul %258, %383, %cst_325 {dimension_numbers = #tpu.dot_dimension_numbers<[1], [0], [0], [1], [0, 0, 1, 1], [], []>} : vector<32x32xf32>, vector<32x8xf32>, vector<32x8xf32> -> vector<32x8xf32>
    %c1_326 = arith.constant 1 : index
    %c3_327 = arith.constant 3 : index
    %c0_328 = arith.constant 0 : index
    %c0_329 = arith.constant 0 : index
    %385 = vector.load %arg9[%c1_326, %c3_327, %c0_328, %c0_329] : memref<2x4x1x8xf32, #tpu.memory_space<vmem>>, vector<1x1x1x8xf32>
    %386 = vector.shape_cast %385 : vector<1x1x1x8xf32> to vector<1x8xf32>
    %387 = vector.broadcast %386 : vector<1x8xf32> to vector<32x8xf32>
    %388 = arith.addf %384, %387 : vector<32x8xf32>
    %c1_330 = arith.constant 1 : index
    %c3_331 = arith.constant 3 : index
    %c0_332 = arith.constant 0 : index
    %c0_333 = arith.constant 0 : index
    %389 = vector.load %arg7[%c1_330, %c3_331, %c0_332, %c0_333] : memref<2x4x32x8xf32, #tpu.memory_space<vmem>>, vector<1x1x32x8xf32>
    %390 = vector.shape_cast %389 : vector<1x1x32x8xf32> to vector<32x8xf32>
    %cst_334 = arith.constant dense<0.000000e+00> : vector<32x8xf32>
    %391 = tpu.matmul %258, %390, %cst_334 {dimension_numbers = #tpu.dot_dimension_numbers<[1], [0], [0], [1], [0, 0, 1, 1], [], []>} : vector<32x32xf32>, vector<32x8xf32>, vector<32x8xf32> -> vector<32x8xf32>
    %c1_335 = arith.constant 1 : index
    %c3_336 = arith.constant 3 : index
    %c0_337 = arith.constant 0 : index
    %c0_338 = arith.constant 0 : index
    %392 = vector.load %arg10[%c1_335, %c3_336, %c0_337, %c0_338] : memref<2x4x1x8xf32, #tpu.memory_space<vmem>>, vector<1x1x1x8xf32>
    %393 = vector.shape_cast %392 : vector<1x1x1x8xf32> to vector<1x8xf32>
    %394 = vector.broadcast %393 : vector<1x8xf32> to vector<32x8xf32>
    %395 = arith.addf %391, %394 : vector<32x8xf32>
    %cst_339 = arith.constant dense<0.000000e+00> : vector<32x32xf32>
    %396 = tpu.matmul %381, %388, %cst_339 {dimension_numbers = #tpu.dot_dimension_numbers<[1], [1], [0], [0], [0, 0, 1, 0], [], []>} : vector<32x8xf32>, vector<32x8xf32>, vector<32x32xf32> -> vector<32x32xf32>
    %cst_340 = arith.constant 0.353553385 : f32
    %397 = vector.broadcast %cst_340 : f32 to vector<32x32xf32>
    %398 = arith.mulf %396, %397 : vector<32x32xf32>
    %cst_341 = arith.constant dense<0xFF800000> : vector<32xf32>
    %399 = vector.multi_reduction <maximumf>, %398, %cst_341 [1] : vector<32x32xf32> to vector<32xf32>
    %400 = vector.shape_cast %399 : vector<32xf32> to vector<32x1xf32>
    %401 = vector.broadcast %400 : vector<32x1xf32> to vector<32x32xf32>
    %402 = arith.subf %398, %401 : vector<32x32xf32>
    %403 = math.exp %402 : vector<32x32xf32>
    %cst_342 = arith.constant dense<0.000000e+00> : vector<32xf32>
    %404 = vector.multi_reduction <add>, %403, %cst_342 [1] : vector<32x32xf32> to vector<32xf32>
    %405 = vector.shape_cast %404 : vector<32xf32> to vector<32x1xf32>
    %406 = tpu.reciprocal %405 {approx = true} : vector<32x1xf32> -> vector<32x1xf32>
    %407 = vector.broadcast %406 : vector<32x1xf32> to vector<32x32xf32>
    %408 = arith.mulf %403, %407 : vector<32x32xf32>
    %cst_343 = arith.constant dense<0.000000e+00> : vector<32x8xf32>
    %409 = tpu.matmul %408, %395, %cst_343 {dimension_numbers = #tpu.dot_dimension_numbers<[1], [0], [0], [1], [0, 0, 1, 1], [], []>} : vector<32x32xf32>, vector<32x8xf32>, vector<32x8xf32> -> vector<32x8xf32>
    %c1_344 = arith.constant 1 : index
    %c3_345 = arith.constant 3 : index
    %c0_346 = arith.constant 0 : index
    %c0_347 = arith.constant 0 : index
    %410 = vector.load %arg11[%c1_344, %c3_345, %c0_346, %c0_347] : memref<2x4x8x32xf32, #tpu.memory_space<vmem>>, vector<1x1x8x32xf32>
    %411 = vector.shape_cast %410 : vector<1x1x8x32xf32> to vector<8x32xf32>
    %cst_348 = arith.constant dense<0.000000e+00> : vector<32x32xf32>
    %412 = tpu.matmul %409, %411, %cst_348 {dimension_numbers = #tpu.dot_dimension_numbers<[1], [0], [0], [1], [0, 0, 1, 1], [], []>} : vector<32x8xf32>, vector<8x32xf32>, vector<32x32xf32> -> vector<32x32xf32>
    %413 = arith.addf %374, %412 : vector<32x32xf32>
    %c1_349 = arith.constant 1 : index
    %c0_350 = arith.constant 0 : index
    %c0_351 = arith.constant 0 : index
    %414 = vector.load %arg12[%c1_349, %c0_350, %c0_351] : memref<2x1x32xf32, #tpu.memory_space<vmem>>, vector<1x1x32xf32>
    %415 = vector.shape_cast %414 : vector<1x1x32xf32> to vector<1x32xf32>
    %416 = vector.broadcast %415 : vector<1x32xf32> to vector<32x32xf32>
    %417 = arith.addf %413, %416 : vector<32x32xf32>
    %418 = arith.addf %258, %417 : vector<32x32xf32>
    %c1_352 = arith.constant 1 : index
    %c0_353 = arith.constant 0 : index
    %c0_354 = arith.constant 0 : index
    %419 = vector.load %arg13[%c1_352, %c0_353, %c0_354] : memref<2x1x32xf32, #tpu.memory_space<vmem>>, vector<1x1x32xf32>
    %420 = vector.shape_cast %419 : vector<1x1x32xf32> to vector<1x32xf32>
    %c1_355 = arith.constant 1 : index
    %c0_356 = arith.constant 0 : index
    %c0_357 = arith.constant 0 : index
    %421 = vector.load %arg14[%c1_355, %c0_356, %c0_357] : memref<2x1x32xf32, #tpu.memory_space<vmem>>, vector<1x1x32xf32>
    %422 = vector.shape_cast %421 : vector<1x1x32xf32> to vector<1x32xf32>
    %cst_358 = arith.constant dense<0.000000e+00> : vector<32xf32>
    %423 = vector.multi_reduction <add>, %418, %cst_358 [1] : vector<32x32xf32> to vector<32xf32>
    %424 = vector.shape_cast %423 : vector<32xf32> to vector<32x1xf32>
    %cst_359 = arith.constant 3.200000e+01 : f32
    %425 = vector.broadcast %cst_359 : f32 to vector<32x1xf32>
    %426 = arith.divf %424, %425 : vector<32x1xf32>
    %427 = vector.broadcast %426 : vector<32x1xf32> to vector<32x32xf32>
    %428 = arith.subf %418, %427 : vector<32x32xf32>
    %429 = arith.mulf %428, %428 : vector<32x32xf32>
    %cst_360 = arith.constant dense<0.000000e+00> : vector<32xf32>
    %430 = vector.multi_reduction <add>, %429, %cst_360 [1] : vector<32x32xf32> to vector<32xf32>
    %431 = vector.shape_cast %430 : vector<32xf32> to vector<32x1xf32>
    %cst_361 = arith.constant 3.200000e+01 : f32
    %432 = vector.broadcast %cst_361 : f32 to vector<32x1xf32>
    %433 = arith.divf %431, %432 : vector<32x1xf32>
    %cst_362 = arith.constant 9.99999974E-6 : f32
    %434 = vector.broadcast %cst_362 : f32 to vector<32x1xf32>
    %435 = arith.addf %433, %434 : vector<32x1xf32>
    %436 = math.rsqrt %435 : vector<32x1xf32>
    %437 = vector.broadcast %436 : vector<32x1xf32> to vector<32x32xf32>
    %438 = arith.mulf %428, %437 : vector<32x32xf32>
    %439 = vector.broadcast %420 : vector<1x32xf32> to vector<32x32xf32>
    %440 = arith.mulf %438, %439 : vector<32x32xf32>
    %441 = vector.broadcast %422 : vector<1x32xf32> to vector<32x32xf32>
    %442 = arith.addf %440, %441 : vector<32x32xf32>
    %c1_363 = arith.constant 1 : index
    %c0_364 = arith.constant 0 : index
    %c0_365 = arith.constant 0 : index
    %443 = vector.load %arg15[%c1_363, %c0_364, %c0_365] : memref<2x32x128xf32, #tpu.memory_space<vmem>>, vector<1x32x128xf32>
    %444 = vector.shape_cast %443 : vector<1x32x128xf32> to vector<32x128xf32>
    %cst_366 = arith.constant dense<0.000000e+00> : vector<32x128xf32>
    %445 = tpu.matmul %442, %444, %cst_366 {dimension_numbers = #tpu.dot_dimension_numbers<[1], [0], [0], [1], [0, 0, 1, 1], [], []>} : vector<32x32xf32>, vector<32x128xf32>, vector<32x128xf32> -> vector<32x128xf32>
    %c1_367 = arith.constant 1 : index
    %c0_368 = arith.constant 0 : index
    %c0_369 = arith.constant 0 : index
    %446 = vector.load %arg16[%c1_367, %c0_368, %c0_369] : memref<2x1x128xf32, #tpu.memory_space<vmem>>, vector<1x1x128xf32>
    %447 = vector.shape_cast %446 : vector<1x1x128xf32> to vector<1x128xf32>
    %448 = vector.broadcast %447 : vector<1x128xf32> to vector<32x128xf32>
    %449 = arith.addf %445, %448 : vector<32x128xf32>
    %450 = arith.mulf %449, %449 : vector<32x128xf32>
    %451 = arith.mulf %449, %450 : vector<32x128xf32>
    %cst_370 = arith.constant 4.471500e-02 : f32
    %452 = vector.broadcast %cst_370 : f32 to vector<32x128xf32>
    %453 = arith.mulf %452, %451 : vector<32x128xf32>
    %454 = arith.addf %449, %453 : vector<32x128xf32>
    %cst_371 = arith.constant 0.797884583 : f32
    %455 = vector.broadcast %cst_371 : f32 to vector<32x128xf32>
    %456 = arith.mulf %455, %454 : vector<32x128xf32>
    %457 = math.tanh %456 : vector<32x128xf32>
    %cst_372 = arith.constant 1.000000e+00 : f32
    %458 = vector.broadcast %cst_372 : f32 to vector<32x128xf32>
    %459 = arith.addf %458, %457 : vector<32x128xf32>
    %cst_373 = arith.constant 5.000000e-01 : f32
    %460 = vector.broadcast %cst_373 : f32 to vector<32x128xf32>
    %461 = arith.mulf %460, %459 : vector<32x128xf32>
    %462 = arith.mulf %449, %461 : vector<32x128xf32>
    %c1_374 = arith.constant 1 : index
    %c0_375 = arith.constant 0 : index
    %c0_376 = arith.constant 0 : index
    %463 = vector.load %arg17[%c1_374, %c0_375, %c0_376] : memref<2x128x32xf32, #tpu.memory_space<vmem>>, vector<1x128x32xf32>
    %464 = vector.shape_cast %463 : vector<1x128x32xf32> to vector<128x32xf32>
    %cst_377 = arith.constant dense<0.000000e+00> : vector<32x32xf32>
    %465 = tpu.matmul %462, %464, %cst_377 {dimension_numbers = #tpu.dot_dimension_numbers<[1], [0], [0], [1], [0, 0, 1, 1], [], []>} : vector<32x128xf32>, vector<128x32xf32>, vector<32x32xf32> -> vector<32x32xf32>
    %466 = arith.addf %442, %465 : vector<32x32xf32>
    %c1_378 = arith.constant 1 : index
    %c0_379 = arith.constant 0 : index
    %c0_380 = arith.constant 0 : index
    %467 = vector.load %arg18[%c1_378, %c0_379, %c0_380] : memref<2x1x32xf32, #tpu.memory_space<vmem>>, vector<1x1x32xf32>
    %468 = vector.shape_cast %467 : vector<1x1x32xf32> to vector<1x32xf32>
    %469 = vector.broadcast %468 : vector<1x32xf32> to vector<32x32xf32>
    %470 = arith.addf %466, %469 : vector<32x32xf32>
    %c1_381 = arith.constant 1 : index
    %c0_382 = arith.constant 0 : index
    %c0_383 = arith.constant 0 : index
    %471 = vector.load %arg19[%c1_381, %c0_382, %c0_383] : memref<2x1x32xf32, #tpu.memory_space<vmem>>, vector<1x1x32xf32>
    %472 = vector.shape_cast %471 : vector<1x1x32xf32> to vector<1x32xf32>
    %c1_384 = arith.constant 1 : index
    %c0_385 = arith.constant 0 : index
    %c0_386 = arith.constant 0 : index
    %473 = vector.load %arg20[%c1_384, %c0_385, %c0_386] : memref<2x1x32xf32, #tpu.memory_space<vmem>>, vector<1x1x32xf32>
    %474 = vector.shape_cast %473 : vector<1x1x32xf32> to vector<1x32xf32>
    %cst_387 = arith.constant dense<0.000000e+00> : vector<32xf32>
    %475 = vector.multi_reduction <add>, %470, %cst_387 [1] : vector<32x32xf32> to vector<32xf32>
    %476 = vector.shape_cast %475 : vector<32xf32> to vector<32x1xf32>
    %cst_388 = arith.constant 3.200000e+01 : f32
    %477 = vector.broadcast %cst_388 : f32 to vector<32x1xf32>
    %478 = arith.divf %476, %477 : vector<32x1xf32>
    %479 = vector.broadcast %478 : vector<32x1xf32> to vector<32x32xf32>
    %480 = arith.subf %470, %479 : vector<32x32xf32>
    %481 = arith.mulf %480, %480 : vector<32x32xf32>
    %cst_389 = arith.constant dense<0.000000e+00> : vector<32xf32>
    %482 = vector.multi_reduction <add>, %481, %cst_389 [1] : vector<32x32xf32> to vector<32xf32>
    %483 = vector.shape_cast %482 : vector<32xf32> to vector<32x1xf32>
    %cst_390 = arith.constant 3.200000e+01 : f32
    %484 = vector.broadcast %cst_390 : f32 to vector<32x1xf32>
    %485 = arith.divf %483, %484 : vector<32x1xf32>
    %cst_391 = arith.constant 9.99999974E-6 : f32
    %486 = vector.broadcast %cst_391 : f32 to vector<32x1xf32>
    %487 = arith.addf %485, %486 : vector<32x1xf32>
    %488 = math.rsqrt %487 : vector<32x1xf32>
    %489 = vector.broadcast %488 : vector<32x1xf32> to vector<32x32xf32>
    %490 = arith.mulf %480, %489 : vector<32x32xf32>
    %491 = vector.broadcast %472 : vector<1x32xf32> to vector<32x32xf32>
    %492 = arith.mulf %490, %491 : vector<32x32xf32>
    %493 = vector.broadcast %474 : vector<1x32xf32> to vector<32x32xf32>
    %494 = arith.addf %492, %493 : vector<32x32xf32>
    %cst_392 = arith.constant dense<0.000000e+00> : vector<32xf32>
    %495 = vector.multi_reduction <add>, %494, %cst_392 [1] : vector<32x32xf32> to vector<32xf32>
    %496 = vector.shape_cast %495 : vector<32xf32> to vector<32x1xf32>
    %cst_393 = arith.constant 3.200000e+01 : f32
    %497 = vector.broadcast %cst_393 : f32 to vector<32x1xf32>
    %498 = arith.divf %496, %497 : vector<32x1xf32>
    %c0_394 = arith.constant 0 : index
    %c0_395 = arith.constant 0 : index
    %499 = vector.load %arg21[%c0_394, %c0_395] : memref<8x32xf32, #tpu.memory_space<vmem>>, vector<8x32xf32>
    %cst_396 = arith.constant dense<0.000000e+00> : vector<8x1xf32>
    %500 = tpu.matmul %499, %498, %cst_396 {dimension_numbers = #tpu.dot_dimension_numbers<[1], [0], [0], [1], [0, 0, 1, 1], [], []>} : vector<8x32xf32>, vector<32x1xf32>, vector<8x1xf32> -> vector<8x1xf32>
    %c0_397 = arith.constant 0 : index
    %c0_398 = arith.constant 0 : index
    %501 = vector.load %arg22[%c0_397, %c0_398] : memref<8x1xf32, #tpu.memory_space<vmem>>, vector<8x1xf32>
    %502 = arith.addf %500, %501 : vector<8x1xf32>
    %cst_399 = arith.constant 0.000000e+00 : f32
    %503 = vector.broadcast %cst_399 : f32 to vector<8x1xf32>
    %504 = arith.maximumf %502, %503 : vector<8x1xf32>
    %c0_400 = arith.constant 0 : index
    %c0_401 = arith.constant 0 : index
    %505 = vector.load %arg23[%c0_400, %c0_401] : memref<32x8xf32, #tpu.memory_space<vmem>>, vector<32x8xf32>
    %cst_402 = arith.constant dense<0.000000e+00> : vector<32x1xf32>
    %506 = tpu.matmul %505, %504, %cst_402 {dimension_numbers = #tpu.dot_dimension_numbers<[1], [0], [0], [1], [0, 0, 1, 1], [], []>} : vector<32x8xf32>, vector<8x1xf32>, vector<32x1xf32> -> vector<32x1xf32>
    %c0_403 = arith.constant 0 : index
    %c0_404 = arith.constant 0 : index
    %507 = vector.load %arg24[%c0_403, %c0_404] : memref<32x1xf32, #tpu.memory_space<vmem>>, vector<32x1xf32>
    %508 = arith.addf %506, %507 : vector<32x1xf32>
    %509 = arith.negf %508 : vector<32x1xf32>
    %510 = math.exp %509 : vector<32x1xf32>
    %cst_405 = arith.constant 1.000000e+00 : f32
    %511 = vector.broadcast %cst_405 : f32 to vector<32x1xf32>
    %512 = arith.addf %511, %510 : vector<32x1xf32>
    %513 = arith.divf %511, %512 : vector<32x1xf32>
    %514 = vector.broadcast %513 : vector<32x1xf32> to vector<32x32xf32>
    %515 = arith.mulf %494, %514 : vector<32x32xf32>
    %c0_406 = arith.constant 0 : index
    %c0_407 = arith.constant 0 : index
    %516 = vector.load %arg25[%c0_406, %c0_407] : memref<32x32xf32, #tpu.memory_space<vmem>>, vector<32x32xf32>
    %cst_408 = arith.constant dense<0.000000e+00> : vector<32x32xf32>
    %517 = tpu.matmul %515, %516, %cst_408 {dimension_numbers = #tpu.dot_dimension_numbers<[1], [0], [0], [1], [0, 0, 1, 1], [], []>} : vector<32x32xf32>, vector<32x32xf32>, vector<32x32xf32> -> vector<32x32xf32>
    %c0_409 = arith.constant 0 : index
    %c0_410 = arith.constant 0 : index
    %518 = vector.load %arg26[%c0_409, %c0_410] : memref<1x32xf32, #tpu.memory_space<vmem>>, vector<1x32xf32>
    %519 = vector.broadcast %518 : vector<1x32xf32> to vector<32x32xf32>
    %520 = arith.addf %517, %519 : vector<32x32xf32>
    %c0_411 = arith.constant 0 : index
    %c0_412 = arith.constant 0 : index
    %c0_413 = arith.constant 0 : index
    %521 = vector.load %arg27[%c0_411, %c0_412, %c0_413] : memref<1x32x32xf32, #tpu.memory_space<vmem>>, vector<1x32x32xf32>
    %522 = vector.shape_cast %521 : vector<1x32x32xf32> to vector<32x32xf32>
    %c0_414 = arith.constant 0 : index
    %c0_415 = arith.constant 0 : index
    %c0_416 = arith.constant 0 : index
    %523 = vector.load %arg28[%c0_414, %c0_415, %c0_416] : memref<4x32x8xf32, #tpu.memory_space<vmem>>, vector<1x32x8xf32>
    %524 = vector.shape_cast %523 : vector<1x32x8xf32> to vector<32x8xf32>
    %cst_417 = arith.constant dense<0.000000e+00> : vector<32x8xf32>
    %525 = tpu.matmul %522, %524, %cst_417 {dimension_numbers = #tpu.dot_dimension_numbers<[1], [0], [0], [1], [0, 0, 1, 1], [], []>} : vector<32x32xf32>, vector<32x8xf32>, vector<32x8xf32> -> vector<32x8xf32>
    %c0_418 = arith.constant 0 : index
    %c0_419 = arith.constant 0 : index
    %c0_420 = arith.constant 0 : index
    %526 = vector.load %arg31[%c0_418, %c0_419, %c0_420] : memref<4x1x8xf32, #tpu.memory_space<vmem>>, vector<1x1x8xf32>
    %527 = vector.shape_cast %526 : vector<1x1x8xf32> to vector<1x8xf32>
    %528 = vector.broadcast %527 : vector<1x8xf32> to vector<32x8xf32>
    %529 = arith.addf %525, %528 : vector<32x8xf32>
    %c0_421 = arith.constant 0 : index
    %c0_422 = arith.constant 0 : index
    %c0_423 = arith.constant 0 : index
    %530 = vector.load %arg29[%c0_421, %c0_422, %c0_423] : memref<4x32x8xf32, #tpu.memory_space<vmem>>, vector<1x32x8xf32>
    %531 = vector.shape_cast %530 : vector<1x32x8xf32> to vector<32x8xf32>
    %cst_424 = arith.constant dense<0.000000e+00> : vector<32x8xf32>
    %532 = tpu.matmul %520, %531, %cst_424 {dimension_numbers = #tpu.dot_dimension_numbers<[1], [0], [0], [1], [0, 0, 1, 1], [], []>} : vector<32x32xf32>, vector<32x8xf32>, vector<32x8xf32> -> vector<32x8xf32>
    %c0_425 = arith.constant 0 : index
    %c0_426 = arith.constant 0 : index
    %c0_427 = arith.constant 0 : index
    %533 = vector.load %arg32[%c0_425, %c0_426, %c0_427] : memref<4x1x8xf32, #tpu.memory_space<vmem>>, vector<1x1x8xf32>
    %534 = vector.shape_cast %533 : vector<1x1x8xf32> to vector<1x8xf32>
    %535 = vector.broadcast %534 : vector<1x8xf32> to vector<32x8xf32>
    %536 = arith.addf %532, %535 : vector<32x8xf32>
    %c0_428 = arith.constant 0 : index
    %c0_429 = arith.constant 0 : index
    %c0_430 = arith.constant 0 : index
    %537 = vector.load %arg30[%c0_428, %c0_429, %c0_430] : memref<4x32x8xf32, #tpu.memory_space<vmem>>, vector<1x32x8xf32>
    %538 = vector.shape_cast %537 : vector<1x32x8xf32> to vector<32x8xf32>
    %cst_431 = arith.constant dense<0.000000e+00> : vector<32x8xf32>
    %539 = tpu.matmul %520, %538, %cst_431 {dimension_numbers = #tpu.dot_dimension_numbers<[1], [0], [0], [1], [0, 0, 1, 1], [], []>} : vector<32x32xf32>, vector<32x8xf32>, vector<32x8xf32> -> vector<32x8xf32>
    %c0_432 = arith.constant 0 : index
    %c0_433 = arith.constant 0 : index
    %c0_434 = arith.constant 0 : index
    %540 = vector.load %arg33[%c0_432, %c0_433, %c0_434] : memref<4x1x8xf32, #tpu.memory_space<vmem>>, vector<1x1x8xf32>
    %541 = vector.shape_cast %540 : vector<1x1x8xf32> to vector<1x8xf32>
    %542 = vector.broadcast %541 : vector<1x8xf32> to vector<32x8xf32>
    %543 = arith.addf %539, %542 : vector<32x8xf32>
    %cst_435 = arith.constant dense<0.000000e+00> : vector<32x32xf32>
    %544 = tpu.matmul %529, %536, %cst_435 {dimension_numbers = #tpu.dot_dimension_numbers<[1], [1], [0], [0], [0, 0, 1, 0], [], []>} : vector<32x8xf32>, vector<32x8xf32>, vector<32x32xf32> -> vector<32x32xf32>
    %cst_436 = arith.constant 0.353553385 : f32
    %545 = vector.broadcast %cst_436 : f32 to vector<32x32xf32>
    %546 = arith.mulf %544, %545 : vector<32x32xf32>
    %cst_437 = arith.constant dense<0xFF800000> : vector<32xf32>
    %547 = vector.multi_reduction <maximumf>, %546, %cst_437 [1] : vector<32x32xf32> to vector<32xf32>
    %548 = vector.shape_cast %547 : vector<32xf32> to vector<32x1xf32>
    %549 = vector.broadcast %548 : vector<32x1xf32> to vector<32x32xf32>
    %550 = arith.subf %546, %549 : vector<32x32xf32>
    %551 = math.exp %550 : vector<32x32xf32>
    %cst_438 = arith.constant dense<0.000000e+00> : vector<32xf32>
    %552 = vector.multi_reduction <add>, %551, %cst_438 [1] : vector<32x32xf32> to vector<32xf32>
    %553 = vector.shape_cast %552 : vector<32xf32> to vector<32x1xf32>
    %554 = tpu.reciprocal %553 {approx = true} : vector<32x1xf32> -> vector<32x1xf32>
    %555 = vector.broadcast %554 : vector<32x1xf32> to vector<32x32xf32>
    %556 = arith.mulf %551, %555 : vector<32x32xf32>
    %cst_439 = arith.constant dense<0.000000e+00> : vector<32x8xf32>
    %557 = tpu.matmul %556, %543, %cst_439 {dimension_numbers = #tpu.dot_dimension_numbers<[1], [0], [0], [1], [0, 0, 1, 1], [], []>} : vector<32x32xf32>, vector<32x8xf32>, vector<32x8xf32> -> vector<32x8xf32>
    %c0_440 = arith.constant 0 : index
    %c0_441 = arith.constant 0 : index
    %c0_442 = arith.constant 0 : index
    %558 = vector.load %arg34[%c0_440, %c0_441, %c0_442] : memref<4x8x32xf32, #tpu.memory_space<vmem>>, vector<1x8x32xf32>
    %559 = vector.shape_cast %558 : vector<1x8x32xf32> to vector<8x32xf32>
    %cst_443 = arith.constant dense<0.000000e+00> : vector<32x32xf32>
    %560 = tpu.matmul %557, %559, %cst_443 {dimension_numbers = #tpu.dot_dimension_numbers<[1], [0], [0], [1], [0, 0, 1, 1], [], []>} : vector<32x8xf32>, vector<8x32xf32>, vector<32x32xf32> -> vector<32x32xf32>
    %c1_444 = arith.constant 1 : index
    %c0_445 = arith.constant 0 : index
    %c0_446 = arith.constant 0 : index
    %561 = vector.load %arg28[%c1_444, %c0_445, %c0_446] : memref<4x32x8xf32, #tpu.memory_space<vmem>>, vector<1x32x8xf32>
    %562 = vector.shape_cast %561 : vector<1x32x8xf32> to vector<32x8xf32>
    %cst_447 = arith.constant dense<0.000000e+00> : vector<32x8xf32>
    %563 = tpu.matmul %522, %562, %cst_447 {dimension_numbers = #tpu.dot_dimension_numbers<[1], [0], [0], [1], [0, 0, 1, 1], [], []>} : vector<32x32xf32>, vector<32x8xf32>, vector<32x8xf32> -> vector<32x8xf32>
    %c1_448 = arith.constant 1 : index
    %c0_449 = arith.constant 0 : index
    %c0_450 = arith.constant 0 : index
    %564 = vector.load %arg31[%c1_448, %c0_449, %c0_450] : memref<4x1x8xf32, #tpu.memory_space<vmem>>, vector<1x1x8xf32>
    %565 = vector.shape_cast %564 : vector<1x1x8xf32> to vector<1x8xf32>
    %566 = vector.broadcast %565 : vector<1x8xf32> to vector<32x8xf32>
    %567 = arith.addf %563, %566 : vector<32x8xf32>
    %c1_451 = arith.constant 1 : index
    %c0_452 = arith.constant 0 : index
    %c0_453 = arith.constant 0 : index
    %568 = vector.load %arg29[%c1_451, %c0_452, %c0_453] : memref<4x32x8xf32, #tpu.memory_space<vmem>>, vector<1x32x8xf32>
    %569 = vector.shape_cast %568 : vector<1x32x8xf32> to vector<32x8xf32>
    %cst_454 = arith.constant dense<0.000000e+00> : vector<32x8xf32>
    %570 = tpu.matmul %520, %569, %cst_454 {dimension_numbers = #tpu.dot_dimension_numbers<[1], [0], [0], [1], [0, 0, 1, 1], [], []>} : vector<32x32xf32>, vector<32x8xf32>, vector<32x8xf32> -> vector<32x8xf32>
    %c1_455 = arith.constant 1 : index
    %c0_456 = arith.constant 0 : index
    %c0_457 = arith.constant 0 : index
    %571 = vector.load %arg32[%c1_455, %c0_456, %c0_457] : memref<4x1x8xf32, #tpu.memory_space<vmem>>, vector<1x1x8xf32>
    %572 = vector.shape_cast %571 : vector<1x1x8xf32> to vector<1x8xf32>
    %573 = vector.broadcast %572 : vector<1x8xf32> to vector<32x8xf32>
    %574 = arith.addf %570, %573 : vector<32x8xf32>
    %c1_458 = arith.constant 1 : index
    %c0_459 = arith.constant 0 : index
    %c0_460 = arith.constant 0 : index
    %575 = vector.load %arg30[%c1_458, %c0_459, %c0_460] : memref<4x32x8xf32, #tpu.memory_space<vmem>>, vector<1x32x8xf32>
    %576 = vector.shape_cast %575 : vector<1x32x8xf32> to vector<32x8xf32>
    %cst_461 = arith.constant dense<0.000000e+00> : vector<32x8xf32>
    %577 = tpu.matmul %520, %576, %cst_461 {dimension_numbers = #tpu.dot_dimension_numbers<[1], [0], [0], [1], [0, 0, 1, 1], [], []>} : vector<32x32xf32>, vector<32x8xf32>, vector<32x8xf32> -> vector<32x8xf32>
    %c1_462 = arith.constant 1 : index
    %c0_463 = arith.constant 0 : index
    %c0_464 = arith.constant 0 : index
    %578 = vector.load %arg33[%c1_462, %c0_463, %c0_464] : memref<4x1x8xf32, #tpu.memory_space<vmem>>, vector<1x1x8xf32>
    %579 = vector.shape_cast %578 : vector<1x1x8xf32> to vector<1x8xf32>
    %580 = vector.broadcast %579 : vector<1x8xf32> to vector<32x8xf32>
    %581 = arith.addf %577, %580 : vector<32x8xf32>
    %cst_465 = arith.constant dense<0.000000e+00> : vector<32x32xf32>
    %582 = tpu.matmul %567, %574, %cst_465 {dimension_numbers = #tpu.dot_dimension_numbers<[1], [1], [0], [0], [0, 0, 1, 0], [], []>} : vector<32x8xf32>, vector<32x8xf32>, vector<32x32xf32> -> vector<32x32xf32>
    %cst_466 = arith.constant 0.353553385 : f32
    %583 = vector.broadcast %cst_466 : f32 to vector<32x32xf32>
    %584 = arith.mulf %582, %583 : vector<32x32xf32>
    %cst_467 = arith.constant dense<0xFF800000> : vector<32xf32>
    %585 = vector.multi_reduction <maximumf>, %584, %cst_467 [1] : vector<32x32xf32> to vector<32xf32>
    %586 = vector.shape_cast %585 : vector<32xf32> to vector<32x1xf32>
    %587 = vector.broadcast %586 : vector<32x1xf32> to vector<32x32xf32>
    %588 = arith.subf %584, %587 : vector<32x32xf32>
    %589 = math.exp %588 : vector<32x32xf32>
    %cst_468 = arith.constant dense<0.000000e+00> : vector<32xf32>
    %590 = vector.multi_reduction <add>, %589, %cst_468 [1] : vector<32x32xf32> to vector<32xf32>
    %591 = vector.shape_cast %590 : vector<32xf32> to vector<32x1xf32>
    %592 = tpu.reciprocal %591 {approx = true} : vector<32x1xf32> -> vector<32x1xf32>
    %593 = vector.broadcast %592 : vector<32x1xf32> to vector<32x32xf32>
    %594 = arith.mulf %589, %593 : vector<32x32xf32>
    %cst_469 = arith.constant dense<0.000000e+00> : vector<32x8xf32>
    %595 = tpu.matmul %594, %581, %cst_469 {dimension_numbers = #tpu.dot_dimension_numbers<[1], [0], [0], [1], [0, 0, 1, 1], [], []>} : vector<32x32xf32>, vector<32x8xf32>, vector<32x8xf32> -> vector<32x8xf32>
    %c1_470 = arith.constant 1 : index
    %c0_471 = arith.constant 0 : index
    %c0_472 = arith.constant 0 : index
    %596 = vector.load %arg34[%c1_470, %c0_471, %c0_472] : memref<4x8x32xf32, #tpu.memory_space<vmem>>, vector<1x8x32xf32>
    %597 = vector.shape_cast %596 : vector<1x8x32xf32> to vector<8x32xf32>
    %cst_473 = arith.constant dense<0.000000e+00> : vector<32x32xf32>
    %598 = tpu.matmul %595, %597, %cst_473 {dimension_numbers = #tpu.dot_dimension_numbers<[1], [0], [0], [1], [0, 0, 1, 1], [], []>} : vector<32x8xf32>, vector<8x32xf32>, vector<32x32xf32> -> vector<32x32xf32>
    %599 = arith.addf %560, %598 : vector<32x32xf32>
    %c2_474 = arith.constant 2 : index
    %c0_475 = arith.constant 0 : index
    %c0_476 = arith.constant 0 : index
    %600 = vector.load %arg28[%c2_474, %c0_475, %c0_476] : memref<4x32x8xf32, #tpu.memory_space<vmem>>, vector<1x32x8xf32>
    %601 = vector.shape_cast %600 : vector<1x32x8xf32> to vector<32x8xf32>
    %cst_477 = arith.constant dense<0.000000e+00> : vector<32x8xf32>
    %602 = tpu.matmul %522, %601, %cst_477 {dimension_numbers = #tpu.dot_dimension_numbers<[1], [0], [0], [1], [0, 0, 1, 1], [], []>} : vector<32x32xf32>, vector<32x8xf32>, vector<32x8xf32> -> vector<32x8xf32>
    %c2_478 = arith.constant 2 : index
    %c0_479 = arith.constant 0 : index
    %c0_480 = arith.constant 0 : index
    %603 = vector.load %arg31[%c2_478, %c0_479, %c0_480] : memref<4x1x8xf32, #tpu.memory_space<vmem>>, vector<1x1x8xf32>
    %604 = vector.shape_cast %603 : vector<1x1x8xf32> to vector<1x8xf32>
    %605 = vector.broadcast %604 : vector<1x8xf32> to vector<32x8xf32>
    %606 = arith.addf %602, %605 : vector<32x8xf32>
    %c2_481 = arith.constant 2 : index
    %c0_482 = arith.constant 0 : index
    %c0_483 = arith.constant 0 : index
    %607 = vector.load %arg29[%c2_481, %c0_482, %c0_483] : memref<4x32x8xf32, #tpu.memory_space<vmem>>, vector<1x32x8xf32>
    %608 = vector.shape_cast %607 : vector<1x32x8xf32> to vector<32x8xf32>
    %cst_484 = arith.constant dense<0.000000e+00> : vector<32x8xf32>
    %609 = tpu.matmul %520, %608, %cst_484 {dimension_numbers = #tpu.dot_dimension_numbers<[1], [0], [0], [1], [0, 0, 1, 1], [], []>} : vector<32x32xf32>, vector<32x8xf32>, vector<32x8xf32> -> vector<32x8xf32>
    %c2_485 = arith.constant 2 : index
    %c0_486 = arith.constant 0 : index
    %c0_487 = arith.constant 0 : index
    %610 = vector.load %arg32[%c2_485, %c0_486, %c0_487] : memref<4x1x8xf32, #tpu.memory_space<vmem>>, vector<1x1x8xf32>
    %611 = vector.shape_cast %610 : vector<1x1x8xf32> to vector<1x8xf32>
    %612 = vector.broadcast %611 : vector<1x8xf32> to vector<32x8xf32>
    %613 = arith.addf %609, %612 : vector<32x8xf32>
    %c2_488 = arith.constant 2 : index
    %c0_489 = arith.constant 0 : index
    %c0_490 = arith.constant 0 : index
    %614 = vector.load %arg30[%c2_488, %c0_489, %c0_490] : memref<4x32x8xf32, #tpu.memory_space<vmem>>, vector<1x32x8xf32>
    %615 = vector.shape_cast %614 : vector<1x32x8xf32> to vector<32x8xf32>
    %cst_491 = arith.constant dense<0.000000e+00> : vector<32x8xf32>
    %616 = tpu.matmul %520, %615, %cst_491 {dimension_numbers = #tpu.dot_dimension_numbers<[1], [0], [0], [1], [0, 0, 1, 1], [], []>} : vector<32x32xf32>, vector<32x8xf32>, vector<32x8xf32> -> vector<32x8xf32>
    %c2_492 = arith.constant 2 : index
    %c0_493 = arith.constant 0 : index
    %c0_494 = arith.constant 0 : index
    %617 = vector.load %arg33[%c2_492, %c0_493, %c0_494] : memref<4x1x8xf32, #tpu.memory_space<vmem>>, vector<1x1x8xf32>
    %618 = vector.shape_cast %617 : vector<1x1x8xf32> to vector<1x8xf32>
    %619 = vector.broadcast %618 : vector<1x8xf32> to vector<32x8xf32>
    %620 = arith.addf %616, %619 : vector<32x8xf32>
    %cst_495 = arith.constant dense<0.000000e+00> : vector<32x32xf32>
    %621 = tpu.matmul %606, %613, %cst_495 {dimension_numbers = #tpu.dot_dimension_numbers<[1], [1], [0], [0], [0, 0, 1, 0], [], []>} : vector<32x8xf32>, vector<32x8xf32>, vector<32x32xf32> -> vector<32x32xf32>
    %cst_496 = arith.constant 0.353553385 : f32
    %622 = vector.broadcast %cst_496 : f32 to vector<32x32xf32>
    %623 = arith.mulf %621, %622 : vector<32x32xf32>
    %cst_497 = arith.constant dense<0xFF800000> : vector<32xf32>
    %624 = vector.multi_reduction <maximumf>, %623, %cst_497 [1] : vector<32x32xf32> to vector<32xf32>
    %625 = vector.shape_cast %624 : vector<32xf32> to vector<32x1xf32>
    %626 = vector.broadcast %625 : vector<32x1xf32> to vector<32x32xf32>
    %627 = arith.subf %623, %626 : vector<32x32xf32>
    %628 = math.exp %627 : vector<32x32xf32>
    %cst_498 = arith.constant dense<0.000000e+00> : vector<32xf32>
    %629 = vector.multi_reduction <add>, %628, %cst_498 [1] : vector<32x32xf32> to vector<32xf32>
    %630 = vector.shape_cast %629 : vector<32xf32> to vector<32x1xf32>
    %631 = tpu.reciprocal %630 {approx = true} : vector<32x1xf32> -> vector<32x1xf32>
    %632 = vector.broadcast %631 : vector<32x1xf32> to vector<32x32xf32>
    %633 = arith.mulf %628, %632 : vector<32x32xf32>
    %cst_499 = arith.constant dense<0.000000e+00> : vector<32x8xf32>
    %634 = tpu.matmul %633, %620, %cst_499 {dimension_numbers = #tpu.dot_dimension_numbers<[1], [0], [0], [1], [0, 0, 1, 1], [], []>} : vector<32x32xf32>, vector<32x8xf32>, vector<32x8xf32> -> vector<32x8xf32>
    %c2_500 = arith.constant 2 : index
    %c0_501 = arith.constant 0 : index
    %c0_502 = arith.constant 0 : index
    %635 = vector.load %arg34[%c2_500, %c0_501, %c0_502] : memref<4x8x32xf32, #tpu.memory_space<vmem>>, vector<1x8x32xf32>
    %636 = vector.shape_cast %635 : vector<1x8x32xf32> to vector<8x32xf32>
    %cst_503 = arith.constant dense<0.000000e+00> : vector<32x32xf32>
    %637 = tpu.matmul %634, %636, %cst_503 {dimension_numbers = #tpu.dot_dimension_numbers<[1], [0], [0], [1], [0, 0, 1, 1], [], []>} : vector<32x8xf32>, vector<8x32xf32>, vector<32x32xf32> -> vector<32x32xf32>
    %638 = arith.addf %599, %637 : vector<32x32xf32>
    %c3_504 = arith.constant 3 : index
    %c0_505 = arith.constant 0 : index
    %c0_506 = arith.constant 0 : index
    %639 = vector.load %arg28[%c3_504, %c0_505, %c0_506] : memref<4x32x8xf32, #tpu.memory_space<vmem>>, vector<1x32x8xf32>
    %640 = vector.shape_cast %639 : vector<1x32x8xf32> to vector<32x8xf32>
    %cst_507 = arith.constant dense<0.000000e+00> : vector<32x8xf32>
    %641 = tpu.matmul %522, %640, %cst_507 {dimension_numbers = #tpu.dot_dimension_numbers<[1], [0], [0], [1], [0, 0, 1, 1], [], []>} : vector<32x32xf32>, vector<32x8xf32>, vector<32x8xf32> -> vector<32x8xf32>
    %c3_508 = arith.constant 3 : index
    %c0_509 = arith.constant 0 : index
    %c0_510 = arith.constant 0 : index
    %642 = vector.load %arg31[%c3_508, %c0_509, %c0_510] : memref<4x1x8xf32, #tpu.memory_space<vmem>>, vector<1x1x8xf32>
    %643 = vector.shape_cast %642 : vector<1x1x8xf32> to vector<1x8xf32>
    %644 = vector.broadcast %643 : vector<1x8xf32> to vector<32x8xf32>
    %645 = arith.addf %641, %644 : vector<32x8xf32>
    %c3_511 = arith.constant 3 : index
    %c0_512 = arith.constant 0 : index
    %c0_513 = arith.constant 0 : index
    %646 = vector.load %arg29[%c3_511, %c0_512, %c0_513] : memref<4x32x8xf32, #tpu.memory_space<vmem>>, vector<1x32x8xf32>
    %647 = vector.shape_cast %646 : vector<1x32x8xf32> to vector<32x8xf32>
    %cst_514 = arith.constant dense<0.000000e+00> : vector<32x8xf32>
    %648 = tpu.matmul %520, %647, %cst_514 {dimension_numbers = #tpu.dot_dimension_numbers<[1], [0], [0], [1], [0, 0, 1, 1], [], []>} : vector<32x32xf32>, vector<32x8xf32>, vector<32x8xf32> -> vector<32x8xf32>
    %c3_515 = arith.constant 3 : index
    %c0_516 = arith.constant 0 : index
    %c0_517 = arith.constant 0 : index
    %649 = vector.load %arg32[%c3_515, %c0_516, %c0_517] : memref<4x1x8xf32, #tpu.memory_space<vmem>>, vector<1x1x8xf32>
    %650 = vector.shape_cast %649 : vector<1x1x8xf32> to vector<1x8xf32>
    %651 = vector.broadcast %650 : vector<1x8xf32> to vector<32x8xf32>
    %652 = arith.addf %648, %651 : vector<32x8xf32>
    %c3_518 = arith.constant 3 : index
    %c0_519 = arith.constant 0 : index
    %c0_520 = arith.constant 0 : index
    %653 = vector.load %arg30[%c3_518, %c0_519, %c0_520] : memref<4x32x8xf32, #tpu.memory_space<vmem>>, vector<1x32x8xf32>
    %654 = vector.shape_cast %653 : vector<1x32x8xf32> to vector<32x8xf32>
    %cst_521 = arith.constant dense<0.000000e+00> : vector<32x8xf32>
    %655 = tpu.matmul %520, %654, %cst_521 {dimension_numbers = #tpu.dot_dimension_numbers<[1], [0], [0], [1], [0, 0, 1, 1], [], []>} : vector<32x32xf32>, vector<32x8xf32>, vector<32x8xf32> -> vector<32x8xf32>
    %c3_522 = arith.constant 3 : index
    %c0_523 = arith.constant 0 : index
    %c0_524 = arith.constant 0 : index
    %656 = vector.load %arg33[%c3_522, %c0_523, %c0_524] : memref<4x1x8xf32, #tpu.memory_space<vmem>>, vector<1x1x8xf32>
    %657 = vector.shape_cast %656 : vector<1x1x8xf32> to vector<1x8xf32>
    %658 = vector.broadcast %657 : vector<1x8xf32> to vector<32x8xf32>
    %659 = arith.addf %655, %658 : vector<32x8xf32>
    %cst_525 = arith.constant dense<0.000000e+00> : vector<32x32xf32>
    %660 = tpu.matmul %645, %652, %cst_525 {dimension_numbers = #tpu.dot_dimension_numbers<[1], [1], [0], [0], [0, 0, 1, 0], [], []>} : vector<32x8xf32>, vector<32x8xf32>, vector<32x32xf32> -> vector<32x32xf32>
    %cst_526 = arith.constant 0.353553385 : f32
    %661 = vector.broadcast %cst_526 : f32 to vector<32x32xf32>
    %662 = arith.mulf %660, %661 : vector<32x32xf32>
    %cst_527 = arith.constant dense<0xFF800000> : vector<32xf32>
    %663 = vector.multi_reduction <maximumf>, %662, %cst_527 [1] : vector<32x32xf32> to vector<32xf32>
    %664 = vector.shape_cast %663 : vector<32xf32> to vector<32x1xf32>
    %665 = vector.broadcast %664 : vector<32x1xf32> to vector<32x32xf32>
    %666 = arith.subf %662, %665 : vector<32x32xf32>
    %667 = math.exp %666 : vector<32x32xf32>
    %cst_528 = arith.constant dense<0.000000e+00> : vector<32xf32>
    %668 = vector.multi_reduction <add>, %667, %cst_528 [1] : vector<32x32xf32> to vector<32xf32>
    %669 = vector.shape_cast %668 : vector<32xf32> to vector<32x1xf32>
    %670 = tpu.reciprocal %669 {approx = true} : vector<32x1xf32> -> vector<32x1xf32>
    %671 = vector.broadcast %670 : vector<32x1xf32> to vector<32x32xf32>
    %672 = arith.mulf %667, %671 : vector<32x32xf32>
    %cst_529 = arith.constant dense<0.000000e+00> : vector<32x8xf32>
    %673 = tpu.matmul %672, %659, %cst_529 {dimension_numbers = #tpu.dot_dimension_numbers<[1], [0], [0], [1], [0, 0, 1, 1], [], []>} : vector<32x32xf32>, vector<32x8xf32>, vector<32x8xf32> -> vector<32x8xf32>
    %c3_530 = arith.constant 3 : index
    %c0_531 = arith.constant 0 : index
    %c0_532 = arith.constant 0 : index
    %674 = vector.load %arg34[%c3_530, %c0_531, %c0_532] : memref<4x8x32xf32, #tpu.memory_space<vmem>>, vector<1x8x32xf32>
    %675 = vector.shape_cast %674 : vector<1x8x32xf32> to vector<8x32xf32>
    %cst_533 = arith.constant dense<0.000000e+00> : vector<32x32xf32>
    %676 = tpu.matmul %673, %675, %cst_533 {dimension_numbers = #tpu.dot_dimension_numbers<[1], [0], [0], [1], [0, 0, 1, 1], [], []>} : vector<32x8xf32>, vector<8x32xf32>, vector<32x32xf32> -> vector<32x32xf32>
    %677 = arith.addf %638, %676 : vector<32x32xf32>
    %c0_534 = arith.constant 0 : index
    %c0_535 = arith.constant 0 : index
    %678 = vector.load %arg35[%c0_534, %c0_535] : memref<1x32xf32, #tpu.memory_space<vmem>>, vector<1x32xf32>
    %679 = vector.broadcast %678 : vector<1x32xf32> to vector<32x32xf32>
    %680 = arith.addf %677, %679 : vector<32x32xf32>
    %681 = arith.addf %522, %680 : vector<32x32xf32>
    %c0_536 = arith.constant 0 : index
    %c0_537 = arith.constant 0 : index
    %682 = vector.load %arg36[%c0_536, %c0_537] : memref<1x32xf32, #tpu.memory_space<vmem>>, vector<1x32xf32>
    %c0_538 = arith.constant 0 : index
    %c0_539 = arith.constant 0 : index
    %683 = vector.load %arg37[%c0_538, %c0_539] : memref<1x32xf32, #tpu.memory_space<vmem>>, vector<1x32xf32>
    %cst_540 = arith.constant dense<0.000000e+00> : vector<32xf32>
    %684 = vector.multi_reduction <add>, %681, %cst_540 [1] : vector<32x32xf32> to vector<32xf32>
    %685 = vector.shape_cast %684 : vector<32xf32> to vector<32x1xf32>
    %cst_541 = arith.constant 3.200000e+01 : f32
    %686 = vector.broadcast %cst_541 : f32 to vector<32x1xf32>
    %687 = arith.divf %685, %686 : vector<32x1xf32>
    %688 = vector.broadcast %687 : vector<32x1xf32> to vector<32x32xf32>
    %689 = arith.subf %681, %688 : vector<32x32xf32>
    %690 = arith.mulf %689, %689 : vector<32x32xf32>
    %cst_542 = arith.constant dense<0.000000e+00> : vector<32xf32>
    %691 = vector.multi_reduction <add>, %690, %cst_542 [1] : vector<32x32xf32> to vector<32xf32>
    %692 = vector.shape_cast %691 : vector<32xf32> to vector<32x1xf32>
    %cst_543 = arith.constant 3.200000e+01 : f32
    %693 = vector.broadcast %cst_543 : f32 to vector<32x1xf32>
    %694 = arith.divf %692, %693 : vector<32x1xf32>
    %cst_544 = arith.constant 9.99999974E-6 : f32
    %695 = vector.broadcast %cst_544 : f32 to vector<32x1xf32>
    %696 = arith.addf %694, %695 : vector<32x1xf32>
    %697 = math.rsqrt %696 : vector<32x1xf32>
    %698 = vector.broadcast %697 : vector<32x1xf32> to vector<32x32xf32>
    %699 = arith.mulf %689, %698 : vector<32x32xf32>
    %700 = vector.broadcast %682 : vector<1x32xf32> to vector<32x32xf32>
    %701 = arith.mulf %699, %700 : vector<32x32xf32>
    %702 = vector.broadcast %683 : vector<1x32xf32> to vector<32x32xf32>
    %703 = arith.addf %701, %702 : vector<32x32xf32>
    %c0_545 = arith.constant 0 : index
    %c0_546 = arith.constant 0 : index
    %704 = vector.load %arg38[%c0_545, %c0_546] : memref<32x128xf32, #tpu.memory_space<vmem>>, vector<32x128xf32>
    %cst_547 = arith.constant dense<0.000000e+00> : vector<32x128xf32>
    %705 = tpu.matmul %703, %704, %cst_547 {dimension_numbers = #tpu.dot_dimension_numbers<[1], [0], [0], [1], [0, 0, 1, 1], [], []>} : vector<32x32xf32>, vector<32x128xf32>, vector<32x128xf32> -> vector<32x128xf32>
    %c0_548 = arith.constant 0 : index
    %c0_549 = arith.constant 0 : index
    %706 = vector.load %arg39[%c0_548, %c0_549] : memref<1x128xf32, #tpu.memory_space<vmem>>, vector<1x128xf32>
    %707 = vector.broadcast %706 : vector<1x128xf32> to vector<32x128xf32>
    %708 = arith.addf %705, %707 : vector<32x128xf32>
    %709 = arith.mulf %708, %708 : vector<32x128xf32>
    %710 = arith.mulf %708, %709 : vector<32x128xf32>
    %cst_550 = arith.constant 4.471500e-02 : f32
    %711 = vector.broadcast %cst_550 : f32 to vector<32x128xf32>
    %712 = arith.mulf %711, %710 : vector<32x128xf32>
    %713 = arith.addf %708, %712 : vector<32x128xf32>
    %cst_551 = arith.constant 0.797884583 : f32
    %714 = vector.broadcast %cst_551 : f32 to vector<32x128xf32>
    %715 = arith.mulf %714, %713 : vector<32x128xf32>
    %716 = math.tanh %715 : vector<32x128xf32>
    %cst_552 = arith.constant 1.000000e+00 : f32
    %717 = vector.broadcast %cst_552 : f32 to vector<32x128xf32>
    %718 = arith.addf %717, %716 : vector<32x128xf32>
    %cst_553 = arith.constant 5.000000e-01 : f32
    %719 = vector.broadcast %cst_553 : f32 to vector<32x128xf32>
    %720 = arith.mulf %719, %718 : vector<32x128xf32>
    %721 = arith.mulf %708, %720 : vector<32x128xf32>
    %c0_554 = arith.constant 0 : index
    %c0_555 = arith.constant 0 : index
    %722 = vector.load %arg40[%c0_554, %c0_555] : memref<128x32xf32, #tpu.memory_space<vmem>>, vector<128x32xf32>
    %cst_556 = arith.constant dense<0.000000e+00> : vector<32x32xf32>
    %723 = tpu.matmul %721, %722, %cst_556 {dimension_numbers = #tpu.dot_dimension_numbers<[1], [0], [0], [1], [0, 0, 1, 1], [], []>} : vector<32x128xf32>, vector<128x32xf32>, vector<32x32xf32> -> vector<32x32xf32>
    %724 = arith.addf %703, %723 : vector<32x32xf32>
    %c0_557 = arith.constant 0 : index
    %c0_558 = arith.constant 0 : index
    %725 = vector.load %arg41[%c0_557, %c0_558] : memref<1x32xf32, #tpu.memory_space<vmem>>, vector<1x32xf32>
    %726 = vector.broadcast %725 : vector<1x32xf32> to vector<32x32xf32>
    %727 = arith.addf %724, %726 : vector<32x32xf32>
    %c0_559 = arith.constant 0 : index
    %c0_560 = arith.constant 0 : index
    %728 = vector.load %arg42[%c0_559, %c0_560] : memref<1x32xf32, #tpu.memory_space<vmem>>, vector<1x32xf32>
    %c0_561 = arith.constant 0 : index
    %c0_562 = arith.constant 0 : index
    %729 = vector.load %arg43[%c0_561, %c0_562] : memref<1x32xf32, #tpu.memory_space<vmem>>, vector<1x32xf32>
    %cst_563 = arith.constant dense<0.000000e+00> : vector<32xf32>
    %730 = vector.multi_reduction <add>, %727, %cst_563 [1] : vector<32x32xf32> to vector<32xf32>
    %731 = vector.shape_cast %730 : vector<32xf32> to vector<32x1xf32>
    %cst_564 = arith.constant 3.200000e+01 : f32
    %732 = vector.broadcast %cst_564 : f32 to vector<32x1xf32>
    %733 = arith.divf %731, %732 : vector<32x1xf32>
    %734 = vector.broadcast %733 : vector<32x1xf32> to vector<32x32xf32>
    %735 = arith.subf %727, %734 : vector<32x32xf32>
    %736 = arith.mulf %735, %735 : vector<32x32xf32>
    %cst_565 = arith.constant dense<0.000000e+00> : vector<32xf32>
    %737 = vector.multi_reduction <add>, %736, %cst_565 [1] : vector<32x32xf32> to vector<32xf32>
    %738 = vector.shape_cast %737 : vector<32xf32> to vector<32x1xf32>
    %cst_566 = arith.constant 3.200000e+01 : f32
    %739 = vector.broadcast %cst_566 : f32 to vector<32x1xf32>
    %740 = arith.divf %738, %739 : vector<32x1xf32>
    %cst_567 = arith.constant 9.99999974E-6 : f32
    %741 = vector.broadcast %cst_567 : f32 to vector<32x1xf32>
    %742 = arith.addf %740, %741 : vector<32x1xf32>
    %743 = math.rsqrt %742 : vector<32x1xf32>
    %744 = vector.broadcast %743 : vector<32x1xf32> to vector<32x32xf32>
    %745 = arith.mulf %735, %744 : vector<32x32xf32>
    %746 = vector.broadcast %728 : vector<1x32xf32> to vector<32x32xf32>
    %747 = arith.mulf %745, %746 : vector<32x32xf32>
    %748 = vector.broadcast %729 : vector<1x32xf32> to vector<32x32xf32>
    %749 = arith.addf %747, %748 : vector<32x32xf32>
    %c0_568 = arith.constant 0 : index
    %c0_569 = arith.constant 0 : index
    %750 = vector.load %arg44[%c0_568, %c0_569] : memref<32x128xf32, #tpu.memory_space<vmem>>, vector<32x128xf32>
    %cst_570 = arith.constant dense<0.000000e+00> : vector<32x128xf32>
    %751 = tpu.matmul %749, %750, %cst_570 {dimension_numbers = #tpu.dot_dimension_numbers<[1], [0], [0], [1], [0, 0, 1, 1], [], []>} : vector<32x32xf32>, vector<32x128xf32>, vector<32x128xf32> -> vector<32x128xf32>
    %c0_571 = arith.constant 0 : index
    %c0_572 = arith.constant 0 : index
    %752 = vector.load %arg45[%c0_571, %c0_572] : memref<1x128xf32, #tpu.memory_space<vmem>>, vector<1x128xf32>
    %753 = vector.broadcast %752 : vector<1x128xf32> to vector<32x128xf32>
    %754 = arith.addf %751, %753 : vector<32x128xf32>
    %c0_573 = arith.constant 0 : index
    %c0_574 = arith.constant 0 : index
    %c0_575 = arith.constant 0 : index
    %755 = vector.load %arg46[%c0_573, %c0_574, %c0_575] : memref<1x32x128xf32, #tpu.memory_space<vmem>>, vector<1x32x128xf32>
    %756 = vector.shape_cast %755 : vector<1x32x128xf32> to vector<32x128xf32>
    %757 = vector.shape_cast %754 : vector<32x128xf32> to vector<1x32x128xf32>
    tpu.vector_store %arg46[%c0_573, %c0_574, %c0_575], %757 {strides = array<i32>} : memref<1x32x128xf32, #tpu.memory_space<vmem>>, vector<1x32x128xf32>,
    return
  }
  func.func @transform_0(%arg0: i32) -> (i32, i32, i32) {
    %c0_i32 = arith.constant 0 : i32
    %c0_i32_0 = arith.constant 0 : i32
    %c0_i32_1 = arith.constant 0 : i32
    return %arg0, %c0_i32, %c0_i32_0 : i32, i32, i32
  }
  func.func @transform_1(%arg0: i32) -> (i32, i32) {
    %c0_i32 = arith.constant 0 : i32
    %c0_i32_0 = arith.constant 0 : i32
    %c0_i32_1 = arith.constant 0 : i32
    return %c0_i32, %c0_i32_0 : i32, i32
  }
  func.func @transform_2(%arg0: i32) -> (i32, i32) {
    %c0_i32 = arith.constant 0 : i32
    %c0_i32_0 = arith.constant 0 : i32
    %c0_i32_1 = arith.constant 0 : i32
    return %c0_i32, %c0_i32_0 : i32, i32
  }
  func.func @transform_3(%arg0: i32) -> (i32, i32, i32) {
    %c0_i32 = arith.constant 0 : i32
    %c0_i32_0 = arith.constant 0 : i32
    %c0_i32_1 = arith.constant 0 : i32
    %c0_i32_2 = arith.constant 0 : i32
    return %c0_i32, %c0_i32_0, %c0_i32_1 : i32, i32, i32
  }
  func.func @transform_4(%arg0: i32) -> (i32, i32, i32, i32) {
    %c0_i32 = arith.constant 0 : i32
    %c0_i32_0 = arith.constant 0 : i32
    %c0_i32_1 = arith.constant 0 : i32
    %c0_i32_2 = arith.constant 0 : i32
    %c0_i32_3 = arith.constant 0 : i32
    return %c0_i32, %c0_i32_0, %c0_i32_1, %c0_i32_2 : i32, i32, i32, i32
  }
  func.func @transform_5(%arg0: i32) -> (i32, i32, i32, i32) {
    %c0_i32 = arith.constant 0 : i32
    %c0_i32_0 = arith.constant 0 : i32
    %c0_i32_1 = arith.constant 0 : i32
    %c0_i32_2 = arith.constant 0 : i32
    %c0_i32_3 = arith.constant 0 : i32
    return %c0_i32, %c0_i32_0, %c0_i32_1, %c0_i32_2 : i32, i32, i32, i32
  }
  func.func @transform_6(%arg0: i32) -> (i32, i32, i32, i32) {
    %c0_i32 = arith.constant 0 : i32
    %c0_i32_0 = arith.constant 0 : i32
    %c0_i32_1 = arith.constant 0 : i32
    %c0_i32_2 = arith.constant 0 : i32
    %c0_i32_3 = arith.constant 0 : i32
    return %c0_i32, %c0_i32_0, %c0_i32_1, %c0_i32_2 : i32, i32, i32, i32
  }
  func.func @transform_7(%arg0: i32) -> (i32, i32, i32, i32) {
    %c0_i32 = arith.constant 0 : i32
    %c0_i32_0 = arith.constant 0 : i32
    %c0_i32_1 = arith.constant 0 : i32
    %c0_i32_2 = arith.constant 0 : i32
    %c0_i32_3 = arith.constant 0 : i32
    return %c0_i32, %c0_i32_0, %c0_i32_1, %c0_i32_2 : i32, i32, i32, i32
  }
  func.func @transform_8(%arg0: i32) -> (i32, i32, i32, i32) {
    %c0_i32 = arith.constant 0 : i32
    %c0_i32_0 = arith.constant 0 : i32
    %c0_i32_1 = arith.constant 0 : i32
    %c0_i32_2 = arith.constant 0 : i32
    %c0_i32_3 = arith.constant 0 : i32
    return %c0_i32, %c0_i32_0, %c0_i32_1, %c0_i32_2 : i32, i32, i32, i32
  }
  func.func @transform_9(%arg0: i32) -> (i32, i32, i32, i32) {
    %c0_i32 = arith.constant 0 : i32
    %c0_i32_0 = arith.constant 0 : i32
    %c0_i32_1 = arith.constant 0 : i32
    %c0_i32_2 = arith.constant 0 : i32
    %c0_i32_3 = arith.constant 0 : i32
    return %c0_i32, %c0_i32_0, %c0_i32_1, %c0_i32_2 : i32, i32, i32, i32
  }
  func.func @transform_10(%arg0: i32) -> (i32, i32, i32, i32) {
    %c0_i32 = arith.constant 0 : i32
    %c0_i32_0 = arith.constant 0 : i32
    %c0_i32_1 = arith.constant 0 : i32
    %c0_i32_2 = arith.constant 0 : i32
    %c0_i32_3 = arith.constant 0 : i32
    return %c0_i32, %c0_i32_0, %c0_i32_1, %c0_i32_2 : i32, i32, i32, i32
  }
  func.func @transform_11(%arg0: i32) -> (i32, i32, i32) {
    %c0_i32 = arith.constant 0 : i32
    %c0_i32_0 = arith.constant 0 : i32
    %c0_i32_1 = arith.constant 0 : i32
    %c0_i32_2 = arith.constant 0 : i32
    return %c0_i32, %c0_i32_0, %c0_i32_1 : i32, i32, i32
  }
  func.func @transform_12(%arg0: i32) -> (i32, i32, i32) {
    %c0_i32 = arith.constant 0 : i32
    %c0_i32_0 = arith.constant 0 : i32
    %c0_i32_1 = arith.constant 0 : i32
    %c0_i32_2 = arith.constant 0 : i32
    return %c0_i32, %c0_i32_0, %c0_i32_1 : i32, i32, i32
  }
  func.func @transform_13(%arg0: i32) -> (i32, i32, i32) {
    %c0_i32 = arith.constant 0 : i32
    %c0_i32_0 = arith.constant 0 : i32
    %c0_i32_1 = arith.constant 0 : i32
    %c0_i32_2 = arith.constant 0 : i32
    return %c0_i32, %c0_i32_0, %c0_i32_1 : i32, i32, i32
  }
  func.func @transform_14(%arg0: i32) -> (i32, i32, i32) {
    %c0_i32 = arith.constant 0 : i32
    %c0_i32_0 = arith.constant 0 : i32
    %c0_i32_1 = arith.constant 0 : i32
    %c0_i32_2 = arith.constant 0 : i32
    return %c0_i32, %c0_i32_0, %c0_i32_1 : i32, i32, i32
  }
  func.func @transform_15(%arg0: i32) -> (i32, i32, i32) {
    %c0_i32 = arith.constant 0 : i32
    %c0_i32_0 = arith.constant 0 : i32
    %c0_i32_1 = arith.constant 0 : i32
    %c0_i32_2 = arith.constant 0 : i32
    return %c0_i32, %c0_i32_0, %c0_i32_1 : i32, i32, i32
  }
  func.func @transform_16(%arg0: i32) -> (i32, i32, i32) {
    %c0_i32 = arith.constant 0 : i32
    %c0_i32_0 = arith.constant 0 : i32
    %c0_i32_1 = arith.constant 0 : i32
    %c0_i32_2 = arith.constant 0 : i32
    return %c0_i32, %c0_i32_0, %c0_i32_1 : i32, i32, i32
  }
  func.func @transform_17(%arg0: i32) -> (i32, i32, i32) {
    %c0_i32 = arith.constant 0 : i32
    %c0_i32_0 = arith.constant 0 : i32
    %c0_i32_1 = arith.constant 0 : i32
    %c0_i32_2 = arith.constant 0 : i32
    return %c0_i32, %c0_i32_0, %c0_i32_1 : i32, i32, i32
  }
  func.func @transform_18(%arg0: i32) -> (i32, i32, i32) {
    %c0_i32 = arith.constant 0 : i32
    %c0_i32_0 = arith.constant 0 : i32
    %c0_i32_1 = arith.constant 0 : i32
    %c0_i32_2 = arith.constant 0 : i32
    return %c0_i32, %c0_i32_0, %c0_i32_1 : i32, i32, i32
  }
  func.func @transform_19(%arg0: i32) -> (i32, i32, i32) {
    %c0_i32 = arith.constant 0 : i32
    %c0_i32_0 = arith.constant 0 : i32
    %c0_i32_1 = arith.constant 0 : i32
    %c0_i32_2 = arith.constant 0 : i32
    return %c0_i32, %c0_i32_0, %c0_i32_1 : i32, i32, i32
  }
  func.func @transform_20(%arg0: i32) -> (i32, i32) {
    %c0_i32 = arith.constant 0 : i32
    %c0_i32_0 = arith.constant 0 : i32
    %c0_i32_1 = arith.constant 0 : i32
    return %c0_i32, %c0_i32_0 : i32, i32
  }
  func.func @transform_21(%arg0: i32) -> (i32, i32) {
    %c0_i32 = arith.constant 0 : i32
    %c0_i32_0 = arith.constant 0 : i32
    %c0_i32_1 = arith.constant 0 : i32
    return %c0_i32, %c0_i32_0 : i32, i32
  }
  func.func @transform_22(%arg0: i32) -> (i32, i32) {
    %c0_i32 = arith.constant 0 : i32
    %c0_i32_0 = arith.constant 0 : i32
    %c0_i32_1 = arith.constant 0 : i32
    return %c0_i32, %c0_i32_0 : i32, i32
  }
  func.func @transform_23(%arg0: i32) -> (i32, i32) {
    %c0_i32 = arith.constant 0 : i32
    %c0_i32_0 = arith.constant 0 : i32
    %c0_i32_1 = arith.constant 0 : i32
    return %c0_i32, %c0_i32_0 : i32, i32
  }
  func.func @transform_24(%arg0: i32) -> (i32, i32) {
    %c0_i32 = arith.constant 0 : i32
    %c0_i32_0 = arith.constant 0 : i32
    %c0_i32_1 = arith.constant 0 : i32
    return %c0_i32, %c0_i32_0 : i32, i32
  }
  func.func @transform_25(%arg0: i32) -> (i32, i32) {
    %c0_i32 = arith.constant 0 : i32
    %c0_i32_0 = arith.constant 0 : i32
    %c0_i32_1 = arith.constant 0 : i32
    return %c0_i32, %c0_i32_0 : i32, i32
  }
  func.func @transform_26(%arg0: i32) -> (i32, i32, i32) {
    %c0_i32 = arith.constant 0 : i32
    %c0_i32_0 = arith.constant 0 : i32
    %c0_i32_1 = arith.constant 0 : i32
    %c0_i32_2 = arith.constant 0 : i32
    return %c0_i32, %c0_i32_0, %c0_i32_1 : i32, i32, i32
  }
  func.func @transform_27(%arg0: i32) -> (i32, i32, i32) {
    %c0_i32 = arith.constant 0 : i32
    %c0_i32_0 = arith.constant 0 : i32
    %c0_i32_1 = arith.constant 0 : i32
    %c0_i32_2 = arith.constant 0 : i32
    return %c0_i32, %c0_i32_0, %c0_i32_1 : i32, i32, i32
  }
  func.func @transform_28(%arg0: i32) -> (i32, i32, i32) {
    %c0_i32 = arith.constant 0 : i32
    %c0_i32_0 = arith.constant 0 : i32
    %c0_i32_1 = arith.constant 0 : i32
    %c0_i32_2 = arith.constant 0 : i32
    return %c0_i32, %c0_i32_0, %c0_i32_1 : i32, i32, i32
  }
  func.func @transform_29(%arg0: i32) -> (i32, i32, i32) {
    %c0_i32 = arith.constant 0 : i32
    %c0_i32_0 = arith.constant 0 : i32
    %c0_i32_1 = arith.constant 0 : i32
    %c0_i32_2 = arith.constant 0 : i32
    return %c0_i32, %c0_i32_0, %c0_i32_1 : i32, i32, i32
  }
  func.func @transform_30(%arg0: i32) -> (i32, i32, i32) {
    %c0_i32 = arith.constant 0 : i32
    %c0_i32_0 = arith.constant 0 : i32
    %c0_i32_1 = arith.constant 0 : i32
    %c0_i32_2 = arith.constant 0 : i32
    return %c0_i32, %c0_i32_0, %c0_i32_1 : i32, i32, i32
  }
  func.func @transform_31(%arg0: i32) -> (i32, i32, i32) {
    %c0_i32 = arith.constant 0 : i32
    %c0_i32_0 = arith.constant 0 : i32
    %c0_i32_1 = arith.constant 0 : i32
    %c0_i32_2 = arith.constant 0 : i32
    return %c0_i32, %c0_i32_0, %c0_i32_1 : i32, i32, i32
  }
  func.func @transform_32(%arg0: i32) -> (i32, i32, i32) {
    %c0_i32 = arith.constant 0 : i32
    %c0_i32_0 = arith.constant 0 : i32
    %c0_i32_1 = arith.constant 0 : i32
    %c0_i32_2 = arith.constant 0 : i32
    return %c0_i32, %c0_i32_0, %c0_i32_1 : i32, i32, i32
  }
  func.func @transform_33(%arg0: i32) -> (i32, i32, i32) {
    %c0_i32 = arith.constant 0 : i32
    %c0_i32_0 = arith.constant 0 : i32
    %c0_i32_1 = arith.constant 0 : i32
    %c0_i32_2 = arith.constant 0 : i32
    return %c0_i32, %c0_i32_0, %c0_i32_1 : i32, i32, i32
  }
  func.func @transform_34(%arg0: i32) -> (i32, i32) {
    %c0_i32 = arith.constant 0 : i32
    %c0_i32_0 = arith.constant 0 : i32
    %c0_i32_1 = arith.constant 0 : i32
    return %c0_i32, %c0_i32_0 : i32, i32
  }
  func.func @transform_35(%arg0: i32) -> (i32, i32) {
    %c0_i32 = arith.constant 0 : i32
    %c0_i32_0 = arith.constant 0 : i32
    %c0_i32_1 = arith.constant 0 : i32
    return %c0_i32, %c0_i32_0 : i32, i32
  }
  func.func @transform_36(%arg0: i32) -> (i32, i32) {
    %c0_i32 = arith.constant 0 : i32
    %c0_i32_0 = arith.constant 0 : i32
    %c0_i32_1 = arith.constant 0 : i32
    return %c0_i32, %c0_i32_0 : i32, i32
  }
  func.func @transform_37(%arg0: i32) -> (i32, i32) {
    %c0_i32 = arith.constant 0 : i32
    %c0_i32_0 = arith.constant 0 : i32
    %c0_i32_1 = arith.constant 0 : i32
    return %c0_i32, %c0_i32_0 : i32, i32
  }
  func.func @transform_38(%arg0: i32) -> (i32, i32) {
    %c0_i32 = arith.constant 0 : i32
    %c0_i32_0 = arith.constant 0 : i32
    %c0_i32_1 = arith.constant 0 : i32
    return %c0_i32, %c0_i32_0 : i32, i32
  }
  func.func @transform_39(%arg0: i32) -> (i32, i32) {
    %c0_i32 = arith.constant 0 : i32
    %c0_i32_0 = arith.constant 0 : i32
    %c0_i32_1 = arith.constant 0 : i32
    return %c0_i32, %c0_i32_0 : i32, i32
  }
  func.func @transform_40(%arg0: i32) -> (i32, i32) {
    %c0_i32 = arith.constant 0 : i32
    %c0_i32_0 = arith.constant 0 : i32
    %c0_i32_1 = arith.constant 0 : i32
    return %c0_i32, %c0_i32_0 : i32, i32
  }
  func.func @transform_41(%arg0: i32) -> (i32, i32) {
    %c0_i32 = arith.constant 0 : i32
    %c0_i32_0 = arith.constant 0 : i32
    %c0_i32_1 = arith.constant 0 : i32
    return %c0_i32, %c0_i32_0 : i32, i32
  }
  func.func @transform_42(%arg0: i32) -> (i32, i32) {
    %c0_i32 = arith.constant 0 : i32
    %c0_i32_0 = arith.constant 0 : i32
    %c0_i32_1 = arith.constant 0 : i32
    return %c0_i32, %c0_i32_0 : i32, i32
  }
  func.func @transform_43(%arg0: i32) -> (i32, i32) {
    %c0_i32 = arith.constant 0 : i32
    %c0_i32_0 = arith.constant 0 : i32
    %c0_i32_1 = arith.constant 0 : i32
    return %c0_i32, %c0_i32_0 : i32, i32
  }
  func.func @transform_44(%arg0: i32) -> (i32, i32) {
    %c0_i32 = arith.constant 0 : i32
    %c0_i32_0 = arith.constant 0 : i32
    %c0_i32_1 = arith.constant 0 : i32
    return %c0_i32, %c0_i32_0 : i32, i32
  }
  func.func @transform_45(%arg0: i32) -> (i32, i32, i32) {
    %c0_i32 = arith.constant 0 : i32
    %c0_i32_0 = arith.constant 0 : i32
    %c0_i32_1 = arith.constant 0 : i32
    return %arg0, %c0_i32, %c0_i32_0 : i32, i32, i32
  }
}

</mosaic_0001>

<bundles_post_ra>
// kernel: finder_forward.2
= control target key start
LH: loop header
LB: loop body
LE: loop exit
PB: predicated region body
PF: predicated region fallthrough
CT: control target
= control target key end

     0   :  { %s640_s12 = smov 0   ;;  %s877_s0 = inlined_call_operand.vmem [shape: f32[2,128,27], index: 0, kind: input, shape index: {}]   ;;  %s878_s1 = inlined_call_operand.vmem [shape: f32[27,16], index: 1, kind: input, shape index: {}]   ;;  %s879_s2 = inlined_call_operand.vmem [shape: f32[1,16], index: 2, kind: input, shape index: {}]   ;;  %s880_s3 = inlined_call_operand.vmem [shape: f32[2,128,16], index: 3, kind: output, shape index: {}]  }
   0x1 LB: > { %s529_s13 = sadd.s32 4294967295, %s618_s12   ;;  %p533_p0 = scmp.ge.s32.totalorder %s618_s12, 1  ;;  %s618_s12 = sphi %s640_s12, %s13_s12  }
   0x2   : > { %p137_p1 = scmp.lt.s32.totalorder %s618_s12, 3 }
   0x4   : > { %p138_p2 = pnand %p533_p0, %p137_p1 }
   0x5   : > { %p161_p3 = scmp.lt.s32.totalorder (!%p138_p2), %s529_s13, 1 }
   0x6   : > { %141 = sbr.rel (%p138_p2) target bundleno = 206 (0xce), region = 32 }
   0xb   : > { %v190_v0 = vld [vmem:[%s878_s1 + $0x18] sm:$0x7]  ;;  %vm244_vm0 = vcmask 1042432   ;;  %v189_v1 = vld [vmem:[%s878_s1 + $0x10] sm:$0xff]  ;;  %v188_v2 = vld [vmem:[%s878_s1 + $0x8] sm:$0xff]  ;;  %s882_s13 = smov (!%p161_p3, %s529_s13), 1 }
   0xc   : > { %538 = vmatpush.msk.msra.mxu0 %vm244_vm0, %v190_v0  ;;  %559 = vmatpush.msk.msra.mxu1 %vm244_vm0, %v190_v0  ;;  %v187_v3 = vld [vmem:[%s878_s1] sm:$0xff]  ;;  %s557_s22 = sshll.u32 %s882_s13, 7  ;;  %vm195_vm1 = vcmask 220160   ;;  %vm457_vm2 = vcmask 130048  }
   0xd   : > { %560 = vmatpush.msk.msra.mxu2 %vm244_vm0, %v190_v0  ;;  %561 = vmatpush.msk.msra.mxu3 %vm244_vm0, %v190_v0  ;;  %s668_s25 = scalar_lea.vmem %s877_s0, %s557_s22  ;;  %v705_v20 = vld [vmem:[%s879_s2] ss:$0 sm:$0xff]  ;;  %s778_s30 = scalar_lea.vmem %s880_s3, %s557_s22 }
   0xe   : > { %261 = vmatpush.msra.mxu0 %v189_v1  ;;  %562 = vmatpush.msra.mxu1 %v189_v1  ;;  %v171_v4 = vld [vmem:[%s668_s25] sm:$0xff]  ;;  %v172_v8 = vld [vmem:[%s668_s25 + $0x8] sm:$0xff]  ;;  %v173_v12 = vld [vmem:[%s668_s25 + $0x10] sm:$0xff] }
   0xf   : > { %563 = vmatpush.msra.mxu2 %v189_v1  ;;  %564 = vmatpush.msra.mxu3 %v189_v1  ;;  %v175_v5 = vld [vmem:[%s668_s25 + $0x20] sm:$0xff]  ;;  %v176_v9 = vld [vmem:[%s668_s25 + $0x28] sm:$0xff]  ;;  %v177_v13 = vld [vmem:[%s668_s25 + $0x30] sm:$0xff] }
  0x10   : > { %262 = vmatpush.msra.mxu0 %v188_v2  ;;  %565 = vmatpush.msra.mxu1 %v188_v2  ;;  %v179_v6 = vld [vmem:[%s668_s25 + $0x40] sm:$0xff]  ;;  %v180_v10 = vld [vmem:[%s668_s25 + $0x48] sm:$0xff]  ;;  %v181_v14 = vld [vmem:[%s668_s25 + $0x50] sm:$0xff] }
  0x11   : > { %566 = vmatpush.msra.mxu2 %v188_v2  ;;  %567 = vmatpush.msra.mxu3 %v188_v2  ;;  %v183_v7 = vld [vmem:[%s668_s25 + $0x60] sm:$0xff]  ;;  %v184_v11 = vld [vmem:[%s668_s25 + $0x68] sm:$0xff]  ;;  %v185_v15 = vld [vmem:[%s668_s25 + $0x70] sm:$0xff] }
  0x12   : > { %263 = vmatpush.msra.mxu0 %v187_v3  ;;  %568 = vmatpush.msra.mxu1 %v187_v3  ;;  %v174_v16 = vld [vmem:[%s668_s25 + $0x18] sm:$0xff] }
  0x13   : > { %569 = vmatpush.msra.mxu2 %v187_v3  ;;  %570 = vmatpush.msra.mxu3 %v187_v3  ;;  %v178_v17 = vld [vmem:[%s668_s25 + $0x38] sm:$0xff] }
  0x14   : > { %539 = vmatmul.msk.f32.vlgmr.msra.gmra.mxu0 %vm195_vm1, %v171_v4  ;;  %543 = vmatmul.msk.f32.vlgmr.msra.gmra.mxu1 %vm195_vm1, %v175_v5  ;;  %v182_v18 = vld [vmem:[%s668_s25 + $0x58] sm:$0xff] }
  0x15   : > { %547 = vmatmul.msk.f32.vlgmr.msra.gmra.mxu2 %vm195_vm1, %v179_v6  ;;  %551 = vmatmul.msk.f32.vlgmr.msra.gmra.mxu3 %vm195_vm1, %v183_v7  ;;  %v186_v19 = vld [vmem:[%s668_s25 + $0x78] sm:$0xff] }
  0x1c   : > { %540 = vmatmul.msk.f32.gmra.mxu0 %vm195_vm1, %v172_v8  ;;  %544 = vmatmul.msk.f32.gmra.mxu1 %vm195_vm1, %v176_v9 }
  0x1d   : > { %548 = vmatmul.msk.f32.gmra.mxu2 %vm195_vm1, %v180_v10  ;;  %552 = vmatmul.msk.f32.gmra.mxu3 %vm195_vm1, %v184_v11 }
  0x24   : > { %541 = vmatmul.msk.f32.gmra.mxu0 %vm195_vm1, %v173_v12  ;;  %545 = vmatmul.msk.f32.gmra.mxu1 %vm195_vm1, %v177_v13 }
  0x25   : > { %549 = vmatmul.msk.f32.gmra.mxu2 %vm195_vm1, %v181_v14  ;;  %553 = vmatmul.msk.f32.gmra.mxu3 %vm195_vm1, %v185_v15 }
  0x2c   : > { %542 = vmatmul.msk.f32.gmra.mxu0 %vm195_vm1, %v174_v16  ;;  %546 = vmatmul.msk.f32.gmra.mxu1 %vm195_vm1, %v178_v17 }
  0x2d   : > { %550 = vmatmul.msk.f32.gmra.mxu2 %vm195_vm1, %v182_v18  ;;  %554 = vmatmul.msk.f32.gmra.mxu3 %vm195_vm1, %v186_v19 }
  0x91   : > { %v265_v21 = vpop.f32.mrf.mxu0  ;;  %v277_v22 = vpop.f32.mrf.mxu1 }
  0x92   : > { %v708_v23 = vadd.f32 %v705_v20, %v265_v21  ;;  %v711_v24 = vadd.f32 %v705_v20, %v277_v22 }
  0x94   : > { %v313_v25 = vmul.f32 %v708_v23, %v708_v23  ;;  %v317_v26 = vmul.f32 %v711_v24, %v711_v24 }
  0x96   : > { %v329_v27 = vmul.f32 %v313_v25, %v708_v23  ;;  %v333_v28 = vmul.f32 %v317_v26, %v711_v24 }
  0x98   : > { %v345_v29 = vmul.f32 0.044715, %v329_v27  ;;  %v349_v30 = vmul.f32 0.044715, %v333_v28  ;;  %v289_v31 = vpop.f32.mrf.mxu2  ;;  %v301_v32 = vpop.f32.mrf.mxu3 }
  0x99   : > { %v720_v33 = vadd.f32 %v705_v20, %v289_v31  ;;  %v723_v34 = vadd.f32 %v705_v20, %v301_v32  ;;  %v268_v35 = vpop.f32.mrf.mxu0  ;;  %v280_v36 = vpop.f32.mrf.mxu1 }
  0x9a   : > { %v361_v37 = vadd.f32 %v345_v29, %v708_v23  ;;  %v365_v38 = vadd.f32 %v349_v30, %v711_v24  ;;  %v728_v39 = vadd.f32 %v705_v20, %v268_v35  ;;  %v731_v40 = vadd.f32 %v705_v20, %v280_v36 }
  0x9b   : > { %v321_v41 = vmul.f32 %v720_v33, %v720_v33  ;;  %v325_v42 = vmul.f32 %v723_v34, %v723_v34 }
  0x9c   : > { %v377_v43 = vmul.f32 0.7978846, %v361_v37  ;;  %v381_v44 = vmul.f32 0.7978846, %v365_v38  ;;  %v314_v45 = vmul.f32 %v728_v39, %v728_v39  ;;  %v318_v46 = vmul.f32 %v731_v40, %v731_v40 }
  0x9d   : > { %v337_v47 = vmul.f32 %v321_v41, %v720_v33  ;;  %v341_v48 = vmul.f32 %v325_v42, %v723_v34 }
  0x9e   : > { %580 = vtanh.f32 %v377_v43  ;;  %v330_v49 = vmul.f32 %v314_v45, %v728_v39  ;;  %v334_v50 = vmul.f32 %v318_v46, %v731_v40 }
  0x9f   : > { %582 = vtanh.f32 %v381_v44  ;;  %v353_v51 = vmul.f32 0.044715, %v337_v47  ;;  %v357_v52 = vmul.f32 0.044715, %v341_v48 }
  0xa0   : > { %v346_v53 = vmul.f32 0.044715, %v330_v49  ;;  %v350_v54 = vmul.f32 0.044715, %v334_v50  ;;  %v292_v55 = vpop.f32.mrf.mxu2  ;;  %v304_v56 = vpop.f32.mrf.mxu3 }
  0xa1   : > { %v369_v57 = vadd.f32 %v353_v51, %v720_v33  ;;  %v373_v58 = vadd.f32 %v357_v52, %v723_v34  ;;  %v748_v59 = vadd.f32 %v705_v20, %v292_v55  ;;  %v751_v60 = vadd.f32 %v705_v20, %v304_v56  ;;  %v271_v61 = vpop.f32.mrf.mxu0  ;;  %v283_v62 = vpop.f32.mrf.mxu1 }
  0xa2   : > { %v362_v63 = vadd.f32 %v346_v53, %v728_v39  ;;  %v366_v0 = vadd.f32 %v350_v54, %v731_v40  ;;  %v756_v1 = vadd.f32 %v705_v20, %v271_v61  ;;  %v759_v2 = vadd.f32 %v705_v20, %v283_v62 }
  0xa3   : > { %v385_v3 = vmul.f32 0.7978846, %v369_v57  ;;  %v389_v4 = vmul.f32 0.7978846, %v373_v58  ;;  %v322_v5 = vmul.f32 %v748_v59, %v748_v59  ;;  %v326_v6 = vmul.f32 %v751_v60, %v751_v60 }
  0xa4   : > { %v581_v7 = vpop.eup %580  ;;  %v378_v8 = vmul.f32 0.7978846, %v362_v63  ;;  %v382_v9 = vmul.f32 0.7978846, %v366_v0  ;;  %v315_v10 = vmul.f32 %v756_v1, %v756_v1  ;;  %v319_v11 = vmul.f32 %v759_v2, %v759_v2 }
  0xa5   : > { %v583_v12 = vpop.eup %582  ;;  %v409_v13 = vadd.f32 1.0, %v581_v7  ;;  %584 = vtanh.f32 %v385_v3  ;;  %v338_v14 = vmul.f32 %v322_v5, %v748_v59  ;;  %v342_v15 = vmul.f32 %v326_v6, %v751_v60 }
  0xa6   : > { %v413_v16 = vadd.f32 1.0, %v583_v12  ;;  %586 = vtanh.f32 %v389_v4  ;;  %v331_v17 = vmul.f32 %v315_v10, %v756_v1  ;;  %v335_v18 = vmul.f32 %v319_v11, %v759_v2 }
  0xa7   : > { %v425_v19 = vmul.f32 0.5, %v409_v13  ;;  %588 = vtanh.f32 %v378_v8  ;;  %v354_v21 = vmul.f32 0.044715, %v338_v14  ;;  %v358_v22 = vmul.f32 0.044715, %v342_v15 }
  0xa8   : > { %v429_v25 = vmul.f32 0.5, %v413_v16  ;;  %590 = vtanh.f32 %v382_v9  ;;  %v347_v26 = vmul.f32 0.044715, %v331_v17  ;;  %v351_v27 = vmul.f32 0.044715, %v335_v18  ;;  %v295_v28 = vpop.f32.mrf.mxu2  ;;  %v307_v29 = vpop.f32.mrf.mxu3 }
  0xa9   : > { %v441_v30 = vmul.f32 %v425_v19, %v708_v23  ;;  %v370_v31 = vadd.f32 %v354_v21, %v748_v59  ;;  %v374_v32 = vadd.f32 %v358_v22, %v751_v60  ;;  %v784_v35 = vadd.f32 %v705_v20, %v295_v28  ;;  %v274_v36 = vpop.f32.mrf.mxu0  ;;  %v286_v0 = vpop.f32.mrf.mxu1 }
  0xaa   : > { %v445_v37 = vmul.f32 %v429_v25, %v711_v24  ;;  %v363_v38 = vadd.f32 %v347_v26, %v756_v1  ;;  %v367_v41 = vadd.f32 %v351_v27, %v759_v2  ;;  %v790_v42 = vadd.f32 %v705_v20, %v307_v29 }
  0xab   : > { %v585_v43 = vpop.eup %584  ;;  %458 = vst.msk [vmem:[%s778_s30] sm:$0xff] %vm457_vm2, %v441_v30  ;;  %v386_v23 = vmul.f32 0.7978846, %v370_v31  ;;  %v390_v44 = vmul.f32 0.7978846, %v374_v32  ;;  %v323_v45 = vmul.f32 %v784_v35, %v784_v35  ;;  %v797_v46 = vadd.f32 %v705_v20, %v274_v36 }
  0xac   : > { %v587_v47 = vpop.eup %586  ;;  %462 = vst.msk [vmem:[%s778_s30 + $0x20] sm:$0xff] %vm457_vm2, %v445_v37  ;;  %v417_v24 = vadd.f32 1.0, %v585_v43  ;;  %v379_v48 = vmul.f32 0.7978846, %v363_v38  ;;  %v383_v49 = vmul.f32 0.7978846, %v367_v41  ;;  %v327_v50 = vmul.f32 %v790_v42, %v790_v42 }
  0xad   : > { %v589_v51 = vpop.eup %588  ;;  %v421_v52 = vadd.f32 1.0, %v587_v47  ;;  %592 = vtanh.f32 %v386_v23  ;;  %v339_v53 = vmul.f32 %v323_v45, %v784_v35  ;;  %v316_v54 = vmul.f32 %v797_v46, %v797_v46 }
  0xae   : > { %v591_v55 = vpop.eup %590  ;;  %v433_v56 = vmul.f32 0.5, %v417_v24  ;;  %v410_v57 = vadd.f32 1.0, %v589_v51  ;;  %594 = vtanh.f32 %v390_v44  ;;  %v343_v58 = vmul.f32 %v327_v50, %v790_v42 }
  0xaf   : > { %v437_v61 = vmul.f32 0.5, %v421_v52  ;;  %v414_v62 = vadd.f32 1.0, %v591_v55  ;;  %596 = vtanh.f32 %v379_v48  ;;  %v355_v63 = vmul.f32 0.044715, %v339_v53 }
  0xb0   : > { %v449_v3 = vmul.f32 %v433_v56, %v720_v33  ;;  %v426_v4 = vmul.f32 0.5, %v410_v57  ;;  %598 = vtanh.f32 %v383_v49  ;;  %v359_v5 = vmul.f32 0.044715, %v343_v58  ;;  %v298_v6 = vpop.f32.mrf.mxu2  ;;  %v310_v7 = vpop.f32.mrf.mxu3 }
  0xb1   : > { %v453_v8 = vmul.f32 %v437_v61, %v723_v34  ;;  %v430_v9 = vmul.f32 0.5, %v414_v62  ;;  %v371_v10 = vadd.f32 %v355_v63, %v784_v35  ;;  %v332_v11 = vmul.f32 %v316_v54, %v797_v46 }
  0xb2   : > { %466 = vst.msk [vmem:[%s778_s30 + $0x40] sm:$0xff] %vm457_vm2, %v449_v3  ;;  %v442_v12 = vmul.f32 %v426_v4, %v728_v39  ;;  %v375_v33 = vadd.f32 %v359_v5, %v790_v42  ;;  %v816_v13 = vadd.f32 %v705_v20, %v286_v0  ;;  %v819_v14 = vadd.f32 %v705_v20, %v298_v6 }
  0xb3   : > { %v593_v34 = vpop.eup %592  ;;  %470 = vst.msk [vmem:[%s778_s30 + $0x60] sm:$0xff] %vm457_vm2, %v453_v8  ;;  %v446_v15 = vmul.f32 %v430_v9, %v731_v40  ;;  %v387_v16 = vmul.f32 0.7978846, %v371_v10  ;;  %v348_v17 = vmul.f32 0.044715, %v332_v11  ;;  %v825_v18 = vadd.f32 %v705_v20, %v310_v7 }
  0xb4   : > { %v595_v39 = vpop.eup %594  ;;  %459 = vst.msk [vmem:[%s778_s30 + $0x8] sm:$0xff] %vm457_vm2, %v442_v12  ;;  %v418_v19 = vadd.f32 1.0, %v593_v34  ;;  %v391_v21 = vmul.f32 0.7978846, %v375_v33  ;;  %v320_v22 = vmul.f32 %v816_v13, %v816_v13  ;;  %v324_v25 = vmul.f32 %v819_v14, %v819_v14 }
  0xb5   : > { %v597_v26 = vpop.eup %596  ;;  %463 = vst.msk [vmem:[%s778_s30 + $0x28] sm:$0xff] %vm457_vm2, %v446_v15  ;;  %v422_v40 = vadd.f32 1.0, %v595_v39  ;;  %600 = vtanh.f32 %v387_v16  ;;  %v364_v27 = vadd.f32 %v348_v17, %v797_v46  ;;  %v328_v20 = vmul.f32 %v825_v18, %v825_v18 }
  0xb6   : > { %v599_v28 = vpop.eup %598  ;;  %v434_v29 = vmul.f32 0.5, %v418_v19  ;;  %v411_v30 = vadd.f32 1.0, %v597_v26  ;;  %602 = vtanh.f32 %v391_v21  ;;  %v336_v31 = vmul.f32 %v320_v22, %v816_v13 }
  0xb7   : > { %v438_v32 = vmul.f32 0.5, %v422_v40  ;;  %v415_v36 = vadd.f32 1.0, %v599_v28  ;;  %v380_v37 = vmul.f32 0.7978846, %v364_v27  ;;  %v340_v38 = vmul.f32 %v324_v25, %v819_v14 }
  0xb8   : > { %v450_v41 = vmul.f32 %v434_v29, %v748_v59  ;;  %v427_v43 = vmul.f32 0.5, %v411_v30  ;;  %v352_v23 = vmul.f32 0.044715, %v336_v31  ;;  %v344_v44 = vmul.f32 %v328_v20, %v825_v18 }
  0xb9   : > { %v454_v45 = vmul.f32 %v438_v32, %v751_v60  ;;  %v431_v47 = vmul.f32 0.5, %v415_v36  ;;  %604 = vtanh.f32 %v380_v37  ;;  %v356_v24 = vmul.f32 0.044715, %v340_v38 }
  0xba   : > { %467 = vst.msk [vmem:[%s778_s30 + $0x48] sm:$0xff] %vm457_vm2, %v450_v41  ;;  %v443_v48 = vmul.f32 %v427_v43, %v756_v1  ;;  %v368_v49 = vadd.f32 %v352_v23, %v816_v13  ;;  %v360_v50 = vmul.f32 0.044715, %v344_v44 }
  0xbb   : > { %v601_v51 = vpop.eup %600  ;;  %471 = vst.msk [vmem:[%s778_s30 + $0x68] sm:$0xff] %vm457_vm2, %v454_v45  ;;  %v447_v59 = vmul.f32 %v431_v47, %v759_v2  ;;  %v372_v52 = vadd.f32 %v356_v24, %v819_v14 }
  0xbc   : > { %v603_v53 = vpop.eup %602  ;;  %460 = vst.msk [vmem:[%s778_s30 + $0x10] sm:$0xff] %vm457_vm2, %v443_v48  ;;  %v419_v60 = vadd.f32 1.0, %v601_v51  ;;  %v384_v54 = vmul.f32 0.7978846, %v368_v49  ;;  %v376_v55 = vadd.f32 %v360_v50, %v825_v18 }
  0xbd   : > { %464 = vst.msk [vmem:[%s778_s30 + $0x30] sm:$0xff] %vm457_vm2, %v447_v59  ;;  %v423_v1 = vadd.f32 1.0, %v603_v53  ;;  %v388_v56 = vmul.f32 0.7978846, %v372_v52 }
  0xbe   : > { %v435_v57 = vmul.f32 0.5, %v419_v60  ;;  %606 = vtanh.f32 %v384_v54  ;;  %v392_v58 = vmul.f32 0.7978846, %v376_v55 }
  0xbf   : > { %v605_v2 = vpop.eup %604  ;;  %v439_v61 = vmul.f32 0.5, %v423_v1  ;;  %608 = vtanh.f32 %v388_v56 }
  0xc0   : > { %v451_v62 = vmul.f32 %v435_v57, %v784_v35  ;;  %v412_v63 = vadd.f32 1.0, %v605_v2  ;;  %610 = vtanh.f32 %v392_v58 }
  0xc1   : > { %v455_v0 = vmul.f32 %v439_v61, %v790_v42 }
  0xc2   : > { %468 = vst.msk [vmem:[%s778_s30 + $0x50] sm:$0xff] %vm457_vm2, %v451_v62  ;;  %v428_v3 = vmul.f32 0.5, %v412_v63 }
  0xc3   : > { %472 = vst.msk [vmem:[%s778_s30 + $0x70] sm:$0xff] %vm457_vm2, %v455_v0 }
  0xc4   : > { %v607_v4 = vpop.eup %606  ;;  %v444_v5 = vmul.f32 %v428_v3, %v797_v46 }
  0xc5   : > { %v609_v6 = vpop.eup %608  ;;  %v416_v7 = vadd.f32 1.0, %v607_v4 }
  0xc6   : > { %v611_v8 = vpop.eup %610  ;;  %461 = vst.msk [vmem:[%s778_s30 + $0x18] sm:$0xff] %vm457_vm2, %v444_v5  ;;  %v420_v35 = vadd.f32 1.0, %v609_v6 }
  0xc7   : > { %v432_v9 = vmul.f32 0.5, %v416_v7  ;;  %v424_v10 = vadd.f32 1.0, %v611_v8 }
  0xc8   : > { %v436_v42 = vmul.f32 0.5, %v420_v35 }
  0xc9   : > { %v448_v11 = vmul.f32 %v432_v9, %v816_v13  ;;  %v440_v12 = vmul.f32 0.5, %v424_v10 }
  0xca   : > { %v452_v33 = vmul.f32 %v436_v42, %v819_v14 }
  0xcb   : > { %465 = vst.msk [vmem:[%s778_s30 + $0x38] sm:$0xff] %vm457_vm2, %v448_v11  ;;  %v456_v34 = vmul.f32 %v440_v12, %v825_v18 }
  0xcc   : > { %469 = vst.msk [vmem:[%s778_s30 + $0x58] sm:$0xff] %vm457_vm2, %v452_v33 }
  0xcd   : > { %473 = vst.msk [vmem:[%s778_s30 + $0x78] sm:$0xff] %vm457_vm2, %v456_v34 }
  0xce PF: > { %s13_s12 = sadd.s32 1, %s618_s12  }
  0xcf   : > { %p10_p4 = scmp.ge.s32.totalorder %s13_s12, 4  }
  0xd1   :  { %12 = sbr.rel (!%p10_p4) target bundleno = 1 (0x1), region = 62 }

// kernel: finder_forward.3
= control target key start
LH: loop header
LB: loop body
LE: loop exit
PB: predicated region body
PF: predicated region fallthrough
CT: control target
= control target key end

     0   :  { %s7672_s6 = smov 1   ;;  %s7673_s10 = smov 2   ;;  %s9332_s0 = inlined_call_operand.smem [shape: u32[46], index: -1, kind: input, shape index: {}] }
   0x1   :  { %s7727_s5 = sld [smem:[%s9332_s0]]   ;;  %s7674_s14 = smov 3  }
   0x2   :  { %s7732_s9 = sld [smem:[%s9332_s0 + %s7672_s6]]   ;;  %s7675_s18 = smov 4  }
   0x3   :  { %s7737_s13 = sld [smem:[%s9332_s0 + %s7673_s10]]   ;;  %s7676_s22 = smov 5  }
   0x4   :  { %s7742_s17 = sld [smem:[%s9332_s0 + %s7674_s14]]   ;;  %s7677_s26 = smov 6  }
   0x5   :  { %s7747_s21 = sld [smem:[%s9332_s0 + %s7675_s18]]   ;;  %s7678_s30 = smov 7  }
   0x6   :  { %s7752_s25 = sld [smem:[%s9332_s0 + %s7676_s22]]   ;;  %s7679_s4 = smov 8  }
   0x7   :  { %9361 = sst [smem:[#allocation2_spill]] %s7727_s5  ;;  %s7680_s10 = smov 9  }
   0x8   :  { %9362 = sst [smem:[#allocation3_spill]] %s7732_s9  ;;  %s7681_s15 = smov 10  }
   0x9   :  { %s7757_s29 = sld [smem:[%s9332_s0 + %s7677_s26]]   ;;  %s7682_s20 = smov 11  }
   0xa   :  { %s7762_s3 = sld [smem:[%s9332_s0 + %s7678_s30]]   ;;  %s7683_s26 = smov 12  }
   0xb   :  { %s7767_s8 = sld [smem:[%s9332_s0 + %s7679_s4]]   ;;  %s7684_s1 = smov 13  }
   0xc   :  { %s7772_s14 = sld [smem:[%s9332_s0 + %s7680_s10]]   ;;  %s7685_s7 = smov 14  }
   0xd   :  { %s7777_s19 = sld [smem:[%s9332_s0 + %s7681_s15]]   ;;  %s7686_s15 = smov 15  }
   0xe   :  { %s7782_s24 = sld [smem:[%s9332_s0 + %s7682_s20]]   ;;  %s7687_s22 = smov 16  }
   0xf   :  { %s7787_s30 = sld [smem:[%s9332_s0 + %s7683_s26]]   ;;  %s7688_s28 = smov 17  }
  0x10   :  { %9363 = sst [smem:[#allocation4_spill]] %s7762_s3 }
  0x11   :  { %9364 = sst [smem:[#allocation5_spill]] %s7767_s8 }
  0x12   :  { %s7792_s6 = sld [smem:[%s9332_s0 + %s7684_s1]]  }
  0x13   :  { %s7797_s12 = sld [smem:[%s9332_s0 + %s7685_s7]]   ;;  %s7689_s7 = smov 18  }
  0x14   :  { %s7802_s20 = sld [smem:[%s9332_s0 + %s7686_s15]]   ;;  %s7690_s15 = smov 19  }
  0x15   :  { %s7807_s27 = sld [smem:[%s9332_s0 + %s7687_s22]]   ;;  %s7691_s22 = smov 20  }
  0x16   :  { %s7812_s4 = sld [smem:[%s9332_s0 + %s7688_s28]]   ;;  %s7692_s28 = smov 21  }
  0x18   :  { %9365 = sst [smem:[#allocation6_spill]] %s7792_s6 }
  0x19   :  { %s7817_s6 = sld [smem:[%s9332_s0 + %s7689_s7]]   ;;  %s7693_s7 = smov 22  }
  0x1a   :  { %9366 = sst [smem:[#allocation7_spill]] %s7802_s20 }
  0x1b   :  { %9367 = sst [smem:[#allocation8_spill]] %s7807_s27 }
  0x1c   :  { %9368 = sst [smem:[#allocation9_spill]] %s7812_s4 }
  0x1d   :  { %s7822_s20 = sld [smem:[%s9332_s0 + %s7690_s15]]   ;;  %s7694_s15 = smov 23  }
  0x1e   :  { %s7827_s27 = sld [smem:[%s9332_s0 + %s7691_s22]]   ;;  %s7695_s22 = smov 24  }
  0x1f   :  { %9369 = sst [smem:[#allocation10_spill]] %s7817_s6 }
  0x20   :  { %s7832_s4 = sld [smem:[%s9332_s0 + %s7692_s28]]   ;;  %s7696_s28 = smov 25  }
  0x21   :  { %s7837_s6 = sld [smem:[%s9332_s0 + %s7693_s7]]   ;;  %s7697_s7 = smov 26  }
  0x23   :  { %9370 = sst [smem:[#allocation11_spill]] %s7822_s20 }
  0x24   :  { %9371 = sst [smem:[#allocation12_spill]] %s7827_s27 }
  0x25   :  { %s7842_s20 = sld [smem:[%s9332_s0 + %s7694_s15]]   ;;  %s7698_s15 = smov 27  }
  0x26   :  { %9372 = sst [smem:[#allocation13_spill]] %s7832_s4 }
  0x27   :  { %9373 = sst [smem:[#allocation14_spill]] %s7837_s6 }
  0x28   :  { %s7847_s27 = sld [smem:[%s9332_s0 + %s7695_s22]]   ;;  %s7699_s22 = smov 28  }
  0x29   :  { %s7852_s4 = sld [smem:[%s9332_s0 + %s7696_s28]]   ;;  %s7700_s28 = smov 29  }
  0x2a   :  { %s7857_s6 = sld [smem:[%s9332_s0 + %s7697_s7]]   ;;  %s7701_s7 = smov 30  }
  0x2b   :  { %9374 = sst [smem:[#allocation15_spill]] %s7842_s20 }
  0x2c   :  { %s7862_s20 = sld [smem:[%s9332_s0 + %s7698_s15]]   ;;  %s7702_s15 = smov 31  }
  0x2e   :  { %9375 = sst [smem:[#allocation16_spill]] %s7847_s27 }
  0x2f   :  { %9376 = sst [smem:[#allocation17_spill]] %s7852_s4 }
  0x30   :  { %9377 = sst [smem:[#allocation18_spill]] %s7857_s6 }
  0x31   :  { %s7867_s27 = sld [smem:[%s9332_s0 + %s7699_s22]]   ;;  %s7703_s22 = smov 32  }
  0x32   :  { %9378 = sst [smem:[#allocation19_spill]] %s7862_s20 }
  0x33   :  { %s7872_s4 = sld [smem:[%s9332_s0 + %s7700_s28]]   ;;  %s7704_s28 = smov 33  }
  0x34   :  { %s7877_s6 = sld [smem:[%s9332_s0 + %s7701_s7]]   ;;  %s7705_s7 = smov 34  }
  0x35   :  { %s7882_s20 = sld [smem:[%s9332_s0 + %s7702_s15]]   ;;  %s7706_s15 = smov 35  }
  0x37   :  { %9379 = sst [smem:[#allocation20_spill]] %s7867_s27 }
  0x38   :  { %s7887_s27 = sld [smem:[%s9332_s0 + %s7703_s22]]   ;;  %s7707_s22 = smov 36  }
  0x39   :  { %9380 = sst [smem:[#allocation21_spill]] %s7872_s4 }
  0x3a   :  { %9381 = sst [smem:[#allocation22_spill]] %s7877_s6 }
  0x3b   :  { %9382 = sst [smem:[#allocation23_spill]] %s7882_s20 }
  0x3c   :  { %s7892_s4 = sld [smem:[%s9332_s0 + %s7704_s28]]   ;;  %s7708_s28 = smov 37  }
  0x3d   :  { %s7897_s6 = sld [smem:[%s9332_s0 + %s7705_s7]]   ;;  %s7709_s7 = smov 38  }
  0x3e   :  { %9383 = sst [smem:[#allocation24_spill]] %s7887_s27 }
  0x3f   :  { %s7902_s20 = sld [smem:[%s9332_s0 + %s7706_s15]]   ;;  %s7710_s15 = smov 39  }
  0x40   :  { %s7907_s27 = sld [smem:[%s9332_s0 + %s7707_s22]]   ;;  %s7711_s22 = smov 40  }
  0x42   :  { %9384 = sst [smem:[#allocation25_spill]] %s7892_s4 }
  0x43   :  { %9385 = sst [smem:[#allocation26_spill]] %s7897_s6 }
  0x44   :  { %s7912_s4 = sld [smem:[%s9332_s0 + %s7708_s28]]   ;;  %s7712_s28 = smov 41  }
  0x45   :  { %9386 = sst [smem:[#allocation27_spill]] %s7902_s20 }
  0x46   :  { %9387 = sst [smem:[#allocation28_spill]] %s7907_s27 }
  0x47   :  { %s7917_s6 = sld [smem:[%s9332_s0 + %s7709_s7]]   ;;  %s7713_s7 = smov 42  }
  0x48   :  { %s7922_s20 = sld [smem:[%s9332_s0 + %s7710_s15]]   ;;  %s7714_s15 = smov 43  }
  0x49   :  { %s7927_s27 = sld [smem:[%s9332_s0 + %s7711_s22]]   ;;  %s7715_s22 = smov 44  }
  0x4a   :  { %9388 = sst [smem:[#allocation29_spill]] %s7912_s4 }
  0x4b   :  { %s7932_s4 = sld [smem:[%s9332_s0 + %s7712_s28]]   ;;  %s7716_s28 = smov 45  }
  0x4d   :  { %9389 = sst [smem:[#allocation30_spill]] %s7917_s6 }
  0x4e   :  { %9390 = sst [smem:[#allocation31_spill]] %s7922_s20 }
  0x4f   :  { %9391 = sst [smem:[#allocation32_spill]] %s7927_s27 }
  0x50   :  { %s7937_s6 = sld [smem:[%s9332_s0 + %s7713_s7]]   ;;  %s7954_s7 = smov 0  }
  0x51   :  { %9392 = sst [smem:[#allocation33_spill]] %s7932_s4 }
  0x52   :  { %s7942_s20 = sld [smem:[%s9332_s0 + %s7714_s15]]  }
  0x53   :  { %s7947_s27 = sld [smem:[%s9332_s0 + %s7715_s22]]  }
  0x54   :  { %s7952_s4 = sld [smem:[%s9332_s0 + %s7716_s28]]  }
  0x55 LB: > { %s9393_s9 = sld [smem:[#allocation3_spill]]  ;;  %s6679_s10 = sadd.s32 4294967295, %s7670_s7   ;;  %s7670_s7 = sphi %s7954_s7, %s101_s7  }
  0x56   : > { %s9394_s8 = sld [smem:[#allocation5_spill]]  ;;  %p6683_p0 = scmp.ge.s32.totalorder %s7670_s7, 1 }
  0x57   : > { %s9395_s3 = sld [smem:[#allocation4_spill]]  ;;  %p1233_p1 = scmp.lt.s32.totalorder %s7670_s7, 3 }
  0x59   : > { %p1234_p2 = pnand %p6683_p0, %p1233_p1 }
  0x5a   : > { %s9396_s5 = sld [smem:[#allocation2_spill]] (!%p1234_p2)  ;;  %p1341_p3 = scmp.lt.s32.totalorder (!%p1234_p2), %s6679_s10, 1 }
  0x5b   : > { %1237 = sbr.rel (%p1234_p2) target bundleno = 10717 (0x29dd), region = 200  ;;  %s9397_s15 = sld [smem:[#allocation8_spill]] (!%p1234_p2) }
  0x5c   : > { %s9398_s16 = sld [smem:[#allocation6_spill]] (!%p1234_p2) }
  0x5d   : > { %s9399_s18 = sld [smem:[#allocation7_spill]] (!%p1234_p2) }
  0x5e   : > { %s9400_s22 = sld [smem:[#allocation9_spill]] (!%p1234_p2) }
  0x5f   : > { %s9401_s23 = sld [smem:[#allocation10_spill]] (!%p1234_p2) }
  0x60   : > { %v1374_v0 = vld [vmem:[%s9393_s9 + $0x78] sm:$0xff]  ;;  %v1373_v1 = vld [vmem:[%s9393_s9 + $0x70] sm:$0xff]  ;;  %v1372_v2 = vld [vmem:[%s9393_s9 + $0x68] sm:$0xff]  ;;  %s9426_s10 = smov (!%p1341_p3, %s6679_s10), 1  ;;  %vm1381_vm0 = vcmask 130048   ;;  %vm1504_vm1 = vcmask 261120  }
  0x61   : > { %1394 = vmatpush.msra.mxu0 %v1374_v0  ;;  %v1371_v3 = vld [vmem:[%s9393_s9 + $0x60] sm:$0xff]  ;;  %s7246_s0 = sshll.u32 %s9426_s10, 6  ;;  %v1376_v4 = vld [vmem:[%s9393_s9 + $0x88] sm:$0xff]  ;;  %v1370_v6 = vld [vmem:[%s9393_s9 + $0x58] sm:$0xff]  ;;  %vm1620_vm2 = vcmask 64512   ;;  %s9402_s26 = sld [smem:[#allocation11_spill]] }
  0x62   : > { %s7971_s11 = scalar_lea.vmem %s9396_s5, %s7246_s0  ;;  %v1375_v5 = vld [vmem:[%s9393_s9 + $0x80] sm:$0xff]  ;;  %1437 = vmatpush.msra.mxu1 %v1376_v4  ;;  %v1369_v8 = vld [vmem:[%s9393_s9 + $0x50] sm:$0xff]  ;;  %v1368_v9 = vld [vmem:[%s9393_s9 + $0x48] sm:$0xff]  ;;  %s9403_s28 = sld [smem:[#allocation12_spill]] }
  0x63   : > { %1395 = vmatpush.msra.mxu0 %v1373_v1  ;;  %v1352_v7 = vld [vmem:[%s7971_s11 + $0x8] sm:$0xff]  ;;  %v1367_v10 = vld [vmem:[%s9393_s9 + $0x40] sm:$0xff]  ;;  %v1366_v11 = vld [vmem:[%s9393_s9 + $0x38] sm:$0xff]  ;;  %s9404_s1 = sld [smem:[#allocation13_spill]] }
  0x64   : > { %1438 = vmatpush.msra.mxu1 %v1375_v5  ;;  %v1354_v12 = vld [vmem:[%s7971_s11 + $0x18] sm:$0xff]  ;;  %v1365_v13 = vld [vmem:[%s9393_s9 + $0x30] sm:$0xff]  ;;  %v1364_v14 = vld [vmem:[%s9393_s9 + $0x28] sm:$0xff]  ;;  %s9405_s2 = sld [smem:[#allocation14_spill]] }
  0x65   : > { %1396 = vmatpush.msra.mxu0 %v1372_v2  ;;  %6688 = vmatmul.msk.f32.vlgmr.msra.gmra.mxu1 %vm1381_vm0, %v1352_v7  ;;  %v1363_v15 = vld [vmem:[%s9393_s9 + $0x20] sm:$0xff]  ;;  %v1362_v16 = vld [vmem:[%s9393_s9 + $0x18] sm:$0xff]  ;;  %v1356_v17 = vld [vmem:[%s7971_s11 + $0x28] sm:$0xff]  ;;  %s9406_s0 = sld [smem:[#allocation15_spill]] }
  0x66   : > { %v1361_v18 = vld [vmem:[%s9393_s9 + $0x10] sm:$0xff]  ;;  %v1360_v19 = vld [vmem:[%s9393_s9 + $0x8] sm:$0xff]  ;;  %v1359_v20 = vld [vmem:[%s9393_s9] sm:$0xff]  ;;  %s9414_s5 = sld [smem:[#allocation24_spill]] }
  0x67   : > { %1397 = vmatpush.msra.mxu0 %v1371_v3  ;;  %v1351_v21 = vld [vmem:[%s7971_s11] sm:$0xff]  ;;  %v1358_v22 = vld [vmem:[%s7971_s11 + $0x38] sm:$0xff]  ;;  %v1353_v23 = vld [vmem:[%s7971_s11 + $0x10] sm:$0xff]  ;;  %s9416_s9 = sld [smem:[#allocation25_spill]] }
  0x68   : > { %v1355_v24 = vld [vmem:[%s7971_s11 + $0x20] sm:$0xff]  ;;  %v1357_v25 = vld [vmem:[%s7971_s11 + $0x30] sm:$0xff]  ;;  %v1499_v26 = vld [vmem:[%s7747_s21 + $0x18] sm:$0xff]  ;;  %s9407_s11 = sld [smem:[#allocation16_spill]] }
  0x69   : > { %1398 = vmatpush.msra.mxu0 %v1370_v6  ;;  %v1549_v27 = vld [vmem:[%s7752_s25 + $0x18] sm:$0xff]  ;;  %1529 = vmatpush.msra.mxu2 %v1499_v26  ;;  %v1498_v29 = vld [vmem:[%s7747_s21 + $0x10] sm:$0xff]  ;;  %v1497_v33 = vld [vmem:[%s7747_s21 + $0x8] sm:$0xff] }
  0x6a   : > { %v1586_v28 = vld [vmem:[%s7757_s29 + $0x18] sm:$0xff]  ;;  %v1548_v30 = vld [vmem:[%s7752_s25 + $0x10] sm:$0xff]  ;;  %7248 = vmatpush.msra.mxu3 %v1549_v27  ;;  %v1547_v34 = vld [vmem:[%s7752_s25 + $0x8] sm:$0xff] }
  0x6b   : > { %1399 = vmatpush.msra.mxu0 %v1369_v8  ;;  %1603 = vmatpush.msrb.mxu1 %v1586_v28  ;;  %v1585_v31 = vld [vmem:[%s7757_s29 + $0x10] sm:$0xff]  ;;  %v1584_v35 = vld [vmem:[%s7757_s29 + $0x8] sm:$0xff]  ;;  %v1496_v36 = vld [vmem:[%s7747_s21] sm:$0xff] }
  0x6c   : > { %1530 = vmatpush.msra.mxu2 %v1498_v29  ;;  %7249 = vmatpush.msra.mxu3 %v1548_v30  ;;  %v1546_v37 = vld [vmem:[%s7752_s25] sm:$0xff]  ;;  %v6719_v40 = vld [vmem:[%s7747_s21 + $0x38] sm:$0xff]  ;;  %v6718_v43 = vld [vmem:[%s7747_s21 + $0x30] sm:$0xff] }
  0x6d   : > { %1400 = vmatpush.msra.mxu0 %v1368_v9  ;;  %6689 = vmatmul.msk.f32.gmra.mxu1 %vm1381_vm0, %v1354_v12  ;;  %v1583_v38 = vld [vmem:[%s7757_s29] sm:$0xff]  ;;  %v6717_v45 = vld [vmem:[%s7747_s21 + $0x28] sm:$0xff]  ;;  %v6728_v5 = vld [vmem:[%s7752_s25 + $0x38] sm:$0xff] }
  0x6e   : > { %1604 = vmatpush.msrb.mxu1 %v1585_v31  ;;  %1531 = vmatpush.msra.mxu2 %v1497_v33  ;;  %v7310_v39 = vld [vmem:[%s7737_s13] ss:$0 sm:$0xff]  ;;  %v6727_v6 = vld [vmem:[%s7752_s25 + $0x30] sm:$0xff] }
  0x6f   : > { %1401 = vmatpush.msra.mxu0 %v1367_v10  ;;  %7250 = vmatpush.msra.mxu3 %v1547_v34  ;;  %v6716_v48 = vld [vmem:[%s7747_s21 + $0x20] sm:$0xff] }
  0x70   : > { %1605 = vmatpush.msrb.mxu1 %v1584_v35  ;;  %1532 = vmatpush.msra.mxu2 %v1496_v36  ;;  %v1488_v10 = vld [vmem:[%s7742_s17] sm:$0xff] }
  0x71   : > { %1402 = vmatpush.msra.mxu0 %v1366_v11  ;;  %7251 = vmatpush.msra.mxu3 %v1546_v37 }
  0x72   : > { %1606 = vmatpush.msrb.mxu1 %v1583_v38 }
  0x73   : > { %1403 = vmatpush.msra.mxu0 %v1365_v13  ;;  %v6726_v13 = vld [vmem:[%s7752_s25 + $0x28] sm:$0xff] }
  0x74   : > { %1825 = vmatpush.msra.mxu1 %v6728_v5  ;;  %v6735_v5 = vld [vmem:[%s7757_s29 + $0x28] sm:$0xff] }
  0x75   : > { %1404 = vmatpush.msra.mxu0 %v1364_v14  ;;  %6690 = vmatmul.msk.f32.gmra.mxu1 %vm1381_vm0, %v1356_v17 }
  0x76   : > { %1826 = vmatpush.msra.mxu1 %v6727_v6 }
  0x77   : > { %1405 = vmatpush.msra.mxu0 %v1363_v15 }
  0x78   : > { %1827 = vmatpush.msra.mxu1 %v6726_v13 }
  0x79   : > { %1406 = vmatpush.msra.mxu0 %v1362_v16 }
  0x7b   : > { %1407 = vmatpush.msra.mxu0 %v1361_v18 }
  0x7d   : > { %1408 = vmatpush.msra.mxu0 %v1360_v19  ;;  %6691 = vmatmul.msk.f32.gmra.mxu1 %vm1381_vm0, %v1358_v22 }
  0x7f   : > { %1409 = vmatpush.msra.mxu0 %v1359_v20 }
  0x80   : > { %1410 = vmatmul.f32.vlgmr.msra.gmra.mxu0 %v1351_v21  ;;  %v6725_v21 = vld [vmem:[%s7752_s25 + $0x20] sm:$0xff] }
  0x81   : > { %1566 = vmatpush.msrb.mxu0 %v1549_v27  ;;  %1828 = vmatpush.msra.mxu1 %v6725_v21 }
  0x83   : > { %1567 = vmatpush.msrb.mxu0 %v1548_v30 }
  0x85   : > { %1568 = vmatpush.msrb.mxu0 %v1547_v34  ;;  %v1490_v34 = vld [vmem:[%s7742_s17 + $0x10] sm:$0xff] }
  0x87   : > { %1569 = vmatpush.msrb.mxu0 %v1546_v37 }
  0x88   : > { %1413 = vmatmul.f32.gmra.mxu0 %v1353_v23 }
  0x89   : > { %1786 = vmatpush.msra.mxu0 %v6719_v40  ;;  %v1491_v40 = vld [vmem:[%s7742_s17 + $0x18] sm:$0xff] }
  0x8b   : > { %1787 = vmatpush.msra.mxu0 %v6718_v43 }
  0x8d   : > { %1788 = vmatpush.msra.mxu0 %v6717_v45 }
  0x8f   : > { %1789 = vmatpush.msra.mxu0 %v6716_v48  ;;  %v7314_v48 = vld [vmem:[%s7772_s14] ss:$0 sm:$0xff] }
  0x90   : > { %1416 = vmatmul.f32.gmra.mxu0 %v1355_v24 }
  0x98   : > { %1419 = vmatmul.f32.gmra.mxu0 %v1357_v25  ;;  %v1489_v25 = vld [vmem:[%s7742_s17 + $0x8] sm:$0xff] }
  0xe2   : > { %v1440_v32 = vpop.f32.mrf.mxu1 }
  0xea   : > { %v1443_v46 = vpop.f32.mrf.mxu1 }
  0xf2   : > { %v1446_v57 = vpop.f32.mrf.mxu1 }
  0xfa   : > { %v1449_v9 = vpop.f32.mrf.mxu1 }
  0xfd   : > { %v1411_v41 = vpop.f32.mrf.mxu0 }
  0xfe   : > { %v1412_v42 = vadd.f32 %v7310_v39, %v1411_v41 }
 0x100   : > { %v1441_v44 = vadd.f32 %v1440_v32, %v1412_v42 }
 0x102   : > { %v1452_v47 = vmul.f32 %v1441_v44, %v1441_v44 }
 0x104   : > { %v1456_v49 = vmul.f32 %v1452_v47, %v1441_v44 }
 0x105   : > { %v1414_v50 = vpop.f32.mrf.mxu0 }
 0x106   : > { %v1460_v51 = vmul.f32 0.044715, %v1456_v49  ;;  %v1415_v52 = vadd.f32 %v7310_v39, %v1414_v50 }
 0x108   : > { %v1464_v53 = vadd.f32 %v1460_v51, %v1441_v44  ;;  %v1444_v54 = vadd.f32 %v1443_v46, %v1415_v52  ;;  %v7311_v52 = vld [vmem:[%s9394_s8] ss:$0 sm:$0xff] }
 0x10a   : > { %v1468_v55 = vmul.f32 0.7978846, %v1464_v53  ;;  %v1453_v56 = vmul.f32 %v1444_v54, %v1444_v54 }
 0x10c   : > { %7370 = vtanh.f32 %v1468_v55  ;;  %v1457_v58 = vmul.f32 %v1453_v56, %v1444_v54 }
 0x10d   : > { %v1417_v59 = vpop.f32.mrf.mxu0 }
 0x10e   : > { %v1461_v60 = vmul.f32 0.044715, %v1457_v58  ;;  %v1418_v61 = vadd.f32 %v7310_v39, %v1417_v59 }
 0x110   : > { %v1465_v62 = vadd.f32 %v1461_v60, %v1444_v54  ;;  %v1447_v63 = vadd.f32 %v1446_v57, %v1418_v61 }
 0x112   : > { %v7371_v0 = vpop.eup %7370  ;;  %v1469_v1 = vmul.f32 0.7978846, %v1465_v62  ;;  %v1454_v2 = vmul.f32 %v1447_v63, %v1447_v63 }
 0x113   : > { %v1476_v3 = vadd.f32 1.0, %v7371_v0 }
 0x114   : > { %7372 = vtanh.f32 %v1469_v1  ;;  %v1458_v4 = vmul.f32 %v1454_v2, %v1447_v63  ;;  %v6737_v1 = vld [vmem:[%s7757_s29 + $0x38] sm:$0xff] }
 0x115   : > { %v1480_v7 = vmul.f32 0.5, %v1476_v3  ;;  %v1420_v8 = vpop.f32.mrf.mxu0  ;;  %v6736_v3 = vld [vmem:[%s7757_s29 + $0x30] sm:$0xff] }
 0x116   : > { %v1462_v11 = vmul.f32 0.044715, %v1458_v4  ;;  %v1421_v12 = vadd.f32 %v7310_v39, %v1420_v8 }
 0x117   : > { %v1484_v14 = vmul.f32 %v1480_v7, %v1441_v44  ;;  %v6734_v7 = vld [vmem:[%s7757_s29 + $0x20] sm:$0xff] }
 0x118   : > { %v1466_v15 = vadd.f32 %v1462_v11, %v1447_v63  ;;  %v1450_v16 = vadd.f32 %v1449_v9, %v1421_v12  ;;  %v7315_v9 = vld [vmem:[%s9394_s8 + $0x1] ss:$0 sm:$0xff] }
 0x119   : > { %v8019_v17 = vadd.f32 %v1488_v10, %v1484_v14 }
 0x11a   : > { %v7373_v18 = vpop.eup %7372  ;;  %v1470_v19 = vmul.f32 0.7978846, %v1466_v15  ;;  %v1455_v20 = vmul.f32 %v1450_v16, %v1450_v16 }
 0x11b   : > { %v1477_v22 = vadd.f32 1.0, %v7373_v18  ;;  %6692 = vmatmul.msk.f32.vlgmr.msra.gmra.mxu2 %vm1504_vm1, %v8019_v17  ;;  %6696 = vmatmul.msk.f32.vlgmr.msrb.gmra.mxu0 %vm1504_vm1, %v8019_v17 }
 0x11c   : > { %7374 = vtanh.f32 %v1470_v19  ;;  %v1459_v23 = vmul.f32 %v1455_v20, %v1450_v16  ;;  %6700 = vmatmul.msk.f32.vlgmr.msrb.gmra.mxu1 %vm1504_vm1, %v8019_v17 }
 0x11d   : > { %v1481_v24 = vmul.f32 0.5, %v1477_v22 }
 0x11e   : > { %v1463_v26 = vmul.f32 0.044715, %v1459_v23 }
 0x11f   : > { %v1485_v27 = vmul.f32 %v1481_v24, %v1444_v54 }
 0x120   : > { %v1467_v28 = vadd.f32 %v1463_v26, %v1450_v16 }
 0x121   : > { %v8029_v29 = vadd.f32 %v1489_v25, %v1485_v27 }
 0x122   : > { %v7375_v30 = vpop.eup %7374  ;;  %v1471_v31 = vmul.f32 0.7978846, %v1467_v28 }
 0x123   : > { %v1478_v32 = vadd.f32 1.0, %v7375_v30  ;;  %6693 = vmatmul.msk.f32.gmra.mxu2 %vm1504_vm1, %v8029_v29  ;;  %6697 = vmatmul.msk.f32.vlgmr.msra.gmra.mxu3 %vm1504_vm1, %v8029_v29 }
 0x124   : > { %7376 = vtanh.f32 %v1471_v31  ;;  %6701 = vmatmul.msk.f32.gmra.mxu1 %vm1504_vm1, %v8029_v29  ;;  %6721 = vmatmul.msk.f32.vlgmr.msra.gmra.mxu0 %vm1504_vm1, %v8019_v17 }
 0x125   : > { %v1482_v33 = vmul.f32 0.5, %v1478_v32 }
 0x127   : > { %v1486_v35 = vmul.f32 %v1482_v33, %v1447_v63  ;;  %v7312_v63 = vld [vmem:[%s9395_s3] ss:$0 sm:$0xff] }
 0x129   : > { %v8040_v36 = vadd.f32 %v1490_v34, %v1486_v35 }
 0x12a   : > { %v7377_v37 = vpop.eup %7376 }
 0x12b   : > { %v1479_v38 = vadd.f32 1.0, %v7377_v37  ;;  %6694 = vmatmul.msk.f32.gmra.mxu2 %vm1504_vm1, %v8040_v36  ;;  %6698 = vmatmul.msk.f32.gmra.mxu3 %vm1504_vm1, %v8040_v36  ;;  %v7316_v37 = vld [vmem:[%s7772_s14 + $0x1] ss:$0 sm:$0xff] }
 0x12c   : > { %6702 = vmatmul.msk.f32.gmra.mxu1 %vm1504_vm1, %v8040_v36  ;;  %6722 = vmatmul.msk.f32.gmra.mxu0 %vm1504_vm1, %v8029_v29 }
 0x12d   : > { %v1483_v39 = vmul.f32 0.5, %v1479_v38 }
 0x12f   : > { %v1487_v41 = vmul.f32 %v1483_v39, %v1450_v16 }
 0x131   : > { %v8051_v42 = vadd.f32 %v1491_v40, %v1487_v41 }
 0x133   : > { %6695 = vmatmul.msk.f32.gmra.mxu2 %vm1504_vm1, %v8051_v42  ;;  %6699 = vmatmul.msk.f32.gmra.mxu3 %vm1504_vm1, %v8051_v42 }
 0x134   : > { %6703 = vmatmul.msk.f32.gmra.mxu1 %vm1504_vm1, %v8051_v42  ;;  %6723 = vmatmul.msk.f32.gmra.mxu0 %vm1504_vm1, %v8040_v36 }
 0x13c   : > { %6724 = vmatmul.msk.f32.gmra.mxu0 %vm1504_vm1, %v8051_v42  ;;  %6730 = vmatmul.msk.f32.vlgmr.msra.gmra.mxu1 %vm1504_vm1, %v8019_v17 }
 0x144   : > { %6731 = vmatmul.msk.f32.gmra.mxu1 %vm1504_vm1, %v8029_v29 }
 0x14c   : > { %6732 = vmatmul.msk.f32.gmra.mxu1 %vm1504_vm1, %v8040_v36 }
 0x154   : > { %6733 = vmatmul.msk.f32.gmra.mxu1 %vm1504_vm1, %v8051_v42 }
 0x198   : > { %v1571_v61 = vpop.f32.mrf.mxu0 }
 0x199   : > { %v1608_v43 = vpop.f32.mrf.mxu1  ;;  %v1572_v0 = vadd.f32 %v7311_v52, %v1571_v61 }
 0x19a   : > { %v1609_v56 = vadd.f32 %v7314_v48, %v1608_v43 }
 0x19e   : > { %v1534_v59 = vpop.f32.mrf.mxu2 }
 0x19f   : > { %v1535_v2 = vadd.f32 %v7312_v63, %v1534_v59 }
 0x1a1   : > { %v1611_v44 = vpop.f32.mrf.mxu1 }
 0x1a2   : > { %v1612_v54 = vadd.f32 %v7314_v48, %v1611_v44 }
 0x1a6   : > { %v1574_v45 = vpop.f32.mrf.mxu3  ;;  %v1537_v4 = vpop.f32.mrf.mxu2 }
 0x1a7   : > { %v1575_v60 = vadd.f32 %v7311_v52, %v1574_v45  ;;  %v1538_v8 = vadd.f32 %v7312_v63, %v1537_v4 }
 0x1a9   : > { %v1614_v46 = vpop.f32.mrf.mxu1 }
 0x1aa   : > { %v1615_v51 = vadd.f32 %v7314_v48, %v1614_v46 }
 0x1ae   : > { %v1577_v47 = vpop.f32.mrf.mxu3  ;;  %v1540_v10 = vpop.f32.mrf.mxu2 }
 0x1af   : > { %v1578_v58 = vadd.f32 %v7311_v52, %v1577_v47  ;;  %v1541_v13 = vadd.f32 %v7312_v63, %v1540_v10 }
 0x1b1   : > { %v1617_v49 = vpop.f32.mrf.mxu1 }
 0x1b2   : > { %v1618_v50 = vadd.f32 %v7314_v48, %v1617_v49 }
 0x1b4   : > { %1746 = vmatpush.msrb.mxu3 %v1618_v50 }
 0x1b6   : > { %1747 = vmatpush.msrb.mxu3 %v1615_v51  ;;  %v1580_v53 = vpop.f32.mrf.mxu3  ;;  %v1543_v16 = vpop.f32.mrf.mxu2 }
 0x1b7   : > { %v1581_v55 = vadd.f32 %v7311_v52, %v1580_v53  ;;  %v1544_v18 = vadd.f32 %v7312_v63, %v1543_v16  ;;  %v6765_v16 = vld [vmem:[%s7747_s21 + $0x48] sm:$0xff] }
 0x1b8   : > { %1748 = vmatpush.msrb.mxu3 %v1612_v54 }
 0x1b9   : > { %v1830_v57 = vpop.f32.mrf.mxu1  ;;  %6704 = vmatpush.xpose.msk.msrb.mxu2 %vm1620_vm2, %v1581_v55 }
 0x1ba   : > { %1749 = vmatpush.msrb.mxu3 %v1609_v56  ;;  %v1831_v19 = vadd.f32 %v7315_v9, %v1830_v57 }
 0x1bd   : > { %6705 = vmatpush.xpose.msk.msrb.mxu2 %vm1620_vm2, %v1578_v58 }
 0x1c1   : > { %v1833_v62 = vpop.f32.mrf.mxu1  ;;  %6706 = vmatpush.xpose.msk.msrb.mxu2 %vm1620_vm2, %v1575_v60 }
 0x1c2   : > { %v1834_v15 = vadd.f32 %v7315_v9, %v1833_v62 }
 0x1c5   : > { %6707 = vmatpush.xpose.msk.msrb.mxu2 %vm1620_vm2, %v1572_v0 }
 0x1c8   : > { %6708 = vmatmul.msk.f32.vlgmr.msrb.gmra.mxu2 %vm1620_vm2, %v1535_v2 }
 0x1c9   : > { %1864 = vmatpush.msra.mxu2 %v6737_v1  ;;  %v1836_v6 = vpop.f32.mrf.mxu1 }
 0x1ca   : > { %v1837_v14 = vadd.f32 %v7315_v9, %v1836_v6 }
 0x1cb   : > { %1865 = vmatpush.msra.mxu2 %v6736_v3 }
 0x1cd   : > { %1866 = vmatpush.msra.mxu2 %v6735_v5 }
 0x1cf   : > { %1867 = vmatpush.msra.mxu2 %v6734_v7 }
 0x1d0   : > { %6709 = vmatmul.msk.f32.gmra.mxu2 %vm1620_vm2, %v1538_v8 }
 0x1d1   : > { %v1839_v11 = vpop.f32.mrf.mxu1 }
 0x1d2   : > { %v1840_v12 = vadd.f32 %v7315_v9, %v1839_v11  ;;  %v1791_v11 = vpop.f32.mrf.mxu0 }
 0x1d4   : > { %6743 = vmatpush.xpose.msk.msra.mxu3 %vm1620_vm2, %v1840_v12 }
 0x1d8   : > { %6744 = vmatpush.xpose.msk.msra.mxu3 %vm1620_vm2, %v1837_v14  ;;  %6710 = vmatmul.msk.f32.gmra.mxu2 %vm1620_vm2, %v1541_v13  ;;  %v6767_v13 = vld [vmem:[%s7747_s21 + $0x58] sm:$0xff]  ;;  %v6766_v14 = vld [vmem:[%s7747_s21 + $0x50] sm:$0xff] }
 0x1dc   : > { %6745 = vmatpush.xpose.msk.msra.mxu3 %vm1620_vm2, %v1834_v15  ;;  %v7313_v15 = vld [vmem:[%s9395_s3 + $0x1] ss:$0 sm:$0xff] }
 0x1e0   : > { %6746 = vmatpush.xpose.msk.msra.mxu3 %vm1620_vm2, %v1831_v19  ;;  %6711 = vmatmul.msk.f32.gmra.mxu2 %vm1620_vm2, %v1544_v18  ;;  %v6764_v18 = vld [vmem:[%s7747_s21 + $0x40] sm:$0xff]  ;;  %v1792_v19 = vadd.f32 %v7313_v15, %v1791_v11 }
 0x1e8   : > { %6739 = vmatmul.msk.f32.vlgmr.msra.gmra.mxu2 %vm1504_vm1, %v8019_v17 }
 0x1f0   : > { %6740 = vmatmul.msk.f32.gmra.mxu2 %vm1504_vm1, %v8029_v29 }
 0x1f8   : > { %6741 = vmatmul.msk.f32.gmra.mxu2 %vm1504_vm1, %v8040_v36 }
 0x200   : > { %6742 = vmatmul.msk.f32.gmra.mxu2 %vm1504_vm1, %v8051_v42 }
 0x24b   : > { %v1662_v20 = vpop.f32.mrf.mxu2 }
 0x24c   : > { %v1674_v21 = vmul.f32 0.35355338, %v1662_v20  ;;  %v1794_v20 = vpop.f32.mrf.mxu0 }
 0x24e   : > { %v1678_v22 = vsel %vm1504_vm1, %v1674_v21, -inf }
 0x24f   : > { %1679 = vmax.xlane.f32.xlu0 %v1678_v22 }
 0x253   : > { %v1665_v23 = vpop.f32.mrf.mxu2 }
 0x254   : > { %v1675_v24 = vmul.f32 0.35355338, %v1665_v23  ;;  %v1797_v22 = vpop.f32.mrf.mxu0 }
 0x255   : > { %v1798_v23 = vadd.f32 %v7313_v15, %v1797_v22  ;;  %v6783_v22 = vld [vmem:[%s7757_s29 + $0x48] sm:$0xff] }
 0x256   : > { %v1681_v25 = vsel %vm1504_vm1, %v1675_v24, -inf }
 0x257   : > { %1682 = vmax.xlane.f32.xlu0 %v1681_v25 }
 0x25b   : > { %v1668_v26 = vpop.f32.mrf.mxu2 }
 0x25c   : > { %v1676_v27 = vmul.f32 0.35355338, %v1668_v26  ;;  %v1763_v26 = vld [vmem:[%s7777_s19] sm:$0xff] }
 0x25d   : > { %2093 = vmatpush.msrb.mxu2 %v1763_v26 }
 0x25e   : > { %v1684_v28 = vsel %vm1504_vm1, %v1676_v27, -inf }
 0x25f   : > { %1685 = vmax.xlane.f32.xlu1 %v1684_v28 }
 0x263   : > { %v1671_v30 = vpop.f32.mrf.mxu2 }
 0x264   : > { %v1677_v31 = vmul.f32 0.35355338, %v1671_v30 }
 0x266   : > { %v1687_v32 = vsel %vm1504_vm1, %v1677_v31, -inf }
 0x267   : > { %1688 = vmax.xlane.f32.xlu1 %v1687_v32 }
 0x26b   : > { %v1869_v33 = vpop.f32.mrf.mxu2 }
 0x26c   : > { %v1870_v43 = vadd.f32 %v7316_v37, %v1869_v33 }
 0x273   : > { %v1872_v34 = vpop.f32.mrf.mxu2 }
 0x274   : > { %v1873_v41 = vadd.f32 %v7316_v37, %v1872_v34 }
 0x27b   : > { %v1875_v35 = vpop.f32.mrf.mxu2 }
 0x27c   : > { %v1876_v40 = vadd.f32 %v7316_v37, %v1875_v35 }
 0x283   : > { %v1878_v38 = vpop.f32.mrf.mxu2 }
 0x284   : > { %v1879_v39 = vadd.f32 %v7316_v37, %v1878_v38 }
 0x286   : > { %2006 = vmatpush.msrb.mxu0 %v1879_v39 }
 0x288   : > { %2007 = vmatpush.msrb.mxu0 %v1876_v40 }
 0x28a   : > { %2008 = vmatpush.msrb.mxu0 %v1873_v41 }
 0x28c   : > { %2009 = vmatpush.msrb.mxu0 %v1870_v43 }
 0x2c2   : > { %v1680_v44 = vpop.xlane.xlu0 %1679 }
 0x2c3   : > { %v1690_v45 = vsub.f32 %v1674_v21, %v1680_v44  ;;  %v1795_v21 = vadd.f32 %v7313_v15, %v1794_v20  ;;  %v6785_v20 = vld [vmem:[%s7757_s29 + $0x58] sm:$0xff] }
 0x2c5   : > { %v1694_v46 = vmul.f32 1.442695, %v1690_v45 }
 0x2c7   : > { %7378 = vpow2.f32 %v1694_v46 }
 0x2ca   : > { %v1683_v47 = vpop.xlane.xlu0 %1682 }
 0x2cb   : > { %v1691_v48 = vsub.f32 %v1675_v24, %v1683_v47  ;;  %v1800_v24 = vpop.f32.mrf.mxu0 }
 0x2cc   : > { %v1801_v25 = vadd.f32 %v7313_v15, %v1800_v24  ;;  %v6782_v24 = vld [vmem:[%s7757_s29 + $0x40] sm:$0xff] }
 0x2cd   : > { %v7379_v49 = vpop.eup %7378  ;;  %v1696_v50 = vmul.f32 1.442695, %v1691_v48 }
 0x2ce   : > { %v1702_v51 = vsel %vm1504_vm1, %v7379_v49, 0.0 }
 0x2cf   : > { %7380 = vpow2.f32 %v1696_v50  ;;  %1703 = vadd.xlane.f32.xlu2 %v1702_v51 }
 0x2d2   : > { %v1686_v52 = vpop.xlane.xlu1 %1685 }
 0x2d3   : > { %v1692_v53 = vsub.f32 %v1676_v27, %v1686_v52 }
 0x2d5   : > { %v7381_v54 = vpop.eup %7380  ;;  %v1698_v55 = vmul.f32 1.442695, %v1692_v53 }
 0x2d6   : > { %v1705_v56 = vsel %vm1504_vm1, %v7381_v54, 0.0 }
 0x2d7   : > { %7382 = vpow2.f32 %v1698_v55  ;;  %1706 = vadd.xlane.f32.xlu2 %v1705_v56 }
 0x2da   : > { %v1689_v57 = vpop.xlane.xlu1 %1688 }
 0x2db   : > { %v1693_v58 = vsub.f32 %v1677_v31, %v1689_v57 }
 0x2dd   : > { %v7383_v59 = vpop.eup %7382  ;;  %v1700_v60 = vmul.f32 1.442695, %v1693_v58 }
 0x2de   : > { %v1708_v61 = vsel %vm1504_vm1, %v7383_v59, 0.0 }
 0x2df   : > { %7384 = vpow2.f32 %v1700_v60  ;;  %1709 = vadd.xlane.f32.xlu0 %v1708_v61 }
 0x2e5   : > { %v7385_v62 = vpop.eup %7384 }
 0x2e6   : > { %v1711_v63 = vsel %vm1504_vm1, %v7385_v62, 0.0 }
 0x2e7   : > { %1712 = vadd.xlane.f32.xlu1 %v1711_v63 }
 0x342   : > { %v1704_v0 = vpop.xlane.xlu2 %1703 }
 0x343   : > { %7386 = vrcp.f32 %v1704_v0 }
 0x349   : > { %v7387_v1 = vpop.eup %7386 }
 0x34a   : > { %v1707_v2 = vpop.xlane.xlu2 %1706  ;;  %v1718_v3 = vmul.f32 %v7387_v1, %v7379_v49 }
 0x34b   : > { %7388 = vrcp.f32 %v1707_v2  ;;  %v6776_v2 = vld [vmem:[%s7752_s25 + $0x58] sm:$0xff] }
 0x34c   : > { %6712 = vmatmul.msk.f32.vlgmr.msrb.gmra.mxu3 %vm1504_vm1, %v1718_v3  ;;  %2168 = vmatpush.msra.mxu0 %v6776_v2  ;;  %v7319_v2 = vld [vmem:[%s7772_s14 + $0x2] ss:$0 sm:$0xff] }
 0x34d   : > { %2129 = vmatpush.msrb.mxu3 %v6767_v13 }
 0x34f   : > { %2130 = vmatpush.msrb.mxu3 %v6766_v14 }
 0x351   : > { %v7389_v4 = vpop.eup %7388  ;;  %2131 = vmatpush.msrb.mxu3 %v6765_v16 }
 0x352   : > { %v1710_v5 = vpop.xlane.xlu0 %1709  ;;  %v1719_v6 = vmul.f32 %v7389_v4, %v7381_v54  ;;  %v6775_v4 = vld [vmem:[%s7752_s25 + $0x50] sm:$0xff] }
 0x353   : > { %7390 = vrcp.f32 %v1710_v5  ;;  %2132 = vmatpush.msrb.mxu3 %v6764_v18  ;;  %v6774_v5 = vld [vmem:[%s7752_s25 + $0x48] sm:$0xff]  ;;  %2169 = vmatpush.msra.mxu0 %v6775_v4 }
 0x354   : > { %6713 = vmatmul.msk.f32.gmra.mxu3 %vm1504_vm1, %v1719_v6  ;;  %v6773_v6 = vld [vmem:[%s7752_s25 + $0x40] sm:$0xff] }
 0x355   : > { %2170 = vmatpush.msra.mxu0 %v6774_v5 }
 0x357   : > { %2171 = vmatpush.msra.mxu0 %v6773_v6 }
 0x359   : > { %v7391_v7 = vpop.eup %7390 }
 0x35a   : > { %v1713_v8 = vpop.xlane.xlu1 %1712  ;;  %v1720_v9 = vmul.f32 %v7391_v7, %v7383_v59 }
 0x35b   : > { %7392 = vrcp.f32 %v1713_v8 }
 0x35c   : > { %6714 = vmatmul.msk.f32.gmra.mxu3 %vm1504_vm1, %v1720_v9 }
 0x361   : > { %v7393_v10 = vpop.eup %7392 }
 0x362   : > { %v1721_v12 = vmul.f32 %v7393_v10, %v7385_v62 }
 0x364   : > { %6715 = vmatmul.msk.f32.gmra.mxu3 %vm1504_vm1, %v1721_v12 }
 0x36c   : > { %6747 = vmatmul.msk.f32.vlgmr.msra.gmra.mxu3 %vm1620_vm2, %v1792_v19  ;;  %v6755_v19 = vld [vmem:[%s7777_s19 + $0x8] sm:$0xff] }
 0x36d   : > { %2052 = vmatpush.msrb.mxu1 %v6755_v19 }
 0x36f   : > { %2207 = vmatpush.msra.mxu1 %v6785_v20 }
 0x374   : > { %6748 = vmatmul.msk.f32.gmra.mxu3 %vm1620_vm2, %v1795_v21  ;;  %v6784_v21 = vld [vmem:[%s7757_s29 + $0x50] sm:$0xff] }
 0x375   : > { %2208 = vmatpush.msra.mxu1 %v6784_v21 }
 0x377   : > { %2209 = vmatpush.msra.mxu1 %v6783_v22  ;;  %v6803_v22 = vld [vmem:[%s7777_s19 + $0x10] sm:$0xff] }
 0x379   : > { %2210 = vmatpush.msra.mxu1 %v6782_v24 }
 0x37c   : > { %6749 = vmatmul.msk.f32.gmra.mxu3 %vm1620_vm2, %v1798_v23 }
 0x384   : > { %6750 = vmatmul.msk.f32.gmra.mxu3 %vm1620_vm2, %v1801_v25 }
 0x38c   : > { %6769 = vmatmul.msk.f32.vlgmr.msrb.gmra.mxu3 %vm1504_vm1, %v8019_v17 }
 0x394   : > { %6770 = vmatmul.msk.f32.gmra.mxu3 %vm1504_vm1, %v8029_v29 }
 0x39c   : > { %6771 = vmatmul.msk.f32.gmra.mxu3 %vm1504_vm1, %v8040_v36 }
 0x3a4   : > { %6772 = vmatmul.msk.f32.gmra.mxu3 %vm1504_vm1, %v8051_v42 }
 0x3cf   : > { %v1751_v27 = vpop.f32.mrf.mxu3 }
 0x3d0   : > { %6760 = vmatmul.msk.f32.vlgmr.msrb.gmra.mxu2 %vm1620_vm2, %v1751_v27 }
 0x3d7   : > { %v1754_v28 = vpop.f32.mrf.mxu3 }
 0x3d8   : > { %6761 = vmatmul.msk.f32.gmra.mxu2 %vm1620_vm2, %v1754_v28  ;;  %v6811_v28 = vld [vmem:[%s7747_s21 + $0x78] sm:$0xff] }
 0x3df   : > { %v1757_v30 = vpop.f32.mrf.mxu3 }
 0x3e0   : > { %6762 = vmatmul.msk.f32.gmra.mxu2 %vm1620_vm2, %v1757_v30  ;;  %v6810_v30 = vld [vmem:[%s7747_s21 + $0x70] sm:$0xff] }
 0x3e7   : > { %v1760_v31 = vpop.f32.mrf.mxu3 }
 0x3e8   : > { %6763 = vmatmul.msk.f32.gmra.mxu2 %vm1620_vm2, %v1760_v31  ;;  %v6809_v31 = vld [vmem:[%s7747_s21 + $0x68] sm:$0xff] }
 0x3ef   : > { %v1922_v32 = vpop.f32.mrf.mxu3 }
 0x3f0   : > { %v1934_v33 = vmul.f32 0.35355338, %v1922_v32  ;;  %v6808_v32 = vld [vmem:[%s7747_s21 + $0x60] sm:$0xff] }
 0x3f2   : > { %v1938_v34 = vsel %vm1504_vm1, %v1934_v33, -inf }
 0x3f3   : > { %1939 = vmax.xlane.f32.xlu2 %v1938_v34 }
 0x3f7   : > { %v1925_v35 = vpop.f32.mrf.mxu3 }
 0x3f8   : > { %v1935_v37 = vmul.f32 0.35355338, %v1925_v35 }
 0x3fa   : > { %v1941_v38 = vsel %vm1504_vm1, %v1935_v37, -inf }
 0x3fb   : > { %1942 = vmax.xlane.f32.xlu0 %v1941_v38 }
 0x3ff   : > { %v1928_v39 = vpop.f32.mrf.mxu3 }
 0x400   : > { %v1936_v40 = vmul.f32 0.35355338, %v1928_v39 }
 0x402   : > { %v1944_v41 = vsel %vm1504_vm1, %v1936_v40, -inf }
 0x403   : > { %1945 = vmax.xlane.f32.xlu1 %v1944_v41 }
 0x407   : > { %v1931_v43 = vpop.f32.mrf.mxu3 }
 0x408   : > { %v1937_v44 = vmul.f32 0.35355338, %v1931_v43 }
 0x40a   : > { %v1947_v45 = vsel %vm1504_vm1, %v1937_v44, -inf }
 0x40b   : > { %1948 = vmax.xlane.f32.xlu2 %v1947_v45 }
 0x40f   : > { %v2134_v41 = vpop.f32.mrf.mxu3 }
 0x466   : > { %v1940_v46 = vpop.xlane.xlu2 %1939 }
 0x467   : > { %v1950_v47 = vsub.f32 %v1934_v33, %v1940_v46  ;;  %v6820_v46 = vld [vmem:[%s7752_s25 + $0x78] sm:$0xff] }
 0x469   : > { %v1954_v48 = vmul.f32 1.442695, %v1950_v47 }
 0x46b   : > { %7394 = vpow2.f32 %v1954_v48  ;;  %v6819_v48 = vld [vmem:[%s7752_s25 + $0x70] sm:$0xff] }
 0x46e   : > { %v1943_v49 = vpop.xlane.xlu0 %1942 }
 0x46f   : > { %v1951_v50 = vsub.f32 %v1935_v37, %v1943_v49  ;;  %v7318_v37 = vld [vmem:[%s9394_s8 + $0x2] ss:$0 sm:$0xff]  ;;  %v2137_v49 = vpop.f32.mrf.mxu3 }
 0x471   : > { %v7395_v51 = vpop.eup %7394  ;;  %v1956_v52 = vmul.f32 1.442695, %v1951_v50  ;;  %v6818_v50 = vld [vmem:[%s7752_s25 + $0x68] sm:$0xff] }
 0x472   : > { %v1962_v53 = vsel %vm1504_vm1, %v7395_v51, 0.0 }
 0x473   : > { %7396 = vpow2.f32 %v1956_v52  ;;  %1963 = vadd.xlane.f32.xlu0 %v1962_v53 }
 0x476   : > { %v1946_v54 = vpop.xlane.xlu1 %1945 }
 0x477   : > { %v1952_v55 = vsub.f32 %v1936_v40, %v1946_v54  ;;  %v2140_v53 = vpop.f32.mrf.mxu3 }
 0x479   : > { %v7397_v56 = vpop.eup %7396  ;;  %v1958_v57 = vmul.f32 1.442695, %v1952_v55 }
 0x47a   : > { %v1965_v58 = vsel %vm1504_vm1, %v7397_v56, 0.0 }
 0x47b   : > { %7398 = vpow2.f32 %v1958_v57  ;;  %1966 = vadd.xlane.f32.xlu1 %v1965_v58 }
 0x47e   : > { %v1949_v59 = vpop.xlane.xlu2 %1948 }
 0x47f   : > { %v1953_v60 = vsub.f32 %v1937_v44, %v1949_v59  ;;  %v7317_v44 = vld [vmem:[%s9395_s3 + $0x2] ss:$0 sm:$0xff]  ;;  %v2143_v55 = vpop.f32.mrf.mxu3 }
 0x480   : > { %v2135_v47 = vadd.f32 %v7317_v44, %v2134_v41  ;;  %v2138_v52 = vadd.f32 %v7317_v44, %v2137_v49  ;;  %v2141_v54 = vadd.f32 %v7317_v44, %v2140_v53 }
 0x481   : > { %v7399_v61 = vpop.eup %7398  ;;  %v1960_v62 = vmul.f32 1.442695, %v1953_v60 }
 0x482   : > { %v1968_v63 = vsel %vm1504_vm1, %v7399_v61, 0.0 }
 0x483   : > { %7400 = vpow2.f32 %v1960_v62  ;;  %1969 = vadd.xlane.f32.xlu2 %v1968_v63  ;;  %v8217_v63 = vpop.f32.mrf.mxu2 }
 0x489   : > { %v7401_v0 = vpop.eup %7400 }
 0x48a   : > { %v1971_v1 = vsel %vm1504_vm1, %v7401_v0, 0.0 }
 0x48b   : > { %1972 = vadd.xlane.f32.xlu0 %v1971_v1  ;;  %v8219_v1 = vpop.f32.mrf.mxu2 }
 0x493   : > { %v8222_v6 = vpop.f32.mrf.mxu2 }
 0x4e6   : > { %v1964_v3 = vpop.xlane.xlu0 %1963 }
 0x4e7   : > { %7402 = vrcp.f32 %v1964_v3 }
 0x4ed   : > { %v7403_v7 = vpop.eup %7402 }
 0x4ee   : > { %v1978_v8 = vmul.f32 %v7403_v7, %v7395_v51  ;;  %v1967_v9 = vpop.xlane.xlu1 %1966  ;;  %v6817_v51 = vld [vmem:[%s7752_s25 + $0x60] sm:$0xff] }
 0x4ef   : > { %7404 = vrcp.f32 %v1967_v9  ;;  %v8224_v9 = vpop.f32.mrf.mxu2 }
 0x4f0   : > { %6751 = vmatmul.msk.f32.vlgmr.msrb.gmra.mxu0 %vm1504_vm1, %v1978_v8 }
 0x4f1   : > { %2395 = vmatpush.msrb.mxu0 %v6803_v22  ;;  %v7320_v22 = vld [vmem:[%s9395_s3 + $0x3] ss:$0 sm:$0xff] }
 0x4f5   : > { %v7405_v10 = vpop.eup %7404 }
 0x4f6   : > { %v1970_v11 = vpop.xlane.xlu2 %1969  ;;  %v1979_v12 = vmul.f32 %v7405_v10, %v7397_v56  ;;  %v2144_v56 = vadd.f32 %v7317_v44, %v2143_v55 }
 0x4f7   : > { %7406 = vrcp.f32 %v1970_v11 }
 0x4f8   : > { %6752 = vmatmul.msk.f32.gmra.mxu0 %vm1504_vm1, %v1979_v12 }
 0x4fd   : > { %v7407_v13 = vpop.eup %7406 }
 0x4fe   : > { %v1973_v14 = vpop.xlane.xlu0 %1972  ;;  %v1980_v15 = vmul.f32 %v7407_v13, %v7399_v61 }
 0x4ff   : > { %7408 = vrcp.f32 %v1973_v14 }
 0x500   : > { %6753 = vmatmul.msk.f32.gmra.mxu0 %vm1504_vm1, %v1980_v15 }
 0x505   : > { %v7409_v16 = vpop.eup %7408 }
 0x506   : > { %v1981_v18 = vmul.f32 %v7409_v16, %v7401_v0 }
 0x508   : > { %6754 = vmatmul.msk.f32.gmra.mxu0 %vm1504_vm1, %v1981_v18 }
 0x510   : > { %6778 = vmatmul.msk.f32.vlgmr.msra.gmra.mxu0 %vm1504_vm1, %v8019_v17 }
 0x518   : > { %6779 = vmatmul.msk.f32.gmra.mxu0 %vm1504_vm1, %v8029_v29 }
 0x520   : > { %6780 = vmatmul.msk.f32.gmra.mxu0 %vm1504_vm1, %v8040_v36 }
 0x528   : > { %6781 = vmatmul.msk.f32.gmra.mxu0 %vm1504_vm1, %v8051_v42 }
 0x56d   : > { %v2011_v23 = vpop.f32.mrf.mxu0 }
 0x56e   : > { %6756 = vmatmul.msk.f32.vlgmr.msrb.gmra.mxu1 %vm1620_vm2, %v2011_v23 }
 0x56f   : > { %2435 = vmatpush.msrb.mxu1 %v6811_v28 }
 0x571   : > { %2436 = vmatpush.msrb.mxu1 %v6810_v30 }
 0x573   : > { %2437 = vmatpush.msrb.mxu1 %v6809_v31 }
 0x575   : > { %v2014_v25 = vpop.f32.mrf.mxu0  ;;  %2438 = vmatpush.msrb.mxu1 %v6808_v32 }
 0x576   : > { %6757 = vmatmul.msk.f32.gmra.mxu1 %vm1620_vm2, %v2014_v25 }
 0x57d   : > { %v2017_v26 = vpop.f32.mrf.mxu0 }
 0x57e   : > { %6758 = vmatmul.msk.f32.gmra.mxu1 %vm1620_vm2, %v2017_v26 }
 0x585   : > { %v2020_v27 = vpop.f32.mrf.mxu0 }
 0x586   : > { %6759 = vmatmul.msk.f32.gmra.mxu1 %vm1620_vm2, %v2020_v27  ;;  %v7321_v27 = vld [vmem:[%s9394_s8 + $0x3] ss:$0 sm:$0xff] }
 0x58d   : > { %v2173_v33 = vpop.f32.mrf.mxu0 }
 0x58e   : > { %6787 = vmatmul.msk.f32.vlgmr.msra.gmra.mxu1 %vm1504_vm1, %v8019_v17  ;;  %v2174_v45 = vadd.f32 %v7318_v37, %v2173_v33 }
 0x595   : > { %v2176_v34 = vpop.f32.mrf.mxu0 }
 0x596   : > { %6788 = vmatmul.msk.f32.gmra.mxu1 %vm1504_vm1, %v8029_v29  ;;  %v2177_v43 = vadd.f32 %v7318_v37, %v2176_v34 }
 0x59d   : > { %v2179_v35 = vpop.f32.mrf.mxu0 }
 0x59e   : > { %6789 = vmatmul.msk.f32.gmra.mxu1 %vm1504_vm1, %v8040_v36  ;;  %v2180_v40 = vadd.f32 %v7318_v37, %v2179_v35 }
 0x5a5   : > { %v2182_v38 = vpop.f32.mrf.mxu0 }
 0x5a6   : > { %v2183_v39 = vadd.f32 %v7318_v37, %v2182_v38  ;;  %6790 = vmatmul.msk.f32.gmra.mxu1 %vm1504_vm1, %v8051_v42 }
 0x5a8   : > { %6791 = vmatpush.xpose.msk.msra.mxu2 %vm1620_vm2, %v2183_v39 }
 0x5ac   : > { %6792 = vmatpush.xpose.msk.msra.mxu2 %vm1620_vm2, %v2180_v40 }
 0x5ae   : > { %6813 = vmatmul.msk.f32.vlgmr.msrb.gmra.mxu1 %vm1504_vm1, %v8019_v17 }
 0x5b0   : > { %6793 = vmatpush.xpose.msk.msra.mxu2 %vm1620_vm2, %v2177_v43 }
 0x5b4   : > { %6794 = vmatpush.xpose.msk.msra.mxu2 %vm1620_vm2, %v2174_v45 }
 0x5b6   : > { %6814 = vmatmul.msk.f32.gmra.mxu1 %vm1504_vm1, %v8029_v29 }
 0x5b7   : > { %6795 = vmatmul.msk.f32.vlgmr.msra.gmra.mxu2 %vm1620_vm2, %v2135_v47 }
 0x5b8   : > { %2474 = vmatpush.msrb.mxu2 %v6820_v46 }
 0x5ba   : > { %2475 = vmatpush.msrb.mxu2 %v6819_v48 }
 0x5bc   : > { %2476 = vmatpush.msrb.mxu2 %v6818_v50 }
 0x5be   : > { %2477 = vmatpush.msrb.mxu2 %v6817_v51  ;;  %6815 = vmatmul.msk.f32.gmra.mxu1 %vm1504_vm1, %v8040_v36 }
 0x5bf   : > { %6796 = vmatmul.msk.f32.gmra.mxu2 %vm1620_vm2, %v2138_v52 }
 0x5c6   : > { %6816 = vmatmul.msk.f32.gmra.mxu1 %vm1504_vm1, %v8051_v42 }
 0x5c7   : > { %6797 = vmatmul.msk.f32.gmra.mxu2 %vm1620_vm2, %v2141_v54 }
 0x5cf   : > { %6798 = vmatmul.msk.f32.gmra.mxu2 %vm1620_vm2, %v2144_v56 }
 0x5d7   : > { %6822 = vmatmul.msk.f32.vlgmr.msrb.gmra.mxu2 %vm1504_vm1, %v8019_v17 }
 0x5df   : > { %6823 = vmatmul.msk.f32.gmra.mxu2 %vm1504_vm1, %v8029_v29 }
 0x5e7   : > { %6824 = vmatmul.msk.f32.gmra.mxu2 %vm1504_vm1, %v8040_v36 }
 0x5eb   : > { %v8207_v57 = vpop.f32.mrf.mxu1 }
 0x5ef   : > { %6825 = vmatmul.msk.f32.gmra.mxu2 %vm1504_vm1, %v8051_v42 }
 0x5f3   : > { %v8211_v58 = vpop.f32.mrf.mxu1 }
 0x5fb   : > { %v8213_v59 = vpop.f32.mrf.mxu1 }
 0x603   : > { %v8215_v60 = vpop.f32.mrf.mxu1 }
 0x60b   : > { %v2212_v61 = vpop.f32.mrf.mxu1 }
 0x60c   : > { %v2213_v8 = vadd.f32 %v7319_v2, %v2212_v61  ;;  %v6829_v61 = vld [vmem:[%s7757_s29 + $0x78] sm:$0xff] }
 0x613   : > { %v2215_v62 = vpop.f32.mrf.mxu1 }
 0x614   : > { %v2216_v7 = vadd.f32 %v7319_v2, %v2215_v62  ;;  %v6828_v62 = vld [vmem:[%s7757_s29 + $0x70] sm:$0xff] }
 0x61b   : > { %v2218_v0 = vpop.f32.mrf.mxu1 }
 0x61c   : > { %v2219_v5 = vadd.f32 %v7319_v2, %v2218_v0  ;;  %v6827_v0 = vld [vmem:[%s7757_s29 + $0x68] sm:$0xff] }
 0x623   : > { %v2221_v3 = vpop.f32.mrf.mxu1 }
 0x624   : > { %v2222_v4 = vadd.f32 %v7319_v2, %v2221_v3  ;;  %v6826_v2 = vld [vmem:[%s7757_s29 + $0x60] sm:$0xff] }
 0x626   : > { %2349 = vmatpush.msra.mxu3 %v2222_v4 }
 0x628   : > { %2350 = vmatpush.msra.mxu3 %v2219_v5 }
 0x62a   : > { %2351 = vmatpush.msra.mxu3 %v2216_v7 }
 0x62c   : > { %2352 = vmatpush.msra.mxu3 %v2213_v8 }
 0x62e   : > { %2513 = vmatpush.msrb.mxu3 %v6829_v61 }
 0x630   : > { %2514 = vmatpush.msrb.mxu3 %v6828_v62 }
 0x632   : > { %2515 = vmatpush.msrb.mxu3 %v6827_v0 }
 0x634   : > { %2516 = vmatpush.msrb.mxu3 %v6826_v2 }
 0x63a   : > { %v2265_v10 = vpop.f32.mrf.mxu2 }
 0x63b   : > { %v2277_v11 = vmul.f32 0.35355338, %v2265_v10 }
 0x63d   : > { %v2281_v12 = vsel %vm1504_vm1, %v2277_v11, -inf }
 0x63e   : > { %2282 = vmax.xlane.f32.xlu1 %v2281_v12 }
 0x642   : > { %v2268_v13 = vpop.f32.mrf.mxu2 }
 0x643   : > { %v2278_v14 = vmul.f32 0.35355338, %v2268_v13 }
 0x645   : > { %v2284_v15 = vsel %vm1504_vm1, %v2278_v14, -inf }
 0x646   : > { %2285 = vmax.xlane.f32.xlu2 %v2284_v15 }
 0x64a   : > { %v2271_v16 = vpop.f32.mrf.mxu2 }
 0x64b   : > { %v2279_v18 = vmul.f32 0.35355338, %v2271_v16 }
 0x64d   : > { %v2287_v19 = vsel %vm1504_vm1, %v2279_v18, -inf }
 0x64e   : > { %2288 = vmax.xlane.f32.xlu0 %v2287_v19 }
 0x652   : > { %v2274_v20 = vpop.f32.mrf.mxu2 }
 0x653   : > { %v2280_v21 = vmul.f32 0.35355338, %v2274_v20  ;;  %v2440_v20 = vpop.f32.mrf.mxu1 }
 0x655   : > { %v2290_v23 = vsel %vm1504_vm1, %v2280_v21, -inf }
 0x656   : > { %2291 = vmax.xlane.f32.xlu1 %v2290_v23  ;;  %v2441_v23 = vadd.f32 %v7320_v22, %v2440_v20 }
 0x65a   : > { %v2479_v24 = vpop.f32.mrf.mxu2 }
 0x65b   : > { %v2480_v33 = vadd.f32 %v7321_v27, %v2479_v24  ;;  %v2443_v24 = vpop.f32.mrf.mxu1 }
 0x662   : > { %v2482_v25 = vpop.f32.mrf.mxu2 }
 0x663   : > { %v2483_v32 = vadd.f32 %v7321_v27, %v2482_v25 }
 0x66a   : > { %v2485_v26 = vpop.f32.mrf.mxu2 }
 0x66b   : > { %v2486_v31 = vadd.f32 %v7321_v27, %v2485_v26  ;;  %v2444_v26 = vadd.f32 %v7320_v22, %v2443_v24  ;;  %v6847_v24 = vld [vmem:[%s7777_s19 + $0x18] sm:$0xff] }
 0x66c   : > { %2701 = vmatpush.msra.mxu2 %v6847_v24 }
 0x672   : > { %v2488_v28 = vpop.f32.mrf.mxu2 }
 0x673   : > { %v2489_v30 = vadd.f32 %v7321_v27, %v2488_v28  ;;  %v2446_v28 = vpop.f32.mrf.mxu1 }
 0x675   : > { %6835 = vmatpush.xpose.msk.msra.mxu0 %vm1620_vm2, %v2489_v30  ;;  %v2447_v30 = vadd.f32 %v7320_v22, %v2446_v28 }
 0x679   : > { %6836 = vmatpush.xpose.msk.msra.mxu0 %vm1620_vm2, %v2486_v31 }
 0x67d   : > { %6837 = vmatpush.xpose.msk.msra.mxu0 %vm1620_vm2, %v2483_v32  ;;  %v2449_v32 = vpop.f32.mrf.mxu1 }
 0x681   : > { %6838 = vmatpush.xpose.msk.msra.mxu0 %vm1620_vm2, %v2480_v33  ;;  %v2450_v33 = vadd.f32 %v7320_v22, %v2449_v32 }
 0x6b1   : > { %v2283_v34 = vpop.xlane.xlu1 %2282 }
 0x6b2   : > { %v2293_v35 = vsub.f32 %v2277_v11, %v2283_v34  ;;  %v7322_v34 = vld [vmem:[%s7772_s14 + $0x3] ss:$0 sm:$0xff] }
 0x6b4   : > { %v2297_v37 = vmul.f32 1.442695, %v2293_v35 }
 0x6b6   : > { %7410 = vpow2.f32 %v2297_v37 }
 0x6b9   : > { %v2286_v38 = vpop.xlane.xlu2 %2285 }
 0x6ba   : > { %v2294_v39 = vsub.f32 %v2278_v14, %v2286_v38 }
 0x6bc   : > { %v7411_v40 = vpop.eup %7410  ;;  %v2299_v41 = vmul.f32 1.442695, %v2294_v39 }
 0x6bd   : > { %v2305_v43 = vsel %vm1504_vm1, %v7411_v40, 0.0 }
 0x6be   : > { %7412 = vpow2.f32 %v2299_v41  ;;  %2306 = vadd.xlane.f32.xlu2 %v2305_v43 }
 0x6c1   : > { %v2289_v44 = vpop.xlane.xlu0 %2288 }
 0x6c2   : > { %v2295_v45 = vsub.f32 %v2279_v18, %v2289_v44 }
 0x6c4   : > { %v7413_v46 = vpop.eup %7412  ;;  %v2301_v47 = vmul.f32 1.442695, %v2295_v45 }
 0x6c5   : > { %v2308_v48 = vsel %vm1504_vm1, %v7413_v46, 0.0 }
 0x6c6   : > { %7414 = vpow2.f32 %v2301_v47  ;;  %2309 = vadd.xlane.f32.xlu0 %v2308_v48 }
 0x6c9   : > { %v2292_v49 = vpop.xlane.xlu1 %2291 }
 0x6ca   : > { %v2296_v50 = vsub.f32 %v2280_v21, %v2292_v49 }
 0x6cc   : > { %v7415_v51 = vpop.eup %7414  ;;  %v2303_v52 = vmul.f32 1.442695, %v2296_v50 }
 0x6cd   : > { %v2311_v53 = vsel %vm1504_vm1, %v7415_v51, 0.0 }
 0x6ce   : > { %7416 = vpow2.f32 %v2303_v52  ;;  %2312 = vadd.xlane.f32.xlu1 %v2311_v53 }
 0x6d4   : > { %v7417_v54 = vpop.eup %7416 }
 0x6d5   : > { %v2314_v55 = vsel %vm1504_vm1, %v7417_v54, 0.0 }
 0x6d6   : > { %2315 = vadd.xlane.f32.xlu2 %v2314_v55 }
 0x731   : > { %v2307_v56 = vpop.xlane.xlu2 %2306 }
 0x732   : > { %7418 = vrcp.f32 %v2307_v56 }
 0x738   : > { %v7419_v3 = vpop.eup %7418 }
 0x739   : > { %v2321_v4 = vmul.f32 %v7419_v3, %v7411_v40  ;;  %v2310_v5 = vpop.xlane.xlu0 %2309 }
 0x73a   : > { %7420 = vrcp.f32 %v2310_v5 }
 0x73b   : > { %6799 = vmatmul.msk.f32.vlgmr.msra.gmra.mxu3 %vm1504_vm1, %v2321_v4 }
 0x740   : > { %v7421_v7 = vpop.eup %7420 }
 0x741   : > { %v2313_v8 = vpop.xlane.xlu1 %2312  ;;  %v2322_v10 = vmul.f32 %v7421_v7, %v7413_v46 }
 0x742   : > { %7422 = vrcp.f32 %v2313_v8 }
 0x743   : > { %6800 = vmatmul.msk.f32.gmra.mxu3 %vm1504_vm1, %v2322_v10 }
 0x748   : > { %v7423_v11 = vpop.eup %7422 }
 0x749   : > { %v2316_v12 = vpop.xlane.xlu2 %2315  ;;  %v2323_v13 = vmul.f32 %v7423_v11, %v7415_v51 }
 0x74a   : > { %7424 = vrcp.f32 %v2316_v12 }
 0x74b   : > { %6801 = vmatmul.msk.f32.gmra.mxu3 %vm1504_vm1, %v2323_v13 }
 0x750   : > { %v7425_v14 = vpop.eup %7424 }
 0x751   : > { %v2324_v15 = vmul.f32 %v7425_v14, %v7417_v54 }
 0x753   : > { %6802 = vmatmul.msk.f32.gmra.mxu3 %vm1504_vm1, %v2324_v15 }
 0x75b   : > { %6831 = vmatmul.msk.f32.vlgmr.msrb.gmra.mxu3 %vm1504_vm1, %v8019_v17 }
 0x763   : > { %6832 = vmatmul.msk.f32.gmra.mxu3 %vm1504_vm1, %v8029_v29 }
 0x76b   : > { %6833 = vmatmul.msk.f32.gmra.mxu3 %vm1504_vm1, %v8040_v36 }
 0x773   : > { %6834 = vmatmul.msk.f32.gmra.mxu3 %vm1504_vm1, %v8051_v42 }
 0x7be   : > { %v2354_v16 = vpop.f32.mrf.mxu3 }
 0x7bf   : > { %6804 = vmatmul.msk.f32.vlgmr.msrb.gmra.mxu0 %vm1620_vm2, %v2354_v16 }
 0x7c6   : > { %v2357_v18 = vpop.f32.mrf.mxu3 }
 0x7c7   : > { %6805 = vmatmul.msk.f32.gmra.mxu0 %vm1620_vm2, %v2357_v18 }
 0x7ce   : > { %v2360_v19 = vpop.f32.mrf.mxu3 }
 0x7cf   : > { %6806 = vmatmul.msk.f32.gmra.mxu0 %vm1620_vm2, %v2360_v19 }
 0x7d6   : > { %v2363_v21 = vpop.f32.mrf.mxu3 }
 0x7d7   : > { %6807 = vmatmul.msk.f32.gmra.mxu0 %vm1620_vm2, %v2363_v21 }
 0x7de   : > { %v2518_v25 = vpop.f32.mrf.mxu3 }
 0x7df   : > { %6839 = vmatmul.msk.f32.vlgmr.msra.gmra.mxu0 %vm1620_vm2, %v2441_v23  ;;  %v2519_v40 = vadd.f32 %v7322_v34, %v2518_v25 }
 0x7e6   : > { %v2521_v27 = vpop.f32.mrf.mxu3 }
 0x7e7   : > { %6840 = vmatmul.msk.f32.gmra.mxu0 %vm1620_vm2, %v2444_v26  ;;  %v2522_v39 = vadd.f32 %v7322_v34, %v2521_v27 }
 0x7ee   : > { %v2524_v31 = vpop.f32.mrf.mxu3 }
 0x7ef   : > { %6841 = vmatmul.msk.f32.gmra.mxu0 %vm1620_vm2, %v2447_v30  ;;  %v2525_v38 = vadd.f32 %v7322_v34, %v2524_v31 }
 0x7f6   : > { %v2527_v35 = vpop.f32.mrf.mxu3 }
 0x7f7   : > { %v2528_v37 = vadd.f32 %v7322_v34, %v2527_v35  ;;  %6842 = vmatmul.msk.f32.gmra.mxu0 %vm1620_vm2, %v2450_v33 }
 0x7f9   : > { %2655 = vmatpush.msra.mxu1 %v2528_v37 }
 0x7fb   : > { %2656 = vmatpush.msra.mxu1 %v2525_v38 }
 0x7fd   : > { %2657 = vmatpush.msra.mxu1 %v2522_v39 }
 0x7ff   : > { %2658 = vmatpush.msra.mxu1 %v2519_v40 }
 0x83c   : > { %v8266_v41 = vpop.f32.mrf.mxu0 }
 0x844   : > { %v8268_v43 = vpop.f32.mrf.mxu0 }
 0x84c   : > { %v8270_v44 = vpop.f32.mrf.mxu0 }
 0x854   : > { %v8272_v45 = vpop.f32.mrf.mxu0 }
 0x85c   : > { %v2571_v46 = vpop.f32.mrf.mxu0 }
 0x85d   : > { %v2583_v47 = vmul.f32 0.35355338, %v2571_v46 }
 0x85f   : > { %v2587_v48 = vsel %vm1504_vm1, %v2583_v47, -inf }
 0x860   : > { %2588 = vmax.xlane.f32.xlu0 %v2587_v48 }
 0x864   : > { %v2574_v49 = vpop.f32.mrf.mxu0 }
 0x865   : > { %v2584_v50 = vmul.f32 0.35355338, %v2574_v49  ;;  %v7323_v49 = vld [vmem:[%s7782_s24] ss:$0 sm:$0xff] }
 0x867   : > { %v2590_v51 = vsel %vm1504_vm1, %v2584_v50, -inf }
 0x868   : > { %2591 = vmax.xlane.f32.xlu1 %v2590_v51 }
 0x86c   : > { %v2577_v52 = vpop.f32.mrf.mxu0 }
 0x86d   : > { %v2585_v53 = vmul.f32 0.35355338, %v2577_v52 }
 0x86f   : > { %v2593_v54 = vsel %vm1504_vm1, %v2585_v53, -inf }
 0x870   : > { %2594 = vmax.xlane.f32.xlu2 %v2593_v54 }
 0x874   : > { %v2580_v55 = vpop.f32.mrf.mxu0 }
 0x875   : > { %v2586_v56 = vmul.f32 0.35355338, %v2580_v55 }
 0x877   : > { %v2596_v61 = vsel %vm1504_vm1, %v2586_v56, -inf }
 0x878   : > { %2597 = vmax.xlane.f32.xlu0 %v2596_v61 }
 0x8d3   : > { %v2589_v62 = vpop.xlane.xlu0 %2588 }
 0x8d4   : > { %v2599_v0 = vsub.f32 %v2583_v47, %v2589_v62  ;;  %v2096_v47 = vadd.f32 %v8217_v63, %v8207_v57  ;;  %v2102_v57 = vadd.f32 %v8222_v6, %v8213_v59 }
 0x8d6   : > { %v2603_v2 = vmul.f32 1.442695, %v2599_v0  ;;  %v2409_v48 = vadd.f32 %v8266_v41, %v2096_v47  ;;  %v2411_v41 = vadd.f32 %v8270_v44, %v2102_v57 }
 0x8d8   : > { %7426 = vpow2.f32 %v2603_v2 }
 0x8db   : > { %v2592_v3 = vpop.xlane.xlu1 %2591 }
 0x8dc   : > { %v2600_v4 = vsub.f32 %v2584_v50, %v2592_v3 }
 0x8de   : > { %v7427_v5 = vpop.eup %7426  ;;  %v2605_v7 = vmul.f32 1.442695, %v2600_v4 }
 0x8df   : > { %v2611_v8 = vsel %vm1504_vm1, %v7427_v5, 0.0 }
 0x8e0   : > { %7428 = vpow2.f32 %v2605_v7  ;;  %2612 = vadd.xlane.f32.xlu1 %v2611_v8  ;;  %v7717_v8 = vmov 32.0  }
 0x8e3   : > { %v2595_v10 = vpop.xlane.xlu2 %2594 }
 0x8e4   : > { %v2601_v11 = vsub.f32 %v2585_v53, %v2595_v10  ;;  %v2099_v53 = vadd.f32 %v8219_v1, %v8211_v58 }
 0x8e6   : > { %v7429_v12 = vpop.eup %7428  ;;  %v2607_v13 = vmul.f32 1.442695, %v2601_v11  ;;  %v2410_v55 = vadd.f32 %v8268_v43, %v2099_v53  ;;  %v2105_v43 = vadd.f32 %v8224_v9, %v8215_v60 }
 0x8e7   : > { %v2614_v14 = vsel %vm1504_vm1, %v7429_v12, 0.0 }
 0x8e8   : > { %7430 = vpow2.f32 %v2607_v13  ;;  %2615 = vadd.xlane.f32.xlu2 %v2614_v14  ;;  %v2412_v4 = vadd.f32 %v8272_v45, %v2105_v43  ;;  %v2940_v43 = vld [vmem:[%s9397_s15 + $0x68] sm:$0xff] }
 0x8eb   : > { %v2598_v15 = vpop.xlane.xlu0 %2597 }
 0x8ec   : > { %v2602_v16 = vsub.f32 %v2586_v56, %v2598_v15 }
 0x8ee   : > { %v7431_v18 = vpop.eup %7430  ;;  %v2609_v19 = vmul.f32 1.442695, %v2602_v16 }
 0x8ef   : > { %v2617_v20 = vsel %vm1504_vm1, %v7431_v18, 0.0 }
 0x8f0   : > { %7432 = vpow2.f32 %v2609_v19  ;;  %2618 = vadd.xlane.f32.xlu0 %v2617_v20 }
 0x8f6   : > { %v7433_v21 = vpop.eup %7432 }
 0x8f7   : > { %v2620_v22 = vsel %vm1504_vm1, %v7433_v21, 0.0 }
 0x8f8   : > { %2621 = vadd.xlane.f32.xlu1 %v2620_v22 }
 0x953   : > { %v2613_v23 = vpop.xlane.xlu1 %2612 }
 0x954   : > { %7434 = vrcp.f32 %v2613_v23 }
 0x95a   : > { %v7435_v25 = vpop.eup %7434 }
 0x95b   : > { %v2627_v26 = vmul.f32 %v7435_v25, %v7427_v5  ;;  %v2616_v27 = vpop.xlane.xlu2 %2615 }
 0x95c   : > { %7436 = vrcp.f32 %v2616_v27 }
 0x95d   : > { %6843 = vmatmul.msk.f32.vlgmr.msra.gmra.mxu1 %vm1504_vm1, %v2627_v26 }
 0x962   : > { %v7437_v28 = vpop.eup %7436 }
 0x963   : > { %v2619_v30 = vpop.xlane.xlu0 %2618  ;;  %v2628_v31 = vmul.f32 %v7437_v28, %v7429_v12 }
 0x964   : > { %7438 = vrcp.f32 %v2619_v30 }
 0x965   : > { %6844 = vmatmul.msk.f32.gmra.mxu1 %vm1504_vm1, %v2628_v31 }
 0x96a   : > { %v7439_v32 = vpop.eup %7438 }
 0x96b   : > { %v2622_v33 = vpop.xlane.xlu1 %2621  ;;  %v2629_v34 = vmul.f32 %v7439_v32, %v7431_v18 }
 0x96c   : > { %7440 = vrcp.f32 %v2622_v33  ;;  %v2845_v33 = vld [vmem:[%s7797_s12 + $0x18] sm:$0xff] }
 0x96d   : > { %6845 = vmatmul.msk.f32.gmra.mxu1 %vm1504_vm1, %v2629_v34  ;;  %7442 = vrcp.f32 %v7717_v8  ;;  %2874 = vmatpush.msra.mxu3 %v2845_v33  ;;  %v2844_v34 = vld [vmem:[%s7797_s12 + $0x10] sm:$0xff]  ;;  %v2938_v33 = vld [vmem:[%s9397_s15 + $0x58] sm:$0xff] }
 0x96f   : > { %2875 = vmatpush.msra.mxu3 %v2844_v34  ;;  %v2937_v34 = vld [vmem:[%s9397_s15 + $0x50] sm:$0xff] }
 0x972   : > { %v7441_v35 = vpop.eup %7440 }
 0x973   : > { %v2630_v37 = vmul.f32 %v7441_v35, %v7433_v21  ;;  %v7443_v10 = vpop.eup %7442  ;;  %v2843_v35 = vld [vmem:[%s7797_s12 + $0x8] sm:$0xff] }
 0x974   : > { %v2746_v11 = vmul.f32 32.0, %v7443_v10  ;;  %vm2750_vm3 = vweird.f32 %v7443_v10  ;;  %2876 = vmatpush.msra.mxu3 %v2843_v35  ;;  %v2936_v35 = vld [vmem:[%s9397_s15 + $0x48] sm:$0xff] }
 0x975   : > { %6846 = vmatmul.msk.f32.gmra.mxu1 %vm1504_vm1, %v2630_v37  ;;  %v2842_v37 = vld [vmem:[%s7797_s12] sm:$0xff] }
 0x976   : > { %v2747_v60 = vsub.f32 1.0, %v2746_v11  ;;  %2877 = vmatpush.msra.mxu3 %v2842_v37  ;;  %v2934_v37 = vld [vmem:[%s9397_s15 + $0x38] sm:$0xff] }
 0x978   : > { %v2748_v9 = vmul.f32 %v7443_v10, %v2747_v60 }
 0x9da   : > { %v2660_v38 = vpop.f32.mrf.mxu1 }
 0x9db   : > { %6848 = vmatmul.msk.f32.vlgmr.msra.gmra.mxu2 %vm1620_vm2, %v2660_v38 }
 0x9e2   : > { %v2663_v39 = vpop.f32.mrf.mxu1 }
 0x9e3   : > { %6849 = vmatmul.msk.f32.gmra.mxu2 %vm1620_vm2, %v2663_v39 }
 0x9ea   : > { %v2666_v40 = vpop.f32.mrf.mxu1 }
 0x9eb   : > { %6850 = vmatmul.msk.f32.gmra.mxu2 %vm1620_vm2, %v2666_v40 }
 0x9f2   : > { %v2669_v46 = vpop.f32.mrf.mxu1 }
 0x9f3   : > { %6851 = vmatmul.msk.f32.gmra.mxu2 %vm1620_vm2, %v2669_v46 }
 0xa5e   : > { %v2703_v50 = vpop.f32.mrf.mxu2 }
 0xa5f   : > { %v2715_v51 = vadd.f32 %v2703_v50, %v2409_v48 }
 0xa61   : > { %v2723_v52 = vadd.f32 %v7323_v49, %v2715_v51 }
 0xa63   : > { %v2727_v54 = vadd.f32 %v2723_v52, %v8019_v17 }
 0xa65   : > { %v2733_v56 = vsel %vm1504_vm1, %v2727_v54, 0.0 }
 0xa66   : > { %2734 = vadd.xlane.f32.xlu2 %v2733_v56  ;;  %v2706_v61 = vpop.f32.mrf.mxu2 }
 0xa67   : > { %v2716_v62 = vadd.f32 %v2706_v61, %v2410_v55 }
 0xa69   : > { %v2724_v0 = vadd.f32 %v7323_v49, %v2716_v62  ;;  %v7324_v62 = vld [vmem:[%s7787_s30] ss:$0 sm:$0xff] }
 0xa6b   : > { %v2728_v63 = vadd.f32 %v2724_v0, %v8029_v29 }
 0xa6d   : > { %v2736_v2 = vsel %vm1504_vm1, %v2728_v63, 0.0 }
 0xa6e   : > { %2737 = vadd.xlane.f32.xlu0 %v2736_v2  ;;  %v2709_v58 = vpop.f32.mrf.mxu2 }
 0xa6f   : > { %v2717_v17 = vadd.f32 %v2709_v58, %v2411_v41  ;;  %v2941_v41 = vld [vmem:[%s9397_s15 + $0x70] sm:$0xff] }
 0xa71   : > { %v2725_v1 = vadd.f32 %v7323_v49, %v2717_v17 }
 0xa73   : > { %v2729_v3 = vadd.f32 %v2725_v1, %v8040_v36  ;;  %v2749_v36 = vadd.f32 %v7443_v10, %v2748_v9  ;;  %v7325_v1 = vld [vmem:[%s9398_s16] ss:$0 sm:$0xff] }
 0xa75   : > { %v2739_v5 = vsel %vm1504_vm1, %v2729_v3, 0.0  ;;  %v8312_v45 = vsel %vm2750_vm3, %v7443_v10, %v2749_v36 }
 0xa76   : > { %2740 = vadd.xlane.f32.xlu1 %v2739_v5  ;;  %v2712_v59 = vpop.f32.mrf.mxu2 }
 0xa77   : > { %v2718_v29 = vadd.f32 %v2712_v59, %v2412_v4 }
 0xa79   : > { %v2726_v6 = vadd.f32 %v7323_v49, %v2718_v29 }
 0xa7b   : > { %v2730_v44 = vadd.f32 %v2726_v6, %v8051_v42 }
 0xa7d   : > { %v2742_v7 = vsel %vm1504_vm1, %v2730_v44, 0.0 }
 0xa7e   : > { %2743 = vadd.xlane.f32.xlu2 %v2742_v7 }
 0xad9   : > { %v2735_v12 = vpop.xlane.xlu2 %2734 }
 0xada   : > { %v2752_v13 = vmul.f32 %v8312_v45, %v2735_v12 }
 0xadc   : > { %v2756_v14 = vsub.f32 %v2727_v54, %v2752_v13 }
 0xade   : > { %v2760_v15 = vmul.f32 %v2756_v14, %v2756_v14 }
 0xae0   : > { %v2764_v42 = vsel %vm1504_vm1, %v2760_v15, 0.0 }
 0xae1   : > { %2765 = vadd.xlane.f32.xlu0 %v2764_v42  ;;  %v2738_v16 = vpop.xlane.xlu0 %2737 }
 0xae2   : > { %v2753_v18 = vmul.f32 %v8312_v45, %v2738_v16 }
 0xae4   : > { %v8317_v19 = vsub.f32 %v2728_v63, %v2753_v18  ;;  %v2942_v63 = vld [vmem:[%s9397_s15 + $0x78] sm:$0xff] }
 0xae5   : > { %2943 = vmatpush.msrb.mxu0 %v2942_v63 }
 0xae6   : > { %v2761_v20 = vmul.f32 %v8317_v19, %v8317_v19 }
 0xae7   : > { %2944 = vmatpush.msrb.mxu0 %v2941_v41 }
 0xae8   : > { %v2767_v21 = vsel %vm1504_vm1, %v2761_v20, 0.0 }
 0xae9   : > { %v2741_v22 = vpop.xlane.xlu1 %2740  ;;  %2768 = vadd.xlane.f32.xlu1 %v2767_v21  ;;  %2945 = vmatpush.msrb.mxu0 %v2940_v43 }
 0xaea   : > { %v2754_v23 = vmul.f32 %v8312_v45, %v2741_v22 }
 0xaec   : > { %v8323_v24 = vsub.f32 %v2729_v3, %v2754_v23 }
 0xaee   : > { %v2762_v25 = vmul.f32 %v8323_v24, %v8323_v24 }
 0xaf0   : > { %v2770_v26 = vsel %vm1504_vm1, %v2762_v25, 0.0 }
 0xaf1   : > { %2771 = vadd.xlane.f32.xlu2 %v2770_v26  ;;  %v2744_v27 = vpop.xlane.xlu2 %2743 }
 0xaf2   : > { %v2755_v28 = vmul.f32 %v8312_v45, %v2744_v27 }
 0xaf4   : > { %v8329_v30 = vsub.f32 %v2730_v44, %v2755_v28 }
 0xaf6   : > { %v2763_v31 = vmul.f32 %v8329_v30, %v8329_v30 }
 0xaf8   : > { %v2773_v32 = vsel %vm1504_vm1, %v2763_v31, 0.0 }
 0xaf9   : > { %2774 = vadd.xlane.f32.xlu0 %v2773_v32  ;;  %v2939_v32 = vld [vmem:[%s9397_s15 + $0x60] sm:$0xff] }
 0xafa   : > { %2946 = vmatpush.msrb.mxu0 %v2939_v32 }
 0xafc   : > { %2947 = vmatpush.msrb.mxu0 %v2938_v33 }
 0xafe   : > { %2948 = vmatpush.msrb.mxu0 %v2937_v34 }
 0xb00   : > { %2949 = vmatpush.msrb.mxu0 %v2936_v35 }
 0xb54   : > { %v2766_v38 = vpop.xlane.xlu0 %2765 }
 0xb55   : > { %v2776_v39 = vmul.f32 %v2766_v38, %v8312_v45  ;;  %v2933_v38 = vld [vmem:[%s9397_s15 + $0x30] sm:$0xff] }
 0xb57   : > { %v2780_v40 = vadd.f32 1e-05, %v2776_v39  ;;  %v2932_v39 = vld [vmem:[%s9397_s15 + $0x28] sm:$0xff] }
 0xb59   : > { %7444 = vrsqrt.f32 %v2780_v40  ;;  %vm2790_vm5 = vweird.f32 %v2780_v40 }
 0xb5c   : > { %v2769_v46 = vpop.xlane.xlu1 %2768 }
 0xb5d   : > { %v2777_v47 = vmul.f32 %v2769_v46, %v8312_v45  ;;  %v2930_v46 = vld [vmem:[%s9397_s15 + $0x18] sm:$0xff] }
 0xb5f   : > { %v7445_v48 = vpop.eup %7444  ;;  %v2781_v49 = vadd.f32 1e-05, %v2777_v47  ;;  %v2929_v47 = vld [vmem:[%s9397_s15 + $0x10] sm:$0xff] }
 0xb60   : > { %v2785_v50 = vmul.f32 %v7445_v48, %v2780_v40  ;;  %vm2791_vm4 = vweird.f32 %v7445_v48  ;;  %v2931_v40 = vld [vmem:[%s9397_s15 + $0x20] sm:$0xff] }
 0xb61   : > { %7446 = vrsqrt.f32 %v2781_v49  ;;  %vm2792_vm6 = vmor %vm2790_vm5, %vm2791_vm4  ;;  %vm2800_vm8 = vweird.f32 %v2781_v49 }
 0xb62   : > { %v2786_v51 = vmul.f32 %v7445_v48, %v2785_v50  ;;  %v7326_v50 = vld [vmem:[%s9399_s18] ss:$0 sm:$0xff] }
 0xb64   : > { %v2787_v52 = vmul.f32 0.5, %v2786_v51  ;;  %v2772_v53 = vpop.xlane.xlu2 %2771 }
 0xb65   : > { %v2778_v54 = vmul.f32 %v2772_v53, %v8312_v45 }
 0xb66   : > { %v2788_v55 = vsub.f32 1.5, %v2787_v52 }
 0xb67   : > { %v7447_v56 = vpop.eup %7446  ;;  %v2782_v61 = vadd.f32 1e-05, %v2778_v54 }
 0xb68   : > { %v2789_v0 = vmul.f32 %v7445_v48, %v2788_v55  ;;  %v2795_v57 = vmul.f32 %v7447_v56, %v2781_v49  ;;  %vm2801_vm7 = vweird.f32 %v7447_v56  ;;  %v2927_v49 = vld [vmem:[%s9397_s15] sm:$0xff] }
 0xb69   : > { %7448 = vrsqrt.f32 %v2782_v61  ;;  %vm2802_vm9 = vmor %vm2800_vm8, %vm2801_vm7  ;;  %vm2810_vm11 = vweird.f32 %v2782_v61 }
 0xb6a   : > { %v2793_v2 = vsel %vm2792_vm6, %v7445_v48, %v2789_v0  ;;  %v2796_v58 = vmul.f32 %v7447_v56, %v2795_v57  ;;  %v2928_v48 = vld [vmem:[%s9397_s15 + $0x8] sm:$0xff] }
 0xb6b   : > { %v2824_v17 = vmul.f32 %v2793_v2, %v2756_v14 }
 0xb6c   : > { %v2797_v3 = vmul.f32 0.5, %v2796_v58  ;;  %v2775_v4 = vpop.xlane.xlu0 %2774 }
 0xb6d   : > { %v2831_v5 = vmul.f32 %v7324_v62, %v2824_v17  ;;  %v2779_v59 = vmul.f32 %v2775_v4, %v8312_v45 }
 0xb6e   : > { %v2798_v29 = vsub.f32 1.5, %v2797_v3 }
 0xb6f   : > { %v7449_v6 = vpop.eup %7448  ;;  %v2783_v44 = vadd.f32 1e-05, %v2779_v59  ;;  %v8347_v7 = vadd.f32 %v7325_v1, %v2831_v5 }
 0xb70   : > { %v2799_v8 = vmul.f32 %v7447_v56, %v2798_v29  ;;  %v2805_v10 = vmul.f32 %v7449_v6, %v2782_v61  ;;  %vm2811_vm10 = vweird.f32 %v7449_v6 }
 0xb71   : > { %7450 = vrsqrt.f32 %v2783_v44  ;;  %6852 = vmatmul.msk.f32.vlgmr.msra.gmra.mxu3 %vm1504_vm1, %v8347_v7  ;;  %vm2812_vm12 = vmor %vm2810_vm11, %vm2811_vm10  ;;  %vm2820_vm14 = vweird.f32 %v2783_v44 }
 0xb72   : > { %v2803_v11 = vsel %vm2802_vm9, %v7447_v56, %v2799_v8  ;;  %v2806_v60 = vmul.f32 %v7449_v6, %v2805_v10 }
 0xb73   : > { %v2825_v9 = vmul.f32 %v2803_v11, %v8317_v19 }
 0xb74   : > { %v2807_v36 = vmul.f32 0.5, %v2806_v60 }
 0xb75   : > { %v2832_v12 = vmul.f32 %v7324_v62, %v2825_v9 }
 0xb76   : > { %v2808_v13 = vsub.f32 1.5, %v2807_v36 }
 0xb77   : > { %v7451_v14 = vpop.eup %7450  ;;  %v8352_v15 = vadd.f32 %v7325_v1, %v2832_v12 }
 0xb78   : > { %v2809_v42 = vmul.f32 %v7449_v6, %v2808_v13  ;;  %v2815_v16 = vmul.f32 %v7451_v14, %v2783_v44  ;;  %vm2821_vm13 = vweird.f32 %v7451_v14 }
 0xb79   : > { %6853 = vmatmul.msk.f32.gmra.mxu3 %vm1504_vm1, %v8352_v15  ;;  %vm2822_vm15 = vmor %vm2820_vm14, %vm2821_vm13 }
 0xb7a   : > { %v2813_v18 = vsel %vm2812_vm12, %v7449_v6, %v2809_v42  ;;  %v2816_v20 = vmul.f32 %v7451_v14, %v2815_v16 }
 0xb7b   : > { %v2826_v21 = vmul.f32 %v2813_v18, %v8323_v24 }
 0xb7c   : > { %v2817_v19 = vmul.f32 0.5, %v2816_v20 }
 0xb7d   : > { %v2833_v22 = vmul.f32 %v7324_v62, %v2826_v21 }
 0xb7e   : > { %v2818_v23 = vsub.f32 1.5, %v2817_v19 }
 0xb7f   : > { %v8357_v25 = vadd.f32 %v7325_v1, %v2833_v22 }
 0xb80   : > { %v2819_v26 = vmul.f32 %v7451_v14, %v2818_v23 }
 0xb81   : > { %6854 = vmatmul.msk.f32.gmra.mxu3 %vm1504_vm1, %v8357_v25 }
 0xb82   : > { %v2823_v27 = vsel %vm2822_vm15, %v7451_v14, %v2819_v26 }
 0xb83   : > { %v2827_v24 = vmul.f32 %v2823_v27, %v8329_v30  ;;  %v2935_v30 = vld [vmem:[%s9397_s15 + $0x40] sm:$0xff] }
 0xb84   : > { %2950 = vmatpush.msrb.mxu0 %v2935_v30 }
 0xb85   : > { %v2834_v28 = vmul.f32 %v7324_v62, %v2827_v24 }
 0xb86   : > { %2951 = vmatpush.msrb.mxu0 %v2934_v37 }
 0xb87   : > { %v8362_v31 = vadd.f32 %v7325_v1, %v2834_v28  ;;  %v7327_v28 = vld [vmem:[%s9400_s22] ss:$0 sm:$0xff] }
 0xb88   : > { %2952 = vmatpush.msrb.mxu0 %v2933_v38 }
 0xb89   : > { %6855 = vmatmul.msk.f32.gmra.mxu3 %vm1504_vm1, %v8362_v31 }
 0xb8a   : > { %2953 = vmatpush.msrb.mxu0 %v2932_v39 }
 0xb8c   : > { %2954 = vmatpush.msrb.mxu0 %v2931_v40 }
 0xb8e   : > { %2955 = vmatpush.msrb.mxu0 %v2930_v46 }
 0xb90   : > { %2956 = vmatpush.msrb.mxu0 %v2929_v47 }
 0xb92   : > { %2957 = vmatpush.msrb.mxu0 %v2928_v48 }
 0xb94   : > { %2958 = vmatpush.msrb.mxu0 %v2927_v49 }
 0xbf4   : > { %v2879_v51 = vpop.f32.mrf.mxu3 }
 0xbf5   : > { %v2880_v52 = vadd.f32 %v7326_v50, %v2879_v51 }
 0xbf7   : > { %v2891_v53 = vmul.f32 %v2880_v52, %v2880_v52 }
 0xbf9   : > { %v2895_v54 = vmul.f32 %v2891_v53, %v2880_v52 }
 0xbfb   : > { %v2899_v55 = vmul.f32 0.044715, %v2895_v54 }
 0xbfc   : > { %v2882_v56 = vpop.f32.mrf.mxu3 }
 0xbfd   : > { %v2903_v61 = vadd.f32 %v2899_v55, %v2880_v52  ;;  %v2883_v62 = vadd.f32 %v7326_v50, %v2882_v56 }
 0xbff   : > { %v2907_v0 = vmul.f32 0.7978846, %v2903_v61  ;;  %v2892_v57 = vmul.f32 %v2883_v62, %v2883_v62 }
 0xc01   : > { %7452 = vtanh.f32 %v2907_v0  ;;  %v2896_v63 = vmul.f32 %v2892_v57, %v2883_v62 }
 0xc03   : > { %v2900_v41 = vmul.f32 0.044715, %v2896_v63 }
 0xc04   : > { %v2885_v2 = vpop.f32.mrf.mxu3 }
 0xc05   : > { %v2886_v58 = vadd.f32 %v7326_v50, %v2885_v2  ;;  %v2904_v17 = vadd.f32 %v2900_v41, %v2883_v62 }
 0xc07   : > { %v7453_v1 = vpop.eup %7452  ;;  %v2893_v43 = vmul.f32 %v2886_v58, %v2886_v58  ;;  %v2908_v3 = vmul.f32 0.7978846, %v2904_v17 }
 0xc08   : > { %v2915_v4 = vadd.f32 1.0, %v7453_v1 }
 0xc09   : > { %v2897_v5 = vmul.f32 %v2893_v43, %v2886_v58  ;;  %7454 = vtanh.f32 %v2908_v3 }
 0xc0a   : > { %v2919_v59 = vmul.f32 0.5, %v2915_v4  ;;  %v6868_v4 = vld [vmem:[%s7752_s25 + $0x98] sm:$0xff] }
 0xc0b   : > { %v2901_v29 = vmul.f32 0.044715, %v2897_v5  ;;  %v6859_v5 = vld [vmem:[%s7747_s21 + $0x98] sm:$0xff]  ;;  %3161 = vmatpush.msrb.mxu2 %v6868_v4 }
 0xc0c   : > { %v2923_v6 = vmul.f32 %v2919_v59, %v2880_v52  ;;  %v2888_v44 = vpop.f32.mrf.mxu3  ;;  %v6877_v59 = vld [vmem:[%s7757_s29 + $0x98] sm:$0xff]  ;;  %3122 = vmatpush.msrb.mxu1 %v6859_v5 }
 0xc0d   : > { %v2889_v8 = vadd.f32 %v7326_v50, %v2888_v44  ;;  %v2905_v10 = vadd.f32 %v2901_v29, %v2886_v58  ;;  %3200 = vmatpush.msrb.mxu3 %v6877_v59  ;;  %v6858_v29 = vld [vmem:[%s7747_s21 + $0x90] sm:$0xff] }
 0xc0e   : > { %2959 = vmatmul.f32.vlgmr.msrb.gmra.mxu0 %v2923_v6  ;;  %v6867_v6 = vld [vmem:[%s7752_s25 + $0x90] sm:$0xff]  ;;  %3123 = vmatpush.msrb.mxu1 %v6858_v29 }
 0xc0f   : > { %v7455_v11 = vpop.eup %7454  ;;  %v2894_v60 = vmul.f32 %v2889_v8, %v2889_v8  ;;  %v2909_v9 = vmul.f32 0.7978846, %v2905_v10  ;;  %v6876_v44 = vld [vmem:[%s7757_s29 + $0x90] sm:$0xff]  ;;  %3162 = vmatpush.msrb.mxu2 %v6867_v6  ;;  %v6866_v10 = vld [vmem:[%s7752_s25 + $0x88] sm:$0xff] }
 0xc10   : > { %v2916_v36 = vadd.f32 1.0, %v7455_v11  ;;  %3201 = vmatpush.msrb.mxu3 %v6876_v44  ;;  %v6875_v11 = vld [vmem:[%s7757_s29 + $0x88] sm:$0xff] }
 0xc11   : > { %v2898_v12 = vmul.f32 %v2894_v60, %v2889_v8  ;;  %7456 = vtanh.f32 %v2909_v9  ;;  %3163 = vmatpush.msrb.mxu2 %v6866_v10  ;;  %v6856_v60 = vld [vmem:[%s7747_s21 + $0x80] sm:$0xff] }
 0xc12   : > { %v2920_v13 = vmul.f32 0.5, %v2916_v36  ;;  %3202 = vmatpush.msrb.mxu3 %v6875_v11  ;;  %v6865_v9 = vld [vmem:[%s7752_s25 + $0x80] sm:$0xff] }
 0xc13   : > { %v2902_v14 = vmul.f32 0.044715, %v2898_v12  ;;  %v6874_v36 = vld [vmem:[%s7757_s29 + $0x80] sm:$0xff]  ;;  %3164 = vmatpush.msrb.mxu2 %v6865_v9 }
 0xc14   : > { %v2924_v42 = vmul.f32 %v2920_v13, %v2883_v62  ;;  %3203 = vmatpush.msrb.mxu3 %v6874_v36 }
 0xc15   : > { %v2906_v16 = vadd.f32 %v2902_v14, %v2889_v8 }
 0xc16   : > { %2962 = vmatmul.f32.gmra.mxu0 %v2924_v42 }
 0xc17   : > { %v7457_v18 = vpop.eup %7456  ;;  %v2910_v20 = vmul.f32 0.7978846, %v2906_v16 }
 0xc18   : > { %v2917_v21 = vadd.f32 1.0, %v7457_v18 }
 0xc19   : > { %7458 = vtanh.f32 %v2910_v20 }
 0xc1a   : > { %v2921_v19 = vmul.f32 0.5, %v2917_v21 }
 0xc1c   : > { %v2925_v22 = vmul.f32 %v2921_v19, %v2886_v58 }
 0xc1e   : > { %2965 = vmatmul.f32.gmra.mxu0 %v2925_v22 }
 0xc1f   : > { %v7459_v23 = vpop.eup %7458 }
 0xc20   : > { %v2918_v26 = vadd.f32 1.0, %v7459_v23 }
 0xc22   : > { %v2922_v27 = vmul.f32 0.5, %v2918_v26 }
 0xc24   : > { %v2926_v24 = vmul.f32 %v2922_v27, %v2889_v8  ;;  %v6857_v8 = vld [vmem:[%s7747_s21 + $0x88] sm:$0xff] }
 0xc25   : > { %3124 = vmatpush.msrb.mxu1 %v6857_v8 }
 0xc26   : > { %2968 = vmatmul.f32.gmra.mxu0 %v2926_v24 }
 0xc27   : > { %3125 = vmatpush.msrb.mxu1 %v6856_v60 }
 0xc8b   : > { %v2960_v32 = vpop.f32.mrf.mxu0 }
 0xc8c   : > { %v2972_v33 = vadd.f32 %v2960_v32, %v8347_v7 }
 0xc8e   : > { %v2980_v34 = vadd.f32 %v7327_v28, %v2972_v33 }
 0xc90   : > { %v2986_v35 = vsel %vm1504_vm1, %v2980_v34, 0.0 }
 0xc91   : > { %2987 = vadd.xlane.f32.xlu1 %v2986_v35 }
 0xc93   : > { %v2963_v30 = vpop.f32.mrf.mxu0 }
 0xc94   : > { %v2973_v37 = vadd.f32 %v2963_v30, %v8352_v15 }
 0xc96   : > { %v2981_v38 = vadd.f32 %v7327_v28, %v2973_v37  ;;  %v6899_v37 = vld [vmem:[%s7747_s21 + $0xb8] sm:$0xff] }
 0xc97   : > { %3383 = vmatpush.msra.mxu2 %v6899_v37  ;;  %v6917_v37 = vld [vmem:[%s7757_s29 + $0xb8] sm:$0xff] }
 0xc98   : > { %v2989_v39 = vsel %vm1504_vm1, %v2981_v38, 0.0 }
 0xc99   : > { %2990 = vadd.xlane.f32.xlu2 %v2989_v39  ;;  %v6898_v39 = vld [vmem:[%s7747_s21 + $0xb0] sm:$0xff] }
 0xc9a   : > { %3384 = vmatpush.msra.mxu2 %v6898_v39  ;;  %v6916_v39 = vld [vmem:[%s7757_s29 + $0xb0] sm:$0xff] }
 0xc9b   : > { %v2966_v40 = vpop.f32.mrf.mxu0 }
 0xc9c   : > { %v2974_v46 = vadd.f32 %v2966_v40, %v8357_v25  ;;  %v8435_v40 = vld [vmem:[%s9402_s26] ss:$0 sm:$0xff] }
 0xc9e   : > { %v2982_v47 = vadd.f32 %v7327_v28, %v2974_v46 }
 0xca0   : > { %v2992_v48 = vsel %vm1504_vm1, %v2982_v47, 0.0 }
 0xca1   : > { %2993 = vadd.xlane.f32.xlu0 %v2992_v48 }
 0xca3   : > { %v2969_v49 = vpop.f32.mrf.mxu0 }
 0xca4   : > { %v2975_v7 = vadd.f32 %v2969_v49, %v8362_v31 }
 0xca6   : > { %v2983_v50 = vadd.f32 %v7327_v28, %v2975_v7  ;;  %v6897_v7 = vld [vmem:[%s7747_s21 + $0xa8] sm:$0xff] }
 0xca7   : > { %3385 = vmatpush.msra.mxu2 %v6897_v7 }
 0xca8   : > { %v2995_v51 = vsel %vm1504_vm1, %v2983_v50, 0.0 }
 0xca9   : > { %2996 = vadd.xlane.f32.xlu1 %v2995_v51 }
 0xd04   : > { %v2988_v52 = vpop.xlane.xlu1 %2987 }
 0xd05   : > { %v2998_v15 = vmul.f32 %v2988_v52, %v8312_v45 }
 0xd07   : > { %v8390_v53 = vsub.f32 %v2980_v34, %v2998_v15  ;;  %v8429_v34 = vld [vmem:[%s9401_s23] ss:$0 sm:$0xff] }
 0xd09   : > { %v3006_v54 = vmul.f32 %v8390_v53, %v8390_v53 }
 0xd0b   : > { %v3010_v25 = vsel %vm1504_vm1, %v3006_v54, 0.0 }
 0xd0c   : > { %3011 = vadd.xlane.f32.xlu2 %v3010_v25  ;;  %v2991_v55 = vpop.xlane.xlu2 %2990 }
 0xd0d   : > { %v2999_v56 = vmul.f32 %v2991_v55, %v8312_v45  ;;  %v6896_v55 = vld [vmem:[%s7747_s21 + $0xa0] sm:$0xff] }
 0xd0e   : > { %3386 = vmatpush.msra.mxu2 %v6896_v55 }
 0xd0f   : > { %v8396_v61 = vsub.f32 %v2981_v38, %v2999_v56  ;;  %v6908_v38 = vld [vmem:[%s7752_s25 + $0xb8] sm:$0xff] }
 0xd10   : > { %3422 = vmatpush.msra.mxu3 %v6908_v38 }
 0xd11   : > { %v3007_v31 = vmul.f32 %v8396_v61, %v8396_v61 }
 0xd13   : > { %v3013_v62 = vsel %vm1504_vm1, %v3007_v31, 0.0 }
 0xd14   : > { %v2994_v0 = vpop.xlane.xlu0 %2993  ;;  %3014 = vadd.xlane.f32.xlu0 %v3013_v62  ;;  %v6905_v62 = vld [vmem:[%s7752_s25 + $0xa0] sm:$0xff] }
 0xd15   : > { %v3000_v57 = vmul.f32 %v2994_v0, %v8312_v45 }
 0xd17   : > { %v8402_v63 = vsub.f32 %v2982_v47, %v3000_v57  ;;  %v6907_v47 = vld [vmem:[%s7752_s25 + $0xb0] sm:$0xff] }
 0xd18   : > { %3423 = vmatpush.msra.mxu3 %v6907_v47  ;;  %v6915_v47 = vld [vmem:[%s7757_s29 + $0xa8] sm:$0xff] }
 0xd19   : > { %v3008_v41 = vmul.f32 %v8402_v63, %v8402_v63 }
 0xd1b   : > { %v3016_v2 = vsel %vm1504_vm1, %v3008_v41, 0.0 }
 0xd1c   : > { %3017 = vadd.xlane.f32.xlu1 %v3016_v2  ;;  %v2997_v58 = vpop.xlane.xlu1 %2996 }
 0xd1d   : > { %v3001_v17 = vmul.f32 %v2997_v58, %v8312_v45 }
 0xd1f   : > { %v8408_v1 = vsub.f32 %v2983_v50, %v3001_v17  ;;  %v6906_v50 = vld [vmem:[%s7752_s25 + $0xa8] sm:$0xff] }
 0xd20   : > { %3424 = vmatpush.msra.mxu3 %v6906_v50 }
 0xd21   : > { %v3009_v43 = vmul.f32 %v8408_v1, %v8408_v1 }
 0xd22   : > { %3425 = vmatpush.msra.mxu3 %v6905_v62 }
 0xd23   : > { %v3019_v3 = vsel %vm1504_vm1, %v3009_v43, 0.0 }
 0xd24   : > { %3020 = vadd.xlane.f32.xlu2 %v3019_v3 }
 0xd7f   : > { %v3012_v12 = vpop.xlane.xlu2 %3011 }
 0xd80   : > { %v3022_v13 = vmul.f32 %v3012_v12, %v8312_v45 }
 0xd82   : > { %v3026_v14 = vadd.f32 1e-05, %v3022_v13 }
 0xd84   : > { %7460 = vrsqrt.f32 %v3026_v14  ;;  %vm3036_vm3 = vweird.f32 %v3026_v14 }
 0xd87   : > { %v3015_v42 = vpop.xlane.xlu0 %3014 }
 0xd88   : > { %v3023_v16 = vmul.f32 %v3015_v42, %v8312_v45 }
 0xd8a   : > { %v7461_v18 = vpop.eup %7460  ;;  %v3027_v20 = vadd.f32 1e-05, %v3023_v16 }
 0xd8b   : > { %v3031_v21 = vmul.f32 %v7461_v18, %v3026_v14  ;;  %vm3037_vm0 = vweird.f32 %v7461_v18 }
 0xd8c   : > { %7462 = vrsqrt.f32 %v3027_v20  ;;  %vm3038_vm4 = vmor %vm3036_vm3, %vm3037_vm0  ;;  %vm3046_vm6 = vweird.f32 %v3027_v20 }
 0xd8d   : > { %v3032_v19 = vmul.f32 %v7461_v18, %v3031_v21 }
 0xd8f   : > { %v3033_v22 = vmul.f32 0.5, %v3032_v19  ;;  %v3018_v23 = vpop.xlane.xlu1 %3017 }
 0xd90   : > { %v3024_v26 = vmul.f32 %v3018_v23, %v8312_v45 }
 0xd91   : > { %v3034_v27 = vsub.f32 1.5, %v3033_v22 }
 0xd92   : > { %v7463_v24 = vpop.eup %7462  ;;  %v3028_v28 = vadd.f32 1e-05, %v3024_v26 }
 0xd93   : > { %v3035_v32 = vmul.f32 %v7461_v18, %v3034_v27  ;;  %v3041_v33 = vmul.f32 %v7463_v24, %v3027_v20  ;;  %vm3047_vm5 = vweird.f32 %v7463_v24  ;;  %v7332_v20 = vld [vmem:[%s7772_s14 + $0x4] ss:$0 sm:$0xff] }
 0xd94   : > { %7464 = vrsqrt.f32 %v3028_v28  ;;  %vm3048_vm7 = vmor %vm3046_vm6, %vm3047_vm5  ;;  %vm3056_vm9 = vweird.f32 %v3028_v28 }
 0xd95   : > { %v3039_v35 = vsel %vm3038_vm4, %v7461_v18, %v3035_v32  ;;  %v3042_v30 = vmul.f32 %v7463_v24, %v3041_v33  ;;  %v7331_v18 = vld [vmem:[%s9394_s8 + $0x4] ss:$0 sm:$0xff] }
 0xd96   : > { %v3070_v46 = vmul.f32 %v3039_v35, %v8390_v53  ;;  %v7330_v35 = vld [vmem:[%s9395_s3 + $0x4] ss:$0 sm:$0xff] }
 0xd97   : > { %v3043_v48 = vmul.f32 0.5, %v3042_v30  ;;  %v3021_v49 = vpop.xlane.xlu2 %3020 }
 0xd98   : > { %v3077_v51 = vmul.f32 %v8429_v34, %v3070_v46  ;;  %v3025_v52 = vmul.f32 %v3021_v49, %v8312_v45 }
 0xd99   : > { %v3044_v15 = vsub.f32 1.5, %v3043_v48  ;;  %v6914_v48 = vld [vmem:[%s7757_s29 + $0xa0] sm:$0xff] }
 0xd9a   : > { %v7465_v54 = vpop.eup %7464  ;;  %v8444_v53 = vadd.f32 %v8435_v40, %v3077_v51  ;;  %v3029_v25 = vadd.f32 1e-05, %v3025_v52  ;;  %v7334_v52 = vld [vmem:[%s9394_s8 + $0x5] ss:$0 sm:$0xff] }
 0xd9b   : > { %v3045_v56 = vmul.f32 %v7463_v24, %v3044_v15  ;;  %v3051_v31 = vmul.f32 %v7465_v54, %v3028_v28  ;;  %vm3057_vm8 = vweird.f32 %v7465_v54 }
 0xd9c   : > { %7466 = vrsqrt.f32 %v3029_v25  ;;  %6861 = vmatmul.msk.f32.vlgmr.msrb.gmra.mxu1 %vm1504_vm1, %v8444_v53  ;;  %6870 = vmatmul.msk.f32.vlgmr.msrb.gmra.mxu2 %vm1504_vm1, %v8444_v53  ;;  %vm3058_vm10 = vmor %vm3056_vm9, %vm3057_vm8  ;;  %vm3066_vm12 = vweird.f32 %v3029_v25 }
 0xd9d   : > { %v3049_v0 = vsel %vm3048_vm7, %v7463_v24, %v3045_v56  ;;  %v3052_v57 = vmul.f32 %v7465_v54, %v3051_v31  ;;  %6879 = vmatmul.msk.f32.vlgmr.msrb.gmra.mxu3 %vm1504_vm1, %v8444_v53 }
 0xd9e   : > { %v3071_v41 = vmul.f32 %v3049_v0, %v8396_v61 }
 0xd9f   : > { %v3053_v2 = vmul.f32 0.5, %v3052_v57 }
 0xda0   : > { %v3078_v58 = vmul.f32 %v8429_v34, %v3071_v41 }
 0xda1   : > { %v3054_v17 = vsub.f32 1.5, %v3053_v2 }
 0xda2   : > { %v7467_v43 = vpop.eup %7466  ;;  %v8457_v3 = vadd.f32 %v8435_v40, %v3078_v58 }
 0xda3   : > { %v3055_v4 = vmul.f32 %v7465_v54, %v3054_v17  ;;  %v3061_v5 = vmul.f32 %v7467_v43, %v3029_v25  ;;  %vm3067_vm11 = vweird.f32 %v7467_v43 }
 0xda4   : > { %6862 = vmatmul.msk.f32.gmra.mxu1 %vm1504_vm1, %v8457_v3  ;;  %6871 = vmatmul.msk.f32.gmra.mxu2 %vm1504_vm1, %v8457_v3  ;;  %vm3068_vm13 = vmor %vm3066_vm12, %vm3067_vm11 }
 0xda5   : > { %v3059_v61 = vsel %vm3058_vm10, %v7465_v54, %v3055_v4  ;;  %v3062_v59 = vmul.f32 %v7467_v43, %v3061_v5  ;;  %6880 = vmatmul.msk.f32.gmra.mxu3 %vm1504_vm1, %v8457_v3 }
 0xda6   : > { %v3072_v29 = vmul.f32 %v3059_v61, %v8402_v63 }
 0xda7   : > { %v3063_v6 = vmul.f32 0.5, %v3062_v59 }
 0xda8   : > { %v3079_v44 = vmul.f32 %v8429_v34, %v3072_v29 }
 0xda9   : > { %v3064_v8 = vsub.f32 1.5, %v3063_v6 }
 0xdaa   : > { %v8468_v10 = vadd.f32 %v8435_v40, %v3079_v44 }
 0xdab   : > { %v3065_v11 = vmul.f32 %v7467_v43, %v3064_v8 }
 0xdac   : > { %6863 = vmatmul.msk.f32.gmra.mxu1 %vm1504_vm1, %v8468_v10  ;;  %6872 = vmatmul.msk.f32.gmra.mxu2 %vm1504_vm1, %v8468_v10 }
 0xdad   : > { %v3069_v60 = vsel %vm3068_vm13, %v7467_v43, %v3065_v11  ;;  %6881 = vmatmul.msk.f32.gmra.mxu3 %vm1504_vm1, %v8468_v10  ;;  %v7335_v11 = vld [vmem:[%s7772_s14 + $0x5] ss:$0 sm:$0xff] }
 0xdae   : > { %v3073_v63 = vmul.f32 %v3069_v60, %v8408_v1 }
 0xdb0   : > { %v3080_v9 = vmul.f32 %v8429_v34, %v3073_v63 }
 0xdb2   : > { %v8479_v36 = vadd.f32 %v8435_v40, %v3080_v9 }
 0xdb4   : > { %6864 = vmatmul.msk.f32.gmra.mxu1 %vm1504_vm1, %v8479_v36  ;;  %6873 = vmatmul.msk.f32.gmra.mxu2 %vm1504_vm1, %v8479_v36 }
 0xdb5   : > { %6882 = vmatmul.msk.f32.gmra.mxu3 %vm1504_vm1, %v8479_v36 }
 0xdbc   : > { %6901 = vmatmul.msk.f32.vlgmr.msra.gmra.mxu2 %vm1504_vm1, %v8444_v53 }
 0xdbd   : > { %6910 = vmatmul.msk.f32.vlgmr.msra.gmra.mxu3 %vm1504_vm1, %v8444_v53 }
 0xdc4   : > { %6902 = vmatmul.msk.f32.gmra.mxu2 %vm1504_vm1, %v8457_v3 }
 0xdc5   : > { %6911 = vmatmul.msk.f32.gmra.mxu3 %vm1504_vm1, %v8457_v3 }
 0xdcc   : > { %6903 = vmatmul.msk.f32.gmra.mxu2 %vm1504_vm1, %v8468_v10 }
 0xdcd   : > { %6912 = vmatmul.msk.f32.gmra.mxu3 %vm1504_vm1, %v8468_v10 }
 0xdd4   : > { %6904 = vmatmul.msk.f32.gmra.mxu2 %vm1504_vm1, %v8479_v36 }
 0xdd5   : > { %6913 = vmatmul.msk.f32.gmra.mxu3 %vm1504_vm1, %v8479_v36 }
 0xe19   : > { %v3127_v28 = vpop.f32.mrf.mxu1 }
 0xe1a   : > { %v3128_v38 = vadd.f32 %v7330_v35, %v3127_v28 }
 0xe1f   : > { %v3166_v1 = vpop.f32.mrf.mxu2 }
 0xe20   : > { %v3205_v12 = vpop.f32.mrf.mxu3  ;;  %v3167_v30 = vadd.f32 %v7331_v18, %v3166_v1 }
 0xe21   : > { %v3206_v32 = vadd.f32 %v7332_v20, %v3205_v12  ;;  %v3130_v40 = vpop.f32.mrf.mxu1 }
 0xe22   : > { %v3131_v49 = vadd.f32 %v7330_v35, %v3130_v40 }
 0xe27   : > { %v3169_v13 = vpop.f32.mrf.mxu2 }
 0xe28   : > { %v3208_v14 = vpop.f32.mrf.mxu3  ;;  %v3170_v33 = vadd.f32 %v7331_v18, %v3169_v13 }
 0xe29   : > { %v3209_v24 = vadd.f32 %v7332_v20, %v3208_v14  ;;  %v3133_v50 = vpop.f32.mrf.mxu1 }
 0xe2a   : > { %v3134_v51 = vadd.f32 %v7330_v35, %v3133_v50 }
 0xe2f   : > { %v3172_v42 = vpop.f32.mrf.mxu2 }
 0xe30   : > { %v3211_v16 = vpop.f32.mrf.mxu3  ;;  %v3173_v27 = vadd.f32 %v7331_v18, %v3172_v42 }
 0xe31   : > { %v3212_v26 = vadd.f32 %v7332_v20, %v3211_v16  ;;  %v3136_v25 = vpop.f32.mrf.mxu1 }
 0xe32   : > { %v3137_v56 = vadd.f32 %v7330_v35, %v3136_v25  ;;  %v6947_v25 = vld [vmem:[%s7747_s21 + $0xd8] sm:$0xff] }
 0xe37   : > { %v3175_v21 = vpop.f32.mrf.mxu2 }
 0xe38   : > { %v3176_v19 = vadd.f32 %v7331_v18, %v3175_v21  ;;  %v3214_v22 = vpop.f32.mrf.mxu3 }
 0xe39   : > { %v3215_v23 = vadd.f32 %v7332_v20, %v3214_v22 }
 0xe3a   : > { %6883 = vmatpush.xpose.msk.msra.mxu0 %vm1620_vm2, %v3176_v19 }
 0xe3b   : > { %3342 = vmatpush.msra.mxu1 %v3215_v23 }
 0xe3d   : > { %3343 = vmatpush.msra.mxu1 %v3212_v26 }
 0xe3e   : > { %6884 = vmatpush.xpose.msk.msra.mxu0 %vm1620_vm2, %v3173_v27 }
 0xe3f   : > { %3344 = vmatpush.msra.mxu1 %v3209_v24 }
 0xe40   : > { %v3427_v34 = vpop.f32.mrf.mxu3 }
 0xe41   : > { %3345 = vmatpush.msra.mxu1 %v3206_v32  ;;  %v3428_v62 = vadd.f32 %v7334_v52, %v3427_v34 }
 0xe42   : > { %6885 = vmatpush.xpose.msk.msra.mxu0 %vm1620_vm2, %v3170_v33 }
 0xe46   : > { %6886 = vmatpush.xpose.msk.msra.mxu0 %vm1620_vm2, %v3167_v30 }
 0xe48   : > { %v3430_v46 = vpop.f32.mrf.mxu3 }
 0xe49   : > { %6887 = vmatmul.msk.f32.vlgmr.msra.gmra.mxu0 %vm1620_vm2, %v3128_v38  ;;  %v3431_v31 = vadd.f32 %v7334_v52, %v3430_v46 }
 0xe4a   : > { %3461 = vmatpush.msrb.mxu0 %v6917_v37 }
 0xe4c   : > { %3462 = vmatpush.msrb.mxu0 %v6916_v39 }
 0xe4e   : > { %3463 = vmatpush.msrb.mxu0 %v6915_v47 }
 0xe50   : > { %3464 = vmatpush.msrb.mxu0 %v6914_v48  ;;  %v3433_v7 = vpop.f32.mrf.mxu3 }
 0xe51   : > { %6888 = vmatmul.msk.f32.gmra.mxu0 %vm1620_vm2, %v3131_v49  ;;  %v3434_v55 = vadd.f32 %v7334_v52, %v3433_v7 }
 0xe58   : > { %v3436_v15 = vpop.f32.mrf.mxu3 }
 0xe59   : > { %v3437_v54 = vadd.f32 %v7334_v52, %v3436_v15  ;;  %6889 = vmatmul.msk.f32.gmra.mxu0 %vm1620_vm2, %v3134_v51  ;;  %v3388_v15 = vpop.f32.mrf.mxu2 }
 0xe5b   : > { %6923 = vmatpush.xpose.msk.msrb.mxu1 %vm1620_vm2, %v3437_v54 }
 0xe5f   : > { %6924 = vmatpush.xpose.msk.msrb.mxu1 %vm1620_vm2, %v3434_v55  ;;  %v6946_v55 = vld [vmem:[%s7747_s21 + $0xd0] sm:$0xff] }
 0xe61   : > { %6890 = vmatmul.msk.f32.gmra.mxu0 %vm1620_vm2, %v3137_v56  ;;  %v7333_v56 = vld [vmem:[%s9395_s3 + $0x5] ss:$0 sm:$0xff] }
 0xe63   : > { %6925 = vmatpush.xpose.msk.msrb.mxu1 %vm1620_vm2, %v3431_v31  ;;  %v6945_v31 = vld [vmem:[%s7747_s21 + $0xc8] sm:$0xff] }
 0xe67   : > { %6926 = vmatpush.xpose.msk.msrb.mxu1 %vm1620_vm2, %v3428_v62  ;;  %v6944_v62 = vld [vmem:[%s7747_s21 + $0xc0] sm:$0xff] }
 0xe69   : > { %6919 = vmatmul.msk.f32.vlgmr.msrb.gmra.mxu0 %vm1504_vm1, %v8444_v53 }
 0xe71   : > { %6920 = vmatmul.msk.f32.gmra.mxu0 %vm1504_vm1, %v8457_v3 }
 0xe79   : > { %6921 = vmatmul.msk.f32.gmra.mxu0 %vm1504_vm1, %v8468_v10 }
 0xe81   : > { %6922 = vmatmul.msk.f32.gmra.mxu0 %vm1504_vm1, %v8479_v36 }
 0xec6   : > { %v3258_v0 = vpop.f32.mrf.mxu0 }
 0xec7   : > { %v3270_v57 = vmul.f32 0.35355338, %v3258_v0  ;;  %v3389_v0 = vadd.f32 %v7333_v56, %v3388_v15 }
 0xec9   : > { %v3274_v41 = vsel %vm1504_vm1, %v3270_v57, -inf }
 0xeca   : > { %3275 = vmax.xlane.f32.xlu0 %v3274_v41 }
 0xece   : > { %v3261_v2 = vpop.f32.mrf.mxu0 }
 0xecf   : > { %v3271_v58 = vmul.f32 0.35355338, %v3261_v2 }
 0xed1   : > { %v3277_v17 = vsel %vm1504_vm1, %v3271_v58, -inf }
 0xed2   : > { %3278 = vmax.xlane.f32.xlu1 %v3277_v17 }
 0xed6   : > { %v3264_v43 = vpop.f32.mrf.mxu0 }
 0xed7   : > { %v3272_v4 = vmul.f32 0.35355338, %v3264_v43 }
 0xed9   : > { %v3280_v5 = vsel %vm1504_vm1, %v3272_v4, -inf }
 0xeda   : > { %3281 = vmax.xlane.f32.xlu2 %v3280_v5 }
 0xede   : > { %v3267_v61 = vpop.f32.mrf.mxu0 }
 0xedf   : > { %v3273_v59 = vmul.f32 0.35355338, %v3267_v61 }
 0xee1   : > { %v3283_v29 = vsel %vm1504_vm1, %v3273_v59, -inf }
 0xee2   : > { %3284 = vmax.xlane.f32.xlu0 %v3283_v29 }
 0xee6   : > { %v3466_v6 = vpop.f32.mrf.mxu0 }
 0xee7   : > { %v3467_v12 = vadd.f32 %v7335_v11, %v3466_v6 }
 0xeee   : > { %v3469_v44 = vpop.f32.mrf.mxu0 }
 0xeef   : > { %v3470_v1 = vadd.f32 %v7335_v11, %v3469_v44 }
 0xef6   : > { %v3472_v8 = vpop.f32.mrf.mxu0 }
 0xef7   : > { %v3473_v9 = vadd.f32 %v7335_v11, %v3472_v8 }
 0xefe   : > { %v3475_v60 = vpop.f32.mrf.mxu0 }
 0xeff   : > { %v3476_v63 = vadd.f32 %v7335_v11, %v3475_v60 }
 0xf01   : > { %3603 = vmatpush.msrb.mxu2 %v3476_v63 }
 0xf03   : > { %3604 = vmatpush.msrb.mxu2 %v3473_v9 }
 0xf05   : > { %3605 = vmatpush.msrb.mxu2 %v3470_v1 }
 0xf07   : > { %3606 = vmatpush.msrb.mxu2 %v3467_v12 }
 0xf3d   : > { %v3276_v13 = vpop.xlane.xlu0 %3275 }
 0xf3e   : > { %v3286_v14 = vsub.f32 %v3270_v57, %v3276_v13  ;;  %v3391_v57 = vpop.f32.mrf.mxu2 }
 0xf3f   : > { %v3392_v41 = vadd.f32 %v7333_v56, %v3391_v57  ;;  %v6935_v57 = vld [vmem:[%s7777_s19 + $0x28] sm:$0xff] }
 0xf40   : > { %v3290_v42 = vmul.f32 1.442695, %v3286_v14  ;;  %3649 = vmatpush.msrb.mxu3 %v6935_v57 }
 0xf42   : > { %7468 = vpow2.f32 %v3290_v42 }
 0xf45   : > { %v3279_v16 = vpop.xlane.xlu1 %3278 }
 0xf46   : > { %v3287_v18 = vsub.f32 %v3271_v58, %v3279_v16  ;;  %v3394_v2 = vpop.f32.mrf.mxu2 }
 0xf47   : > { %v3395_v58 = vadd.f32 %v7333_v56, %v3394_v2  ;;  %v6964_v2 = vld [vmem:[%s7757_s29 + $0xd0] sm:$0xff] }
 0xf48   : > { %v7469_v20 = vpop.eup %7468  ;;  %v3292_v21 = vmul.f32 1.442695, %v3287_v18 }
 0xf49   : > { %v3298_v19 = vsel %vm1504_vm1, %v7469_v20, 0.0 }
 0xf4a   : > { %7470 = vpow2.f32 %v3292_v21  ;;  %3299 = vadd.xlane.f32.xlu1 %v3298_v19 }
 0xf4d   : > { %v3282_v22 = vpop.xlane.xlu2 %3281 }
 0xf4e   : > { %v3288_v23 = vsub.f32 %v3272_v4, %v3282_v22  ;;  %v3397_v17 = vpop.f32.mrf.mxu2  ;;  %v6895_v4 = vld [vmem:[%s7777_s19 + $0x20] sm:$0xff] }
 0xf4f   : > { %v3398_v43 = vadd.f32 %v7333_v56, %v3397_v17  ;;  %3690 = vmatpush.msra.mxu0 %v6895_v4 }
 0xf50   : > { %v7471_v26 = vpop.eup %7470  ;;  %v3294_v27 = vmul.f32 1.442695, %v3288_v23 }
 0xf51   : > { %v3301_v24 = vsel %vm1504_vm1, %v7471_v26, 0.0 }
 0xf52   : > { %7472 = vpow2.f32 %v3294_v27  ;;  %3302 = vadd.xlane.f32.xlu2 %v3301_v24 }
 0xf55   : > { %v3285_v28 = vpop.xlane.xlu0 %3284 }
 0xf56   : > { %v3289_v32 = vsub.f32 %v3273_v59, %v3285_v28 }
 0xf58   : > { %v7473_v33 = vpop.eup %7472  ;;  %v3296_v34 = vmul.f32 1.442695, %v3289_v32 }
 0xf59   : > { %v3304_v35 = vsel %vm1504_vm1, %v7473_v33, 0.0 }
 0xf5a   : > { %7474 = vpow2.f32 %v3296_v34  ;;  %3305 = vadd.xlane.f32.xlu0 %v3304_v35 }
 0xf60   : > { %v7475_v30 = vpop.eup %7474 }
 0xf61   : > { %v3307_v37 = vsel %vm1504_vm1, %v7475_v30, 0.0 }
 0xf62   : > { %3308 = vadd.xlane.f32.xlu1 %v3307_v37 }
 0xfbd   : > { %v3300_v38 = vpop.xlane.xlu1 %3299 }
 0xfbe   : > { %7476 = vrcp.f32 %v3300_v38 }
 0xfc4   : > { %v7477_v39 = vpop.eup %7476 }
 0xfc5   : > { %v3314_v40 = vmul.f32 %v7477_v39, %v7469_v20  ;;  %v3303_v46 = vpop.xlane.xlu2 %3302 }
 0xfc6   : > { %7478 = vrcp.f32 %v3303_v46  ;;  %v6956_v46 = vld [vmem:[%s7752_s25 + $0xd8] sm:$0xff] }
 0xfc7   : > { %6891 = vmatmul.msk.f32.vlgmr.msra.gmra.mxu1 %vm1504_vm1, %v3314_v40  ;;  %3765 = vmatpush.msra.mxu2 %v6956_v46 }
 0xfc8   : > { %3726 = vmatpush.msra.mxu1 %v6947_v25 }
 0xfca   : > { %3727 = vmatpush.msra.mxu1 %v6946_v55 }
 0xfcc   : > { %v7479_v47 = vpop.eup %7478  ;;  %3728 = vmatpush.msra.mxu1 %v6945_v31 }
 0xfcd   : > { %v3306_v48 = vpop.xlane.xlu0 %3305  ;;  %v3315_v49 = vmul.f32 %v7479_v47, %v7471_v26 }
 0xfce   : > { %7480 = vrcp.f32 %v3306_v48  ;;  %3729 = vmatpush.msra.mxu1 %v6944_v62  ;;  %v6955_v48 = vld [vmem:[%s7752_s25 + $0xd0] sm:$0xff] }
 0xfcf   : > { %6892 = vmatmul.msk.f32.gmra.mxu1 %vm1504_vm1, %v3315_v49  ;;  %v6954_v49 = vld [vmem:[%s7752_s25 + $0xc8] sm:$0xff]  ;;  %3766 = vmatpush.msra.mxu2 %v6955_v48  ;;  %v7338_v48 = vld [vmem:[%s7772_s14 + $0x6] ss:$0 sm:$0xff] }
 0xfd1   : > { %3767 = vmatpush.msra.mxu2 %v6954_v49 }
 0xfd4   : > { %v7481_v7 = vpop.eup %7480 }
 0xfd5   : > { %v3309_v50 = vpop.xlane.xlu1 %3308  ;;  %v3316_v51 = vmul.f32 %v7481_v7, %v7473_v33  ;;  %v6953_v7 = vld [vmem:[%s7752_s25 + $0xc0] sm:$0xff] }
 0xfd6   : > { %7482 = vrcp.f32 %v3309_v50  ;;  %3768 = vmatpush.msra.mxu2 %v6953_v7 }
 0xfd7   : > { %6893 = vmatmul.msk.f32.gmra.mxu1 %vm1504_vm1, %v3316_v51 }
 0xfdc   : > { %v7483_v52 = vpop.eup %7482 }
 0xfdd   : > { %v3317_v54 = vmul.f32 %v7483_v52, %v7475_v30 }
 0xfdf   : > { %6894 = vmatmul.msk.f32.gmra.mxu1 %vm1504_vm1, %v3317_v54 }
 0xfe7   : > { %6927 = vmatmul.msk.f32.vlgmr.msrb.gmra.mxu1 %vm1620_vm2, %v3389_v0 }
 0xfef   : > { %6928 = vmatmul.msk.f32.gmra.mxu1 %vm1620_vm2, %v3392_v41  ;;  %v6965_v41 = vld [vmem:[%s7757_s29 + $0xd8] sm:$0xff] }
 0xff0   : > { %3804 = vmatpush.msra.mxu3 %v6965_v41 }
 0xff2   : > { %3805 = vmatpush.msra.mxu3 %v6964_v2 }
 0xff7   : > { %6929 = vmatmul.msk.f32.gmra.mxu1 %vm1620_vm2, %v3395_v58  ;;  %v6963_v58 = vld [vmem:[%s7757_s29 + $0xc8] sm:$0xff] }
 0xff8   : > { %3806 = vmatpush.msra.mxu3 %v6963_v58 }
 0xfff   : > { %6930 = vmatmul.msk.f32.gmra.mxu1 %vm1620_vm2, %v3398_v43  ;;  %v6962_v43 = vld [vmem:[%s7757_s29 + $0xc0] sm:$0xff] }
0x1000   : > { %3807 = vmatpush.msra.mxu3 %v6962_v43 }
0x1007   : > { %6949 = vmatmul.msk.f32.vlgmr.msra.gmra.mxu1 %vm1504_vm1, %v8444_v53 }
0x100f   : > { %6950 = vmatmul.msk.f32.gmra.mxu1 %vm1504_vm1, %v8457_v3 }
0x1017   : > { %6951 = vmatmul.msk.f32.gmra.mxu1 %vm1504_vm1, %v8468_v10 }
0x101f   : > { %6952 = vmatmul.msk.f32.gmra.mxu1 %vm1504_vm1, %v8479_v36 }
0x1044   : > { %v3347_v5 = vpop.f32.mrf.mxu1 }
0x1045   : > { %6940 = vmatmul.msk.f32.vlgmr.msra.gmra.mxu0 %vm1620_vm2, %v3347_v5 }
0x104c   : > { %v3350_v61 = vpop.f32.mrf.mxu1 }
0x104d   : > { %6941 = vmatmul.msk.f32.gmra.mxu0 %vm1620_vm2, %v3350_v61 }
0x1054   : > { %v3353_v59 = vpop.f32.mrf.mxu1 }
0x1055   : > { %6942 = vmatmul.msk.f32.gmra.mxu0 %vm1620_vm2, %v3353_v59  ;;  %v6991_v59 = vld [vmem:[%s7747_s21 + $0xf8] sm:$0xff] }
0x105c   : > { %v3356_v29 = vpop.f32.mrf.mxu1 }
0x105d   : > { %6943 = vmatmul.msk.f32.gmra.mxu0 %vm1620_vm2, %v3356_v29  ;;  %v6990_v29 = vld [vmem:[%s7747_s21 + $0xf0] sm:$0xff] }
0x1064   : > { %v3519_v6 = vpop.f32.mrf.mxu1 }
0x1065   : > { %v3531_v44 = vmul.f32 0.35355338, %v3519_v6  ;;  %v6989_v6 = vld [vmem:[%s7747_s21 + $0xe8] sm:$0xff] }
0x1067   : > { %v3535_v8 = vsel %vm1504_vm1, %v3531_v44, -inf }
0x1068   : > { %3536 = vmax.xlane.f32.xlu2 %v3535_v8 }
0x106c   : > { %v3522_v11 = vpop.f32.mrf.mxu1 }
0x106d   : > { %v3532_v60 = vmul.f32 0.35355338, %v3522_v11 }
0x106f   : > { %v3538_v63 = vsel %vm1504_vm1, %v3532_v60, -inf }
0x1070   : > { %3539 = vmax.xlane.f32.xlu0 %v3538_v63  ;;  %v7337_v63 = vld [vmem:[%s9394_s8 + $0x6] ss:$0 sm:$0xff] }
0x1074   : > { %v3525_v9 = vpop.f32.mrf.mxu1 }
0x1075   : > { %v3533_v1 = vmul.f32 0.35355338, %v3525_v9 }
0x1077   : > { %v3541_v12 = vsel %vm1504_vm1, %v3533_v1, -inf }
0x1078   : > { %3542 = vmax.xlane.f32.xlu1 %v3541_v12 }
0x107c   : > { %v3528_v13 = vpop.f32.mrf.mxu1 }
0x107d   : > { %v3534_v14 = vmul.f32 0.35355338, %v3528_v13 }
0x107f   : > { %v3544_v42 = vsel %vm1504_vm1, %v3534_v14, -inf }
0x1080   : > { %3545 = vmax.xlane.f32.xlu2 %v3544_v42  ;;  %v7336_v42 = vld [vmem:[%s9395_s3 + $0x6] ss:$0 sm:$0xff] }
0x1084   : > { %v3731_v13 = vpop.f32.mrf.mxu1 }
0x10db   : > { %v3537_v16 = vpop.xlane.xlu2 %3536 }
0x10dc   : > { %v3547_v18 = vsub.f32 %v3531_v44, %v3537_v16  ;;  %v6988_v44 = vld [vmem:[%s7747_s21 + $0xe0] sm:$0xff] }
0x10de   : > { %v3551_v20 = vmul.f32 1.442695, %v3547_v18  ;;  %v7000_v18 = vld [vmem:[%s7752_s25 + $0xf8] sm:$0xff] }
0x10e0   : > { %7484 = vpow2.f32 %v3551_v20  ;;  %v3732_v20 = vadd.f32 %v7336_v42, %v3731_v13 }
0x10e3   : > { %v3540_v21 = vpop.xlane.xlu0 %3539 }
0x10e4   : > { %v3548_v19 = vsub.f32 %v3532_v60, %v3540_v21  ;;  %v6999_v21 = vld [vmem:[%s7752_s25 + $0xf0] sm:$0xff] }
0x10e6   : > { %v7485_v22 = vpop.eup %7484  ;;  %v3553_v23 = vmul.f32 1.442695, %v3548_v19  ;;  %v3734_v19 = vpop.f32.mrf.mxu1 }
0x10e7   : > { %v3559_v26 = vsel %vm1504_vm1, %v7485_v22, 0.0 }
0x10e8   : > { %7486 = vpow2.f32 %v3553_v23  ;;  %3560 = vadd.xlane.f32.xlu0 %v3559_v26  ;;  %v6997_v23 = vld [vmem:[%s7752_s25 + $0xe0] sm:$0xff]  ;;  %v3735_v26 = vadd.f32 %v7336_v42, %v3734_v19 }
0x10eb   : > { %v3543_v27 = vpop.xlane.xlu1 %3542 }
0x10ec   : > { %v3549_v24 = vsub.f32 %v3533_v1, %v3543_v27 }
0x10ee   : > { %v7487_v28 = vpop.eup %7486  ;;  %v3555_v32 = vmul.f32 1.442695, %v3549_v24  ;;  %v3737_v27 = vpop.f32.mrf.mxu1 }
0x10ef   : > { %v3562_v33 = vsel %vm1504_vm1, %v7487_v28, 0.0  ;;  %v3738_v24 = vadd.f32 %v7336_v42, %v3737_v27 }
0x10f0   : > { %7488 = vpow2.f32 %v3555_v32  ;;  %3563 = vadd.xlane.f32.xlu1 %v3562_v33 }
0x10f3   : > { %v3546_v34 = vpop.xlane.xlu2 %3545 }
0x10f4   : > { %v3550_v35 = vsub.f32 %v3534_v14, %v3546_v34 }
0x10f6   : > { %v7489_v30 = vpop.eup %7488  ;;  %v3557_v37 = vmul.f32 1.442695, %v3550_v35 }
0x10f7   : > { %v3565_v38 = vsel %vm1504_vm1, %v7489_v30, 0.0 }
0x10f8   : > { %7490 = vpow2.f32 %v3557_v37  ;;  %3566 = vadd.xlane.f32.xlu2 %v3565_v38  ;;  %v8649_v37 = vpop.f32.mrf.mxu0 }
0x10fe   : > { %v7491_v39 = vpop.eup %7490 }
0x10ff   : > { %v3568_v40 = vsel %vm1504_vm1, %v7491_v39, 0.0 }
0x1100   : > { %3569 = vadd.xlane.f32.xlu0 %v3568_v40 }
0x115b   : > { %v3561_v47 = vpop.xlane.xlu0 %3560 }
0x115c   : > { %7492 = vrcp.f32 %v3561_v47 }
0x1162   : > { %v7493_v50 = vpop.eup %7492 }
0x1163   : > { %v3575_v51 = vmul.f32 %v7493_v50, %v7485_v22  ;;  %v3564_v52 = vpop.xlane.xlu1 %3563  ;;  %v6998_v22 = vld [vmem:[%s7752_s25 + $0xe8] sm:$0xff] }
0x1164   : > { %7494 = vrcp.f32 %v3564_v52 }
0x1165   : > { %6931 = vmatmul.msk.f32.vlgmr.msrb.gmra.mxu2 %vm1504_vm1, %v3575_v51 }
0x116a   : > { %v7495_v15 = vpop.eup %7494 }
0x116b   : > { %v3567_v54 = vpop.xlane.xlu2 %3566  ;;  %v3576_v25 = vmul.f32 %v7495_v15, %v7487_v28  ;;  %v3740_v28 = vpop.f32.mrf.mxu1 }
0x116c   : > { %7496 = vrcp.f32 %v3567_v54  ;;  %v3741_v32 = vadd.f32 %v7336_v42, %v3740_v28 }
0x116d   : > { %6932 = vmatmul.msk.f32.gmra.mxu2 %vm1504_vm1, %v3576_v25 }
0x1172   : > { %v7497_v55 = vpop.eup %7496 }
0x1173   : > { %v3570_v56 = vpop.xlane.xlu0 %3569  ;;  %v3577_v31 = vmul.f32 %v7497_v55, %v7489_v30 }
0x1174   : > { %7498 = vrcp.f32 %v3570_v56 }
0x1175   : > { %6933 = vmatmul.msk.f32.gmra.mxu2 %vm1504_vm1, %v3577_v31 }
0x117a   : > { %v7499_v62 = vpop.eup %7498 }
0x117b   : > { %v3578_v0 = vmul.f32 %v7499_v62, %v7491_v39  ;;  %v8651_v39 = vpop.f32.mrf.mxu0 }
0x117d   : > { %6934 = vmatmul.msk.f32.gmra.mxu2 %vm1504_vm1, %v3578_v0 }
0x1183   : > { %v8653_v47 = vpop.f32.mrf.mxu0 }
0x1185   : > { %6958 = vmatmul.msk.f32.vlgmr.msra.gmra.mxu2 %vm1504_vm1, %v8444_v53 }
0x118b   : > { %v8656_v50 = vpop.f32.mrf.mxu0 }
0x118d   : > { %6959 = vmatmul.msk.f32.gmra.mxu2 %vm1504_vm1, %v8457_v3 }
0x1195   : > { %6960 = vmatmul.msk.f32.gmra.mxu2 %vm1504_vm1, %v8468_v10 }
0x119d   : > { %6961 = vmatmul.msk.f32.gmra.mxu2 %vm1504_vm1, %v8479_v36 }
0x11e8   : > { %v3608_v17 = vpop.f32.mrf.mxu2 }
0x11e9   : > { %6936 = vmatmul.msk.f32.vlgmr.msrb.gmra.mxu3 %vm1620_vm2, %v3608_v17  ;;  %v6983_v17 = vld [vmem:[%s7777_s19 + $0x30] sm:$0xff] }
0x11ea   : > { %4032 = vmatpush.msrb.mxu3 %v6991_v59  ;;  %3992 = vmatpush.msrb.mxu2 %v6983_v17  ;;  %v7340_v59 = vld [vmem:[%s9394_s8 + $0x7] ss:$0 sm:$0xff]  ;;  %s9415_s8 = sld [smem:[#allocation22_spill]] }
0x11ec   : > { %4033 = vmatpush.msrb.mxu3 %v6990_v29 }
0x11ee   : > { %4034 = vmatpush.msrb.mxu3 %v6989_v6 }
0x11f0   : > { %v3611_v4 = vpop.f32.mrf.mxu2  ;;  %4035 = vmatpush.msrb.mxu3 %v6988_v44 }
0x11f1   : > { %6937 = vmatmul.msk.f32.gmra.mxu3 %vm1620_vm2, %v3611_v4 }
0x11f8   : > { %v3614_v5 = vpop.f32.mrf.mxu2 }
0x11f9   : > { %6938 = vmatmul.msk.f32.gmra.mxu3 %vm1620_vm2, %v3614_v5 }
0x1200   : > { %v3617_v61 = vpop.f32.mrf.mxu2 }
0x1201   : > { %6939 = vmatmul.msk.f32.gmra.mxu3 %vm1620_vm2, %v3617_v61 }
0x1208   : > { %v3770_v8 = vpop.f32.mrf.mxu2 }
0x1209   : > { %6967 = vmatmul.msk.f32.vlgmr.msra.gmra.mxu3 %vm1504_vm1, %v8444_v53  ;;  %v3771_v16 = vadd.f32 %v7337_v63, %v3770_v8 }
0x1210   : > { %v3773_v11 = vpop.f32.mrf.mxu2 }
0x1211   : > { %6968 = vmatmul.msk.f32.gmra.mxu3 %vm1504_vm1, %v8457_v3  ;;  %v3774_v14 = vadd.f32 %v7337_v63, %v3773_v11 }
0x1218   : > { %v3776_v60 = vpop.f32.mrf.mxu2 }
0x1219   : > { %6969 = vmatmul.msk.f32.gmra.mxu3 %vm1504_vm1, %v8468_v10  ;;  %v3777_v12 = vadd.f32 %v7337_v63, %v3776_v60 }
0x1220   : > { %v3779_v9 = vpop.f32.mrf.mxu2 }
0x1221   : > { %v3780_v1 = vadd.f32 %v7337_v63, %v3779_v9  ;;  %6970 = vmatmul.msk.f32.gmra.mxu3 %vm1504_vm1, %v8479_v36 }
0x1223   : > { %6971 = vmatpush.xpose.msk.msrb.mxu0 %vm1620_vm2, %v3780_v1 }
0x1227   : > { %6972 = vmatpush.xpose.msk.msrb.mxu0 %vm1620_vm2, %v3777_v12 }
0x1229   : > { %6993 = vmatmul.msk.f32.vlgmr.msrb.gmra.mxu3 %vm1504_vm1, %v8444_v53 }
0x122b   : > { %6973 = vmatpush.xpose.msk.msrb.mxu0 %vm1620_vm2, %v3774_v14 }
0x122f   : > { %6974 = vmatpush.xpose.msk.msrb.mxu0 %vm1620_vm2, %v3771_v16 }
0x1231   : > { %6994 = vmatmul.msk.f32.gmra.mxu3 %vm1504_vm1, %v8457_v3 }
0x1232   : > { %6975 = vmatmul.msk.f32.vlgmr.msrb.gmra.mxu0 %vm1620_vm2, %v3732_v20 }
0x1233   : > { %4071 = vmatpush.msra.mxu0 %v7000_v18 }
0x1235   : > { %4072 = vmatpush.msra.mxu0 %v6999_v21 }
0x1237   : > { %4073 = vmatpush.msra.mxu0 %v6998_v22 }
0x1239   : > { %4074 = vmatpush.msra.mxu0 %v6997_v23  ;;  %6995 = vmatmul.msk.f32.gmra.mxu3 %vm1504_vm1, %v8468_v10 }
0x123a   : > { %6976 = vmatmul.msk.f32.gmra.mxu0 %vm1620_vm2, %v3735_v26 }
0x1241   : > { %6996 = vmatmul.msk.f32.gmra.mxu3 %vm1504_vm1, %v8479_v36 }
0x1242   : > { %6977 = vmatmul.msk.f32.gmra.mxu0 %vm1620_vm2, %v3738_v24 }
0x124a   : > { %6978 = vmatmul.msk.f32.gmra.mxu0 %vm1620_vm2, %v3741_v32 }
0x1252   : > { %7002 = vmatmul.msk.f32.vlgmr.msra.gmra.mxu0 %vm1504_vm1, %v8444_v53 }
0x125a   : > { %7003 = vmatmul.msk.f32.gmra.mxu0 %vm1504_vm1, %v8457_v3 }
0x1262   : > { %7004 = vmatmul.msk.f32.gmra.mxu0 %vm1504_vm1, %v8468_v10 }
0x126a   : > { %7005 = vmatmul.msk.f32.gmra.mxu0 %vm1504_vm1, %v8479_v36 }
0x126c   : > { %v8641_v33 = vpop.f32.mrf.mxu3 }
0x1274   : > { %v8643_v34 = vpop.f32.mrf.mxu3 }
0x127c   : > { %v8645_v35 = vpop.f32.mrf.mxu3 }
0x1284   : > { %v8647_v30 = vpop.f32.mrf.mxu3 }
0x128c   : > { %v3809_v38 = vpop.f32.mrf.mxu3 }
0x128d   : > { %v3810_v15 = vadd.f32 %v7338_v48, %v3809_v38 }
0x1294   : > { %v3812_v40 = vpop.f32.mrf.mxu3 }
0x1295   : > { %v3813_v52 = vadd.f32 %v7338_v48, %v3812_v40  ;;  %v7009_v40 = vld [vmem:[%s7757_s29 + $0xf8] sm:$0xff] }
0x129c   : > { %v3815_v46 = vpop.f32.mrf.mxu3 }
0x129d   : > { %v3816_v51 = vadd.f32 %v7338_v48, %v3815_v46  ;;  %v7008_v46 = vld [vmem:[%s7757_s29 + $0xf0] sm:$0xff] }
0x12a4   : > { %v3818_v49 = vpop.f32.mrf.mxu3 }
0x12a5   : > { %v3819_v7 = vadd.f32 %v7338_v48, %v3818_v49  ;;  %v7007_v48 = vld [vmem:[%s7757_s29 + $0xe8] sm:$0xff]  ;;  %v7006_v49 = vld [vmem:[%s7757_s29 + $0xe0] sm:$0xff] }
0x12a7   : > { %3946 = vmatpush.msrb.mxu1 %v3819_v7 }
0x12a9   : > { %3947 = vmatpush.msrb.mxu1 %v3816_v51 }
0x12ab   : > { %3948 = vmatpush.msrb.mxu1 %v3813_v52 }
0x12ad   : > { %3949 = vmatpush.msrb.mxu1 %v3810_v15 }
0x12af   : > { %v3862_v54 = vpop.f32.mrf.mxu0  ;;  %4110 = vmatpush.msra.mxu1 %v7009_v40 }
0x12b0   : > { %v3874_v25 = vmul.f32 0.35355338, %v3862_v54 }
0x12b1   : > { %4111 = vmatpush.msra.mxu1 %v7008_v46 }
0x12b2   : > { %v3878_v55 = vsel %vm1504_vm1, %v3874_v25, -inf }
0x12b3   : > { %3879 = vmax.xlane.f32.xlu1 %v3878_v55  ;;  %4112 = vmatpush.msra.mxu1 %v7007_v48 }
0x12b5   : > { %4113 = vmatpush.msra.mxu1 %v7006_v49 }
0x12b7   : > { %v3865_v56 = vpop.f32.mrf.mxu0 }
0x12b8   : > { %v3875_v31 = vmul.f32 0.35355338, %v3865_v56 }
0x12ba   : > { %v3881_v62 = vsel %vm1504_vm1, %v3875_v31, -inf }
0x12bb   : > { %3882 = vmax.xlane.f32.xlu2 %v3881_v62 }
0x12bf   : > { %v3868_v0 = vpop.f32.mrf.mxu0 }
0x12c0   : > { %v3876_v57 = vmul.f32 0.35355338, %v3868_v0 }
0x12c2   : > { %v3884_v41 = vsel %vm1504_vm1, %v3876_v57, -inf }
0x12c3   : > { %3885 = vmax.xlane.f32.xlu0 %v3884_v41 }
0x12c7   : > { %v3871_v2 = vpop.f32.mrf.mxu0 }
0x12c8   : > { %v3877_v58 = vmul.f32 0.35355338, %v3871_v2 }
0x12ca   : > { %v3887_v43 = vsel %vm1504_vm1, %v3877_v58, -inf }
0x12cb   : > { %3888 = vmax.xlane.f32.xlu1 %v3887_v43  ;;  %v7339_v43 = vld [vmem:[%s9395_s3 + $0x7] ss:$0 sm:$0xff]  ;;  %s9412_s3 = sld [smem:[#allocation18_spill]] }
0x12cf   : > { %v4076_v4 = vpop.f32.mrf.mxu0 }
0x12d0   : > { %v4077_v11 = vadd.f32 %v7340_v59, %v4076_v4 }
0x12d7   : > { %v4079_v5 = vpop.f32.mrf.mxu0 }
0x12d8   : > { %v4080_v8 = vadd.f32 %v7340_v59, %v4079_v5 }
0x12df   : > { %v4082_v61 = vpop.f32.mrf.mxu0 }
0x12e0   : > { %v4083_v44 = vadd.f32 %v7340_v59, %v4082_v61 }
0x12e7   : > { %v4085_v29 = vpop.f32.mrf.mxu0 }
0x12e8   : > { %v4086_v6 = vadd.f32 %v7340_v59, %v4085_v29 }
0x12ea   : > { %7015 = vmatpush.xpose.msk.msra.mxu2 %vm1620_vm2, %v4086_v6 }
0x12ee   : > { %7016 = vmatpush.xpose.msk.msra.mxu2 %vm1620_vm2, %v4083_v44 }
0x12f2   : > { %7017 = vmatpush.xpose.msk.msra.mxu2 %vm1620_vm2, %v4080_v8 }
0x12f6   : > { %7018 = vmatpush.xpose.msk.msra.mxu2 %vm1620_vm2, %v4077_v11 }
0x1326   : > { %v3880_v60 = vpop.xlane.xlu1 %3879 }
0x1327   : > { %v3890_v63 = vsub.f32 %v3874_v25, %v3880_v60 }
0x1329   : > { %v3894_v9 = vmul.f32 1.442695, %v3890_v63  ;;  %v7341_v63 = vld [vmem:[%s7772_s14 + $0x7] ss:$0 sm:$0xff] }
0x132b   : > { %7500 = vpow2.f32 %v3894_v9 }
0x132e   : > { %v3883_v1 = vpop.xlane.xlu2 %3882 }
0x132f   : > { %v3891_v12 = vsub.f32 %v3875_v31, %v3883_v1 }
0x1331   : > { %v7501_v13 = vpop.eup %7500  ;;  %v3896_v14 = vmul.f32 1.442695, %v3891_v12 }
0x1332   : > { %v3902_v42 = vsel %vm1504_vm1, %v7501_v13, 0.0 }
0x1333   : > { %7502 = vpow2.f32 %v3896_v14  ;;  %3903 = vadd.xlane.f32.xlu2 %v3902_v42 }
0x1336   : > { %v3886_v16 = vpop.xlane.xlu0 %3885 }
0x1337   : > { %v3892_v18 = vsub.f32 %v3876_v57, %v3886_v16 }
0x1339   : > { %v7503_v20 = vpop.eup %7502  ;;  %v3898_v21 = vmul.f32 1.442695, %v3892_v18 }
0x133a   : > { %v3905_v19 = vsel %vm1504_vm1, %v7503_v20, 0.0 }
0x133b   : > { %7504 = vpow2.f32 %v3898_v21  ;;  %3906 = vadd.xlane.f32.xlu0 %v3905_v19 }
0x133e   : > { %v3889_v22 = vpop.xlane.xlu1 %3888 }
0x133f   : > { %v3893_v23 = vsub.f32 %v3877_v58, %v3889_v22  ;;  %v4037_v58 = vpop.f32.mrf.mxu3 }
0x1340   : > { %v4038_v4 = vadd.f32 %v7339_v43, %v4037_v58 }
0x1341   : > { %v7505_v26 = vpop.eup %7504  ;;  %v3900_v27 = vmul.f32 1.442695, %v3893_v23 }
0x1342   : > { %v3908_v24 = vsel %vm1504_vm1, %v7505_v26, 0.0 }
0x1343   : > { %7506 = vpow2.f32 %v3900_v27  ;;  %3909 = vadd.xlane.f32.xlu1 %v3908_v24 }
0x1347   : > { %v4040_v5 = vpop.f32.mrf.mxu3 }
0x1348   : > { %v4041_v59 = vadd.f32 %v7339_v43, %v4040_v5 }
0x1349   : > { %v7507_v28 = vpop.eup %7506 }
0x134a   : > { %v3911_v32 = vsel %vm1504_vm1, %v7507_v28, 0.0 }
0x134b   : > { %3912 = vadd.xlane.f32.xlu2 %v3911_v32 }
0x134f   : > { %v4043_v6 = vpop.f32.mrf.mxu3 }
0x1350   : > { %v4044_v44 = vadd.f32 %v7339_v43, %v4043_v6 }
0x1357   : > { %v4046_v11 = vpop.f32.mrf.mxu3 }
0x1358   : > { %v4047_v60 = vadd.f32 %v7339_v43, %v4046_v11 }
0x13a6   : > { %v3904_v38 = vpop.xlane.xlu2 %3903 }
0x13a7   : > { %7508 = vrcp.f32 %v3904_v38 }
0x13ad   : > { %v7509_v7 = vpop.eup %7508 }
0x13ae   : > { %v3918_v51 = vmul.f32 %v7509_v7, %v7501_v13  ;;  %v3907_v52 = vpop.xlane.xlu0 %3906 }
0x13af   : > { %7510 = vrcp.f32 %v3907_v52 }
0x13b0   : > { %6979 = vmatmul.msk.f32.vlgmr.msrb.gmra.mxu1 %vm1504_vm1, %v3918_v51 }
0x13b5   : > { %v7511_v15 = vpop.eup %7510 }
0x13b6   : > { %v3910_v54 = vpop.xlane.xlu1 %3909  ;;  %v3919_v25 = vmul.f32 %v7511_v15, %v7503_v20 }
0x13b7   : > { %7512 = vrcp.f32 %v3910_v54 }
0x13b8   : > { %6980 = vmatmul.msk.f32.gmra.mxu1 %vm1504_vm1, %v3919_v25 }
0x13bd   : > { %v7513_v55 = vpop.eup %7512 }
0x13be   : > { %v3913_v56 = vpop.xlane.xlu2 %3912  ;;  %v3920_v31 = vmul.f32 %v7513_v55, %v7505_v26 }
0x13bf   : > { %7514 = vrcp.f32 %v3913_v56 }
0x13c0   : > { %6981 = vmatmul.msk.f32.gmra.mxu1 %vm1504_vm1, %v3920_v31 }
0x13c5   : > { %v7515_v62 = vpop.eup %7514 }
0x13c6   : > { %v3921_v0 = vmul.f32 %v7515_v62, %v7507_v28 }
0x13c8   : > { %6982 = vmatmul.msk.f32.gmra.mxu1 %vm1504_vm1, %v3921_v0 }
0x13d0   : > { %7011 = vmatmul.msk.f32.vlgmr.msra.gmra.mxu1 %vm1504_vm1, %v8444_v53 }
0x13d8   : > { %7012 = vmatmul.msk.f32.gmra.mxu1 %vm1504_vm1, %v8457_v3 }
0x13e0   : > { %7013 = vmatmul.msk.f32.gmra.mxu1 %vm1504_vm1, %v8468_v10 }
0x13e8   : > { %7014 = vmatmul.msk.f32.gmra.mxu1 %vm1504_vm1, %v8479_v36 }
0x142d   : > { %v3951_v57 = vpop.f32.mrf.mxu1 }
0x142e   : > { %6984 = vmatmul.msk.f32.vlgmr.msrb.gmra.mxu2 %vm1620_vm2, %v3951_v57 }
0x1435   : > { %v3954_v41 = vpop.f32.mrf.mxu1 }
0x1436   : > { %6985 = vmatmul.msk.f32.gmra.mxu2 %vm1620_vm2, %v3954_v41 }
0x143d   : > { %v3957_v2 = vpop.f32.mrf.mxu1 }
0x143e   : > { %6986 = vmatmul.msk.f32.gmra.mxu2 %vm1620_vm2, %v3957_v2 }
0x1445   : > { %v3960_v17 = vpop.f32.mrf.mxu1 }
0x1446   : > { %6987 = vmatmul.msk.f32.gmra.mxu2 %vm1620_vm2, %v3960_v17 }
0x144d   : > { %v4115_v61 = vpop.f32.mrf.mxu1 }
0x144e   : > { %7019 = vmatmul.msk.f32.vlgmr.msra.gmra.mxu2 %vm1620_vm2, %v4038_v4  ;;  %v4116_v14 = vadd.f32 %v7341_v63, %v4115_v61  ;;  %v7027_v61 = vld [vmem:[%s7777_s19 + $0x38] sm:$0xff] }
0x144f   : > { %4298 = vmatpush.msrb.mxu0 %v7027_v61 }
0x1455   : > { %v4118_v29 = vpop.f32.mrf.mxu1 }
0x1456   : > { %7020 = vmatmul.msk.f32.gmra.mxu2 %vm1620_vm2, %v4041_v59  ;;  %v4119_v13 = vadd.f32 %v7341_v63, %v4118_v29 }
0x145d   : > { %v4121_v8 = vpop.f32.mrf.mxu1 }
0x145e   : > { %7021 = vmatmul.msk.f32.gmra.mxu2 %vm1620_vm2, %v4044_v44  ;;  %v4122_v12 = vadd.f32 %v7341_v63, %v4121_v8 }
0x1465   : > { %v4124_v9 = vpop.f32.mrf.mxu1 }
0x1466   : > { %v4125_v1 = vadd.f32 %v7341_v63, %v4124_v9  ;;  %7022 = vmatmul.msk.f32.gmra.mxu2 %vm1620_vm2, %v4047_v60 }
0x1468   : > { %4252 = vmatpush.msra.mxu3 %v4125_v1 }
0x146a   : > { %4253 = vmatpush.msra.mxu3 %v4122_v12 }
0x146c   : > { %4254 = vmatpush.msra.mxu3 %v4119_v13 }
0x146e   : > { %4255 = vmatpush.msra.mxu3 %v4116_v14 }
0x14b1   : > { %v8698_v42 = vpop.f32.mrf.mxu2 }
0x14b9   : > { %v8700_v16 = vpop.f32.mrf.mxu2 }
0x14c1   : > { %v8702_v18 = vpop.f32.mrf.mxu2 }
0x14c9   : > { %v8704_v20 = vpop.f32.mrf.mxu2 }
0x14d1   : > { %v4168_v21 = vpop.f32.mrf.mxu2 }
0x14d2   : > { %v4180_v19 = vmul.f32 0.35355338, %v4168_v21 }
0x14d4   : > { %v4184_v22 = vsel %vm1504_vm1, %v4180_v19, -inf }
0x14d5   : > { %4185 = vmax.xlane.f32.xlu0 %v4184_v22  ;;  %v3693_v22 = vadd.f32 %v8649_v37, %v8641_v33  ;;  %v3699_v33 = vadd.f32 %v8653_v47, %v8645_v35 }
0x14d9   : > { %v4171_v23 = vpop.f32.mrf.mxu2 }
0x14da   : > { %v4181_v26 = vmul.f32 0.35355338, %v4171_v23  ;;  %v4006_v23 = vadd.f32 %v8698_v42, %v3693_v22  ;;  %v4008_v42 = vadd.f32 %v8702_v18, %v3699_v33 }
0x14dc   : > { %v4187_v27 = vsel %vm1504_vm1, %v4181_v26, -inf }
0x14dd   : > { %4188 = vmax.xlane.f32.xlu1 %v4187_v27 }
0x14e1   : > { %v4174_v24 = vpop.f32.mrf.mxu2 }
0x14e2   : > { %v4182_v28 = vmul.f32 0.35355338, %v4174_v24 }
0x14e4   : > { %v4190_v32 = vsel %vm1504_vm1, %v4182_v28, -inf }
0x14e5   : > { %4191 = vmax.xlane.f32.xlu2 %v4190_v32  ;;  %v3696_v32 = vadd.f32 %v8651_v39, %v8643_v34 }
0x14e9   : > { %v4177_v38 = vpop.f32.mrf.mxu2 }
0x14ea   : > { %v4183_v40 = vmul.f32 0.35355338, %v4177_v38 }
0x14ec   : > { %v4193_v46 = vsel %vm1504_vm1, %v4183_v40, -inf }
0x14ed   : > { %4194 = vmax.xlane.f32.xlu0 %v4193_v46 }
0x1548   : > { %v4186_v48 = vpop.xlane.xlu0 %4185 }
0x1549   : > { %v4196_v49 = vsub.f32 %v4180_v19, %v4186_v48 }
0x154b   : > { %v4200_v7 = vmul.f32 1.442695, %v4196_v49 }
0x154d   : > { %7516 = vpow2.f32 %v4200_v7 }
0x1550   : > { %v4189_v51 = vpop.xlane.xlu1 %4188 }
0x1551   : > { %v4197_v52 = vsub.f32 %v4181_v26, %v4189_v51  ;;  %v7342_v26 = vld [vmem:[%s7782_s24 + $0x1] ss:$0 sm:$0xff] }
0x1553   : > { %v7517_v15 = vpop.eup %7516  ;;  %v4202_v54 = vmul.f32 1.442695, %v4197_v52 }
0x1554   : > { %v4208_v25 = vsel %vm1504_vm1, %v7517_v15, 0.0 }
0x1555   : > { %7518 = vpow2.f32 %v4202_v54  ;;  %4209 = vadd.xlane.f32.xlu1 %v4208_v25 }
0x1558   : > { %v4192_v55 = vpop.xlane.xlu2 %4191 }
0x1559   : > { %v4198_v56 = vsub.f32 %v4182_v28, %v4192_v55 }
0x155b   : > { %v7519_v31 = vpop.eup %7518  ;;  %v4204_v62 = vmul.f32 1.442695, %v4198_v56 }
0x155c   : > { %v4211_v0 = vsel %vm1504_vm1, %v7519_v31, 0.0 }
0x155d   : > { %7520 = vpow2.f32 %v4204_v62  ;;  %4212 = vadd.xlane.f32.xlu2 %v4211_v0 }
0x1560   : > { %v4195_v57 = vpop.xlane.xlu0 %4194 }
0x1561   : > { %v4199_v41 = vsub.f32 %v4183_v40, %v4195_v57  ;;  %v4007_v40 = vadd.f32 %v8700_v16, %v3696_v32  ;;  %v3702_v16 = vadd.f32 %v8656_v50, %v8647_v30 }
0x1563   : > { %v7521_v2 = vpop.eup %7520  ;;  %v4206_v58 = vmul.f32 1.442695, %v4199_v41 }
0x1564   : > { %v4214_v17 = vsel %vm1504_vm1, %v7521_v2, 0.0 }
0x1565   : > { %7522 = vpow2.f32 %v4206_v58  ;;  %4215 = vadd.xlane.f32.xlu0 %v4214_v17 }
0x156b   : > { %v7523_v43 = vpop.eup %7522 }
0x156c   : > { %v4217_v4 = vsel %vm1504_vm1, %v7523_v43, 0.0 }
0x156d   : > { %4218 = vadd.xlane.f32.xlu1 %v4217_v4 }
0x15c8   : > { %v4210_v5 = vpop.xlane.xlu1 %4209 }
0x15c9   : > { %7524 = vrcp.f32 %v4210_v5 }
0x15cf   : > { %v7525_v59 = vpop.eup %7524 }
0x15d0   : > { %v4224_v29 = vmul.f32 %v7525_v59, %v7517_v15  ;;  %v4213_v6 = vpop.xlane.xlu2 %4212  ;;  %v4009_v15 = vadd.f32 %v8704_v20, %v3702_v16 }
0x15d1   : > { %7526 = vrcp.f32 %v4213_v6  ;;  %v7037_v6 = vld [vmem:[%s7797_s12 + $0x30] sm:$0xff] }
0x15d2   : > { %7023 = vmatmul.msk.f32.vlgmr.msra.gmra.mxu3 %vm1504_vm1, %v4224_v29  ;;  %v7038_v29 = vld [vmem:[%s7797_s12 + $0x38] sm:$0xff] }
0x15d3   : > { %4469 = vmatpush.msrb.mxu1 %v7038_v29  ;;  %v7055_v29 = vld [vmem:[%s9397_s15 + $0xd8] sm:$0xff] }
0x15d5   : > { %4470 = vmatpush.msrb.mxu1 %v7037_v6  ;;  %v7054_v6 = vld [vmem:[%s9397_s15 + $0xd0] sm:$0xff] }
0x15d7   : > { %v7527_v44 = vpop.eup %7526 }
0x15d8   : > { %v4216_v8 = vpop.xlane.xlu0 %4215  ;;  %v4225_v11 = vmul.f32 %v7527_v44, %v7519_v31  ;;  %v7036_v44 = vld [vmem:[%s7797_s12 + $0x28] sm:$0xff] }
0x15d9   : > { %7528 = vrcp.f32 %v4216_v8  ;;  %4471 = vmatpush.msrb.mxu1 %v7036_v44  ;;  %v7035_v8 = vld [vmem:[%s7797_s12 + $0x20] sm:$0xff]  ;;  %v7053_v44 = vld [vmem:[%s9397_s15 + $0xc8] sm:$0xff] }
0x15da   : > { %7024 = vmatmul.msk.f32.gmra.mxu3 %vm1504_vm1, %v4225_v11 }
0x15db   : > { %4472 = vmatpush.msrb.mxu1 %v7035_v8  ;;  %v7051_v8 = vld [vmem:[%s9397_s15 + $0xb8] sm:$0xff] }
0x15df   : > { %v7529_v60 = vpop.eup %7528 }
0x15e0   : > { %v4219_v63 = vpop.xlane.xlu1 %4218  ;;  %v4226_v9 = vmul.f32 %v7529_v60, %v7521_v2 }
0x15e1   : > { %7530 = vrcp.f32 %v4219_v63 }
0x15e2   : > { %7025 = vmatmul.msk.f32.gmra.mxu3 %vm1504_vm1, %v4226_v9 }
0x15e7   : > { %v7531_v1 = vpop.eup %7530 }
0x15e8   : > { %v4227_v12 = vmul.f32 %v7531_v1, %v7523_v43 }
0x15ea   : > { %7026 = vmatmul.msk.f32.gmra.mxu3 %vm1504_vm1, %v4227_v12 }
0x1655   : > { %v4257_v13 = vpop.f32.mrf.mxu3 }
0x1656   : > { %7028 = vmatmul.msk.f32.vlgmr.msrb.gmra.mxu0 %vm1620_vm2, %v4257_v13 }
0x165d   : > { %v4260_v14 = vpop.f32.mrf.mxu3 }
0x165e   : > { %7029 = vmatmul.msk.f32.gmra.mxu0 %vm1620_vm2, %v4260_v14 }
0x1665   : > { %v4263_v21 = vpop.f32.mrf.mxu3 }
0x1666   : > { %7030 = vmatmul.msk.f32.gmra.mxu0 %vm1620_vm2, %v4263_v21 }
0x166d   : > { %v4266_v19 = vpop.f32.mrf.mxu3 }
0x166e   : > { %7031 = vmatmul.msk.f32.gmra.mxu0 %vm1620_vm2, %v4266_v19 }
0x16d3   : > { %v4300_v27 = vpop.f32.mrf.mxu0 }
0x16d4   : > { %v4312_v24 = vadd.f32 %v4300_v27, %v4006_v23 }
0x16d6   : > { %v4321_v28 = vadd.f32 %v7342_v26, %v4312_v24 }
0x16d8   : > { %v4325_v38 = vadd.f32 %v4321_v28, %v8444_v53  ;;  %v7343_v28 = vld [vmem:[%s7787_s30 + $0x1] ss:$0 sm:$0xff] }
0x16da   : > { %v4333_v46 = vsel %vm1504_vm1, %v4325_v38, 0.0 }
0x16db   : > { %4334 = vadd.xlane.f32.xlu2 %v4333_v46  ;;  %v4303_v48 = vpop.f32.mrf.mxu0  ;;  %v7058_v46 = vld [vmem:[%s9397_s15 + $0xf0] sm:$0xff] }
0x16dc   : > { %v4313_v49 = vadd.f32 %v4303_v48, %v4007_v40  ;;  %v7059_v40 = vld [vmem:[%s9397_s15 + $0xf8] sm:$0xff] }
0x16dd   : > { %4539 = vmatpush.msrb.mxu2 %v7059_v40 }
0x16de   : > { %v4322_v7 = vadd.f32 %v7342_v26, %v4313_v49 }
0x16df   : > { %4540 = vmatpush.msrb.mxu2 %v7058_v46 }
0x16e0   : > { %v4326_v37 = vadd.f32 %v4322_v7, %v8457_v3  ;;  %v7344_v7 = vld [vmem:[%s9398_s16 + $0x1] ss:$0 sm:$0xff] }
0x16e2   : > { %v4336_v51 = vsel %vm1504_vm1, %v4326_v37, 0.0 }
0x16e3   : > { %4337 = vadd.xlane.f32.xlu0 %v4336_v51  ;;  %v4306_v34 = vpop.f32.mrf.mxu0 }
0x16e4   : > { %v4314_v53 = vadd.f32 %v4306_v34, %v4008_v42 }
0x16e6   : > { %v4323_v39 = vadd.f32 %v7342_v26, %v4314_v53 }
0x16e8   : > { %v4327_v52 = vadd.f32 %v4323_v39, %v8468_v10 }
0x16ea   : > { %v4339_v54 = vsel %vm1504_vm1, %v4327_v52, 0.0 }
0x16eb   : > { %4340 = vadd.xlane.f32.xlu1 %v4339_v54  ;;  %v4309_v35 = vpop.f32.mrf.mxu0 }
0x16ec   : > { %v4315_v3 = vadd.f32 %v4309_v35, %v4009_v15 }
0x16ee   : > { %v4324_v47 = vadd.f32 %v7342_v26, %v4315_v3 }
0x16f0   : > { %v4328_v18 = vadd.f32 %v4324_v47, %v8479_v36 }
0x16f2   : > { %v4342_v25 = vsel %vm1504_vm1, %v4328_v18, 0.0 }
0x16f3   : > { %4343 = vadd.xlane.f32.xlu2 %v4342_v25 }
0x174e   : > { %v4335_v55 = vpop.xlane.xlu2 %4334 }
0x174f   : > { %v4345_v56 = vmul.f32 %v4335_v55, %v8312_v45 }
0x1751   : > { %v4349_v31 = vsub.f32 %v4325_v38, %v4345_v56 }
0x1753   : > { %v4353_v30 = vmul.f32 %v4349_v31, %v4349_v31 }
0x1755   : > { %v4357_v10 = vsel %vm1504_vm1, %v4353_v30, 0.0 }
0x1756   : > { %4358 = vadd.xlane.f32.xlu0 %v4357_v10  ;;  %v4338_v50 = vpop.xlane.xlu0 %4337 }
0x1757   : > { %v4346_v20 = vmul.f32 %v4338_v50, %v8312_v45 }
0x1759   : > { %v8747_v62 = vsub.f32 %v4326_v37, %v4346_v20  ;;  %v7057_v37 = vld [vmem:[%s9397_s15 + $0xe8] sm:$0xff] }
0x175a   : > { %4541 = vmatpush.msrb.mxu2 %v7057_v37 }
0x175b   : > { %v4354_v36 = vmul.f32 %v8747_v62, %v8747_v62 }
0x175d   : > { %v4360_v0 = vsel %vm1504_vm1, %v4354_v36, 0.0 }
0x175e   : > { %v4341_v57 = vpop.xlane.xlu1 %4340  ;;  %4361 = vadd.xlane.f32.xlu1 %v4360_v0 }
0x175f   : > { %v4347_v41 = vmul.f32 %v4341_v57, %v8312_v45 }
0x1761   : > { %v8753_v2 = vsub.f32 %v4327_v52, %v4347_v41 }
0x1763   : > { %v4355_v58 = vmul.f32 %v8753_v2, %v8753_v2 }
0x1765   : > { %v4363_v17 = vsel %vm1504_vm1, %v4355_v58, 0.0 }
0x1766   : > { %4364 = vadd.xlane.f32.xlu2 %v4363_v17  ;;  %v4344_v43 = vpop.xlane.xlu2 %4343 }
0x1767   : > { %v4348_v4 = vmul.f32 %v4344_v43, %v8312_v45 }
0x1769   : > { %v8759_v5 = vsub.f32 %v4328_v18, %v4348_v4 }
0x176b   : > { %v4356_v61 = vmul.f32 %v8759_v5, %v8759_v5 }
0x176d   : > { %v4366_v59 = vsel %vm1504_vm1, %v4356_v61, 0.0 }
0x176e   : > { %4367 = vadd.xlane.f32.xlu0 %v4366_v59  ;;  %v7056_v59 = vld [vmem:[%s9397_s15 + $0xe0] sm:$0xff] }
0x176f   : > { %4542 = vmatpush.msrb.mxu2 %v7056_v59 }
0x1771   : > { %4543 = vmatpush.msrb.mxu2 %v7055_v29 }
0x1773   : > { %4544 = vmatpush.msrb.mxu2 %v7054_v6  ;;  %v7346_v6 = vld [vmem:[%s9400_s22 + $0x1] ss:$0 sm:$0xff] }
0x1775   : > { %4545 = vmatpush.msrb.mxu2 %v7053_v44 }
0x17c9   : > { %v4359_v11 = vpop.xlane.xlu0 %4358 }
0x17ca   : > { %v4369_v60 = vmul.f32 %v4359_v11, %v8312_v45  ;;  %v7050_v11 = vld [vmem:[%s9397_s15 + $0xb0] sm:$0xff] }
0x17cc   : > { %v4373_v63 = vadd.f32 1e-05, %v4369_v60  ;;  %v7049_v60 = vld [vmem:[%s9397_s15 + $0xa8] sm:$0xff] }
0x17ce   : > { %7532 = vrsqrt.f32 %v4373_v63  ;;  %vm4383_vm15 = vweird.f32 %v4373_v63 }
0x17d1   : > { %v4362_v9 = vpop.xlane.xlu1 %4361 }
0x17d2   : > { %v4370_v1 = vmul.f32 %v4362_v9, %v8312_v45  ;;  %v7047_v9 = vld [vmem:[%s9397_s15 + $0x98] sm:$0xff] }
0x17d4   : > { %v7533_v12 = vpop.eup %7532  ;;  %v4374_v13 = vadd.f32 1e-05, %v4370_v1  ;;  %v7046_v1 = vld [vmem:[%s9397_s15 + $0x90] sm:$0xff] }
0x17d5   : > { %v4378_v14 = vmul.f32 %v7533_v12, %v4373_v63  ;;  %vm4384_vm14 = vweird.f32 %v7533_v12  ;;  %v7048_v63 = vld [vmem:[%s9397_s15 + $0xa0] sm:$0xff] }
0x17d6   : > { %7534 = vrsqrt.f32 %v4374_v13  ;;  %vm4385_vm0 = vmor %vm4383_vm15, %vm4384_vm14  ;;  %vm4393_vm4 = vweird.f32 %v4374_v13 }
0x17d7   : > { %v4379_v21 = vmul.f32 %v7533_v12, %v4378_v14  ;;  %v7345_v14 = vld [vmem:[%s9399_s18 + $0x1] ss:$0 sm:$0xff] }
0x17d9   : > { %v4380_v19 = vmul.f32 0.5, %v4379_v21  ;;  %v4365_v22 = vpop.xlane.xlu2 %4364 }
0x17da   : > { %v4371_v23 = vmul.f32 %v4365_v22, %v8312_v45 }
0x17db   : > { %v4381_v26 = vsub.f32 1.5, %v4380_v19 }
0x17dc   : > { %v7535_v27 = vpop.eup %7534  ;;  %v4375_v24 = vadd.f32 1e-05, %v4371_v23 }
0x17dd   : > { %v4382_v32 = vmul.f32 %v7533_v12, %v4381_v26  ;;  %v4388_v38 = vmul.f32 %v7535_v27, %v4374_v13  ;;  %vm4394_vm3 = vweird.f32 %v7535_v27  ;;  %v7044_v13 = vld [vmem:[%s9397_s15 + $0x80] sm:$0xff] }
0x17de   : > { %7536 = vrsqrt.f32 %v4375_v24  ;;  %vm4395_vm5 = vmor %vm4393_vm4, %vm4394_vm3  ;;  %vm4403_vm7 = vweird.f32 %v4375_v24 }
0x17df   : > { %v4386_v48 = vsel %vm4385_vm0, %v7533_v12, %v4382_v32  ;;  %v4389_v49 = vmul.f32 %v7535_v27, %v4388_v38  ;;  %v7045_v12 = vld [vmem:[%s9397_s15 + $0x88] sm:$0xff] }
0x17e0   : > { %v4417_v33 = vmul.f32 %v4386_v48, %v4349_v31 }
0x17e1   : > { %v4390_v42 = vmul.f32 0.5, %v4389_v49  ;;  %v4368_v51 = vpop.xlane.xlu0 %4367 }
0x17e2   : > { %v4424_v34 = vmul.f32 %v7343_v28, %v4417_v33  ;;  %v4372_v53 = vmul.f32 %v4368_v51, %v8312_v45 }
0x17e3   : > { %v4391_v39 = vsub.f32 1.5, %v4390_v42 }
0x17e4   : > { %v7537_v16 = vpop.eup %7536  ;;  %v8777_v52 = vadd.f32 %v7344_v7, %v4424_v34  ;;  %v4376_v15 = vadd.f32 1e-05, %v4372_v53 }
0x17e5   : > { %v4392_v54 = vmul.f32 %v7535_v27, %v4391_v39  ;;  %v4398_v35 = vmul.f32 %v7537_v16, %v4375_v24  ;;  %vm4404_vm6 = vweird.f32 %v7537_v16 }
0x17e6   : > { %7538 = vrsqrt.f32 %v4376_v15  ;;  %7040 = vmatmul.msk.f32.vlgmr.msrb.gmra.mxu1 %vm1504_vm1, %v8777_v52  ;;  %vm4405_vm8 = vmor %vm4403_vm7, %vm4404_vm6  ;;  %vm4413_vm10 = vweird.f32 %v4376_v15 }
0x17e7   : > { %v4396_v3 = vsel %vm4395_vm5, %v7535_v27, %v4392_v54  ;;  %v4399_v47 = vmul.f32 %v7537_v16, %v4398_v35 }
0x17e8   : > { %v4418_v18 = vmul.f32 %v4396_v3, %v8747_v62 }
0x17e9   : > { %v4400_v25 = vmul.f32 0.5, %v4399_v47 }
0x17ea   : > { %v4425_v55 = vmul.f32 %v7343_v28, %v4418_v18 }
0x17eb   : > { %v4401_v56 = vsub.f32 1.5, %v4400_v25 }
0x17ec   : > { %v7539_v31 = vpop.eup %7538  ;;  %v8782_v30 = vadd.f32 %v7344_v7, %v4425_v55 }
0x17ed   : > { %v4402_v10 = vmul.f32 %v7537_v16, %v4401_v56  ;;  %v4408_v50 = vmul.f32 %v7539_v31, %v4376_v15  ;;  %vm4414_vm9 = vweird.f32 %v7539_v31 }
0x17ee   : > { %7041 = vmatmul.msk.f32.gmra.mxu1 %vm1504_vm1, %v8782_v30  ;;  %vm4415_vm11 = vmor %vm4413_vm10, %vm4414_vm9 }
0x17ef   : > { %v4406_v20 = vsel %vm4405_vm8, %v7537_v16, %v4402_v10  ;;  %v4409_v36 = vmul.f32 %v7539_v31, %v4408_v50 }
0x17f0   : > { %v4419_v0 = vmul.f32 %v4406_v20, %v8753_v2 }
0x17f1   : > { %v4410_v62 = vmul.f32 0.5, %v4409_v36 }
0x17f2   : > { %v4426_v57 = vmul.f32 %v7343_v28, %v4419_v0 }
0x17f3   : > { %v4411_v41 = vsub.f32 1.5, %v4410_v62 }
0x17f4   : > { %v8787_v58 = vadd.f32 %v7344_v7, %v4426_v57 }
0x17f5   : > { %v4412_v17 = vmul.f32 %v7539_v31, %v4411_v41 }
0x17f6   : > { %7042 = vmatmul.msk.f32.gmra.mxu1 %vm1504_vm1, %v8787_v58 }
0x17f7   : > { %v4416_v43 = vsel %vm4415_vm11, %v7539_v31, %v4412_v17 }
0x17f8   : > { %v4420_v2 = vmul.f32 %v4416_v43, %v8759_v5  ;;  %v7052_v5 = vld [vmem:[%s9397_s15 + $0xc0] sm:$0xff] }
0x17f9   : > { %4546 = vmatpush.msrb.mxu2 %v7052_v5 }
0x17fa   : > { %v4427_v4 = vmul.f32 %v7343_v28, %v4420_v2 }
0x17fb   : > { %4547 = vmatpush.msrb.mxu2 %v7051_v8 }
0x17fc   : > { %v8792_v61 = vadd.f32 %v7344_v7, %v4427_v4 }
0x17fd   : > { %4548 = vmatpush.msrb.mxu2 %v7050_v11 }
0x17fe   : > { %7043 = vmatmul.msk.f32.gmra.mxu1 %vm1504_vm1, %v8792_v61 }
0x17ff   : > { %4549 = vmatpush.msrb.mxu2 %v7049_v60 }
0x1801   : > { %4550 = vmatpush.msrb.mxu2 %v7048_v63 }
0x1803   : > { %4551 = vmatpush.msrb.mxu2 %v7047_v9 }
0x1805   : > { %4552 = vmatpush.msrb.mxu2 %v7046_v1 }
0x1807   : > { %4553 = vmatpush.msrb.mxu2 %v7045_v12 }
0x1809   : > { %4554 = vmatpush.msrb.mxu2 %v7044_v13 }
0x1863   : > { %v4474_v21 = vpop.f32.mrf.mxu1 }
0x1864   : > { %v4475_v19 = vadd.f32 %v7345_v14, %v4474_v21 }
0x1866   : > { %v4486_v22 = vmul.f32 %v4475_v19, %v4475_v19 }
0x1868   : > { %v4490_v23 = vmul.f32 %v4486_v22, %v4475_v19 }
0x186a   : > { %v4494_v26 = vmul.f32 0.044715, %v4490_v23 }
0x186b   : > { %v4477_v27 = vpop.f32.mrf.mxu1 }
0x186c   : > { %v4498_v24 = vadd.f32 %v4494_v26, %v4475_v19  ;;  %v4478_v28 = vadd.f32 %v7345_v14, %v4477_v27 }
0x186e   : > { %v4502_v32 = vmul.f32 0.7978846, %v4498_v24  ;;  %v4487_v38 = vmul.f32 %v4478_v28, %v4478_v28 }
0x1870   : > { %7540 = vtanh.f32 %v4502_v32  ;;  %v4491_v40 = vmul.f32 %v4487_v38, %v4478_v28 }
0x1872   : > { %v4495_v46 = vmul.f32 0.044715, %v4491_v40 }
0x1873   : > { %v4480_v48 = vpop.f32.mrf.mxu1 }
0x1874   : > { %v4481_v49 = vadd.f32 %v7345_v14, %v4480_v48  ;;  %v4499_v7 = vadd.f32 %v4495_v46, %v4478_v28 }
0x1876   : > { %v7541_v33 = vpop.eup %7540  ;;  %v4488_v37 = vmul.f32 %v4481_v49, %v4481_v49  ;;  %v4503_v42 = vmul.f32 0.7978846, %v4499_v7 }
0x1877   : > { %v4510_v51 = vadd.f32 1.0, %v7541_v33 }
0x1878   : > { %v4492_v34 = vmul.f32 %v4488_v37, %v4481_v49  ;;  %7542 = vtanh.f32 %v4503_v42 }
0x1879   : > { %v4514_v53 = vmul.f32 0.5, %v4510_v51 }
0x187a   : > { %v4496_v39 = vmul.f32 0.044715, %v4492_v34 }
0x187b   : > { %v4518_v16 = vmul.f32 %v4514_v53, %v4475_v19  ;;  %v4483_v15 = vpop.f32.mrf.mxu1 }
0x187c   : > { %v4484_v54 = vadd.f32 %v7345_v14, %v4483_v15  ;;  %v4500_v35 = vadd.f32 %v4496_v39, %v4481_v49 }
0x187d   : > { %4555 = vmatmul.f32.vlgmr.msrb.gmra.mxu2 %v4518_v16 }
0x187e   : > { %v7543_v3 = vpop.eup %7542  ;;  %v4489_v47 = vmul.f32 %v4484_v54, %v4484_v54  ;;  %v4504_v18 = vmul.f32 0.7978846, %v4500_v35 }
0x187f   : > { %v4511_v25 = vadd.f32 1.0, %v7543_v3 }
0x1880   : > { %v4493_v55 = vmul.f32 %v4489_v47, %v4484_v54  ;;  %7544 = vtanh.f32 %v4504_v18 }
0x1881   : > { %v4515_v56 = vmul.f32 0.5, %v4511_v25 }
0x1882   : > { %v4497_v31 = vmul.f32 0.044715, %v4493_v55 }
0x1883   : > { %v4519_v10 = vmul.f32 %v4515_v56, %v4478_v28 }
0x1884   : > { %v4501_v50 = vadd.f32 %v4497_v31, %v4484_v54 }
0x1885   : > { %4558 = vmatmul.f32.gmra.mxu2 %v4519_v10 }
0x1886   : > { %v7545_v20 = vpop.eup %7544  ;;  %v4505_v36 = vmul.f32 0.7978846, %v4501_v50 }
0x1887   : > { %v4512_v0 = vadd.f32 1.0, %v7545_v20  ;;  %v7347_v20 = vld [vmem:[%s9401_s23 + $0x1] ss:$0 sm:$0xff] }
0x1888   : > { %7546 = vtanh.f32 %v4505_v36 }
0x1889   : > { %v4516_v62 = vmul.f32 0.5, %v4512_v0 }
0x188b   : > { %v4520_v57 = vmul.f32 %v4516_v62, %v4481_v49 }
0x188d   : > { %4561 = vmatmul.f32.gmra.mxu2 %v4520_v57  ;;  %v7348_v57 = vld [vmem:[%s9402_s26 + $0x1] ss:$0 sm:$0xff] }
0x188e   : > { %v7547_v41 = vpop.eup %7546 }
0x188f   : > { %v4513_v17 = vadd.f32 1.0, %v7547_v41 }
0x1891   : > { %v4517_v43 = vmul.f32 0.5, %v4513_v17 }
0x1893   : > { %v4521_v2 = vmul.f32 %v4517_v43, %v4484_v54 }
0x1895   : > { %4564 = vmatmul.f32.gmra.mxu2 %v4521_v2 }
0x1900   : > { %v4556_v4 = vpop.f32.mrf.mxu2 }
0x1901   : > { %v4568_v13 = vadd.f32 %v4556_v4, %v8777_v52 }
0x1903   : > { %v4577_v14 = vadd.f32 %v7346_v6, %v4568_v13 }
0x1905   : > { %v4585_v21 = vsel %vm1504_vm1, %v4577_v14, 0.0 }
0x1908   : > { %v4559_v59 = vpop.f32.mrf.mxu2 }
0x1909   : > { %v4569_v29 = vadd.f32 %v4559_v59, %v8782_v30 }
0x190b   : > { %v4578_v44 = vadd.f32 %v7346_v6, %v4569_v29 }
0x190d   : > { %v4588_v5 = vsel %vm1504_vm1, %v4578_v44, 0.0 }
0x190e   : > { %4589 = vadd.xlane.f32.xlu0 %v4588_v5 }
0x1910   : > { %v4562_v8 = vpop.f32.mrf.mxu2 }
0x1911   : > { %v4570_v11 = vadd.f32 %v4562_v8, %v8787_v58 }
0x1913   : > { %v4579_v60 = vadd.f32 %v7346_v6, %v4570_v11 }
0x1915   : > { %v4591_v63 = vsel %vm1504_vm1, %v4579_v60, 0.0 }
0x1916   : > { %4592 = vadd.xlane.f32.xlu2 %v4591_v63 }
0x1918   : > { %v4565_v9 = vpop.f32.mrf.mxu2 }
0x1919   : > { %v4571_v1 = vadd.f32 %v4565_v9, %v8792_v61 }
0x191b   : > { %v4580_v12 = vadd.f32 %v7346_v6, %v4571_v1 }
0x191d   : > { %v4594_v30 = vsel %vm1504_vm1, %v4580_v12, 0.0 }
0x191e   : > { %4595 = vadd.xlane.f32.xlu1 %v4594_v30 }
0x1926   : > { %4586 = vadd.xlane.f32.xlu1 %v4585_v21 }
0x1981   : > { %v4590_v19 = vpop.xlane.xlu0 %4589 }
0x1982   : > { %v4598_v58 = vmul.f32 %v4590_v19, %v8312_v45 }
0x1984   : > { %v4602_v22 = vsub.f32 %v4578_v44, %v4598_v58 }
0x1986   : > { %v4606_v23 = vmul.f32 %v4602_v22, %v4602_v22 }
0x1988   : > { %v4612_v26 = vsel %vm1504_vm1, %v4606_v23, 0.0 }
0x1989   : > { %v4593_v27 = vpop.xlane.xlu2 %4592  ;;  %4613 = vadd.xlane.f32.xlu1 %v4612_v26 }
0x198a   : > { %v4599_v61 = vmul.f32 %v4593_v27, %v8312_v45 }
0x198c   : > { %v8822_v24 = vsub.f32 %v4579_v60, %v4599_v61 }
0x198e   : > { %v4607_v52 = vmul.f32 %v8822_v24, %v8822_v24 }
0x1990   : > { %v4615_v28 = vsel %vm1504_vm1, %v4607_v52, 0.0 }
0x1991   : > { %4616 = vadd.xlane.f32.xlu0 %v4615_v28  ;;  %v4596_v32 = vpop.xlane.xlu1 %4595 }
0x1992   : > { %v4600_v38 = vmul.f32 %v4596_v32, %v8312_v45 }
0x1994   : > { %v8828_v40 = vsub.f32 %v4580_v12, %v4600_v38 }
0x1996   : > { %v4608_v46 = vmul.f32 %v8828_v40, %v8828_v40 }
0x1998   : > { %v4618_v48 = vsel %vm1504_vm1, %v4608_v46, 0.0 }
0x1999   : > { %4619 = vadd.xlane.f32.xlu2 %v4618_v48  ;;  %v4587_v49 = vpop.xlane.xlu1 %4586 }
0x199a   : > { %v4597_v7 = vmul.f32 %v4587_v49, %v8312_v45 }
0x199c   : > { %v8834_v33 = vsub.f32 %v4577_v14, %v4597_v7 }
0x199e   : > { %v4605_v37 = vmul.f32 %v8834_v33, %v8834_v33 }
0x19a0   : > { %v4609_v42 = vsel %vm1504_vm1, %v4605_v37, 0.0 }
0x19a1   : > { %4610 = vadd.xlane.f32.xlu2 %v4609_v42 }
0x19fc   : > { %v4614_v51 = vpop.xlane.xlu1 %4613 }
0x19fd   : > { %v4622_v34 = vmul.f32 %v4614_v51, %v8312_v45 }
0x19ff   : > { %v4626_v53 = vadd.f32 1e-05, %v4622_v34 }
0x1a01   : > { %7548 = vrsqrt.f32 %v4626_v53  ;;  %vm4645_vm13 = vweird.f32 %v4626_v53 }
0x1a04   : > { %v4617_v39 = vpop.xlane.xlu0 %4616 }
0x1a05   : > { %v4623_v16 = vmul.f32 %v4617_v39, %v8312_v45  ;;  %v4703_v39 = vld [vmem:[%s9403_s28] sm:$0xff]  ;;  %s9408_s28 = sld [smem:[#allocation20_spill]] }
0x1a07   : > { %v7549_v15 = vpop.eup %7548  ;;  %v4627_v54 = vadd.f32 1e-05, %v4623_v16  ;;  %v4704_v16 = vld [vmem:[%s9404_s1] sm:$0xff]  ;;  %s9409_s1 = sld [smem:[#allocation21_spill]] }
0x1a08   : > { %v4640_v35 = vmul.f32 %v7549_v15, %v4626_v53  ;;  %vm4646_vm12 = vweird.f32 %v7549_v15 }
0x1a09   : > { %7550 = vrsqrt.f32 %v4627_v54  ;;  %vm4647_vm14 = vmor %vm4645_vm13, %vm4646_vm12  ;;  %vm4655_vm0 = vweird.f32 %v4627_v54 }
0x1a0a   : > { %v4641_v3 = vmul.f32 %v7549_v15, %v4640_v35 }
0x1a0c   : > { %v4642_v47 = vmul.f32 0.5, %v4641_v3  ;;  %v4620_v18 = vpop.xlane.xlu2 %4619  ;;  %v4729_v3 = vld [vmem:[%s9405_s2] sm:$0xff] }
0x1a0d   : > { %v4624_v25 = vmul.f32 %v4620_v18, %v8312_v45  ;;  %v4731_v18 = vld [vmem:[%s9405_s2 + $0x10] sm:$0xff] }
0x1a0e   : > { %v4643_v55 = vsub.f32 1.5, %v4642_v47  ;;  %v4730_v47 = vld [vmem:[%s9405_s2 + $0x8] sm:$0xff] }
0x1a0f   : > { %v7551_v56 = vpop.eup %7550  ;;  %v4628_v31 = vadd.f32 1e-05, %v4624_v25  ;;  %v4732_v25 = vld [vmem:[%s9405_s2 + $0x18] sm:$0xff]  ;;  %s9411_s2 = sld [smem:[#allocation19_spill]] }
0x1a10   : > { %v4644_v10 = vmul.f32 %v7549_v15, %v4643_v55  ;;  %v4650_v50 = vmul.f32 %v7551_v56, %v4627_v54  ;;  %vm4656_vm15 = vweird.f32 %v7551_v56  ;;  %v4733_v55 = vld [vmem:[%s9406_s0] sm:$0xff] }
0x1a11   : > { %7552 = vrsqrt.f32 %v4628_v31  ;;  %vm4657_vm3 = vmor %vm4655_vm0, %vm4656_vm15  ;;  %vm4665_vm5 = vweird.f32 %v4628_v31 }
0x1a12   : > { %v4651_v36 = vmul.f32 %v7551_v56, %v4650_v50  ;;  %v4648_v0 = vsel %vm4647_vm14, %v7549_v15, %v4644_v10 }
0x1a13   : > { %v4670_v62 = vmul.f32 %v4648_v0, %v4602_v22 }
0x1a14   : > { %v4652_v41 = vmul.f32 0.5, %v4651_v36  ;;  %v4611_v17 = vpop.xlane.xlu2 %4610 }
0x1a15   : > { %v4621_v43 = vmul.f32 %v4611_v17, %v8312_v45  ;;  %v4677_v2 = vmul.f32 %v7347_v20, %v4670_v62  ;;  %v4735_v17 = vld [vmem:[%s9406_s0 + $0x10] sm:$0xff] }
0x1a16   : > { %v4653_v4 = vsub.f32 1.5, %v4652_v41 }
0x1a17   : > { %v7553_v59 = vpop.eup %7552  ;;  %v4625_v29 = vadd.f32 1e-05, %v4621_v43  ;;  %v8845_v6 = vadd.f32 %v7348_v57, %v4677_v2 }
0x1a18   : > { %v4654_v44 = vmul.f32 %v7551_v56, %v4653_v4  ;;  %v4660_v5 = vmul.f32 %v7553_v59, %v4628_v31  ;;  %vm4666_vm4 = vweird.f32 %v7553_v59 }
0x1a19   : > { %7554 = vrsqrt.f32 %v4625_v29  ;;  %v4690_v8 = vsel %vm1504_vm1, %v8845_v6, 0.0  ;;  %vm4667_vm6 = vmor %vm4665_vm5, %vm4666_vm4  ;;  %vm4635_vm8 = vweird.f32 %v4625_v29 }
0x1a1a   : > { %v4661_v11 = vmul.f32 %v7553_v59, %v4660_v5  ;;  %4691 = vadd.xlane.f32.xlu2 %v4690_v8  ;;  %v4658_v60 = vsel %vm4657_vm3, %v7551_v56, %v4654_v44  ;;  %v7718_v56 = vmov 0   ;;  %v4736_v8 = vld [vmem:[%s9406_s0 + $0x18] sm:$0xff] }
0x1a1b   : > { %v4671_v63 = vmul.f32 %v4658_v60, %v8822_v24  ;;  %7307 = vset.pattern.permute.xlu1 %v7718_v56  ;;  %7308 = vset.pattern.permute.xlu2 %v7718_v56 }
0x1a1c   : > { %v4662_v9 = vmul.f32 0.5, %v4661_v11  ;;  %7309 = vset.pattern.permute.xlu0 %v7718_v56 }
0x1a1d   : > { %v4678_v1 = vmul.f32 %v7347_v20, %v4671_v63 }
0x1a1e   : > { %v4663_v12 = vsub.f32 1.5, %v4662_v9 }
0x1a1f   : > { %v7555_v13 = vpop.eup %7554  ;;  %v8850_v30 = vadd.f32 %v7348_v57, %v4678_v1 }
0x1a20   : > { %v4664_v14 = vmul.f32 %v7553_v59, %v4663_v12  ;;  %v4630_v21 = vmul.f32 %v7555_v13, %v4625_v29  ;;  %vm4636_vm7 = vweird.f32 %v7555_v13 }
0x1a21   : > { %v4693_v19 = vsel %vm1504_vm1, %v8850_v30, 0.0  ;;  %vm4637_vm9 = vmor %vm4635_vm8, %vm4636_vm7 }
0x1a22   : > { %v4631_v58 = vmul.f32 %v7555_v13, %v4630_v21  ;;  %4694 = vadd.xlane.f32.xlu1 %v4693_v19  ;;  %v4668_v22 = vsel %vm4667_vm6, %v7553_v59, %v4664_v14 }
0x1a23   : > { %v4672_v23 = vmul.f32 %v4668_v22, %v8828_v40 }
0x1a24   : > { %v4632_v26 = vmul.f32 0.5, %v4631_v58 }
0x1a25   : > { %v4679_v27 = vmul.f32 %v7347_v20, %v4672_v23 }
0x1a26   : > { %v4633_v61 = vsub.f32 1.5, %v4632_v26 }
0x1a27   : > { %v8855_v24 = vadd.f32 %v7348_v57, %v4679_v27 }
0x1a28   : > { %v4634_v52 = vmul.f32 %v7555_v13, %v4633_v61 }
0x1a29   : > { %v4696_v28 = vsel %vm1504_vm1, %v8855_v24, 0.0 }
0x1a2a   : > { %4697 = vadd.xlane.f32.xlu0 %v4696_v28  ;;  %v4638_v32 = vsel %vm4637_vm9, %v7555_v13, %v4634_v52 }
0x1a2b   : > { %v4669_v38 = vmul.f32 %v4638_v32, %v8834_v33 }
0x1a2d   : > { %v4676_v46 = vmul.f32 %v7347_v20, %v4669_v38  ;;  %v4734_v20 = vld [vmem:[%s9406_s0 + $0x8] sm:$0xff]  ;;  %s9410_s0 = sld [smem:[#allocation17_spill]] }
0x1a2f   : > { %v8860_v48 = vadd.f32 %v7348_v57, %v4676_v46 }
0x1a31   : > { %v4687_v40 = vsel %vm1504_vm1, %v8860_v48, 0.0 }
0x1a32   : > { %4688 = vadd.xlane.f32.xlu0 %v4687_v40 }
0x1a8d   : > { %v4692_v42 = vpop.xlane.xlu2 %4691 }
0x1a8e   : > { %v4700_v33 = vmul.f32 %v4692_v42, %v8312_v45 }
0x1a95   : > { %v4695_v49 = vpop.xlane.xlu1 %4694 }
0x1a96   : > { %v4701_v51 = vmul.f32 %v4695_v49, %v8312_v45 }
0x1a9d   : > { %v4698_v7 = vpop.xlane.xlu0 %4697 }
0x1a9e   : > { %v4702_v37 = vmul.f32 %v4698_v7, %v8312_v45 }
0x1aa0   : > { %4720 = vmatpush.msrb.mxu3 %v4702_v37 }
0x1aa2   : > { %4721 = vmatpush.msrb.mxu3 %v4701_v51 }
0x1aa4   : > { %4722 = vmatpush.msrb.mxu3 %v4700_v33 }
0x1aa5   : > { %v4689_v34 = vpop.xlane.xlu0 %4688 }
0x1aa6   : > { %v4699_v53 = vmul.f32 %v4689_v34, %v8312_v45 }
0x1aa8   : > { %4723 = vmatpush.msrb.mxu3 %v4699_v53 }
0x1aa9   : > { %7063 = vmatmul.msk.f32.vlgmr.msrb.gmra.mxu3 %vm1504_vm1, %v4703_v39 }
0x1b2c   : > { %v4725_v15 = vpop.f32.mrf.mxu3 }
0x1b2d   : > { %v4726_v54 = vadd.f32 %v4725_v15, %v4704_v16 }
0x1b2f   : > { %v4728_v35 = vmax.f32 %v4726_v54, 0.0 }
0x1b31   : > { %4764 = vmatpush.msra.mxu3 %v4728_v35 }
0x1b32   : > { %7064 = vmatmul.msk.f32.vlgmr.msra.gmra.mxu3 %vm1620_vm2, %v4729_v3 }
0x1b3a   : > { %7065 = vmatmul.msk.f32.gmra.mxu3 %vm1620_vm2, %v4730_v47 }
0x1b42   : > { %7066 = vmatmul.msk.f32.gmra.mxu3 %vm1620_vm2, %v4731_v18 }
0x1b4a   : > { %7067 = vmatmul.msk.f32.gmra.mxu3 %vm1620_vm2, %v4732_v25 }
0x1bb5   : > { %v4766_v31 = vpop.f32.mrf.mxu3 }
0x1bb6   : > { %v4767_v10 = vadd.f32 %v4766_v31, %v4733_v55 }
0x1bb8   : > { %v7068_v50 = vmul.f32 -1.442695, %v4767_v10 }
0x1bba   : > { %7556 = vpow2.f32 %v7068_v50 }
0x1bbd   : > { %v4769_v36 = vpop.f32.mrf.mxu3 }
0x1bbe   : > { %v4770_v0 = vadd.f32 %v4769_v36, %v4734_v20  ;;  %v4881_v36 = vld [vmem:[%s9407_s11 + $0x18] sm:$0xff] }
0x1bbf   : > { %4910 = vmatpush.msra.mxu0 %v4881_v36 }
0x1bc0   : > { %v7557_v62 = vpop.eup %7556  ;;  %v7069_v57 = vmul.f32 -1.442695, %v4770_v0  ;;  %v4880_v0 = vld [vmem:[%s9407_s11 + $0x10] sm:$0xff] }
0x1bc1   : > { %v4790_v41 = vadd.f32 1.0, %v7557_v62  ;;  %v4879_v62 = vld [vmem:[%s9407_s11 + $0x8] sm:$0xff]  ;;  %4911 = vmatpush.msra.mxu0 %v4880_v0 }
0x1bc2   : > { %7558 = vpow2.f32 %v7069_v57  ;;  %v4878_v57 = vld [vmem:[%s9407_s11] sm:$0xff] }
0x1bc3   : > { %7560 = vrcp.f32 %v4790_v41  ;;  %v4805_v63 = vand.u32 2147483648, %v4790_v41  ;;  %v4803_v12 = vand.u32 2147483647, %v4790_v41  ;;  %vm4799_vm11 = vweird.f32 %v4790_v41  ;;  %4912 = vmatpush.msra.mxu0 %v4879_v62 }
0x1bc5   : > { %v4772_v43 = vpop.f32.mrf.mxu3  ;;  %v4806_v22 = vor.u32 1.1754944e-38, %v4805_v63  ;;  %vm4804_vm13 = vcmp.eq.f32.partialorder %v4803_v12, 8.507059e+37  ;;  %4913 = vmatpush.msra.mxu0 %v4878_v57  ;;  %v5030_v63 = vld [vmem:[%s9409_s1 + $0x8] sm:$0xff]  ;;  %v7349_v12 = vld [vmem:[%s9410_s0] ss:$0 sm:$0xff]  ;;  %s9413_s0 = sld [smem:[#allocation23_spill]] }
0x1bc6   : > { %v4773_v2 = vadd.f32 %v4772_v43, %v4735_v17  ;;  %v5032_v17 = vld [vmem:[%s9409_s1 + $0x18] sm:$0xff]  ;;  %v4982_v43 = vld [vmem:[%s9408_s28 + $0x10] sm:$0xff] }
0x1bc7   : > { %5049 = vmatpush.msrb.mxu3 %v5032_v17  ;;  %v7120_v57 = vld [vmem:[%s9409_s1 + $0x30] sm:$0xff]  ;;  %v7118_v17 = vld [vmem:[%s9409_s1 + $0x20] sm:$0xff] }
0x1bc8   : > { %v7559_v4 = vpop.eup %7558  ;;  %v7070_v59 = vmul.f32 -1.442695, %v4773_v2  ;;  %v5031_v2 = vld [vmem:[%s9409_s1 + $0x10] sm:$0xff] }
0x1bc9   : > { %v7561_v29 = vpop.eup %7560  ;;  %v4791_v44 = vadd.f32 1.0, %v7559_v4  ;;  %5050 = vmatpush.msrb.mxu3 %v5031_v2 }
0x1bca   : > { %7562 = vpow2.f32 %v7070_v59  ;;  %v4795_v5 = vmul.f32 %v7561_v29, %v4790_v41  ;;  %vm4800_vm10 = vweird.f32 %v7561_v29  ;;  %v4983_v41 = vld [vmem:[%s9408_s28 + $0x18] sm:$0xff] }
0x1bcb   : > { %7564 = vrcp.f32 %v4791_v44  ;;  %vm4801_vm12 = vmor %vm4799_vm11, %vm4800_vm10  ;;  %v4820_v52 = vand.u32 2147483648, %v4791_v44  ;;  %v4818_v32 = vand.u32 2147483647, %v4791_v44  ;;  %vm4814_vm15 = vweird.f32 %v4791_v44  ;;  %5012 = vmatpush.msra.mxu2 %v4983_v41  ;;  %5051 = vmatpush.msrb.mxu3 %v5030_v63  ;;  %v7119_v41 = vld [vmem:[%s9409_s1 + $0x28] sm:$0xff] }
0x1bcc   : > { %v4796_v11 = vsub.f32 1.0, %v4795_v5 }
0x1bcd   : > { %v4775_v60 = vpop.f32.mrf.mxu3  ;;  %v4821_v7 = vor.u32 1.1754944e-38, %v4820_v52  ;;  %vm4819_vm3 = vcmp.eq.f32.partialorder %v4818_v32, 8.507059e+37  ;;  %5013 = vmatpush.msra.mxu2 %v4982_v43  ;;  %v8936_v32 = vld [vmem:[%s9412_s3 + $0x8] sm:$0xff] }
0x1bce   : > { %v4776_v9 = vadd.f32 %v4775_v60, %v4736_v8  ;;  %v4797_v1 = vmul.f32 %v7561_v29, %v4796_v11  ;;  %v4981_v60 = vld [vmem:[%s9408_s28 + $0x8] sm:$0xff] }
0x1bcf   : > { %5014 = vmatpush.msra.mxu2 %v4981_v60 }
0x1bd0   : > { %v7563_v13 = vpop.eup %7562  ;;  %v7071_v14 = vmul.f32 -1.442695, %v4776_v9  ;;  %v4798_v21 = vadd.f32 %v7561_v29, %v4797_v1  ;;  %v5029_v9 = vld [vmem:[%s9409_s1] sm:$0xff]  ;;  %v7111_v1 = vld [vmem:[%s9408_s28 + $0x30] sm:$0xff] }
0x1bd1   : > { %v7565_v19 = vpop.eup %7564  ;;  %v4792_v58 = vadd.f32 1.0, %v7563_v13  ;;  %5052 = vmatpush.msrb.mxu3 %v5029_v9  ;;  %v7110_v13 = vld [vmem:[%s9408_s28 + $0x28] sm:$0xff] }
0x1bd2   : > { %7566 = vpow2.f32 %v7071_v14  ;;  %v4802_v23 = vsel %vm4801_vm12, %v7561_v29, %v4798_v21  ;;  %v4810_v26 = vmul.f32 %v7565_v19, %v4791_v44  ;;  %vm4815_vm14 = vweird.f32 %v7565_v19 }
0x1bd3   : > { %7568 = vrcp.f32 %v4792_v58  ;;  %v4807_v27 = vsel %vm4804_vm13, %v4806_v22, %v4802_v23  ;;  %vm4816_vm0 = vmor %vm4814_vm15, %vm4815_vm14  ;;  %v4835_v34 = vand.u32 2147483648, %v4792_v58  ;;  %v4833_v39 = vand.u32 2147483647, %v4792_v58 }
0x1bd4   : > { %4856 = vperm.xlu1 %7307, %v4807_v27   ;;  %v4811_v61 = vsub.f32 1.0, %v4810_v26  ;;  %vm4829_vm5 = vweird.f32 %v4792_v58  ;;  %v4932_v26 = vld [vmem:[%s9411_s2 + $0x8] sm:$0xff]  ;;  %v4931_v27 = vld [vmem:[%s9411_s2] sm:$0xff] }
0x1bd5   : > { %v4836_v54 = vor.u32 1.1754944e-38, %v4835_v34  ;;  %vm4834_vm7 = vcmp.eq.f32.partialorder %v4833_v39, 8.507059e+37  ;;  %v7351_v39 = vld [vmem:[%s9414_s5] ss:$0 sm:$0xff] }
0x1bd6   : > { %v4812_v28 = vmul.f32 %v7565_v19, %v4811_v61  ;;  %v8925_v61 = vld [vmem:[%s9412_s3] sm:$0xff] }
0x1bd8   : > { %v7567_v38 = vpop.eup %7566  ;;  %v4813_v46 = vadd.f32 %v7565_v19, %v4812_v28 }
0x1bd9   : > { %v7569_v40 = vpop.eup %7568  ;;  %v4793_v49 = vadd.f32 1.0, %v7567_v38 }
0x1bda   : > { %v4817_v37 = vsel %vm4816_vm0, %v7565_v19, %v4813_v46  ;;  %v4825_v42 = vmul.f32 %v7569_v40, %v4792_v58  ;;  %vm4830_vm4 = vweird.f32 %v7569_v40  ;;  %v4934_v19 = vld [vmem:[%s9411_s2 + $0x18] sm:$0xff]  ;;  %v4933_v58 = vld [vmem:[%s9411_s2 + $0x10] sm:$0xff] }
0x1bdb   : > { %7570 = vrcp.f32 %v4793_v49  ;;  %v4822_v51 = vsel %vm4819_vm3, %v4821_v7, %v4817_v37  ;;  %vm4831_vm6 = vmor %vm4829_vm5, %vm4830_vm4  ;;  %v4850_v18 = vand.u32 2147483648, %v4793_v49  ;;  %vm4844_vm8 = vweird.f32 %v4793_v49  ;;  %4963 = vmatpush.msra.mxu1 %v4934_v19  ;;  %v7103_v19 = vld [vmem:[%s9411_s2 + $0x38] sm:$0xff] }
0x1bdc   : > { %4861 = vperm.xlu2 %7308, %v4822_v51   ;;  %v4826_v33 = vsub.f32 1.0, %v4825_v42  ;;  %v4848_v55 = vand.u32 2147483647, %v4793_v49 }
0x1bdd   : > { %v4851_v31 = vor.u32 1.1754944e-38, %v4850_v18  ;;  %4964 = vmatpush.msra.mxu1 %v4933_v58  ;;  %v7102_v58 = vld [vmem:[%s9411_s2 + $0x30] sm:$0xff] }
0x1bde   : > { %v4827_v53 = vmul.f32 %v7569_v40, %v4826_v33  ;;  %vm4849_vm11 = vcmp.eq.f32.partialorder %v4848_v55, 8.507059e+37 }
0x1bdf   : > { %4965 = vmatpush.msra.mxu1 %v4932_v26  ;;  %v7101_v26 = vld [vmem:[%s9411_s2 + $0x28] sm:$0xff] }
0x1be0   : > { %v4828_v16 = vadd.f32 %v7569_v40, %v4827_v53  ;;  %v7350_v53 = vld [vmem:[%s9413_s0] ss:$0 sm:$0xff] }
0x1be1   : > { %v7571_v15 = vpop.eup %7570  ;;  %4966 = vmatpush.msra.mxu1 %v4931_v27 }
0x1be2   : > { %v4832_v35 = vsel %vm4831_vm6, %v7569_v40, %v4828_v16  ;;  %v4840_v3 = vmul.f32 %v7571_v15, %v4793_v49  ;;  %vm4845_vm9 = vweird.f32 %v7571_v15  ;;  %7076 = vmatmul.msk.f32.vlgmr.msra.gmra.mxu1 %vm1504_vm1, %v8925_v61  ;;  %v8947_v40 = vld [vmem:[%s9412_s3 + $0x10] sm:$0xff]  ;;  %v8954_v49 = vld [vmem:[%s9412_s3 + $0x18] sm:$0xff] }
0x1be3   : > { %v4837_v47 = vsel %vm4834_vm7, %v4836_v54, %v4832_v35  ;;  %vm4846_vm10 = vmor %vm4844_vm8, %vm4845_vm9 }
0x1be4   : > { %4866 = vperm.xlu0 %7309, %v4837_v47   ;;  %v4841_v25 = vsub.f32 1.0, %v4840_v3 }
0x1be6   : > { %v4842_v56 = vmul.f32 %v7571_v15, %v4841_v25 }
0x1be8   : > { %v4843_v10 = vadd.f32 %v7571_v15, %v4842_v56 }
0x1bea   : > { %v4847_v50 = vsel %vm4846_vm10, %v7571_v15, %v4843_v10  ;;  %7077 = vmatmul.msk.f32.gmra.mxu1 %vm1504_vm1, %v8936_v32  ;;  %v7353_v10 = vld [vmem:[%s9415_s8] ss:$0 sm:$0xff] }
0x1beb   : > { %v4852_v20 = vsel %vm4849_vm11, %v4851_v31, %v4847_v50 }
0x1bec   : > { %4871 = vperm.xlu2 %7308, %v4852_v20   ;;  %v7121_v20 = vld [vmem:[%s9409_s1 + $0x38] sm:$0xff] }
0x1bf2   : > { %7078 = vmatmul.msk.f32.gmra.mxu1 %vm1504_vm1, %v8947_v40 }
0x1bfa   : > { %7079 = vmatmul.msk.f32.gmra.mxu1 %vm1504_vm1, %v8954_v49 }
0x1c36   : > { %v4862_v29 = vpop.permute.xlu2 %4861 }
0x1c37   : > { %v4875_v44 = vmul.f32 %v4862_v29, %v8845_v6  ;;  %v4980_v6 = vld [vmem:[%s9408_s28] sm:$0xff] }
0x1c38   : > { %5015 = vmatpush.msra.mxu2 %v4980_v6  ;;  %v7352_v29 = vld [vmem:[%s9413_s0 + $0x1] ss:$0 sm:$0xff] }
0x1c3a   : > { %5231 = vmatpush.msrb.mxu2 %v7103_v19 }
0x1c3c   : > { %5232 = vmatpush.msrb.mxu2 %v7102_v58 }
0x1c3e   : > { %5233 = vmatpush.msrb.mxu2 %v7101_v26  ;;  %v5208_v26 = vld [vmem:[%s9416_s9] sm:$0xff] }
0x1c46   : > { %v4857_v4 = vpop.permute.xlu1 %4856  ;;  %v4872_v11 = vpop.permute.xlu2 %4871 }
0x1c47   : > { %v4874_v59 = vmul.f32 %v4857_v4, %v8860_v48  ;;  %v4877_v48 = vmul.f32 %v4872_v11, %v8855_v24  ;;  %v7109_v24 = vld [vmem:[%s9408_s28 + $0x20] sm:$0xff] }
0x1c49   : > { %7072 = vmatmul.msk.f32.vlgmr.msra.gmra.mxu0 %vm1504_vm1, %v4874_v59 }
0x1c51   : > { %7073 = vmatmul.msk.f32.gmra.mxu0 %vm1504_vm1, %v4875_v44 }
0x1c56   : > { %v4867_v5 = vpop.permute.xlu0 %4866 }
0x1c57   : > { %v4876_v8 = vmul.f32 %v4867_v5, %v8850_v30  ;;  %v7112_v30 = vld [vmem:[%s9408_s28 + $0x38] sm:$0xff] }
0x1c58   : > { %5270 = vmatpush.msra.mxu3 %v7112_v30 }
0x1c59   : > { %7074 = vmatmul.msk.f32.gmra.mxu0 %vm1504_vm1, %v4876_v8 }
0x1c5a   : > { %5271 = vmatpush.msra.mxu3 %v7111_v1 }
0x1c5c   : > { %5272 = vmatpush.msra.mxu3 %v7110_v13 }
0x1c5e   : > { %5273 = vmatpush.msra.mxu3 %v7109_v24 }
0x1c5f   : > { %v4968_v25 = vpop.f32.mrf.mxu1 }
0x1c60   : > { %v4969_v36 = vadd.f32 %v7353_v10, %v4968_v25 }
0x1c61   : > { %7075 = vmatmul.msk.f32.gmra.mxu0 %vm1504_vm1, %v4877_v48 }
0x1c67   : > { %v4971_v0 = vpop.f32.mrf.mxu1 }
0x1c68   : > { %v4972_v43 = vadd.f32 %v7353_v10, %v4971_v0 }
0x1c6f   : > { %v4974_v4 = vpop.f32.mrf.mxu1 }
0x1c70   : > { %v4975_v59 = vadd.f32 %v7353_v10, %v4974_v4 }
0x1c77   : > { %v4977_v8 = vpop.f32.mrf.mxu1 }
0x1c78   : > { %v4978_v48 = vadd.f32 %v7353_v10, %v4977_v8 }
0x1cc6   : > { %v4915_v14 = vpop.f32.mrf.mxu0 }
0x1cc7   : > { %v8908_v21 = vadd.f32 %v7349_v12, %v4915_v14 }
0x1cc9   : > { %7080 = vmatmul.msk.f32.vlgmr.msra.gmra.mxu2 %vm1504_vm1, %v8908_v21  ;;  %7084 = vmatmul.msk.f32.vlgmr.msrb.gmra.mxu3 %vm1504_vm1, %v8908_v21 }
0x1cce   : > { %v4918_v22 = vpop.f32.mrf.mxu0 }
0x1ccf   : > { %v8916_v23 = vadd.f32 %v7349_v12, %v4918_v22 }
0x1cd1   : > { %7081 = vmatmul.msk.f32.gmra.mxu2 %vm1504_vm1, %v8916_v23  ;;  %7085 = vmatmul.msk.f32.gmra.mxu3 %vm1504_vm1, %v8916_v23 }
0x1cd6   : > { %v4921_v52 = vpop.f32.mrf.mxu0 }
0x1cd7   : > { %v8929_v28 = vadd.f32 %v7349_v12, %v4921_v52 }
0x1cd9   : > { %7082 = vmatmul.msk.f32.gmra.mxu2 %vm1504_vm1, %v8929_v28  ;;  %7086 = vmatmul.msk.f32.gmra.mxu3 %vm1504_vm1, %v8929_v28 }
0x1cde   : > { %v4924_v38 = vpop.f32.mrf.mxu0 }
0x1cdf   : > { %v8940_v46 = vadd.f32 %v7349_v12, %v4924_v38  ;;  %v7100_v38 = vld [vmem:[%s9411_s2 + $0x20] sm:$0xff] }
0x1ce0   : > { %5234 = vmatpush.msrb.mxu2 %v7100_v38 }
0x1ce1   : > { %7083 = vmatmul.msk.f32.gmra.mxu2 %vm1504_vm1, %v8940_v46  ;;  %7087 = vmatmul.msk.f32.gmra.mxu3 %vm1504_vm1, %v8940_v46 }
0x1ce9   : > { %7114 = vmatmul.msk.f32.vlgmr.msra.gmra.mxu3 %vm1504_vm1, %v8908_v21  ;;  %7105 = vmatmul.msk.f32.vlgmr.msrb.gmra.mxu2 %vm1504_vm1, %v8925_v61 }
0x1cf1   : > { %7115 = vmatmul.msk.f32.gmra.mxu3 %vm1504_vm1, %v8916_v23  ;;  %7106 = vmatmul.msk.f32.gmra.mxu2 %vm1504_vm1, %v8936_v32 }
0x1cf9   : > { %7116 = vmatmul.msk.f32.gmra.mxu3 %vm1504_vm1, %v8929_v28  ;;  %7107 = vmatmul.msk.f32.gmra.mxu2 %vm1504_vm1, %v8947_v40 }
0x1d01   : > { %7117 = vmatmul.msk.f32.gmra.mxu3 %vm1504_vm1, %v8940_v46  ;;  %7108 = vmatmul.msk.f32.gmra.mxu2 %vm1504_vm1, %v8954_v49 }
0x1d4c   : > { %v5017_v7 = vpop.f32.mrf.mxu2  ;;  %v5054_v37 = vpop.f32.mrf.mxu3 }
0x1d4d   : > { %v5055_v55 = vadd.f32 %v7351_v39, %v5054_v37  ;;  %v5018_v50 = vadd.f32 %v7350_v53, %v5017_v7 }
0x1d54   : > { %v5020_v42 = vpop.f32.mrf.mxu2  ;;  %v5057_v51 = vpop.f32.mrf.mxu3 }
0x1d55   : > { %v5058_v47 = vadd.f32 %v7351_v39, %v5057_v51  ;;  %v5021_v31 = vadd.f32 %v7350_v53, %v5020_v42 }
0x1d5c   : > { %v5023_v33 = vpop.f32.mrf.mxu2  ;;  %v5060_v34 = vpop.f32.mrf.mxu3 }
0x1d5d   : > { %v5061_v3 = vadd.f32 %v7351_v39, %v5060_v34  ;;  %v5024_v18 = vadd.f32 %v7350_v53, %v5023_v33  ;;  %v7354_v33 = vld [vmem:[%s9414_s5 + $0x1] ss:$0 sm:$0xff] }
0x1d64   : > { %v5026_v16 = vpop.f32.mrf.mxu2  ;;  %v5063_v15 = vpop.f32.mrf.mxu3 }
0x1d65   : > { %v5027_v54 = vadd.f32 %v7350_v53, %v5026_v16  ;;  %v5064_v35 = vadd.f32 %v7351_v39, %v5063_v15 }
0x1d67   : > { %7088 = vmatpush.xpose.msk.msrb.mxu0 %vm1620_vm2, %v5027_v54  ;;  %5191 = vmatpush.msrb.mxu1 %v5064_v35 }
0x1d69   : > { %5192 = vmatpush.msrb.mxu1 %v5061_v3 }
0x1d6b   : > { %7089 = vmatpush.xpose.msk.msrb.mxu0 %vm1620_vm2, %v5024_v18  ;;  %5193 = vmatpush.msrb.mxu1 %v5058_v47 }
0x1d6c   : > { %v5275_v56 = vpop.f32.mrf.mxu3 }
0x1d6d   : > { %5194 = vmatpush.msrb.mxu1 %v5055_v55  ;;  %v5276_v63 = vadd.f32 %v7352_v29, %v5275_v56 }
0x1d6f   : > { %7090 = vmatpush.xpose.msk.msrb.mxu0 %vm1620_vm2, %v5021_v31 }
0x1d73   : > { %7091 = vmatpush.xpose.msk.msrb.mxu0 %vm1620_vm2, %v5018_v50 }
0x1d74   : > { %v5278_v62 = vpop.f32.mrf.mxu3 }
0x1d75   : > { %v5279_v60 = vadd.f32 %v7352_v29, %v5278_v62 }
0x1d76   : > { %7092 = vmatmul.msk.f32.vlgmr.msrb.gmra.mxu0 %vm1620_vm2, %v4969_v36 }
0x1d77   : > { %5309 = vmatpush.msra.mxu0 %v7121_v20 }
0x1d79   : > { %5310 = vmatpush.msra.mxu0 %v7120_v57 }
0x1d7b   : > { %5311 = vmatpush.msra.mxu0 %v7119_v41 }
0x1d7c   : > { %v5281_v2 = vpop.f32.mrf.mxu3 }
0x1d7d   : > { %5312 = vmatpush.msra.mxu0 %v7118_v17  ;;  %v5282_v11 = vadd.f32 %v7352_v29, %v5281_v2 }
0x1d7e   : > { %7093 = vmatmul.msk.f32.gmra.mxu0 %vm1620_vm2, %v4972_v43 }
0x1d7f   : > { %5538 = vmatpush.msrb.mxu0 %v5208_v26  ;;  %v7149_v26 = vld [vmem:[%s9411_s2 + $0x48] sm:$0xff] }
0x1d84   : > { %v5284_v44 = vpop.f32.mrf.mxu3 }
0x1d85   : > { %v5285_v5 = vadd.f32 %v7352_v29, %v5284_v44 }
0x1d86   : > { %7094 = vmatmul.msk.f32.gmra.mxu0 %vm1620_vm2, %v4975_v59 }
0x1d87   : > { %7127 = vmatpush.xpose.msk.msra.mxu1 %vm1620_vm2, %v5285_v5 }
0x1d8b   : > { %7128 = vmatpush.xpose.msk.msra.mxu1 %vm1620_vm2, %v5282_v11 }
0x1d8e   : > { %7095 = vmatmul.msk.f32.gmra.mxu0 %vm1620_vm2, %v4978_v48 }
0x1d8f   : > { %7129 = vmatpush.xpose.msk.msra.mxu1 %vm1620_vm2, %v5279_v60 }
0x1d93   : > { %7130 = vmatpush.xpose.msk.msra.mxu1 %vm1620_vm2, %v5276_v63 }
0x1d96   : > { %7123 = vmatmul.msk.f32.vlgmr.msra.gmra.mxu0 %vm1504_vm1, %v8908_v21 }
0x1d9e   : > { %7124 = vmatmul.msk.f32.gmra.mxu0 %vm1504_vm1, %v8916_v23 }
0x1da6   : > { %7125 = vmatmul.msk.f32.gmra.mxu0 %vm1504_vm1, %v8929_v28 }
0x1dae   : > { %7126 = vmatmul.msk.f32.gmra.mxu0 %vm1504_vm1, %v8940_v46 }
0x1df3   : > { %v5107_v6 = vpop.f32.mrf.mxu0 }
0x1df4   : > { %v5119_v9 = vmul.f32 0.35355338, %v5107_v6  ;;  %v5236_v6 = vpop.f32.mrf.mxu2 }
0x1df6   : > { %v5123_v30 = vsel %vm1504_vm1, %v5119_v9, -inf }
0x1df7   : > { %5124 = vmax.xlane.f32.xlu1 %v5123_v30 }
0x1dfb   : > { %v5110_v1 = vpop.f32.mrf.mxu0 }
0x1dfc   : > { %v5120_v12 = vmul.f32 0.35355338, %v5110_v1  ;;  %v7355_v1 = vld [vmem:[%s9415_s8 + $0x1] ss:$0 sm:$0xff] }
0x1dfe   : > { %v5126_v13 = vsel %vm1504_vm1, %v5120_v12, -inf }
0x1dff   : > { %5127 = vmax.xlane.f32.xlu2 %v5126_v13  ;;  %v5239_v13 = vpop.f32.mrf.mxu2 }
0x1e03   : > { %v5113_v24 = vpop.f32.mrf.mxu0 }
0x1e04   : > { %v5121_v14 = vmul.f32 0.35355338, %v5113_v24  ;;  %v5240_v24 = vadd.f32 %v7355_v1, %v5239_v13 }
0x1e06   : > { %v5129_v22 = vsel %vm1504_vm1, %v5121_v14, -inf }
0x1e07   : > { %5130 = vmax.xlane.f32.xlu0 %v5129_v22 }
0x1e0b   : > { %v5116_v27 = vpop.f32.mrf.mxu0 }
0x1e0c   : > { %v5122_v52 = vmul.f32 0.35355338, %v5116_v27 }
0x1e0e   : > { %v5132_v7 = vsel %vm1504_vm1, %v5122_v52, -inf }
0x1e0f   : > { %5133 = vmax.xlane.f32.xlu1 %v5132_v7 }
0x1e13   : > { %v5314_v37 = vpop.f32.mrf.mxu0 }
0x1e14   : > { %v5315_v15 = vadd.f32 %v7354_v33, %v5314_v37 }
0x1e1b   : > { %v5317_v42 = vpop.f32.mrf.mxu0 }
0x1e1c   : > { %v5318_v16 = vadd.f32 %v7354_v33, %v5317_v42 }
0x1e23   : > { %v5320_v51 = vpop.f32.mrf.mxu0 }
0x1e24   : > { %v5321_v39 = vadd.f32 %v7354_v33, %v5320_v51 }
0x1e2b   : > { %v5323_v34 = vpop.f32.mrf.mxu0 }
0x1e2c   : > { %v5324_v53 = vadd.f32 %v7354_v33, %v5323_v34 }
0x1e2e   : > { %5451 = vmatpush.msra.mxu2 %v5324_v53 }
0x1e30   : > { %5452 = vmatpush.msra.mxu2 %v5321_v39 }
0x1e32   : > { %5453 = vmatpush.msra.mxu2 %v5318_v16 }
0x1e34   : > { %5454 = vmatpush.msra.mxu2 %v5315_v15 }
0x1e6a   : > { %v5125_v54 = vpop.xlane.xlu1 %5124 }
0x1e6b   : > { %v5135_v35 = vsub.f32 %v5119_v9, %v5125_v54 }
0x1e6d   : > { %v5139_v3 = vmul.f32 1.442695, %v5135_v35 }
0x1e6f   : > { %7572 = vpow2.f32 %v5139_v3 }
0x1e72   : > { %v5128_v47 = vpop.xlane.xlu2 %5127 }
0x1e73   : > { %v5136_v18 = vsub.f32 %v5120_v12, %v5128_v47  ;;  %v5237_v12 = vadd.f32 %v7355_v1, %v5236_v6 }
0x1e75   : > { %v7573_v25 = vpop.eup %7572  ;;  %v5141_v55 = vmul.f32 1.442695, %v5136_v18 }
0x1e76   : > { %v5147_v56 = vsel %vm1504_vm1, %v7573_v25, 0.0 }
0x1e77   : > { %7574 = vpow2.f32 %v5141_v55  ;;  %5148 = vadd.xlane.f32.xlu2 %v5147_v56 }
0x1e7a   : > { %v5131_v31 = vpop.xlane.xlu0 %5130 }
0x1e7b   : > { %v5137_v10 = vsub.f32 %v5121_v14, %v5131_v31  ;;  %v5242_v14 = vpop.f32.mrf.mxu2 }
0x1e7c   : > { %v5243_v19 = vadd.f32 %v7355_v1, %v5242_v14 }
0x1e7d   : > { %v7575_v50 = vpop.eup %7574  ;;  %v5143_v20 = vmul.f32 1.442695, %v5137_v10 }
0x1e7e   : > { %v5150_v36 = vsel %vm1504_vm1, %v7575_v50, 0.0 }
0x1e7f   : > { %7576 = vpow2.f32 %v5143_v20  ;;  %5151 = vadd.xlane.f32.xlu1 %v5150_v36 }
0x1e82   : > { %v5134_v0 = vpop.xlane.xlu1 %5133 }
0x1e83   : > { %v5138_v62 = vsub.f32 %v5122_v52, %v5134_v0  ;;  %v5245_v58 = vpop.f32.mrf.mxu2 }
0x1e84   : > { %v5246_v22 = vadd.f32 %v7355_v1, %v5245_v58  ;;  %v7151_v58 = vld [vmem:[%s9411_s2 + $0x58] sm:$0xff] }
0x1e85   : > { %v7577_v57 = vpop.eup %7576  ;;  %v5145_v41 = vmul.f32 1.442695, %v5138_v62 }
0x1e86   : > { %v5153_v17 = vsel %vm1504_vm1, %v7577_v57, 0.0 }
0x1e87   : > { %7578 = vpow2.f32 %v5145_v41  ;;  %5154 = vadd.xlane.f32.xlu2 %v5153_v17 }
0x1e8d   : > { %v7579_v43 = vpop.eup %7578 }
0x1e8e   : > { %v5156_v2 = vsel %vm1504_vm1, %v7579_v43, 0.0 }
0x1e8f   : > { %5157 = vadd.xlane.f32.xlu1 %v5156_v2 }
0x1eea   : > { %v5149_v4 = vpop.xlane.xlu2 %5148 }
0x1eeb   : > { %7580 = vrcp.f32 %v5149_v4 }
0x1ef1   : > { %v7581_v59 = vpop.eup %7580 }
0x1ef2   : > { %v5163_v29 = vmul.f32 %v7581_v59, %v7573_v25  ;;  %v5152_v44 = vpop.xlane.xlu1 %5151 }
0x1ef3   : > { %7582 = vrcp.f32 %v5152_v44  ;;  %v7160_v44 = vld [vmem:[%s9408_s28 + $0x58] sm:$0xff] }
0x1ef4   : > { %7096 = vmatmul.msk.f32.vlgmr.msrb.gmra.mxu1 %vm1504_vm1, %v5163_v29  ;;  %5613 = vmatpush.msrb.mxu2 %v7160_v44 }
0x1ef5   : > { %5574 = vmatpush.msrb.mxu1 %v7151_v58 }
0x1ef9   : > { %v7583_v5 = vpop.eup %7582 }
0x1efa   : > { %v5155_v8 = vpop.xlane.xlu2 %5154  ;;  %v5164_v11 = vmul.f32 %v7583_v5, %v7575_v50 }
0x1efb   : > { %7584 = vrcp.f32 %v5155_v8  ;;  %v7159_v8 = vld [vmem:[%s9408_s28 + $0x50] sm:$0xff] }
0x1efc   : > { %7097 = vmatmul.msk.f32.gmra.mxu1 %vm1504_vm1, %v5164_v11  ;;  %v7158_v11 = vld [vmem:[%s9408_s28 + $0x48] sm:$0xff]  ;;  %5614 = vmatpush.msrb.mxu2 %v7159_v8 }
0x1efe   : > { %5615 = vmatpush.msrb.mxu2 %v7158_v11 }
0x1f01   : > { %v7585_v48 = vpop.eup %7584 }
0x1f02   : > { %v5158_v60 = vpop.xlane.xlu1 %5157  ;;  %v5165_v63 = vmul.f32 %v7585_v48, %v7577_v57  ;;  %v7157_v48 = vld [vmem:[%s9408_s28 + $0x40] sm:$0xff] }
0x1f03   : > { %7586 = vrcp.f32 %v5158_v60  ;;  %5616 = vmatpush.msrb.mxu2 %v7157_v48 }
0x1f04   : > { %7098 = vmatmul.msk.f32.gmra.mxu1 %vm1504_vm1, %v5165_v63 }
0x1f09   : > { %v7587_v9 = vpop.eup %7586 }
0x1f0a   : > { %v5166_v30 = vmul.f32 %v7587_v9, %v7579_v43 }
0x1f0c   : > { %7099 = vmatmul.msk.f32.gmra.mxu1 %vm1504_vm1, %v5166_v30 }
0x1f14   : > { %7131 = vmatmul.msk.f32.vlgmr.msra.gmra.mxu1 %vm1620_vm2, %v5237_v12 }
0x1f1c   : > { %7132 = vmatmul.msk.f32.gmra.mxu1 %vm1620_vm2, %v5240_v24 }
0x1f24   : > { %7133 = vmatmul.msk.f32.gmra.mxu1 %vm1620_vm2, %v5243_v19 }
0x1f2c   : > { %7134 = vmatmul.msk.f32.gmra.mxu1 %vm1620_vm2, %v5246_v22  ;;  %v7150_v22 = vld [vmem:[%s9411_s2 + $0x50] sm:$0xff] }
0x1f2d   : > { %5575 = vmatpush.msrb.mxu1 %v7150_v22 }
0x1f2f   : > { %5576 = vmatpush.msrb.mxu1 %v7149_v26 }
0x1f71   : > { %v5196_v27 = vpop.f32.mrf.mxu1 }
0x1f72   : > { %7144 = vmatmul.msk.f32.vlgmr.msrb.gmra.mxu0 %vm1620_vm2, %v5196_v27  ;;  %v7148_v27 = vld [vmem:[%s9411_s2 + $0x40] sm:$0xff] }
0x1f73   : > { %5577 = vmatpush.msrb.mxu1 %v7148_v27 }
0x1f74   : > { %7153 = vmatmul.msk.f32.vlgmr.msrb.gmra.mxu1 %vm1504_vm1, %v8925_v61 }
0x1f79   : > { %v5199_v52 = vpop.f32.mrf.mxu1 }
0x1f7a   : > { %7145 = vmatmul.msk.f32.gmra.mxu0 %vm1620_vm2, %v5199_v52  ;;  %v7139_v52 = vld [vmem:[%s9416_s9 + $0x8] sm:$0xff] }
0x1f7b   : > { %5497 = vmatpush.msrb.mxu3 %v7139_v52 }
0x1f7c   : > { %7154 = vmatmul.msk.f32.gmra.mxu1 %vm1504_vm1, %v8936_v32 }
0x1f81   : > { %v5202_v38 = vpop.f32.mrf.mxu1 }
0x1f82   : > { %7146 = vmatmul.msk.f32.gmra.mxu0 %vm1620_vm2, %v5202_v38  ;;  %v7169_v38 = vld [vmem:[%s9409_s1 + $0x58] sm:$0xff] }
0x1f83   : > { %5652 = vmatpush.msra.mxu3 %v7169_v38 }
0x1f84   : > { %7155 = vmatmul.msk.f32.gmra.mxu1 %vm1504_vm1, %v8947_v40 }
0x1f89   : > { %v5205_v7 = vpop.f32.mrf.mxu1 }
0x1f8a   : > { %7147 = vmatmul.msk.f32.gmra.mxu0 %vm1620_vm2, %v5205_v7  ;;  %v7168_v7 = vld [vmem:[%s9409_s1 + $0x50] sm:$0xff] }
0x1f8b   : > { %5653 = vmatpush.msra.mxu3 %v7168_v7 }
0x1f8c   : > { %7156 = vmatmul.msk.f32.gmra.mxu1 %vm1504_vm1, %v8954_v49 }
0x1f91   : > { %v5367_v37 = vpop.f32.mrf.mxu1 }
0x1f92   : > { %v5379_v42 = vmul.f32 0.35355338, %v5367_v37  ;;  %v7167_v37 = vld [vmem:[%s9409_s1 + $0x48] sm:$0xff] }
0x1f93   : > { %5654 = vmatpush.msra.mxu3 %v7167_v37 }
0x1f94   : > { %v5383_v51 = vsel %vm1504_vm1, %v5379_v42, -inf }
0x1f95   : > { %5384 = vmax.xlane.f32.xlu2 %v5383_v51  ;;  %v7166_v51 = vld [vmem:[%s9409_s1 + $0x40] sm:$0xff] }
0x1f96   : > { %5655 = vmatpush.msra.mxu3 %v7166_v51  ;;  %v7187_v51 = vld [vmem:[%s9416_s9 + $0x10] sm:$0xff] }
0x1f99   : > { %v5370_v33 = vpop.f32.mrf.mxu1 }
0x1f9a   : > { %v5380_v34 = vmul.f32 0.35355338, %v5370_v33 }
0x1f9c   : > { %v5386_v53 = vsel %vm1504_vm1, %v5380_v34, -inf }
0x1f9d   : > { %5387 = vmax.xlane.f32.xlu0 %v5386_v53 }
0x1fa1   : > { %v5373_v39 = vpop.f32.mrf.mxu1 }
0x1fa2   : > { %v5381_v16 = vmul.f32 0.35355338, %v5373_v39 }
0x1fa4   : > { %v5389_v15 = vsel %vm1504_vm1, %v5381_v16, -inf }
0x1fa5   : > { %5390 = vmax.xlane.f32.xlu1 %v5389_v15 }
0x1fa9   : > { %v5376_v54 = vpop.f32.mrf.mxu1 }
0x1faa   : > { %v5382_v35 = vmul.f32 0.35355338, %v5376_v54  ;;  %v7356_v54 = vld [vmem:[%s9413_s0 + $0x2] ss:$0 sm:$0xff] }
0x1fac   : > { %v5392_v3 = vsel %vm1504_vm1, %v5382_v35, -inf }
0x1fad   : > { %5393 = vmax.xlane.f32.xlu2 %v5392_v3 }
0x2008   : > { %v5385_v47 = vpop.xlane.xlu2 %5384 }
0x2009   : > { %v5395_v18 = vsub.f32 %v5379_v42, %v5385_v47 }
0x200b   : > { %v5399_v25 = vmul.f32 1.442695, %v5395_v18  ;;  %v5579_v18 = vpop.f32.mrf.mxu1 }
0x200d   : > { %7588 = vpow2.f32 %v5399_v25 }
0x2010   : > { %v5388_v55 = vpop.xlane.xlu0 %5387 }
0x2011   : > { %v5396_v56 = vsub.f32 %v5380_v34, %v5388_v55  ;;  %v7357_v55 = vld [vmem:[%s9415_s8 + $0x2] ss:$0 sm:$0xff] }
0x2013   : > { %v7589_v31 = vpop.eup %7588  ;;  %v5401_v10 = vmul.f32 1.442695, %v5396_v56 }
0x2014   : > { %v5407_v50 = vsel %vm1504_vm1, %v7589_v31, 0.0 }
0x2015   : > { %7590 = vpow2.f32 %v5401_v10  ;;  %5408 = vadd.xlane.f32.xlu0 %v5407_v50  ;;  %v5580_v10 = vadd.f32 %v7357_v55, %v5579_v18  ;;  %v5582_v50 = vpop.f32.mrf.mxu1 }
0x2018   : > { %v5391_v20 = vpop.xlane.xlu1 %5390 }
0x2019   : > { %v5397_v36 = vsub.f32 %v5381_v16, %v5391_v20  ;;  %v7203_v20 = vld [vmem:[%s9408_s28 + $0x70] sm:$0xff] }
0x201b   : > { %v7591_v0 = vpop.eup %7590  ;;  %v5403_v62 = vmul.f32 1.442695, %v5397_v36  ;;  %v7202_v36 = vld [vmem:[%s9408_s28 + $0x68] sm:$0xff] }
0x201c   : > { %v5410_v57 = vsel %vm1504_vm1, %v7591_v0, 0.0 }
0x201d   : > { %7592 = vpow2.f32 %v5403_v62  ;;  %5411 = vadd.xlane.f32.xlu1 %v5410_v57  ;;  %v5583_v62 = vadd.f32 %v7357_v55, %v5582_v50  ;;  %v5585_v57 = vpop.f32.mrf.mxu1 }
0x2020   : > { %v5394_v41 = vpop.xlane.xlu2 %5393 }
0x2021   : > { %v5398_v17 = vsub.f32 %v5382_v35, %v5394_v41  ;;  %v5586_v41 = vadd.f32 %v7357_v55, %v5585_v57 }
0x2023   : > { %v7593_v43 = vpop.eup %7592  ;;  %v5405_v2 = vmul.f32 1.442695, %v5398_v17 }
0x2024   : > { %v5413_v4 = vsel %vm1504_vm1, %v7593_v43, 0.0 }
0x2025   : > { %7594 = vpow2.f32 %v5405_v2  ;;  %5414 = vadd.xlane.f32.xlu2 %v5413_v4  ;;  %v5588_v17 = vpop.f32.mrf.mxu1  ;;  %v9100_v2 = vpop.f32.mrf.mxu0 }
0x202b   : > { %v7595_v59 = vpop.eup %7594 }
0x202c   : > { %v5416_v29 = vsel %vm1504_vm1, %v7595_v59, 0.0 }
0x202d   : > { %5417 = vadd.xlane.f32.xlu0 %v5416_v29 }
0x2088   : > { %v5409_v5 = vpop.xlane.xlu0 %5408 }
0x2089   : > { %7596 = vrcp.f32 %v5409_v5 }
0x208f   : > { %v7597_v60 = vpop.eup %7596 }
0x2090   : > { %v5423_v63 = vmul.f32 %v7597_v60, %v7589_v31  ;;  %v5412_v6 = vpop.xlane.xlu1 %5411  ;;  %v7204_v31 = vld [vmem:[%s9408_s28 + $0x78] sm:$0xff] }
0x2091   : > { %7598 = vrcp.f32 %v5412_v6 }
0x2092   : > { %7135 = vmatmul.msk.f32.vlgmr.msra.gmra.mxu2 %vm1504_vm1, %v5423_v63 }
0x2093   : > { %5840 = vmatpush.msra.mxu2 %v7187_v51 }
0x2097   : > { %v7599_v9 = vpop.eup %7598 }
0x2098   : > { %v5415_v30 = vpop.xlane.xlu2 %5414  ;;  %v5424_v1 = vmul.f32 %v7599_v9, %v7591_v0  ;;  %v7201_v0 = vld [vmem:[%s9408_s28 + $0x60] sm:$0xff] }
0x2099   : > { %7600 = vrcp.f32 %v5415_v30  ;;  %v7358_v9 = vld [vmem:[%s9414_s5 + $0x2] ss:$0 sm:$0xff] }
0x209a   : > { %7136 = vmatmul.msk.f32.gmra.mxu2 %vm1504_vm1, %v5424_v1 }
0x209f   : > { %v7601_v12 = vpop.eup %7600 }
0x20a0   : > { %v5418_v13 = vpop.xlane.xlu0 %5417  ;;  %v5425_v24 = vmul.f32 %v7601_v12, %v7593_v43  ;;  %v5589_v43 = vadd.f32 %v7357_v55, %v5588_v17 }
0x20a1   : > { %7602 = vrcp.f32 %v5418_v13 }
0x20a2   : > { %7137 = vmatmul.msk.f32.gmra.mxu2 %vm1504_vm1, %v5425_v24 }
0x20a7   : > { %v7603_v14 = vpop.eup %7602 }
0x20a8   : > { %v5426_v19 = vmul.f32 %v7603_v14, %v7595_v59  ;;  %v9106_v59 = vpop.f32.mrf.mxu0 }
0x20aa   : > { %7138 = vmatmul.msk.f32.gmra.mxu2 %vm1504_vm1, %v5426_v19 }
0x20b0   : > { %v9110_v44 = vpop.f32.mrf.mxu0 }
0x20b2   : > { %7162 = vmatmul.msk.f32.vlgmr.msrb.gmra.mxu2 %vm1504_vm1, %v8908_v21 }
0x20b8   : > { %v5549_v8 = vpop.f32.mrf.mxu0 }
0x20ba   : > { %7163 = vmatmul.msk.f32.gmra.mxu2 %vm1504_vm1, %v8916_v23 }
0x20c2   : > { %7164 = vmatmul.msk.f32.gmra.mxu2 %vm1504_vm1, %v8929_v28 }
0x20ca   : > { %7165 = vmatmul.msk.f32.gmra.mxu2 %vm1504_vm1, %v8940_v46 }
0x2115   : > { %v5456_v42 = vpop.f32.mrf.mxu2 }
0x2116   : > { %7140 = vmatmul.msk.f32.vlgmr.msrb.gmra.mxu3 %vm1620_vm2, %v5456_v42 }
0x211d   : > { %v5459_v33 = vpop.f32.mrf.mxu2 }
0x211e   : > { %7141 = vmatmul.msk.f32.gmra.mxu3 %vm1620_vm2, %v5459_v33 }
0x2125   : > { %v5462_v34 = vpop.f32.mrf.mxu2 }
0x2126   : > { %7142 = vmatmul.msk.f32.gmra.mxu3 %vm1620_vm2, %v5462_v34 }
0x212d   : > { %v5465_v53 = vpop.f32.mrf.mxu2 }
0x212e   : > { %7143 = vmatmul.msk.f32.gmra.mxu3 %vm1620_vm2, %v5465_v53 }
0x2135   : > { %v5618_v39 = vpop.f32.mrf.mxu2 }
0x2136   : > { %7171 = vmatmul.msk.f32.vlgmr.msra.gmra.mxu3 %vm1504_vm1, %v8908_v21  ;;  %v5619_v56 = vadd.f32 %v7356_v54, %v5618_v39 }
0x213d   : > { %v5621_v16 = vpop.f32.mrf.mxu2 }
0x213e   : > { %7172 = vmatmul.msk.f32.gmra.mxu3 %vm1504_vm1, %v8916_v23  ;;  %v5622_v25 = vadd.f32 %v7356_v54, %v5621_v16  ;;  %v7359_v16 = vld [vmem:[%s9413_s0 + $0x3] ss:$0 sm:$0xff]  ;;  %s9417_s0 = sld [smem:[#allocation26_spill]] }
0x2145   : > { %v5624_v15 = vpop.f32.mrf.mxu2 }
0x2146   : > { %7173 = vmatmul.msk.f32.gmra.mxu3 %vm1504_vm1, %v8929_v28  ;;  %v5625_v47 = vadd.f32 %v7356_v54, %v5624_v15 }
0x214d   : > { %v5627_v35 = vpop.f32.mrf.mxu2 }
0x214e   : > { %v5628_v3 = vadd.f32 %v7356_v54, %v5627_v35  ;;  %7174 = vmatmul.msk.f32.gmra.mxu3 %vm1504_vm1, %v8940_v46 }
0x2150   : > { %7175 = vmatpush.xpose.msk.msra.mxu0 %vm1620_vm2, %v5628_v3 }
0x2154   : > { %7176 = vmatpush.xpose.msk.msra.mxu0 %vm1620_vm2, %v5625_v47 }
0x2158   : > { %7177 = vmatpush.xpose.msk.msra.mxu0 %vm1620_vm2, %v5622_v25 }
0x215c   : > { %7178 = vmatpush.xpose.msk.msra.mxu0 %vm1620_vm2, %v5619_v56 }
0x215f   : > { %7179 = vmatmul.msk.f32.vlgmr.msra.gmra.mxu0 %vm1620_vm2, %v5580_v10 }
0x2160   : > { %5919 = vmatpush.msrb.mxu0 %v7204_v31 }
0x2162   : > { %5920 = vmatpush.msrb.mxu0 %v7203_v20 }
0x2164   : > { %5921 = vmatpush.msrb.mxu0 %v7202_v36 }
0x2166   : > { %5922 = vmatpush.msrb.mxu0 %v7201_v0 }
0x2167   : > { %7180 = vmatmul.msk.f32.gmra.mxu0 %vm1620_vm2, %v5583_v62 }
0x216f   : > { %7181 = vmatmul.msk.f32.gmra.mxu0 %vm1620_vm2, %v5586_v41 }
0x2177   : > { %7182 = vmatmul.msk.f32.gmra.mxu0 %vm1620_vm2, %v5589_v43 }
0x217f   : > { %7206 = vmatmul.msk.f32.vlgmr.msrb.gmra.mxu0 %vm1504_vm1, %v8908_v21 }
0x2187   : > { %7207 = vmatmul.msk.f32.gmra.mxu0 %vm1504_vm1, %v8916_v23 }
0x218f   : > { %7208 = vmatmul.msk.f32.gmra.mxu0 %vm1504_vm1, %v8929_v28 }
0x2197   : > { %7209 = vmatmul.msk.f32.gmra.mxu0 %vm1504_vm1, %v8940_v46 }
0x2199   : > { %v9104_v4 = vpop.f32.mrf.mxu3 }
0x21a1   : > { %v9108_v29 = vpop.f32.mrf.mxu3 }
0x21a9   : > { %v9112_v5 = vpop.f32.mrf.mxu3 }
0x21b1   : > { %v5508_v11 = vpop.f32.mrf.mxu3 }
0x21b2   : > { %v9114_v48 = vadd.f32 %v5549_v8, %v5508_v11 }
0x21b9   : > { %v5657_v60 = vpop.f32.mrf.mxu3 }
0x21ba   : > { %v5658_v24 = vadd.f32 %v7358_v9, %v5657_v60 }
0x21c1   : > { %v5660_v63 = vpop.f32.mrf.mxu3 }
0x21c2   : > { %v5661_v13 = vadd.f32 %v7358_v9, %v5660_v63 }
0x21c9   : > { %v5663_v6 = vpop.f32.mrf.mxu3 }
0x21ca   : > { %v5664_v12 = vadd.f32 %v7358_v9, %v5663_v6 }
0x21d1   : > { %v5666_v30 = vpop.f32.mrf.mxu3 }
0x21d2   : > { %v5667_v1 = vadd.f32 %v7358_v9, %v5666_v30  ;;  %v7195_v9 = vld [vmem:[%s9411_s2 + $0x78] sm:$0xff]  ;;  %v7194_v30 = vld [vmem:[%s9411_s2 + $0x70] sm:$0xff] }
0x21d3   : > { %5880 = vmatpush.msrb.mxu3 %v7195_v9 }
0x21d4   : > { %5794 = vmatpush.msra.mxu1 %v5667_v1  ;;  %v7193_v1 = vld [vmem:[%s9411_s2 + $0x68] sm:$0xff] }
0x21d5   : > { %5881 = vmatpush.msrb.mxu3 %v7194_v30 }
0x21d6   : > { %5795 = vmatpush.msra.mxu1 %v5664_v12  ;;  %v7192_v12 = vld [vmem:[%s9411_s2 + $0x60] sm:$0xff]  ;;  %s9420_s2 = sld [smem:[#allocation31_spill]] }
0x21d7   : > { %5882 = vmatpush.msrb.mxu3 %v7193_v1 }
0x21d8   : > { %5796 = vmatpush.msra.mxu1 %v5661_v13 }
0x21d9   : > { %5883 = vmatpush.msrb.mxu3 %v7192_v12 }
0x21da   : > { %5797 = vmatpush.msra.mxu1 %v5658_v24  ;;  %7197 = vmatmul.msk.f32.vlgmr.msrb.gmra.mxu3 %vm1504_vm1, %v8925_v61  ;;  %v7213_v24 = vld [vmem:[%s9409_s1 + $0x78] sm:$0xff] }
0x21dc   : > { %v5710_v14 = vpop.f32.mrf.mxu0  ;;  %5958 = vmatpush.msrb.mxu1 %v7213_v24 }
0x21dd   : > { %v5722_v19 = vmul.f32 0.35355338, %v5710_v14  ;;  %v7212_v14 = vld [vmem:[%s9409_s1 + $0x70] sm:$0xff] }
0x21de   : > { %5959 = vmatpush.msrb.mxu1 %v7212_v14 }
0x21df   : > { %v5726_v58 = vsel %vm1504_vm1, %v5722_v19, -inf }
0x21e0   : > { %5727 = vmax.xlane.f32.xlu1 %v5726_v58  ;;  %v7210_v58 = vld [vmem:[%s9409_s1 + $0x60] sm:$0xff] }
0x21e2   : > { %7198 = vmatmul.msk.f32.gmra.mxu3 %vm1504_vm1, %v8936_v32 }
0x21e4   : > { %v5713_v22 = vpop.f32.mrf.mxu0 }
0x21e5   : > { %v5723_v26 = vmul.f32 0.35355338, %v5713_v22 }
0x21e7   : > { %v5729_v27 = vsel %vm1504_vm1, %v5723_v26, -inf }
0x21e8   : > { %5730 = vmax.xlane.f32.xlu2 %v5729_v27 }
0x21ea   : > { %7199 = vmatmul.msk.f32.gmra.mxu3 %vm1504_vm1, %v8947_v40 }
0x21ec   : > { %v5716_v52 = vpop.f32.mrf.mxu0 }
0x21ed   : > { %v5724_v38 = vmul.f32 0.35355338, %v5716_v52 }
0x21ef   : > { %v5732_v7 = vsel %vm1504_vm1, %v5724_v38, -inf }
0x21f0   : > { %5733 = vmax.xlane.f32.xlu0 %v5732_v7 }
0x21f2   : > { %7200 = vmatmul.msk.f32.gmra.mxu3 %vm1504_vm1, %v8954_v49 }
0x21f4   : > { %v5719_v37 = vpop.f32.mrf.mxu0 }
0x21f5   : > { %v5725_v42 = vmul.f32 0.35355338, %v5719_v37 }
0x21f7   : > { %v5735_v33 = vsel %vm1504_vm1, %v5725_v42, -inf }
0x21f8   : > { %5736 = vmax.xlane.f32.xlu1 %v5735_v33 }
0x21fc   : > { %v5924_v34 = vpop.f32.mrf.mxu0 }
0x21fd   : > { %v5925_v47 = vadd.f32 %v7359_v16, %v5924_v34 }
0x2204   : > { %v5927_v53 = vpop.f32.mrf.mxu0 }
0x2205   : > { %v5928_v3 = vadd.f32 %v7359_v16, %v5927_v53 }
0x220c   : > { %v5930_v39 = vpop.f32.mrf.mxu0 }
0x220d   : > { %v5931_v35 = vadd.f32 %v7359_v16, %v5930_v39 }
0x2214   : > { %v5933_v15 = vpop.f32.mrf.mxu0 }
0x2215   : > { %v5934_v54 = vadd.f32 %v7359_v16, %v5933_v15 }
0x2217   : > { %7219 = vmatpush.xpose.msk.msrb.mxu2 %vm1620_vm2, %v5934_v54 }
0x221b   : > { %7220 = vmatpush.xpose.msk.msrb.mxu2 %vm1620_vm2, %v5931_v35 }
0x221f   : > { %7221 = vmatpush.xpose.msk.msrb.mxu2 %vm1620_vm2, %v5928_v3 }
0x2223   : > { %7222 = vmatpush.xpose.msk.msrb.mxu2 %vm1620_vm2, %v5925_v47 }
0x2253   : > { %v5728_v18 = vpop.xlane.xlu1 %5727 }
0x2254   : > { %v5738_v25 = vsub.f32 %v5722_v19, %v5728_v18  ;;  %v7211_v19 = vld [vmem:[%s9409_s1 + $0x68] sm:$0xff]  ;;  %v7361_v18 = vld [vmem:[%s9414_s5 + $0x3] ss:$0 sm:$0xff]  ;;  %s9419_s1 = sld [smem:[#allocation27_spill]] }
0x2255   : > { %5960 = vmatpush.msrb.mxu1 %v7211_v19 }
0x2256   : > { %v5742_v55 = vmul.f32 1.442695, %v5738_v25 }
0x2257   : > { %5961 = vmatpush.msrb.mxu1 %v7210_v58 }
0x2258   : > { %7604 = vpow2.f32 %v5742_v55 }
0x225b   : > { %v5731_v56 = vpop.xlane.xlu2 %5730 }
0x225c   : > { %v5739_v31 = vsub.f32 %v5723_v26, %v5731_v56 }
0x225d   : > { %v5885_v34 = vpop.f32.mrf.mxu3 }
0x225e   : > { %v7605_v10 = vpop.eup %7604  ;;  %v5744_v50 = vmul.f32 1.442695, %v5739_v31 }
0x225f   : > { %v5750_v20 = vsel %vm1504_vm1, %v7605_v10, 0.0 }
0x2260   : > { %7606 = vpow2.f32 %v5744_v50  ;;  %5751 = vadd.xlane.f32.xlu2 %v5750_v20  ;;  %v5541_v50 = vadd.f32 %v9100_v2, %v9104_v4 }
0x2263   : > { %v5734_v36 = vpop.xlane.xlu0 %5733 }
0x2264   : > { %v5740_v0 = vsub.f32 %v5724_v38, %v5734_v36 }
0x2266   : > { %v7607_v62 = vpop.eup %7606  ;;  %v5746_v57 = vmul.f32 1.442695, %v5740_v0  ;;  %v5544_v0 = vadd.f32 %v9106_v59, %v9108_v29 }
0x2267   : > { %v5753_v41 = vsel %vm1504_vm1, %v7607_v62, 0.0 }
0x2268   : > { %7608 = vpow2.f32 %v5746_v57  ;;  %5754 = vadd.xlane.f32.xlu0 %v5753_v41  ;;  %v5547_v41 = vadd.f32 %v9110_v44, %v9112_v5 }
0x226b   : > { %v5737_v17 = vpop.xlane.xlu1 %5736 }
0x226c   : > { %v5741_v43 = vsub.f32 %v5725_v42, %v5737_v17 }
0x226e   : > { %v7609_v8 = vpop.eup %7608  ;;  %v5748_v11 = vmul.f32 1.442695, %v5741_v43 }
0x226f   : > { %v5756_v60 = vsel %vm1504_vm1, %v7609_v8, 0.0 }
0x2270   : > { %7610 = vpow2.f32 %v5748_v11  ;;  %5757 = vadd.xlane.f32.xlu1 %v5756_v60 }
0x2276   : > { %v7611_v63 = vpop.eup %7610 }
0x2277   : > { %v5759_v6 = vsel %vm1504_vm1, %v7611_v63, 0.0 }
0x2278   : > { %5760 = vadd.xlane.f32.xlu2 %v5759_v6 }
0x22d3   : > { %v5752_v13 = vpop.xlane.xlu2 %5751 }
0x22d4   : > { %7612 = vrcp.f32 %v5752_v13 }
0x22da   : > { %v7613_v22 = vpop.eup %7612 }
0x22db   : > { %v5766_v26 = vmul.f32 %v7613_v22, %v7605_v10  ;;  %v5755_v27 = vpop.xlane.xlu0 %5754 }
0x22dc   : > { %7614 = vrcp.f32 %v5755_v27 }
0x22dd   : > { %7183 = vmatmul.msk.f32.vlgmr.msra.gmra.mxu1 %vm1504_vm1, %v5766_v26 }
0x22e2   : > { %v7615_v52 = vpop.eup %7614 }
0x22e3   : > { %v5758_v38 = vpop.xlane.xlu1 %5757  ;;  %v5767_v61 = vmul.f32 %v7615_v52, %v7607_v62 }
0x22e4   : > { %7616 = vrcp.f32 %v5758_v38 }
0x22e5   : > { %7184 = vmatmul.msk.f32.gmra.mxu1 %vm1504_vm1, %v5767_v61 }
0x22ea   : > { %v7617_v7 = vpop.eup %7616 }
0x22eb   : > { %v5761_v37 = vpop.xlane.xlu2 %5760  ;;  %v5768_v42 = vmul.f32 %v7617_v7, %v7609_v8 }
0x22ec   : > { %7618 = vrcp.f32 %v5761_v37 }
0x22ed   : > { %7185 = vmatmul.msk.f32.gmra.mxu1 %vm1504_vm1, %v5768_v42 }
0x22f2   : > { %v7619_v32 = vpop.eup %7618 }
0x22f3   : > { %v5769_v51 = vmul.f32 %v7619_v32, %v7611_v63 }
0x22f5   : > { %7186 = vmatmul.msk.f32.gmra.mxu1 %vm1504_vm1, %v5769_v51 }
0x22fd   : > { %7215 = vmatmul.msk.f32.vlgmr.msrb.gmra.mxu1 %vm1504_vm1, %v8908_v21 }
0x2305   : > { %7216 = vmatmul.msk.f32.gmra.mxu1 %vm1504_vm1, %v8916_v23  ;;  %v7360_v23 = vld [vmem:[%s9415_s8 + $0x3] ss:$0 sm:$0xff] }
0x2306   : > { %v5886_v53 = vadd.f32 %v7360_v23, %v5885_v34  ;;  %v7231_v34 = vld [vmem:[%s9416_s9 + $0x18] sm:$0xff] }
0x2307   : > { %6146 = vmatpush.msra.mxu0 %v7231_v34 }
0x230d   : > { %7217 = vmatmul.msk.f32.gmra.mxu1 %vm1504_vm1, %v8929_v28  ;;  %v5888_v28 = vpop.f32.mrf.mxu3 }
0x2315   : > { %7218 = vmatmul.msk.f32.gmra.mxu1 %vm1504_vm1, %v8940_v46  ;;  %v5889_v46 = vadd.f32 %v7360_v23, %v5888_v28  ;;  %v5891_v15 = vpop.f32.mrf.mxu3 }
0x2316   : > { %v5892_v54 = vadd.f32 %v7360_v23, %v5891_v15 }
0x231d   : > { %v5894_v3 = vpop.f32.mrf.mxu3 }
0x231e   : > { %v5895_v47 = vadd.f32 %v7360_v23, %v5894_v3 }
0x235a   : > { %v5799_v40 = vpop.f32.mrf.mxu1 }
0x235b   : > { %7188 = vmatmul.msk.f32.vlgmr.msra.gmra.mxu2 %vm1620_vm2, %v5799_v40 }
0x2362   : > { %v5802_v49 = vpop.f32.mrf.mxu1 }
0x2363   : > { %7189 = vmatmul.msk.f32.gmra.mxu2 %vm1620_vm2, %v5802_v49 }
0x236a   : > { %v5805_v33 = vpop.f32.mrf.mxu1 }
0x236b   : > { %7190 = vmatmul.msk.f32.gmra.mxu2 %vm1620_vm2, %v5805_v33 }
0x2372   : > { %v5808_v21 = vpop.f32.mrf.mxu1 }
0x2373   : > { %7191 = vmatmul.msk.f32.gmra.mxu2 %vm1620_vm2, %v5808_v21 }
0x237a   : > { %v5963_v39 = vpop.f32.mrf.mxu1 }
0x237b   : > { %7223 = vmatmul.msk.f32.vlgmr.msrb.gmra.mxu2 %vm1620_vm2, %v5886_v53  ;;  %v5964_v10 = vadd.f32 %v7361_v18, %v5963_v39 }
0x2382   : > { %v5966_v16 = vpop.f32.mrf.mxu1 }
0x2383   : > { %7224 = vmatmul.msk.f32.gmra.mxu2 %vm1620_vm2, %v5889_v46  ;;  %v5967_v31 = vadd.f32 %v7361_v18, %v5966_v16 }
0x238a   : > { %v5969_v35 = vpop.f32.mrf.mxu1 }
0x238b   : > { %7225 = vmatmul.msk.f32.gmra.mxu2 %vm1620_vm2, %v5892_v54  ;;  %v5970_v56 = vadd.f32 %v7361_v18, %v5969_v35 }
0x2392   : > { %v5972_v25 = vpop.f32.mrf.mxu1 }
0x2393   : > { %v5973_v55 = vadd.f32 %v7361_v18, %v5972_v25  ;;  %7226 = vmatmul.msk.f32.gmra.mxu2 %vm1620_vm2, %v5895_v47 }
0x2395   : > { %6100 = vmatpush.msra.mxu3 %v5973_v55 }
0x2397   : > { %6101 = vmatpush.msra.mxu3 %v5970_v56  ;;  %v7362_v56 = vld [vmem:[%s9417_s0] ss:$0 sm:$0xff]  ;;  %s9418_s0 = sld [smem:[#allocation29_spill]] }
0x2399   : > { %6102 = vmatpush.msra.mxu3 %v5967_v31 }
0x239b   : > { %6103 = vmatpush.msra.mxu3 %v5964_v10 }
0x239d   : > { %v6281_v34 = vld [vmem:[%s9418_s0 + $0x8] sm:$0xff] }
0x23de   : > { %v5842_v20 = vpop.f32.mrf.mxu2 }
0x23df   : > { %v9171_v36 = vadd.f32 %v5842_v20, %v5541_v50  ;;  %v7660_v20 = vld [vmem:[%s9412_s3] sm:$0xff] }
0x23e6   : > { %v5845_v62 = vpop.f32.mrf.mxu2 }
0x23e7   : > { %v9175_v57 = vadd.f32 %v5845_v62, %v5544_v0 }
0x23ee   : > { %v5848_v17 = vpop.f32.mrf.mxu2 }
0x23ef   : > { %v9179_v43 = vadd.f32 %v5848_v17, %v5547_v41 }
0x23f6   : > { %v5851_v8 = vpop.f32.mrf.mxu2 }
0x23f7   : > { %v9182_v11 = vadd.f32 %v5851_v8, %v9114_v48 }
0x23fe   : > { %v6016_v2 = vpop.f32.mrf.mxu2 }
0x23ff   : > { %v6028_v4 = vmul.f32 0.35355338, %v6016_v2  ;;  %v7661_v2 = vld [vmem:[%s9412_s3 + $0x8] sm:$0xff] }
0x2401   : > { %v6032_v60 = vsel %vm1504_vm1, %v6028_v4, -inf }
0x2402   : > { %6033 = vmax.xlane.f32.xlu0 %v6032_v60 }
0x2406   : > { %v6019_v63 = vpop.f32.mrf.mxu2 }
0x2407   : > { %v6029_v59 = vmul.f32 0.35355338, %v6019_v63 }
0x2409   : > { %v6035_v29 = vsel %vm1504_vm1, %v6029_v59, -inf }
0x240a   : > { %6036 = vmax.xlane.f32.xlu1 %v6035_v29  ;;  %v7662_v29 = vld [vmem:[%s9412_s3 + $0x10] sm:$0xff] }
0x240e   : > { %v6022_v6 = vpop.f32.mrf.mxu2 }
0x240f   : > { %v6030_v9 = vmul.f32 0.35355338, %v6022_v6 }
0x2411   : > { %v6038_v44 = vsel %vm1504_vm1, %v6030_v9, -inf }
0x2412   : > { %6039 = vmax.xlane.f32.xlu2 %v6038_v44 }
0x2416   : > { %v6025_v5 = vpop.f32.mrf.mxu2 }
0x2417   : > { %v6031_v30 = vmul.f32 0.35355338, %v6025_v5 }
0x2419   : > { %v6041_v48 = vsel %vm1504_vm1, %v6031_v30, -inf }
0x241a   : > { %6042 = vmax.xlane.f32.xlu0 %v6041_v48 }
0x2475   : > { %v6034_v1 = vpop.xlane.xlu0 %6033 }
0x2476   : > { %v6044_v12 = vsub.f32 %v6028_v4, %v6034_v1 }
0x2478   : > { %v6048_v13 = vmul.f32 1.442695, %v6044_v12 }
0x247a   : > { %7620 = vpow2.f32 %v6048_v13 }
0x247d   : > { %v6037_v24 = vpop.xlane.xlu1 %6036 }
0x247e   : > { %v6045_v14 = vsub.f32 %v6029_v59, %v6037_v24 }
0x2480   : > { %v7621_v19 = vpop.eup %7620  ;;  %v6050_v58 = vmul.f32 1.442695, %v6045_v14 }
0x2481   : > { %v6056_v22 = vsel %vm1504_vm1, %v7621_v19, 0.0 }
0x2482   : > { %7622 = vpow2.f32 %v6050_v58  ;;  %6057 = vadd.xlane.f32.xlu1 %v6056_v22 }
0x2485   : > { %v6040_v26 = vpop.xlane.xlu2 %6039 }
0x2486   : > { %v6046_v27 = vsub.f32 %v6030_v9, %v6040_v26 }
0x2488   : > { %v7623_v52 = vpop.eup %7622  ;;  %v6052_v38 = vmul.f32 1.442695, %v6046_v27 }
0x2489   : > { %v6059_v61 = vsel %vm1504_vm1, %v7623_v52, 0.0 }
0x248a   : > { %7624 = vpow2.f32 %v6052_v38  ;;  %6060 = vadd.xlane.f32.xlu2 %v6059_v61 }
0x248d   : > { %v6043_v7 = vpop.xlane.xlu0 %6042 }
0x248e   : > { %v6047_v37 = vsub.f32 %v6031_v30, %v6043_v7  ;;  %v7663_v30 = vld [vmem:[%s9412_s3 + $0x18] sm:$0xff] }
0x2490   : > { %v7625_v42 = vpop.eup %7624  ;;  %v6054_v32 = vmul.f32 1.442695, %v6047_v37 }
0x2491   : > { %v6062_v51 = vsel %vm1504_vm1, %v7625_v42, 0.0 }
0x2492   : > { %7626 = vpow2.f32 %v6054_v32  ;;  %6063 = vadd.xlane.f32.xlu0 %v6062_v51 }
0x2498   : > { %v7627_v40 = vpop.eup %7626 }
0x2499   : > { %v6065_v49 = vsel %vm1504_vm1, %v7627_v40, 0.0 }
0x249a   : > { %6066 = vadd.xlane.f32.xlu1 %v6065_v49  ;;  %v6283_v49 = vld [vmem:[%s9418_s0 + $0x18] sm:$0xff] }
0x249b   : > { %6312 = vmatpush.msra.mxu1 %v6283_v49  ;;  %v6376_v49 = vld [vmem:[%s9420_s2 + $0x58] sm:$0xff] }
0x24f5   : > { %v6058_v33 = vpop.xlane.xlu1 %6057 }
0x24f6   : > { %7628 = vrcp.f32 %v6058_v33  ;;  %v6282_v33 = vld [vmem:[%s9418_s0 + $0x10] sm:$0xff] }
0x24f7   : > { %6313 = vmatpush.msra.mxu1 %v6282_v33  ;;  %v6375_v33 = vld [vmem:[%s9420_s2 + $0x50] sm:$0xff] }
0x24f9   : > { %6314 = vmatpush.msra.mxu1 %v6281_v34  ;;  %v6374_v34 = vld [vmem:[%s9420_s2 + $0x48] sm:$0xff] }
0x24fc   : > { %v7629_v21 = vpop.eup %7628 }
0x24fd   : > { %v6072_v23 = vmul.f32 %v7629_v21, %v7621_v19  ;;  %v6061_v53 = vpop.xlane.xlu2 %6060  ;;  %v6280_v21 = vld [vmem:[%s9418_s0] sm:$0xff]  ;;  %s9421_s0 = sld [smem:[#allocation28_spill]] }
0x24fe   : > { %7630 = vrcp.f32 %v6061_v53  ;;  %6315 = vmatpush.msra.mxu1 %v6280_v21  ;;  %v6372_v21 = vld [vmem:[%s9420_s2 + $0x38] sm:$0xff] }
0x24ff   : > { %7227 = vmatmul.msk.f32.vlgmr.msra.gmra.mxu3 %vm1504_vm1, %v6072_v23 }
0x2504   : > { %v7631_v28 = vpop.eup %7630 }
0x2505   : > { %v6064_v39 = vpop.xlane.xlu0 %6063  ;;  %v6073_v46 = vmul.f32 %v7631_v28, %v7623_v52 }
0x2506   : > { %7632 = vrcp.f32 %v6064_v39 }
0x2507   : > { %7228 = vmatmul.msk.f32.gmra.mxu3 %vm1504_vm1, %v6073_v46 }
0x250c   : > { %v7633_v16 = vpop.eup %7632 }
0x250d   : > { %v6067_v15 = vpop.xlane.xlu1 %6066  ;;  %v6074_v54 = vmul.f32 %v7633_v16, %v7625_v42 }
0x250e   : > { %7634 = vrcp.f32 %v6067_v15 }
0x250f   : > { %7229 = vmatmul.msk.f32.gmra.mxu3 %vm1504_vm1, %v6074_v54 }
0x2514   : > { %v7635_v35 = vpop.eup %7634 }
0x2515   : > { %v6075_v3 = vmul.f32 %v7635_v35, %v7627_v40 }
0x2517   : > { %7230 = vmatmul.msk.f32.gmra.mxu3 %vm1504_vm1, %v6075_v3 }
0x2582   : > { %v6105_v47 = vpop.f32.mrf.mxu3 }
0x2583   : > { %7232 = vmatmul.msk.f32.vlgmr.msra.gmra.mxu0 %vm1620_vm2, %v6105_v47 }
0x258a   : > { %v6108_v18 = vpop.f32.mrf.mxu3 }
0x258b   : > { %7233 = vmatmul.msk.f32.gmra.mxu0 %vm1620_vm2, %v6108_v18 }
0x2592   : > { %v6111_v25 = vpop.f32.mrf.mxu3 }
0x2593   : > { %7234 = vmatmul.msk.f32.gmra.mxu0 %vm1620_vm2, %v6111_v25 }
0x259a   : > { %v6114_v55 = vpop.f32.mrf.mxu3 }
0x259b   : > { %7235 = vmatmul.msk.f32.gmra.mxu0 %vm1620_vm2, %v6114_v55 }
0x2600   : > { %v6148_v31 = vpop.f32.mrf.mxu0 }
0x2601   : > { %v6160_v10 = vadd.f32 %v6148_v31, %v9171_v36  ;;  %v7363_v31 = vld [vmem:[%s9419_s1] ss:$0 sm:$0xff]  ;;  %s9422_s1 = sld [smem:[#allocation30_spill]] }
0x2603   : > { %v6168_v50 = vadd.f32 %v7362_v56, %v6160_v10 }
0x2605   : > { %v6172_v0 = vadd.f32 %v7660_v20, %v6168_v50  ;;  %v6380_v20 = vld [vmem:[%s9420_s2 + $0x78] sm:$0xff] }
0x2606   : > { %6381 = vmatpush.msra.mxu2 %v6380_v20 }
0x2607   : > { %v6178_v62 = vsel %vm1504_vm1, %v6172_v0, 0.0 }
0x2608   : > { %6179 = vadd.xlane.f32.xlu2 %v6178_v62  ;;  %v6151_v41 = vpop.f32.mrf.mxu0 }
0x2609   : > { %v6161_v17 = vadd.f32 %v6151_v41, %v9175_v57 }
0x260b   : > { %v6169_v8 = vadd.f32 %v7362_v56, %v6161_v17  ;;  %v7364_v17 = vld [vmem:[%s9421_s0] ss:$0 sm:$0xff]  ;;  %s9423_s0 = sld [smem:[#allocation32_spill]] }
0x260d   : > { %v6173_v4 = vadd.f32 %v7661_v2, %v6169_v8  ;;  %v6378_v2 = vld [vmem:[%s9420_s2 + $0x68] sm:$0xff] }
0x260f   : > { %v6181_v60 = vsel %vm1504_vm1, %v6173_v4, 0.0 }
0x2610   : > { %6182 = vadd.xlane.f32.xlu0 %v6181_v60  ;;  %v6154_v63 = vpop.f32.mrf.mxu0 }
0x2611   : > { %v6162_v36 = vadd.f32 %v6154_v63, %v9179_v43 }
0x2613   : > { %v6170_v59 = vadd.f32 %v7362_v56, %v6162_v36 }
0x2615   : > { %v6174_v6 = vadd.f32 %v7662_v29, %v6170_v59 }
0x2617   : > { %v6184_v9 = vsel %vm1504_vm1, %v6174_v6, 0.0 }
0x2618   : > { %6185 = vadd.xlane.f32.xlu1 %v6184_v9  ;;  %v6157_v44 = vpop.f32.mrf.mxu0 }
0x2619   : > { %v6163_v5 = vadd.f32 %v6157_v44, %v9182_v11 }
0x261b   : > { %v6171_v57 = vadd.f32 %v7362_v56, %v6163_v5 }
0x261d   : > { %v6175_v48 = vadd.f32 %v7663_v30, %v6171_v57 }
0x261f   : > { %v6187_v1 = vsel %vm1504_vm1, %v6175_v48, 0.0 }
0x2620   : > { %6188 = vadd.xlane.f32.xlu2 %v6187_v1 }
0x267b   : > { %v6180_v12 = vpop.xlane.xlu2 %6179 }
0x267c   : > { %v6190_v13 = vmul.f32 %v6180_v12, %v8312_v45 }
0x267e   : > { %v6194_v24 = vsub.f32 %v6172_v0, %v6190_v13  ;;  %v6379_v0 = vld [vmem:[%s9420_s2 + $0x70] sm:$0xff] }
0x267f   : > { %6382 = vmatpush.msra.mxu2 %v6379_v0 }
0x2680   : > { %v6198_v43 = vmul.f32 %v6194_v24, %v6194_v24 }
0x2681   : > { %6383 = vmatpush.msra.mxu2 %v6378_v2 }
0x2682   : > { %v6202_v14 = vsel %vm1504_vm1, %v6198_v43, 0.0 }
0x2683   : > { %6203 = vadd.xlane.f32.xlu0 %v6202_v14  ;;  %v6183_v19 = vpop.xlane.xlu0 %6182 }
0x2684   : > { %v6191_v58 = vmul.f32 %v6183_v19, %v8312_v45 }
0x2686   : > { %v9217_v22 = vsub.f32 %v6173_v4, %v6191_v58 }
0x2688   : > { %v6199_v11 = vmul.f32 %v9217_v22, %v9217_v22 }
0x268a   : > { %v6205_v26 = vsel %vm1504_vm1, %v6199_v11, 0.0 }
0x268b   : > { %v6186_v27 = vpop.xlane.xlu1 %6185  ;;  %6206 = vadd.xlane.f32.xlu1 %v6205_v26 }
0x268c   : > { %v6192_v52 = vmul.f32 %v6186_v27, %v8312_v45 }
0x268e   : > { %v9223_v38 = vsub.f32 %v6174_v6, %v6192_v52 }
0x2690   : > { %v6200_v61 = vmul.f32 %v9223_v38, %v9223_v38 }
0x2692   : > { %v6208_v7 = vsel %vm1504_vm1, %v6200_v61, 0.0 }
0x2693   : > { %6209 = vadd.xlane.f32.xlu2 %v6208_v7  ;;  %v6189_v37 = vpop.xlane.xlu2 %6188 }
0x2694   : > { %v6193_v42 = vmul.f32 %v6189_v37, %v8312_v45 }
0x2696   : > { %v9229_v32 = vsub.f32 %v6175_v48, %v6193_v42 }
0x2698   : > { %v6201_v51 = vmul.f32 %v9229_v32, %v9229_v32 }
0x269a   : > { %v6211_v40 = vsel %vm1504_vm1, %v6201_v51, 0.0 }
0x269b   : > { %6212 = vadd.xlane.f32.xlu0 %v6211_v40  ;;  %v6377_v40 = vld [vmem:[%s9420_s2 + $0x60] sm:$0xff] }
0x269c   : > { %6384 = vmatpush.msra.mxu2 %v6377_v40 }
0x269e   : > { %6385 = vmatpush.msra.mxu2 %v6376_v49 }
0x26a0   : > { %6386 = vmatpush.msra.mxu2 %v6375_v33 }
0x26a2   : > { %6387 = vmatpush.msra.mxu2 %v6374_v34 }
0x26f6   : > { %v6204_v23 = vpop.xlane.xlu0 %6203 }
0x26f7   : > { %v6214_v53 = vmul.f32 %v6204_v23, %v8312_v45  ;;  %v6371_v23 = vld [vmem:[%s9420_s2 + $0x30] sm:$0xff] }
0x26f9   : > { %v6218_v28 = vadd.f32 1e-05, %v6214_v53  ;;  %v6370_v53 = vld [vmem:[%s9420_s2 + $0x28] sm:$0xff] }
0x26fb   : > { %7636 = vrsqrt.f32 %v6218_v28  ;;  %vm6228_vm12 = vweird.f32 %v6218_v28 }
0x26fe   : > { %v6207_v39 = vpop.xlane.xlu1 %6206 }
0x26ff   : > { %v6215_v46 = vmul.f32 %v6207_v39, %v8312_v45  ;;  %v6368_v39 = vld [vmem:[%s9420_s2 + $0x18] sm:$0xff] }
0x2701   : > { %v7637_v16 = vpop.eup %7636  ;;  %v6219_v15 = vadd.f32 1e-05, %v6215_v46  ;;  %v6367_v46 = vld [vmem:[%s9420_s2 + $0x10] sm:$0xff] }
0x2702   : > { %v6223_v54 = vmul.f32 %v7637_v16, %v6218_v28  ;;  %vm6229_vm2 = vweird.f32 %v7637_v16  ;;  %v6369_v28 = vld [vmem:[%s9420_s2 + $0x20] sm:$0xff] }
0x2703   : > { %7638 = vrsqrt.f32 %v6219_v15  ;;  %vm6230_vm13 = vmor %vm6228_vm12, %vm6229_vm2  ;;  %vm6238_vm15 = vweird.f32 %v6219_v15 }
0x2704   : > { %v6224_v35 = vmul.f32 %v7637_v16, %v6223_v54  ;;  %v7365_v54 = vld [vmem:[%s9422_s1] ss:$0 sm:$0xff]  ;;  %s9424_s1 = sld [smem:[#allocation33_spill]] }
0x2706   : > { %v6225_v3 = vmul.f32 0.5, %v6224_v35  ;;  %v6210_v47 = vpop.xlane.xlu2 %6209 }
0x2707   : > { %v6216_v18 = vmul.f32 %v6210_v47, %v8312_v45 }
0x2708   : > { %v6226_v25 = vsub.f32 1.5, %v6225_v3 }
0x2709   : > { %v7639_v55 = vpop.eup %7638  ;;  %v6220_v56 = vadd.f32 1e-05, %v6216_v18 }
0x270a   : > { %v6227_v10 = vmul.f32 %v7637_v16, %v6226_v25  ;;  %v6233_v50 = vmul.f32 %v7639_v55, %v6219_v15  ;;  %vm6239_vm14 = vweird.f32 %v7639_v55  ;;  %v6365_v15 = vld [vmem:[%s9420_s2] sm:$0xff] }
0x270b   : > { %7640 = vrsqrt.f32 %v6220_v56  ;;  %vm6240_vm0 = vmor %vm6238_vm15, %vm6239_vm14  ;;  %vm6248_vm4 = vweird.f32 %v6220_v56 }
0x270c   : > { %v6231_v62 = vsel %vm6230_vm13, %v7637_v16, %v6227_v10  ;;  %v6234_v41 = vmul.f32 %v7639_v55, %v6233_v50  ;;  %v6366_v16 = vld [vmem:[%s9420_s2 + $0x8] sm:$0xff] }
0x270d   : > { %v6262_v8 = vmul.f32 %v6231_v62, %v6194_v24 }
0x270e   : > { %v6235_v4 = vmul.f32 0.5, %v6234_v41  ;;  %v6213_v60 = vpop.xlane.xlu0 %6212 }
0x270f   : > { %v6269_v63 = vmul.f32 %v7363_v31, %v6262_v8  ;;  %v6217_v36 = vmul.f32 %v6213_v60, %v8312_v45 }
0x2710   : > { %v6236_v59 = vsub.f32 1.5, %v6235_v4 }
0x2711   : > { %v7641_v29 = vpop.eup %7640  ;;  %v9247_v6 = vadd.f32 %v7364_v17, %v6269_v63  ;;  %v6221_v9 = vadd.f32 1e-05, %v6217_v36 }
0x2712   : > { %v6237_v44 = vmul.f32 %v7639_v55, %v6236_v59  ;;  %v6243_v5 = vmul.f32 %v7641_v29, %v6220_v56  ;;  %vm6249_vm3 = vweird.f32 %v7641_v29 }
0x2713   : > { %7642 = vrsqrt.f32 %v6221_v9  ;;  %7236 = vmatmul.msk.f32.vlgmr.msra.gmra.mxu1 %vm1504_vm1, %v9247_v6  ;;  %vm6250_vm5 = vmor %vm6248_vm4, %vm6249_vm3  ;;  %vm6258_vm7 = vweird.f32 %v6221_v9 }
0x2714   : > { %v6241_v57 = vsel %vm6240_vm0, %v7639_v55, %v6237_v44  ;;  %v6244_v30 = vmul.f32 %v7641_v29, %v6243_v5 }
0x2715   : > { %v6263_v48 = vmul.f32 %v6241_v57, %v9217_v22 }
0x2716   : > { %v6245_v1 = vmul.f32 0.5, %v6244_v30 }
0x2717   : > { %v6270_v12 = vmul.f32 %v7363_v31, %v6263_v48 }
0x2718   : > { %v6246_v13 = vsub.f32 1.5, %v6245_v1 }
0x2719   : > { %v7643_v24 = vpop.eup %7642  ;;  %v9252_v43 = vadd.f32 %v7364_v17, %v6270_v12 }
0x271a   : > { %v6247_v14 = vmul.f32 %v7641_v29, %v6246_v13  ;;  %v6253_v19 = vmul.f32 %v7643_v24, %v6221_v9  ;;  %vm6259_vm6 = vweird.f32 %v7643_v24 }
0x271b   : > { %7237 = vmatmul.msk.f32.gmra.mxu1 %vm1504_vm1, %v9252_v43  ;;  %vm6260_vm8 = vmor %vm6258_vm7, %vm6259_vm6 }
0x271c   : > { %v6251_v58 = vsel %vm6250_vm5, %v7641_v29, %v6247_v14  ;;  %v6254_v11 = vmul.f32 %v7643_v24, %v6253_v19 }
0x271d   : > { %v6264_v26 = vmul.f32 %v6251_v58, %v9223_v38 }
0x271e   : > { %v6255_v22 = vmul.f32 0.5, %v6254_v11 }
0x271f   : > { %v6271_v27 = vmul.f32 %v7363_v31, %v6264_v26 }
0x2720   : > { %v6256_v52 = vsub.f32 1.5, %v6255_v22 }
0x2721   : > { %v9257_v61 = vadd.f32 %v7364_v17, %v6271_v27 }
0x2722   : > { %v6257_v7 = vmul.f32 %v7643_v24, %v6256_v52 }
0x2723   : > { %7238 = vmatmul.msk.f32.gmra.mxu1 %vm1504_vm1, %v9257_v61 }
0x2724   : > { %v6261_v37 = vsel %vm6260_vm8, %v7643_v24, %v6257_v7 }
0x2725   : > { %v6265_v38 = vmul.f32 %v6261_v37, %v9229_v32  ;;  %v6373_v32 = vld [vmem:[%s9420_s2 + $0x40] sm:$0xff] }
0x2726   : > { %6388 = vmatpush.msra.mxu2 %v6373_v32 }
0x2727   : > { %v6272_v42 = vmul.f32 %v7363_v31, %v6265_v38 }
0x2728   : > { %6389 = vmatpush.msra.mxu2 %v6372_v21 }
0x2729   : > { %v9262_v51 = vadd.f32 %v7364_v17, %v6272_v42  ;;  %v7366_v42 = vld [vmem:[%s9423_s0] ss:$0 sm:$0xff]  ;;  %s7247_s0 = sshll.u32 %s9426_s10, 5 }
0x272a   : > { %6390 = vmatpush.msra.mxu2 %v6371_v23 }
0x272b   : > { %7239 = vmatmul.msk.f32.gmra.mxu1 %vm1504_vm1, %v9262_v51 }
0x272c   : > { %6391 = vmatpush.msra.mxu2 %v6370_v53 }
0x272e   : > { %6392 = vmatpush.msra.mxu2 %v6369_v28 }
0x2730   : > { %6393 = vmatpush.msra.mxu2 %v6368_v39 }
0x2732   : > { %6394 = vmatpush.msra.mxu2 %v6367_v46 }
0x2734   : > { %6395 = vmatpush.msra.mxu2 %v6366_v16 }
0x2736   : > { %6396 = vmatpush.msra.mxu2 %v6365_v15 }
0x2790   : > { %v6317_v35 = vpop.f32.mrf.mxu1 }
0x2791   : > { %v6318_v3 = vadd.f32 %v7365_v54, %v6317_v35 }
0x2793   : > { %v6329_v47 = vmul.f32 %v6318_v3, %v6318_v3 }
0x2795   : > { %v6333_v18 = vmul.f32 %v6329_v47, %v6318_v3 }
0x2797   : > { %v6337_v25 = vmul.f32 0.044715, %v6333_v18 }
0x2798   : > { %v6320_v55 = vpop.f32.mrf.mxu1 }
0x2799   : > { %v6341_v56 = vadd.f32 %v6337_v25, %v6318_v3  ;;  %v6321_v31 = vadd.f32 %v7365_v54, %v6320_v55 }
0x279b   : > { %v6345_v10 = vmul.f32 0.7978846, %v6341_v56  ;;  %v6330_v50 = vmul.f32 %v6321_v31, %v6321_v31 }
0x279d   : > { %7644 = vtanh.f32 %v6345_v10  ;;  %v6334_v20 = vmul.f32 %v6330_v50, %v6321_v31 }
0x279f   : > { %v6338_v0 = vmul.f32 0.044715, %v6334_v20 }
0x27a0   : > { %v6323_v62 = vpop.f32.mrf.mxu1 }
0x27a1   : > { %v6342_v41 = vadd.f32 %v6338_v0, %v6321_v31  ;;  %v6324_v17 = vadd.f32 %v7365_v54, %v6323_v62 }
0x27a3   : > { %v7645_v8 = vpop.eup %7644  ;;  %v6331_v2 = vmul.f32 %v6324_v17, %v6324_v17  ;;  %v6346_v4 = vmul.f32 0.7978846, %v6342_v41 }
0x27a4   : > { %v6353_v60 = vadd.f32 1.0, %v7645_v8 }
0x27a5   : > { %v6335_v63 = vmul.f32 %v6331_v2, %v6324_v17  ;;  %7646 = vtanh.f32 %v6346_v4 }
0x27a6   : > { %v6357_v36 = vmul.f32 0.5, %v6353_v60  ;;  %v6529_v60 = vld [vmem:[%s7942_s20 + $0x18] sm:$0xff] }
0x27a7   : > { %v6339_v59 = vmul.f32 0.044715, %v6335_v63  ;;  %6558 = vmatpush.msrb.mxu3 %v6529_v60  ;;  %v6528_v63 = vld [vmem:[%s7942_s20 + $0x10] sm:$0xff] }
0x27a8   : > { %v6361_v29 = vmul.f32 %v6357_v36, %v6318_v3  ;;  %v6326_v9 = vpop.f32.mrf.mxu1  ;;  %v6527_v36 = vld [vmem:[%s7942_s20 + $0x8] sm:$0xff] }
0x27a9   : > { %v6343_v44 = vadd.f32 %v6339_v59, %v6324_v17  ;;  %v6327_v5 = vadd.f32 %v7365_v54, %v6326_v9  ;;  %6559 = vmatpush.msrb.mxu3 %v6528_v63  ;;  %v6526_v59 = vld [vmem:[%s7942_s20] sm:$0xff] }
0x27aa   : > { %6397 = vmatmul.f32.vlgmr.msra.gmra.mxu2 %v6361_v29 }
0x27ab   : > { %v7647_v57 = vpop.eup %7646  ;;  %v6332_v30 = vmul.f32 %v6327_v5, %v6327_v5  ;;  %v6347_v48 = vmul.f32 0.7978846, %v6343_v44  ;;  %6560 = vmatpush.msrb.mxu3 %v6527_v36 }
0x27ac   : > { %v6354_v1 = vadd.f32 1.0, %v7647_v57 }
0x27ad   : > { %v6336_v12 = vmul.f32 %v6332_v30, %v6327_v5  ;;  %7648 = vtanh.f32 %v6347_v48  ;;  %6561 = vmatpush.msrb.mxu3 %v6526_v59 }
0x27ae   : > { %v6358_v13 = vmul.f32 0.5, %v6354_v1 }
0x27af   : > { %v6340_v24 = vmul.f32 0.044715, %v6336_v12 }
0x27b0   : > { %v6362_v14 = vmul.f32 %v6358_v13, %v6321_v31 }
0x27b1   : > { %v6344_v19 = vadd.f32 %v6340_v24, %v6327_v5 }
0x27b2   : > { %6400 = vmatmul.f32.gmra.mxu2 %v6362_v14 }
0x27b3   : > { %v7649_v58 = vpop.eup %7648  ;;  %v6348_v11 = vmul.f32 0.7978846, %v6344_v19 }
0x27b4   : > { %v6355_v26 = vadd.f32 1.0, %v7649_v58 }
0x27b5   : > { %7650 = vtanh.f32 %v6348_v11 }
0x27b6   : > { %v6359_v22 = vmul.f32 0.5, %v6355_v26 }
0x27b8   : > { %v6363_v27 = vmul.f32 %v6359_v22, %v6324_v17 }
0x27ba   : > { %6403 = vmatmul.f32.gmra.mxu2 %v6363_v27  ;;  %v7367_v27 = vld [vmem:[%s9424_s1] ss:$0 sm:$0xff]  ;;  %s1350_s1 = scalar_lea.vmem %s7952_s4, %s7247_s0 }
0x27bb   : > { %v7651_v52 = vpop.eup %7650 }
0x27bc   : > { %v6356_v7 = vadd.f32 1.0, %v7651_v52 }
0x27be   : > { %v6360_v37 = vmul.f32 0.5, %v6356_v7 }
0x27c0   : > { %v6364_v38 = vmul.f32 %v6360_v37, %v6327_v5  ;;  %v7368_v37 = vld [vmem:[%s7937_s6] ss:$0 sm:$0xff] }
0x27c2   : > { %6406 = vmatmul.f32.gmra.mxu2 %v6364_v38 }
0x282d   : > { %v6398_v40 = vpop.f32.mrf.mxu2 }
0x282e   : > { %v6410_v49 = vadd.f32 %v6398_v40, %v9247_v6 }
0x2830   : > { %v6418_v33 = vadd.f32 %v7366_v42, %v6410_v49 }
0x2832   : > { %v6424_v34 = vsel %vm1504_vm1, %v6418_v33, 0.0 }
0x2833   : > { %6425 = vadd.xlane.f32.xlu1 %v6424_v34 }
0x2835   : > { %v6401_v32 = vpop.f32.mrf.mxu2 }
0x2836   : > { %v6411_v21 = vadd.f32 %v6401_v32, %v9252_v43 }
0x2838   : > { %v6419_v23 = vadd.f32 %v7366_v42, %v6411_v21 }
0x283a   : > { %v6427_v53 = vsel %vm1504_vm1, %v6419_v23, 0.0 }
0x283b   : > { %6428 = vadd.xlane.f32.xlu2 %v6427_v53 }
0x283d   : > { %v6404_v28 = vpop.f32.mrf.mxu2 }
0x283e   : > { %v6412_v39 = vadd.f32 %v6404_v28, %v9257_v61 }
0x2840   : > { %v6420_v46 = vadd.f32 %v7366_v42, %v6412_v39 }
0x2842   : > { %v6430_v16 = vsel %vm1504_vm1, %v6420_v46, 0.0 }
0x2843   : > { %6431 = vadd.xlane.f32.xlu0 %v6430_v16 }
0x2845   : > { %v6407_v15 = vpop.f32.mrf.mxu2 }
0x2846   : > { %v6413_v6 = vadd.f32 %v6407_v15, %v9262_v51 }
0x2848   : > { %v6421_v54 = vadd.f32 %v7366_v42, %v6413_v6 }
0x284a   : > { %v6433_v35 = vsel %vm1504_vm1, %v6421_v54, 0.0 }
0x284b   : > { %6434 = vadd.xlane.f32.xlu1 %v6433_v35 }
0x28a6   : > { %v6426_v3 = vpop.xlane.xlu1 %6425 }
0x28a7   : > { %v6436_v43 = vmul.f32 %v6426_v3, %v8312_v45 }
0x28a9   : > { %v6440_v47 = vsub.f32 %v6418_v33, %v6436_v43 }
0x28ab   : > { %v6444_v18 = vmul.f32 %v6440_v47, %v6440_v47 }
0x28ad   : > { %v6448_v25 = vsel %vm1504_vm1, %v6444_v18, 0.0 }
0x28ae   : > { %6449 = vadd.xlane.f32.xlu2 %v6448_v25  ;;  %v6429_v61 = vpop.xlane.xlu2 %6428 }
0x28af   : > { %v6437_v55 = vmul.f32 %v6429_v61, %v8312_v45 }
0x28b1   : > { %v9292_v56 = vsub.f32 %v6419_v23, %v6437_v55 }
0x28b3   : > { %v6445_v51 = vmul.f32 %v9292_v56, %v9292_v56 }
0x28b5   : > { %v6451_v31 = vsel %vm1504_vm1, %v6445_v51, 0.0 }
0x28b6   : > { %v6432_v10 = vpop.xlane.xlu0 %6431  ;;  %6452 = vadd.xlane.f32.xlu0 %v6451_v31 }
0x28b7   : > { %v6438_v50 = vmul.f32 %v6432_v10, %v8312_v45 }
0x28b9   : > { %v9298_v20 = vsub.f32 %v6420_v46, %v6438_v50 }
0x28bb   : > { %v6446_v0 = vmul.f32 %v9298_v20, %v9298_v20 }
0x28bd   : > { %v6454_v62 = vsel %vm1504_vm1, %v6446_v0, 0.0 }
0x28be   : > { %6455 = vadd.xlane.f32.xlu1 %v6454_v62  ;;  %v6435_v41 = vpop.xlane.xlu1 %6434 }
0x28bf   : > { %v6439_v17 = vmul.f32 %v6435_v41, %v8312_v45 }
0x28c1   : > { %v9304_v8 = vsub.f32 %v6421_v54, %v6439_v17 }
0x28c3   : > { %v6447_v2 = vmul.f32 %v9304_v8, %v9304_v8 }
0x28c5   : > { %v6457_v4 = vsel %vm1504_vm1, %v6447_v2, 0.0 }
0x28c6   : > { %6458 = vadd.xlane.f32.xlu2 %v6457_v4 }
0x2921   : > { %v6450_v29 = vpop.xlane.xlu2 %6449 }
0x2922   : > { %v6460_v9 = vmul.f32 %v6450_v29, %v8312_v45 }
0x2924   : > { %v6464_v44 = vadd.f32 1e-05, %v6460_v9 }
0x2926   : > { %7652 = vrsqrt.f32 %v6464_v44  ;;  %vm6474_vm10 = vweird.f32 %v6464_v44 }
0x2929   : > { %v6453_v5 = vpop.xlane.xlu0 %6452 }
0x292a   : > { %v6461_v57 = vmul.f32 %v6453_v5, %v8312_v45 }
0x292c   : > { %v7653_v30 = vpop.eup %7652  ;;  %v6465_v48 = vadd.f32 1e-05, %v6461_v57 }
0x292d   : > { %v6469_v1 = vmul.f32 %v7653_v30, %v6464_v44  ;;  %vm6475_vm9 = vweird.f32 %v7653_v30 }
0x292e   : > { %7654 = vrsqrt.f32 %v6465_v48  ;;  %vm6476_vm11 = vmor %vm6474_vm10, %vm6475_vm9  ;;  %vm6484_vm12 = vweird.f32 %v6465_v48 }
0x292f   : > { %v6470_v12 = vmul.f32 %v7653_v30, %v6469_v1 }
0x2931   : > { %v6471_v13 = vmul.f32 0.5, %v6470_v12  ;;  %v6456_v24 = vpop.xlane.xlu1 %6455 }
0x2932   : > { %v6462_v14 = vmul.f32 %v6456_v24, %v8312_v45 }
0x2933   : > { %v6472_v19 = vsub.f32 1.5, %v6471_v13 }
0x2934   : > { %v7655_v58 = vpop.eup %7654  ;;  %v6466_v11 = vadd.f32 1e-05, %v6462_v14 }
0x2935   : > { %v6473_v26 = vmul.f32 %v7653_v30, %v6472_v19  ;;  %v6479_v22 = vmul.f32 %v7655_v58, %v6465_v48  ;;  %vm6485_vm2 = vweird.f32 %v7655_v58 }
0x2936   : > { %7656 = vrsqrt.f32 %v6466_v11  ;;  %vm6486_vm13 = vmor %vm6484_vm12, %vm6485_vm2  ;;  %vm6494_vm15 = vweird.f32 %v6466_v11 }
0x2937   : > { %v6477_v52 = vsel %vm6476_vm11, %v7653_v30, %v6473_v26  ;;  %v6480_v7 = vmul.f32 %v7655_v58, %v6479_v22 }
0x2938   : > { %v6508_v38 = vmul.f32 %v6477_v52, %v6440_v47 }
0x2939   : > { %v6481_v42 = vmul.f32 0.5, %v6480_v7  ;;  %v6459_v40 = vpop.xlane.xlu2 %6458 }
0x293a   : > { %v6515_v49 = vmul.f32 %v7367_v27, %v6508_v38  ;;  %v6463_v33 = vmul.f32 %v6459_v40, %v8312_v45 }
0x293b   : > { %v6482_v34 = vsub.f32 1.5, %v6481_v42 }
0x293c   : > { %v7657_v32 = vpop.eup %7656  ;;  %v6522_v21 = vadd.f32 %v7368_v37, %v6515_v49  ;;  %v6467_v23 = vadd.f32 1e-05, %v6463_v33 }
0x293d   : > { %v6483_v53 = vmul.f32 %v7655_v58, %v6482_v34  ;;  %v6489_v28 = vmul.f32 %v7657_v32, %v6466_v11  ;;  %vm6495_vm14 = vweird.f32 %v7657_v32 }
0x293e   : > { %7658 = vrsqrt.f32 %v6467_v23  ;;  %7240 = vmatmul.msk.f32.vlgmr.msrb.gmra.mxu3 %vm1504_vm1, %v6522_v21  ;;  %vm6496_vm0 = vmor %vm6494_vm15, %vm6495_vm14  ;;  %vm6504_vm4 = vweird.f32 %v6467_v23 }
0x293f   : > { %v6487_v39 = vsel %vm6486_vm13, %v7655_v58, %v6483_v53  ;;  %v6490_v46 = vmul.f32 %v7657_v32, %v6489_v28 }
0x2940   : > { %v6509_v16 = vmul.f32 %v6487_v39, %v9292_v56 }
0x2941   : > { %v6491_v15 = vmul.f32 0.5, %v6490_v46 }
0x2942   : > { %v6516_v6 = vmul.f32 %v7367_v27, %v6509_v16 }
0x2943   : > { %v6492_v54 = vsub.f32 1.5, %v6491_v15 }
0x2944   : > { %v7659_v45 = vpop.eup %7658  ;;  %v6523_v35 = vadd.f32 %v7368_v37, %v6516_v6 }
0x2945   : > { %v6493_v3 = vmul.f32 %v7657_v32, %v6492_v54  ;;  %v6499_v43 = vmul.f32 %v7659_v45, %v6467_v23  ;;  %vm6505_vm3 = vweird.f32 %v7659_v45 }
0x2946   : > { %7241 = vmatmul.msk.f32.gmra.mxu3 %vm1504_vm1, %v6523_v35  ;;  %vm6506_vm5 = vmor %vm6504_vm4, %vm6505_vm3 }
0x2947   : > { %v6497_v47 = vsel %vm6496_vm0, %v7657_v32, %v6493_v3  ;;  %v6500_v18 = vmul.f32 %v7659_v45, %v6499_v43 }
0x2948   : > { %v6510_v25 = vmul.f32 %v6497_v47, %v9298_v20  ;;  %v7369_v20 = vld [vmem:[%s7947_s27] ss:$0 sm:$0xff] }
0x2949   : > { %v6501_v61 = vmul.f32 0.5, %v6500_v18 }
0x294a   : > { %v6517_v55 = vmul.f32 %v7367_v27, %v6510_v25 }
0x294b   : > { %v6502_v56 = vsub.f32 1.5, %v6501_v61 }
0x294c   : > { %v6524_v51 = vadd.f32 %v7368_v37, %v6517_v55 }
0x294d   : > { %v6503_v31 = vmul.f32 %v7659_v45, %v6502_v56 }
0x294e   : > { %7242 = vmatmul.msk.f32.gmra.mxu3 %vm1504_vm1, %v6524_v51 }
0x294f   : > { %v6507_v10 = vsel %vm6506_vm5, %v7659_v45, %v6503_v31 }
0x2950   : > { %v6511_v50 = vmul.f32 %v6507_v10, %v9304_v8 }
0x2952   : > { %v6518_v0 = vmul.f32 %v7367_v27, %v6511_v50 }
0x2954   : > { %v6525_v62 = vadd.f32 %v7368_v37, %v6518_v0 }
0x2956   : > { %7243 = vmatmul.msk.f32.gmra.mxu3 %vm1504_vm1, %v6525_v62 }
0x29c1   : > { %v6563_v41 = vpop.f32.mrf.mxu3 }
0x29c2   : > { %v6564_v17 = vadd.f32 %v7369_v20, %v6563_v41 }
0x29c4   : > { %6575 = vst [vmem:[%s1350_s1] sm:$0xff] %v6564_v17 }
0x29c9   : > { %v6566_v2 = vpop.f32.mrf.mxu3 }
0x29ca   : > { %v6567_v4 = vadd.f32 %v7369_v20, %v6566_v2 }
0x29cc   : > { %6576 = vst [vmem:[%s1350_s1 + $0x8] sm:$0xff] %v6567_v4 }
0x29d1   : > { %v6569_v60 = vpop.f32.mrf.mxu3 }
0x29d2   : > { %v6570_v63 = vadd.f32 %v7369_v20, %v6569_v60 }
0x29d4   : > { %6577 = vst [vmem:[%s1350_s1 + $0x10] sm:$0xff] %v6570_v63 }
0x29d9   : > { %v6572_v36 = vpop.f32.mrf.mxu3 }
0x29da   : > { %v6573_v59 = vadd.f32 %v7369_v20, %v6572_v36 }
0x29dc   : > { %6578 = vst [vmem:[%s1350_s1 + $0x18] sm:$0xff] %v6573_v59 }
0x29dd PF: > { %s101_s7 = sadd.s32 1, %s7670_s7  }
0x29de   : > { %p98_p4 = scmp.ge.s32.totalorder %s101_s7, 4  }
0x29e0   :  { %100 = sbr.rel (!%p98_p4) target bundleno = 85 (0x55), region = 354 }

</bundles_post_ra>
